<compile_context>
chip_gen: v7x
topology: tpu7x:2x2x1
jax: 0.10.0
libtpu: 0.0.40
codegen_flags: <defaults>
</compile_context>

<pallas_src>
import functools
import math

import jax
import jax.numpy as jnp
from jax import lax
from jax.experimental import pallas as pl
from jax.experimental.pallas import tpu as pltpu


# ----------------------------------------------------------------------------
# Pallas kernel: one chunk of Tc timesteps, one direction, per grid step.
#   gx_ref  : (Tc, Bp, 4*Hp)  precomputed x@W_ih^T + bias (bf16 storage)
#   whh_hbm : (ndir, Hp, 4*Hp) recurrent weights in HBM (memory_space=ANY)
#   out_ref : (Tc, Bp, Hp)    hidden states for this chunk (original time order)
#   whh_vmem: (Hp, 4*Hp)      single-buffered resident weight (scratch)
#   h_scr/c_scr : (Bp, Hp)    f32 carries across chunks (reset at first chunk)
# ----------------------------------------------------------------------------
def _lstm_chunk_kernel(gx_ref, whh_hbm, out_ref, whh_vmem, h_scr, c_scr, dma_sem):
    d = pl.program_id(0)        # direction: 0 = forward, 1 = backward
    c_idx = pl.program_id(1)    # time-chunk index (sequential, "arbitrary")
    Tc = gx_ref.shape[0]
    Hp = h_scr.shape[-1]

    @pl.when(c_idx == 0)
    def _():
        # Single-buffered resident recurrent weight: one DMA per direction.
        cp = pltpu.make_async_copy(whh_hbm.at[d], whh_vmem, dma_sem)
        cp.start()
        cp.wait()
        h_scr[...] = jnp.zeros_like(h_scr)
        c_scr[...] = jnp.zeros_like(c_scr)

    whh = whh_vmem[...]   # hoist resident weight load out of the step loop

    def run_chunk(reverse):
        # h/c carried as register values; scratch touched only at chunk edges.
        h = h_scr[...]
        c = c_scr[...]
        for i in range(Tc):
            tt = Tc - 1 - i if reverse else i          # compile-time constant
            gates = gx_ref[tt].astype(jnp.float32) + jnp.dot(
                h.astype(whh.dtype), whh, preferred_element_type=jnp.float32)
            # PyTorch gate order: i, f, g, o — each a lane-dense Hp block.
            ig = jax.nn.sigmoid(gates[:, 0:Hp])
            fg = jax.nn.sigmoid(gates[:, Hp:2 * Hp])
            gg = jnp.tanh(gates[:, 2 * Hp:3 * Hp])
            og = jax.nn.sigmoid(gates[:, 3 * Hp:4 * Hp])
            c = fg * c + ig * gg
            h = og * jnp.tanh(c)
            out_ref[tt] = h.astype(out_ref.dtype)
        h_scr[...] = h
        c_scr[...] = c

    @pl.when(d == 0)
    def _():
        run_chunk(False)

    @pl.when(d == 1)
    def _():
        run_chunk(True)


# ----------------------------------------------------------------------------
# One bidirectional (or unidirectional) LSTM layer as a single pallas_call.
#   gx    : (ndir, Tp, Bp, 4*Hp)  precomputed input projections (+ folded bias)
#   whh_t : (ndir, Hp, 4*Hp)
# returns (ndir, Tp, Bp, Hp) in gx.dtype
# ----------------------------------------------------------------------------
def _fused_lstm_layer(gx, whh_t, *, chunk, dir_semantics="parallel"):
    ndir, Tp, Bp, Gp = gx.shape
    Hp = whh_t.shape[1]
    nC = Tp // chunk

    def time_map(d, c):
        # forward walks chunks 0..nC-1; backward walks nC-1..0, so that the
        # in-kernel reversed step order lands outputs in original time order.
        return (d, c + d * (nC - 1 - 2 * c), 0, 0)

    # VMEM budget: double-buffered gx/out blocks + single-buffered W_hh scratch
    # + f32 carries (W_hh is intentionally counted once).
    gx_b = chunk * Bp * Gp * gx.dtype.itemsize
    out_b = chunk * Bp * Hp * gx.dtype.itemsize
    whh_b = Hp * Gp * whh_t.dtype.itemsize
    carry_b = 2 * Bp * Hp * 4
    need = 2 * (gx_b + out_b) + whh_b + carry_b
    cap = 48 * 1024 * 1024                    # safe on v7x (64 MiB physical / TC)
    try:                                      # raise the cap on v5e/v6e (128 MiB)
        phys = getattr(pltpu.get_tpu_info(), "vmem_capacity_bytes", None)
        if phys:
            cap = int(phys) * 3 // 4          # leave headroom for compiler scratch
    except Exception:
        pass
    vmem_limit = int(min(max(2 * need, 32 * 1024 * 1024), cap))

    return pl.pallas_call(
        _lstm_chunk_kernel,
        out_shape=jax.ShapeDtypeStruct((ndir, Tp, Bp, Hp), gx.dtype),
        grid=(ndir, nC),
        in_specs=[
            pl.BlockSpec((None, chunk, Bp, Gp), time_map),   # gate slab (pipelined)
            pl.BlockSpec(memory_space=pl.ANY),               # W_hh^T: manual DMA once/dir
        ],
        out_specs=pl.BlockSpec((None, chunk, Bp, Hp), time_map),
        scratch_shapes=[
            pltpu.VMEM((Hp, Gp), whh_t.dtype),  # resident recurrent weight (1 buffer)
            pltpu.VMEM((Bp, Hp), jnp.float32),  # h carry
            pltpu.VMEM((Bp, Hp), jnp.float32),  # c carry
            pltpu.SemaphoreType.DMA,            # weight-copy semaphore
        ],
        compiler_params=pltpu.CompilerParams(
            # Directions are independent; time chunks carry state -> sequential.
            dimension_semantics=(dir_semantics, "arbitrary"),
            vmem_limit_bytes=vmem_limit,
        ),
    )(gx, whh_t)


# ----------------------------------------------------------------------------
# Helpers
# ----------------------------------------------------------------------------
def _round_up(x, m):
    return ((x + m - 1) // m) * m


# ----------------------------------------------------------------------------
# Parameter packing (done once): pre-transpose, fold biases, pad each gate to a
# multiple of 128 lanes, store W_hh^T in bf16, and reshape layer>0 input
# weights so the between-layer concat fuses into the next layer's einsum.
# ----------------------------------------------------------------------------
def pack_params(params, hidden_size, *, store_dtype=jnp.bfloat16, lane=128):
    H = hidden_size
    Hp = _round_up(H, lane)
    packed = []
    prev_ndir = None
    for li, layer in enumerate(params):
        ndir = len(layer)
        wih_l, whh_l, b_l = [], [], []
        for (wih, whh, bih, bhh) in layer:
            def pad_gate_rows(w):                      # (4H, X) -> (4Hp, X), zero pad
                w4 = w.reshape(4, H, w.shape[-1])
                return jnp.pad(w4, ((0, 0), (0, Hp - H), (0, 0))).reshape(4 * Hp, -1)
            wih_p = pad_gate_rows(wih)                               # (4Hp, D_in)
            whh_p = jnp.pad(pad_gate_rows(whh), ((0, 0), (0, Hp - H)))  # (4Hp, Hp)
            b = jnp.pad((bih + bhh).reshape(4, H),
                        ((0, 0), (0, Hp - H))).reshape(4 * Hp)
            wih_l.append(wih_p.T)                                    # (D_in, 4Hp)
            whh_l.append(whh_p.T.astype(store_dtype))                # (Hp, 4Hp)
            b_l.append(b)
        wih_t = jnp.stack(wih_l)                                     # (ndir, D_in, 4Hp)
        whh_t = jnp.stack(whh_l)                                     # (ndir, Hp, 4Hp)
        bias = jnp.stack(b_l)                                        # (ndir, 4Hp)
        if li > 0:
            # Input of this layer is (ndir_in, T, Bp, Hp): split and pad the
            # per-direction input axis so the concat fuses into the einsum.
            wih_t = wih_t.reshape(ndir, prev_ndir, H, 4 * Hp)
            wih_t = jnp.pad(wih_t, ((0, 0), (0, 0), (0, Hp - H), (0, 0)))
        packed.append((wih_t, whh_t, bias))
        prev_ndir = ndir
    return packed


# ----------------------------------------------------------------------------
# Encoder forward: stacked (bi)directional LSTM, batch_first semantics.
# ----------------------------------------------------------------------------
def encoder_forward(x_btd, packed_params, *, hidden_size, max_chunk=32,
                    store_dtype=jnp.bfloat16, dir_semantics="parallel"):
    """x_btd: (B, T, input_size) -> (B, T, num_directions * hidden_size)."""
    B, T, _ = x_btd.shape
    sublane = 8 * 4 // jnp.dtype(store_dtype).itemsize   # 8 for f32, 16 for bf16
    Bp = _round_up(B, sublane)
    chunk = min(max_chunk, T)
    Tp = _round_up(T, chunk)
    pad_t = Tp - T
    H = hidden_size

    x = jnp.transpose(x_btd, (1, 0, 2))                  # time-major (T, B, D)
    if Bp != B:
        x = jnp.pad(x, ((0, 0), (0, Bp - B), (0, 0)))    # (T, Bp, D)

    h_dirs = None                                        # (ndir, T, Bp, Hp) for layer > 0
    for li, (wih_t, whh_t, bias) in enumerate(packed_params):
        ndir = whh_t.shape[0]
        # Hoisted input projection: one big MXU GEMM over all timesteps.  For
        # layer > 0 the concat over input directions is fused into the einsum.
        if li == 0:
            gx = jnp.einsum("tbd,ndg->ntbg", x, wih_t,
                            preferred_element_type=jnp.float32)
        else:
            gx = jnp.einsum("ktbh,nkhg->ntbg", h_dirs, wih_t,
                            preferred_element_type=jnp.float32)
        gx = (gx + bias[:, None, None, :]).astype(store_dtype)   # (ndir, T, Bp, 4Hp)

        # Pad time up to a multiple of `chunk`.  Padding sits *after* the real
        # steps in each direction's processing order (end for fwd, start for
        # bwd), so the padded steps never contaminate real outputs.
        if pad_t:
            slabs = [jnp.pad(gx[0], ((0, pad_t), (0, 0), (0, 0)))]
            if ndir == 2:
                slabs.append(jnp.pad(gx[1], ((pad_t, 0), (0, 0), (0, 0))))
            gx = jnp.stack(slabs)

        out = _fused_lstm_layer(gx, whh_t, chunk=chunk,
                                dir_semantics=dir_semantics)      # (ndir, Tp, Bp, Hp)
        if pad_t:
            reals = [out[0, :T]]
            if ndir == 2:
                reals.append(out[1, pad_t:])
            h_dirs = jnp.stack(reals)                             # (ndir, T, Bp, Hp)
        else:
            h_dirs = out

    final = jnp.concatenate(
        [h_dirs[i][..., :H] for i in range(h_dirs.shape[0])], axis=-1)
    final = final[:, :B, :].astype(jnp.float32)          # drop batch/lane padding
    return jnp.transpose(final, (1, 0, 2))               # back to (B, T, ndir*H)


# ----------------------------------------------------------------------------
# Pure-JAX f32 reference (lax.scan) for verification.
# ----------------------------------------------------------------------------
def _ref_direction(x_tbd, wih, whh, bih, bhh, reverse):
    H = whh.shape[1]
    xs = x_tbd[::-1] if reverse else x_tbd
    B = x_tbd.shape[1]

    def step(carry, x_t):
        h, c = carry
        gates = x_t @ wih.T + h @ whh.T + bih + bhh
        i = jax.nn.sigmoid(gates[:, 0:H])
        f = jax.nn.sigmoid(gates[:, H:2 * H])
        g = jnp.tanh(gates[:, 2 * H:3 * H])
        o = jax.nn.sigmoid(gates[:, 3 * H:4 * H])
        c = f * c + i * g
        h = o * jnp.tanh(c)
        return (h, c), h

    init = (jnp.zeros((B, H), jnp.float32), jnp.zeros((B, H), jnp.float32))
    _, hs = lax.scan(step, init, xs)
    return hs[::-1] if reverse else hs


def encoder_reference(x_btd, params):
    x = jnp.transpose(x_btd, (1, 0, 2))
    for layer_params in params:
        outs = [
            _ref_direction(x, wih, whh, bih, bhh, reverse=(d == 1))
            for d, (wih, whh, bih, bhh) in enumerate(layer_params)
        ]
        x = jnp.concatenate(outs, axis=-1)
    return jnp.transpose(x, (1, 0, 2))


# ----------------------------------------------------------------------------
# Deterministic parameter init (PyTorch nn.LSTM shapes & uniform(-k, k) init).
# ----------------------------------------------------------------------------
def init_lstm_params(key, input_size, hidden_size, num_layers, bidirectional):
    num_dirs = 2 if bidirectional else 1
    k = 1.0 / math.sqrt(hidden_size)
    params = []
    for layer in range(num_layers):
        d_in = input_size if layer == 0 else hidden_size * num_dirs
        layer_params = []
        for _ in range(num_dirs):
            key, k1, k2, k3, k4 = jax.random.split(key, 5)
            wih = jax.random.uniform(k1, (4 * hidden_size, d_in), jnp.float32, -k, k)
            whh = jax.random.uniform(k2, (4 * hidden_size, hidden_size), jnp.float32, -k, k)
            bih = jax.random.uniform(k3, (4 * hidden_size,), jnp.float32, -k, k)
            bhh = jax.random.uniform(k4, (4 * hidden_size,), jnp.float32, -k, k)
            layer_params.append((wih, whh, bih, bhh))
        params.append(layer_params)
    return params


if __name__ == "__main__":
    # Small shapes: batch=2, seq=8, input_size=16, hidden=32, 2 layers, bidir.
    B, T, INPUT, HIDDEN, LAYERS = 2, 8, 16, 32, 2

    key = jax.random.PRNGKey(0)
    kx, kp, kx2 = jax.random.split(key, 3)
    x = jax.random.normal(kx, (B, T, INPUT), jnp.float32)
    params = init_lstm_params(kp, INPUT, HIDDEN, LAYERS, bidirectional=True)
    packed = pack_params(params, HIDDEN)          # bf16 W_hh^T, 128-lane padded gates

    fwd = jax.jit(functools.partial(encoder_forward, packed_params=packed,
                                    hidden_size=HIDDEN))
    out = jax.block_until_ready(fwd(x))
    ref = jax.block_until_ready(encoder_reference(x, params))
    assert out.shape == (B, T, 2 * HIDDEN), out.shape
    err = float(jnp.max(jnp.abs(out - ref)))
    # Tolerance relaxed vs the f32 reference because gx / W_hh / layer outputs
    # are stored in bf16 (structural bugs would show as O(1) errors).
    assert jnp.allclose(out, ref, atol=5e-2, rtol=5e-2), f"max_err={err}"

    # Also exercise the T-not-multiple-of-chunk path (padded tail chunk).
    T2 = 7
    x2 = jax.random.normal(kx2, (B, T2, INPUT), jnp.float32)
    fwd2 = jax.jit(functools.partial(encoder_forward, packed_params=packed,
                                     hidden_size=HIDDEN, max_chunk=4))
    out2 = jax.block_until_ready(fwd2(x2))
    ref2 = jax.block_until_ready(encoder_reference(x2, params))
    assert out2.shape == (B, T2, 2 * HIDDEN), out2.shape
    err2 = float(jnp.max(jnp.abs(out2 - ref2)))
    assert jnp.allclose(out2, ref2, atol=5e-2, rtol=5e-2), f"max_err={err2}"

    print("KERNEL_OK")
</pallas_src>

<mosaic_0001>
module attributes {stable_mosaic.version = 11 : i64} {
  func.func @_lstm_chunk_kernel(%arg0: i32, %arg1: i32, %arg2: memref<1x8x16x512xbf16, #tpu.memory_space<vmem>>, %arg3: memref<2x128x512xbf16, #tpu.memory_space<any>>, %arg4: memref<1x8x16x128xbf16, #tpu.memory_space<vmem>>, %arg5: memref<128x512xbf16, #tpu.memory_space<vmem>>, %arg6: memref<16x128xf32, #tpu.memory_space<vmem>>, %arg7: memref<16x128xf32, #tpu.memory_space<vmem>>, %arg8: memref<!tpu.dma_semaphore, #tpu.memory_space<semaphore_mem>>) attributes {dimension_semantics = [#tpu.dimension_semantics<parallel>, #tpu.dimension_semantics<arbitrary>], iteration_bounds = array<i64: 2, 1>, scalar_prefetch = 0 : i64, scratch_operands = 4 : i64, tpu.core_type = #tpu.core_type<tc>, window_params = [{transform_indices = @transform_0, window_bounds = array<i64: 1, 8, 16, 512>}, {}, {transform_indices = @transform_2, window_bounds = array<i64: 1, 8, 16, 128>}]} {
    %c0_i32 = arith.constant 0 : i32
    %0 = arith.cmpi eq, %arg1, %c0_i32 : i32
    %1 = arith.extui %0 : i1 to i32
    %c0_i32_0 = arith.constant 0 : i32
    %2 = arith.cmpi ne, %1, %c0_i32_0 : i32
    scf.if %2 {
      %c0_i32_5 = arith.constant 0 : i32
      %c0_i32_6 = arith.constant 0 : i32
      %10 = tpu.memref_slice %arg3[%arg0, %c0_i32_5, %c0_i32_6] : memref<2x128x512xbf16, #tpu.memory_space<any>> -> memref<1x128x512xbf16, #tpu.memory_space<any>>
      %11 = tpu.memref_squeeze %10 : memref<1x128x512xbf16, #tpu.memory_space<any>> -> memref<128x512xbf16, #tpu.memory_space<any>>
      tpu.enqueue_dma source(%11 : memref<128x512xbf16, #tpu.memory_space<any>>) target(%arg5 : memref<128x512xbf16, #tpu.memory_space<vmem>>) target_semaphore(%arg8 : memref<!tpu.dma_semaphore, #tpu.memory_space<semaphore_mem>>)
      %c0_i32_7 = arith.constant 0 : i32
      %c0_i32_8 = arith.constant 0 : i32
      %12 = tpu.memref_slice %arg3[%arg0, %c0_i32_7, %c0_i32_8] : memref<2x128x512xbf16, #tpu.memory_space<any>> -> memref<1x128x512xbf16, #tpu.memory_space<any>>
      %13 = tpu.memref_squeeze %12 : memref<1x128x512xbf16, #tpu.memory_space<any>> -> memref<128x512xbf16, #tpu.memory_space<any>>
      tpu.wait_dma2 semaphore(%arg8 : memref<!tpu.dma_semaphore, #tpu.memory_space<semaphore_mem>>) src(%13 : memref<128x512xbf16, #tpu.memory_space<any>>) dst(%arg5 : memref<128x512xbf16, #tpu.memory_space<vmem>>)
      %cst = arith.constant 0.000000e+00 : f32
      %14 = vector.broadcast %cst : f32 to vector<16x128xf32>
      %c0_9 = arith.constant 0 : index
      %c0_10 = arith.constant 0 : index
      %15 = vector.load %arg6[%c0_9, %c0_10] : memref<16x128xf32, #tpu.memory_space<vmem>>, vector<16x128xf32>
      tpu.vector_store %arg6[%c0_9, %c0_10], %14 {strides = array<i32>} : memref<16x128xf32, #tpu.memory_space<vmem>>, vector<16x128xf32>,
      %cst_11 = arith.constant 0.000000e+00 : f32
      %16 = vector.broadcast %cst_11 : f32 to vector<16x128xf32>
      %c0_12 = arith.constant 0 : index
      %c0_13 = arith.constant 0 : index
      %17 = vector.load %arg7[%c0_12, %c0_13] : memref<16x128xf32, #tpu.memory_space<vmem>>, vector<16x128xf32>
      tpu.vector_store %arg7[%c0_12, %c0_13], %16 {strides = array<i32>} : memref<16x128xf32, #tpu.memory_space<vmem>>, vector<16x128xf32>,
    } else {
    }
    %c0 = arith.constant 0 : index
    %c0_1 = arith.constant 0 : index
    %3 = vector.load %arg5[%c0, %c0_1] : memref<128x512xbf16, #tpu.memory_space<vmem>>, vector<128x512xbf16>
    %c0_i32_2 = arith.constant 0 : i32
    %4 = arith.cmpi eq, %arg0, %c0_i32_2 : i32
    %5 = arith.extui %4 : i1 to i32
    %c0_i32_3 = arith.constant 0 : i32
    %6 = arith.cmpi ne, %5, %c0_i32_3 : i32
    scf.if %6 {
      %c0_5 = arith.constant 0 : index
      %c0_6 = arith.constant 0 : index
      %10 = vector.load %arg6[%c0_5, %c0_6] : memref<16x128xf32, #tpu.memory_space<vmem>>, vector<16x128xf32>
      %c0_7 = arith.constant 0 : index
      %c0_8 = arith.constant 0 : index
      %11 = vector.load %arg7[%c0_7, %c0_8] : memref<16x128xf32, #tpu.memory_space<vmem>>, vector<16x128xf32>
      %c0_9 = arith.constant 0 : index
      %c0_10 = arith.constant 0 : index
      %c0_11 = arith.constant 0 : index
      %c0_12 = arith.constant 0 : index
      %12 = vector.load %arg2[%c0_9, %c0_10, %c0_11, %c0_12] : memref<1x8x16x512xbf16, #tpu.memory_space<vmem>>, vector<1x1x16x512xbf16>
      %13 = vector.shape_cast %12 : vector<1x1x16x512xbf16> to vector<16x512xbf16>
      %14 = arith.extf %13 : vector<16x512xbf16> to vector<16x512xf32>
      %15 = arith.truncf %10 : vector<16x128xf32> to vector<16x128xbf16>
      %cst = arith.constant dense<0.000000e+00> : vector<16x512xf32>
      %16 = tpu.matmul %15, %3, %cst {dimension_numbers = #tpu.dot_dimension_numbers<[1], [0], [0], [1], [0, 0, 1, 1], [], []>} : vector<16x128xbf16>, vector<128x512xbf16>, vector<16x512xf32> -> vector<16x512xf32>
      %17 = arith.addf %14, %16 : vector<16x512xf32>
      %18 = vector.extract_strided_slice %17 {offsets = [0, 0], sizes = [16, 128], strides = [1, 1]} : vector<16x512xf32> to vector<16x128xf32>
      %19 = arith.negf %18 : vector<16x128xf32>
      %20 = math.exp %19 : vector<16x128xf32>
      %cst_13 = arith.constant 1.000000e+00 : f32
      %21 = vector.broadcast %cst_13 : f32 to vector<16x128xf32>
      %22 = arith.addf %21, %20 : vector<16x128xf32>
      %23 = arith.divf %21, %22 : vector<16x128xf32>
      %24 = vector.extract_strided_slice %17 {offsets = [0, 128], sizes = [16, 128], strides = [1, 1]} : vector<16x512xf32> to vector<16x128xf32>
      %25 = arith.negf %24 : vector<16x128xf32>
      %26 = math.exp %25 : vector<16x128xf32>
      %cst_14 = arith.constant 1.000000e+00 : f32
      %27 = vector.broadcast %cst_14 : f32 to vector<16x128xf32>
      %28 = arith.addf %27, %26 : vector<16x128xf32>
      %29 = arith.divf %27, %28 : vector<16x128xf32>
      %30 = vector.extract_strided_slice %17 {offsets = [0, 256], sizes = [16, 128], strides = [1, 1]} : vector<16x512xf32> to vector<16x128xf32>
      %31 = math.tanh %30 : vector<16x128xf32>
      %32 = vector.extract_strided_slice %17 {offsets = [0, 384], sizes = [16, 128], strides = [1, 1]} : vector<16x512xf32> to vector<16x128xf32>
      %33 = arith.negf %32 : vector<16x128xf32>
      %34 = math.exp %33 : vector<16x128xf32>
      %cst_15 = arith.constant 1.000000e+00 : f32
      %35 = vector.broadcast %cst_15 : f32 to vector<16x128xf32>
      %36 = arith.addf %35, %34 : vector<16x128xf32>
      %37 = arith.divf %35, %36 : vector<16x128xf32>
      %38 = arith.mulf %29, %11 : vector<16x128xf32>
      %39 = arith.mulf %23, %31 : vector<16x128xf32>
      %40 = arith.addf %38, %39 : vector<16x128xf32>
      %41 = math.tanh %40 : vector<16x128xf32>
      %42 = arith.mulf %37, %41 : vector<16x128xf32>
      %43 = arith.truncf %42 : vector<16x128xf32> to vector<16x128xbf16>
      %c0_16 = arith.constant 0 : index
      %c0_17 = arith.constant 0 : index
      %c0_18 = arith.constant 0 : index
      %c0_19 = arith.constant 0 : index
      %44 = vector.load %arg4[%c0_16, %c0_17, %c0_18, %c0_19] : memref<1x8x16x128xbf16, #tpu.memory_space<vmem>>, vector<1x1x16x128xbf16>
      %45 = vector.shape_cast %44 : vector<1x1x16x128xbf16> to vector<16x128xbf16>
      %46 = vector.shape_cast %43 : vector<16x128xbf16> to vector<1x1x16x128xbf16>
      tpu.vector_store %arg4[%c0_16, %c0_17, %c0_18, %c0_19], %46 {strides = array<i32>} : memref<1x8x16x128xbf16, #tpu.memory_space<vmem>>, vector<1x1x16x128xbf16>,
      %c0_20 = arith.constant 0 : index
      %c1 = arith.constant 1 : index
      %c0_21 = arith.constant 0 : index
      %c0_22 = arith.constant 0 : index
      %47 = vector.load %arg2[%c0_20, %c1, %c0_21, %c0_22] : memref<1x8x16x512xbf16, #tpu.memory_space<vmem>>, vector<1x1x16x512xbf16>
      %48 = vector.shape_cast %47 : vector<1x1x16x512xbf16> to vector<16x512xbf16>
      %49 = arith.extf %48 : vector<16x512xbf16> to vector<16x512xf32>
      %50 = arith.truncf %42 : vector<16x128xf32> to vector<16x128xbf16>
      %cst_23 = arith.constant dense<0.000000e+00> : vector<16x512xf32>
      %51 = tpu.matmul %50, %3, %cst_23 {dimension_numbers = #tpu.dot_dimension_numbers<[1], [0], [0], [1], [0, 0, 1, 1], [], []>} : vector<16x128xbf16>, vector<128x512xbf16>, vector<16x512xf32> -> vector<16x512xf32>
      %52 = arith.addf %49, %51 : vector<16x512xf32>
      %53 = vector.extract_strided_slice %52 {offsets = [0, 0], sizes = [16, 128], strides = [1, 1]} : vector<16x512xf32> to vector<16x128xf32>
      %54 = arith.negf %53 : vector<16x128xf32>
      %55 = math.exp %54 : vector<16x128xf32>
      %cst_24 = arith.constant 1.000000e+00 : f32
      %56 = vector.broadcast %cst_24 : f32 to vector<16x128xf32>
      %57 = arith.addf %56, %55 : vector<16x128xf32>
      %58 = arith.divf %56, %57 : vector<16x128xf32>
      %59 = vector.extract_strided_slice %52 {offsets = [0, 128], sizes = [16, 128], strides = [1, 1]} : vector<16x512xf32> to vector<16x128xf32>
      %60 = arith.negf %59 : vector<16x128xf32>
      %61 = math.exp %60 : vector<16x128xf32>
      %cst_25 = arith.constant 1.000000e+00 : f32
      %62 = vector.broadcast %cst_25 : f32 to vector<16x128xf32>
      %63 = arith.addf %62, %61 : vector<16x128xf32>
      %64 = arith.divf %62, %63 : vector<16x128xf32>
      %65 = vector.extract_strided_slice %52 {offsets = [0, 256], sizes = [16, 128], strides = [1, 1]} : vector<16x512xf32> to vector<16x128xf32>
      %66 = math.tanh %65 : vector<16x128xf32>
      %67 = vector.extract_strided_slice %52 {offsets = [0, 384], sizes = [16, 128], strides = [1, 1]} : vector<16x512xf32> to vector<16x128xf32>
      %68 = arith.negf %67 : vector<16x128xf32>
      %69 = math.exp %68 : vector<16x128xf32>
      %cst_26 = arith.constant 1.000000e+00 : f32
      %70 = vector.broadcast %cst_26 : f32 to vector<16x128xf32>
      %71 = arith.addf %70, %69 : vector<16x128xf32>
      %72 = arith.divf %70, %71 : vector<16x128xf32>
      %73 = arith.mulf %64, %40 : vector<16x128xf32>
      %74 = arith.mulf %58, %66 : vector<16x128xf32>
      %75 = arith.addf %73, %74 : vector<16x128xf32>
      %76 = math.tanh %75 : vector<16x128xf32>
      %77 = arith.mulf %72, %76 : vector<16x128xf32>
      %78 = arith.truncf %77 : vector<16x128xf32> to vector<16x128xbf16>
      %c0_27 = arith.constant 0 : index
      %c1_28 = arith.constant 1 : index
      %c0_29 = arith.constant 0 : index
      %c0_30 = arith.constant 0 : index
      %79 = vector.load %arg4[%c0_27, %c1_28, %c0_29, %c0_30] : memref<1x8x16x128xbf16, #tpu.memory_space<vmem>>, vector<1x1x16x128xbf16>
      %80 = vector.shape_cast %79 : vector<1x1x16x128xbf16> to vector<16x128xbf16>
      %81 = vector.shape_cast %78 : vector<16x128xbf16> to vector<1x1x16x128xbf16>
      tpu.vector_store %arg4[%c0_27, %c1_28, %c0_29, %c0_30], %81 {strides = array<i32>} : memref<1x8x16x128xbf16, #tpu.memory_space<vmem>>, vector<1x1x16x128xbf16>,
      %c0_31 = arith.constant 0 : index
      %c2 = arith.constant 2 : index
      %c0_32 = arith.constant 0 : index
      %c0_33 = arith.constant 0 : index
      %82 = vector.load %arg2[%c0_31, %c2, %c0_32, %c0_33] : memref<1x8x16x512xbf16, #tpu.memory_space<vmem>>, vector<1x1x16x512xbf16>
      %83 = vector.shape_cast %82 : vector<1x1x16x512xbf16> to vector<16x512xbf16>
      %84 = arith.extf %83 : vector<16x512xbf16> to vector<16x512xf32>
      %85 = arith.truncf %77 : vector<16x128xf32> to vector<16x128xbf16>
      %cst_34 = arith.constant dense<0.000000e+00> : vector<16x512xf32>
      %86 = tpu.matmul %85, %3, %cst_34 {dimension_numbers = #tpu.dot_dimension_numbers<[1], [0], [0], [1], [0, 0, 1, 1], [], []>} : vector<16x128xbf16>, vector<128x512xbf16>, vector<16x512xf32> -> vector<16x512xf32>
      %87 = arith.addf %84, %86 : vector<16x512xf32>
      %88 = vector.extract_strided_slice %87 {offsets = [0, 0], sizes = [16, 128], strides = [1, 1]} : vector<16x512xf32> to vector<16x128xf32>
      %89 = arith.negf %88 : vector<16x128xf32>
      %90 = math.exp %89 : vector<16x128xf32>
      %cst_35 = arith.constant 1.000000e+00 : f32
      %91 = vector.broadcast %cst_35 : f32 to vector<16x128xf32>
      %92 = arith.addf %91, %90 : vector<16x128xf32>
      %93 = arith.divf %91, %92 : vector<16x128xf32>
      %94 = vector.extract_strided_slice %87 {offsets = [0, 128], sizes = [16, 128], strides = [1, 1]} : vector<16x512xf32> to vector<16x128xf32>
      %95 = arith.negf %94 : vector<16x128xf32>
      %96 = math.exp %95 : vector<16x128xf32>
      %cst_36 = arith.constant 1.000000e+00 : f32
      %97 = vector.broadcast %cst_36 : f32 to vector<16x128xf32>
      %98 = arith.addf %97, %96 : vector<16x128xf32>
      %99 = arith.divf %97, %98 : vector<16x128xf32>
      %100 = vector.extract_strided_slice %87 {offsets = [0, 256], sizes = [16, 128], strides = [1, 1]} : vector<16x512xf32> to vector<16x128xf32>
      %101 = math.tanh %100 : vector<16x128xf32>
      %102 = vector.extract_strided_slice %87 {offsets = [0, 384], sizes = [16, 128], strides = [1, 1]} : vector<16x512xf32> to vector<16x128xf32>
      %103 = arith.negf %102 : vector<16x128xf32>
      %104 = math.exp %103 : vector<16x128xf32>
      %cst_37 = arith.constant 1.000000e+00 : f32
      %105 = vector.broadcast %cst_37 : f32 to vector<16x128xf32>
      %106 = arith.addf %105, %104 : vector<16x128xf32>
      %107 = arith.divf %105, %106 : vector<16x128xf32>
      %108 = arith.mulf %99, %75 : vector<16x128xf32>
      %109 = arith.mulf %93, %101 : vector<16x128xf32>
      %110 = arith.addf %108, %109 : vector<16x128xf32>
      %111 = math.tanh %110 : vector<16x128xf32>
      %112 = arith.mulf %107, %111 : vector<16x128xf32>
      %113 = arith.truncf %112 : vector<16x128xf32> to vector<16x128xbf16>
      %c0_38 = arith.constant 0 : index
      %c2_39 = arith.constant 2 : index
      %c0_40 = arith.constant 0 : index
      %c0_41 = arith.constant 0 : index
      %114 = vector.load %arg4[%c0_38, %c2_39, %c0_40, %c0_41] : memref<1x8x16x128xbf16, #tpu.memory_space<vmem>>, vector<1x1x16x128xbf16>
      %115 = vector.shape_cast %114 : vector<1x1x16x128xbf16> to vector<16x128xbf16>
      %116 = vector.shape_cast %113 : vector<16x128xbf16> to vector<1x1x16x128xbf16>
      tpu.vector_store %arg4[%c0_38, %c2_39, %c0_40, %c0_41], %116 {strides = array<i32>} : memref<1x8x16x128xbf16, #tpu.memory_space<vmem>>, vector<1x1x16x128xbf16>,
      %c0_42 = arith.constant 0 : index
      %c3 = arith.constant 3 : index
      %c0_43 = arith.constant 0 : index
      %c0_44 = arith.constant 0 : index
      %117 = vector.load %arg2[%c0_42, %c3, %c0_43, %c0_44] : memref<1x8x16x512xbf16, #tpu.memory_space<vmem>>, vector<1x1x16x512xbf16>
      %118 = vector.shape_cast %117 : vector<1x1x16x512xbf16> to vector<16x512xbf16>
      %119 = arith.extf %118 : vector<16x512xbf16> to vector<16x512xf32>
      %120 = arith.truncf %112 : vector<16x128xf32> to vector<16x128xbf16>
      %cst_45 = arith.constant dense<0.000000e+00> : vector<16x512xf32>
      %121 = tpu.matmul %120, %3, %cst_45 {dimension_numbers = #tpu.dot_dimension_numbers<[1], [0], [0], [1], [0, 0, 1, 1], [], []>} : vector<16x128xbf16>, vector<128x512xbf16>, vector<16x512xf32> -> vector<16x512xf32>
      %122 = arith.addf %119, %121 : vector<16x512xf32>
      %123 = vector.extract_strided_slice %122 {offsets = [0, 0], sizes = [16, 128], strides = [1, 1]} : vector<16x512xf32> to vector<16x128xf32>
      %124 = arith.negf %123 : vector<16x128xf32>
      %125 = math.exp %124 : vector<16x128xf32>
      %cst_46 = arith.constant 1.000000e+00 : f32
      %126 = vector.broadcast %cst_46 : f32 to vector<16x128xf32>
      %127 = arith.addf %126, %125 : vector<16x128xf32>
      %128 = arith.divf %126, %127 : vector<16x128xf32>
      %129 = vector.extract_strided_slice %122 {offsets = [0, 128], sizes = [16, 128], strides = [1, 1]} : vector<16x512xf32> to vector<16x128xf32>
      %130 = arith.negf %129 : vector<16x128xf32>
      %131 = math.exp %130 : vector<16x128xf32>
      %cst_47 = arith.constant 1.000000e+00 : f32
      %132 = vector.broadcast %cst_47 : f32 to vector<16x128xf32>
      %133 = arith.addf %132, %131 : vector<16x128xf32>
      %134 = arith.divf %132, %133 : vector<16x128xf32>
      %135 = vector.extract_strided_slice %122 {offsets = [0, 256], sizes = [16, 128], strides = [1, 1]} : vector<16x512xf32> to vector<16x128xf32>
      %136 = math.tanh %135 : vector<16x128xf32>
      %137 = vector.extract_strided_slice %122 {offsets = [0, 384], sizes = [16, 128], strides = [1, 1]} : vector<16x512xf32> to vector<16x128xf32>
      %138 = arith.negf %137 : vector<16x128xf32>
      %139 = math.exp %138 : vector<16x128xf32>
      %cst_48 = arith.constant 1.000000e+00 : f32
      %140 = vector.broadcast %cst_48 : f32 to vector<16x128xf32>
      %141 = arith.addf %140, %139 : vector<16x128xf32>
      %142 = arith.divf %140, %141 : vector<16x128xf32>
      %143 = arith.mulf %134, %110 : vector<16x128xf32>
      %144 = arith.mulf %128, %136 : vector<16x128xf32>
      %145 = arith.addf %143, %144 : vector<16x128xf32>
      %146 = math.tanh %145 : vector<16x128xf32>
      %147 = arith.mulf %142, %146 : vector<16x128xf32>
      %148 = arith.truncf %147 : vector<16x128xf32> to vector<16x128xbf16>
      %c0_49 = arith.constant 0 : index
      %c3_50 = arith.constant 3 : index
      %c0_51 = arith.constant 0 : index
      %c0_52 = arith.constant 0 : index
      %149 = vector.load %arg4[%c0_49, %c3_50, %c0_51, %c0_52] : memref<1x8x16x128xbf16, #tpu.memory_space<vmem>>, vector<1x1x16x128xbf16>
      %150 = vector.shape_cast %149 : vector<1x1x16x128xbf16> to vector<16x128xbf16>
      %151 = vector.shape_cast %148 : vector<16x128xbf16> to vector<1x1x16x128xbf16>
      tpu.vector_store %arg4[%c0_49, %c3_50, %c0_51, %c0_52], %151 {strides = array<i32>} : memref<1x8x16x128xbf16, #tpu.memory_space<vmem>>, vector<1x1x16x128xbf16>,
      %c0_53 = arith.constant 0 : index
      %c4 = arith.constant 4 : index
      %c0_54 = arith.constant 0 : index
      %c0_55 = arith.constant 0 : index
      %152 = vector.load %arg2[%c0_53, %c4, %c0_54, %c0_55] : memref<1x8x16x512xbf16, #tpu.memory_space<vmem>>, vector<1x1x16x512xbf16>
      %153 = vector.shape_cast %152 : vector<1x1x16x512xbf16> to vector<16x512xbf16>
      %154 = arith.extf %153 : vector<16x512xbf16> to vector<16x512xf32>
      %155 = arith.truncf %147 : vector<16x128xf32> to vector<16x128xbf16>
      %cst_56 = arith.constant dense<0.000000e+00> : vector<16x512xf32>
      %156 = tpu.matmul %155, %3, %cst_56 {dimension_numbers = #tpu.dot_dimension_numbers<[1], [0], [0], [1], [0, 0, 1, 1], [], []>} : vector<16x128xbf16>, vector<128x512xbf16>, vector<16x512xf32> -> vector<16x512xf32>
      %157 = arith.addf %154, %156 : vector<16x512xf32>
      %158 = vector.extract_strided_slice %157 {offsets = [0, 0], sizes = [16, 128], strides = [1, 1]} : vector<16x512xf32> to vector<16x128xf32>
      %159 = arith.negf %158 : vector<16x128xf32>
      %160 = math.exp %159 : vector<16x128xf32>
      %cst_57 = arith.constant 1.000000e+00 : f32
      %161 = vector.broadcast %cst_57 : f32 to vector<16x128xf32>
      %162 = arith.addf %161, %160 : vector<16x128xf32>
      %163 = arith.divf %161, %162 : vector<16x128xf32>
      %164 = vector.extract_strided_slice %157 {offsets = [0, 128], sizes = [16, 128], strides = [1, 1]} : vector<16x512xf32> to vector<16x128xf32>
      %165 = arith.negf %164 : vector<16x128xf32>
      %166 = math.exp %165 : vector<16x128xf32>
      %cst_58 = arith.constant 1.000000e+00 : f32
      %167 = vector.broadcast %cst_58 : f32 to vector<16x128xf32>
      %168 = arith.addf %167, %166 : vector<16x128xf32>
      %169 = arith.divf %167, %168 : vector<16x128xf32>
      %170 = vector.extract_strided_slice %157 {offsets = [0, 256], sizes = [16, 128], strides = [1, 1]} : vector<16x512xf32> to vector<16x128xf32>
      %171 = math.tanh %170 : vector<16x128xf32>
      %172 = vector.extract_strided_slice %157 {offsets = [0, 384], sizes = [16, 128], strides = [1, 1]} : vector<16x512xf32> to vector<16x128xf32>
      %173 = arith.negf %172 : vector<16x128xf32>
      %174 = math.exp %173 : vector<16x128xf32>
      %cst_59 = arith.constant 1.000000e+00 : f32
      %175 = vector.broadcast %cst_59 : f32 to vector<16x128xf32>
      %176 = arith.addf %175, %174 : vector<16x128xf32>
      %177 = arith.divf %175, %176 : vector<16x128xf32>
      %178 = arith.mulf %169, %145 : vector<16x128xf32>
      %179 = arith.mulf %163, %171 : vector<16x128xf32>
      %180 = arith.addf %178, %179 : vector<16x128xf32>
      %181 = math.tanh %180 : vector<16x128xf32>
      %182 = arith.mulf %177, %181 : vector<16x128xf32>
      %183 = arith.truncf %182 : vector<16x128xf32> to vector<16x128xbf16>
      %c0_60 = arith.constant 0 : index
      %c4_61 = arith.constant 4 : index
      %c0_62 = arith.constant 0 : index
      %c0_63 = arith.constant 0 : index
      %184 = vector.load %arg4[%c0_60, %c4_61, %c0_62, %c0_63] : memref<1x8x16x128xbf16, #tpu.memory_space<vmem>>, vector<1x1x16x128xbf16>
      %185 = vector.shape_cast %184 : vector<1x1x16x128xbf16> to vector<16x128xbf16>
      %186 = vector.shape_cast %183 : vector<16x128xbf16> to vector<1x1x16x128xbf16>
      tpu.vector_store %arg4[%c0_60, %c4_61, %c0_62, %c0_63], %186 {strides = array<i32>} : memref<1x8x16x128xbf16, #tpu.memory_space<vmem>>, vector<1x1x16x128xbf16>,
      %c0_64 = arith.constant 0 : index
      %c5 = arith.constant 5 : index
      %c0_65 = arith.constant 0 : index
      %c0_66 = arith.constant 0 : index
      %187 = vector.load %arg2[%c0_64, %c5, %c0_65, %c0_66] : memref<1x8x16x512xbf16, #tpu.memory_space<vmem>>, vector<1x1x16x512xbf16>
      %188 = vector.shape_cast %187 : vector<1x1x16x512xbf16> to vector<16x512xbf16>
      %189 = arith.extf %188 : vector<16x512xbf16> to vector<16x512xf32>
      %190 = arith.truncf %182 : vector<16x128xf32> to vector<16x128xbf16>
      %cst_67 = arith.constant dense<0.000000e+00> : vector<16x512xf32>
      %191 = tpu.matmul %190, %3, %cst_67 {dimension_numbers = #tpu.dot_dimension_numbers<[1], [0], [0], [1], [0, 0, 1, 1], [], []>} : vector<16x128xbf16>, vector<128x512xbf16>, vector<16x512xf32> -> vector<16x512xf32>
      %192 = arith.addf %189, %191 : vector<16x512xf32>
      %193 = vector.extract_strided_slice %192 {offsets = [0, 0], sizes = [16, 128], strides = [1, 1]} : vector<16x512xf32> to vector<16x128xf32>
      %194 = arith.negf %193 : vector<16x128xf32>
      %195 = math.exp %194 : vector<16x128xf32>
      %cst_68 = arith.constant 1.000000e+00 : f32
      %196 = vector.broadcast %cst_68 : f32 to vector<16x128xf32>
      %197 = arith.addf %196, %195 : vector<16x128xf32>
      %198 = arith.divf %196, %197 : vector<16x128xf32>
      %199 = vector.extract_strided_slice %192 {offsets = [0, 128], sizes = [16, 128], strides = [1, 1]} : vector<16x512xf32> to vector<16x128xf32>
      %200 = arith.negf %199 : vector<16x128xf32>
      %201 = math.exp %200 : vector<16x128xf32>
      %cst_69 = arith.constant 1.000000e+00 : f32
      %202 = vector.broadcast %cst_69 : f32 to vector<16x128xf32>
      %203 = arith.addf %202, %201 : vector<16x128xf32>
      %204 = arith.divf %202, %203 : vector<16x128xf32>
      %205 = vector.extract_strided_slice %192 {offsets = [0, 256], sizes = [16, 128], strides = [1, 1]} : vector<16x512xf32> to vector<16x128xf32>
      %206 = math.tanh %205 : vector<16x128xf32>
      %207 = vector.extract_strided_slice %192 {offsets = [0, 384], sizes = [16, 128], strides = [1, 1]} : vector<16x512xf32> to vector<16x128xf32>
      %208 = arith.negf %207 : vector<16x128xf32>
      %209 = math.exp %208 : vector<16x128xf32>
      %cst_70 = arith.constant 1.000000e+00 : f32
      %210 = vector.broadcast %cst_70 : f32 to vector<16x128xf32>
      %211 = arith.addf %210, %209 : vector<16x128xf32>
      %212 = arith.divf %210, %211 : vector<16x128xf32>
      %213 = arith.mulf %204, %180 : vector<16x128xf32>
      %214 = arith.mulf %198, %206 : vector<16x128xf32>
      %215 = arith.addf %213, %214 : vector<16x128xf32>
      %216 = math.tanh %215 : vector<16x128xf32>
      %217 = arith.mulf %212, %216 : vector<16x128xf32>
      %218 = arith.truncf %217 : vector<16x128xf32> to vector<16x128xbf16>
      %c0_71 = arith.constant 0 : index
      %c5_72 = arith.constant 5 : index
      %c0_73 = arith.constant 0 : index
      %c0_74 = arith.constant 0 : index
      %219 = vector.load %arg4[%c0_71, %c5_72, %c0_73, %c0_74] : memref<1x8x16x128xbf16, #tpu.memory_space<vmem>>, vector<1x1x16x128xbf16>
      %220 = vector.shape_cast %219 : vector<1x1x16x128xbf16> to vector<16x128xbf16>
      %221 = vector.shape_cast %218 : vector<16x128xbf16> to vector<1x1x16x128xbf16>
      tpu.vector_store %arg4[%c0_71, %c5_72, %c0_73, %c0_74], %221 {strides = array<i32>} : memref<1x8x16x128xbf16, #tpu.memory_space<vmem>>, vector<1x1x16x128xbf16>,
      %c0_75 = arith.constant 0 : index
      %c6 = arith.constant 6 : index
      %c0_76 = arith.constant 0 : index
      %c0_77 = arith.constant 0 : index
      %222 = vector.load %arg2[%c0_75, %c6, %c0_76, %c0_77] : memref<1x8x16x512xbf16, #tpu.memory_space<vmem>>, vector<1x1x16x512xbf16>
      %223 = vector.shape_cast %222 : vector<1x1x16x512xbf16> to vector<16x512xbf16>
      %224 = arith.extf %223 : vector<16x512xbf16> to vector<16x512xf32>
      %225 = arith.truncf %217 : vector<16x128xf32> to vector<16x128xbf16>
      %cst_78 = arith.constant dense<0.000000e+00> : vector<16x512xf32>
      %226 = tpu.matmul %225, %3, %cst_78 {dimension_numbers = #tpu.dot_dimension_numbers<[1], [0], [0], [1], [0, 0, 1, 1], [], []>} : vector<16x128xbf16>, vector<128x512xbf16>, vector<16x512xf32> -> vector<16x512xf32>
      %227 = arith.addf %224, %226 : vector<16x512xf32>
      %228 = vector.extract_strided_slice %227 {offsets = [0, 0], sizes = [16, 128], strides = [1, 1]} : vector<16x512xf32> to vector<16x128xf32>
      %229 = arith.negf %228 : vector<16x128xf32>
      %230 = math.exp %229 : vector<16x128xf32>
      %cst_79 = arith.constant 1.000000e+00 : f32
      %231 = vector.broadcast %cst_79 : f32 to vector<16x128xf32>
      %232 = arith.addf %231, %230 : vector<16x128xf32>
      %233 = arith.divf %231, %232 : vector<16x128xf32>
      %234 = vector.extract_strided_slice %227 {offsets = [0, 128], sizes = [16, 128], strides = [1, 1]} : vector<16x512xf32> to vector<16x128xf32>
      %235 = arith.negf %234 : vector<16x128xf32>
      %236 = math.exp %235 : vector<16x128xf32>
      %cst_80 = arith.constant 1.000000e+00 : f32
      %237 = vector.broadcast %cst_80 : f32 to vector<16x128xf32>
      %238 = arith.addf %237, %236 : vector<16x128xf32>
      %239 = arith.divf %237, %238 : vector<16x128xf32>
      %240 = vector.extract_strided_slice %227 {offsets = [0, 256], sizes = [16, 128], strides = [1, 1]} : vector<16x512xf32> to vector<16x128xf32>
      %241 = math.tanh %240 : vector<16x128xf32>
      %242 = vector.extract_strided_slice %227 {offsets = [0, 384], sizes = [16, 128], strides = [1, 1]} : vector<16x512xf32> to vector<16x128xf32>
      %243 = arith.negf %242 : vector<16x128xf32>
      %244 = math.exp %243 : vector<16x128xf32>
      %cst_81 = arith.constant 1.000000e+00 : f32
      %245 = vector.broadcast %cst_81 : f32 to vector<16x128xf32>
      %246 = arith.addf %245, %244 : vector<16x128xf32>
      %247 = arith.divf %245, %246 : vector<16x128xf32>
      %248 = arith.mulf %239, %215 : vector<16x128xf32>
      %249 = arith.mulf %233, %241 : vector<16x128xf32>
      %250 = arith.addf %248, %249 : vector<16x128xf32>
      %251 = math.tanh %250 : vector<16x128xf32>
      %252 = arith.mulf %247, %251 : vector<16x128xf32>
      %253 = arith.truncf %252 : vector<16x128xf32> to vector<16x128xbf16>
      %c0_82 = arith.constant 0 : index
      %c6_83 = arith.constant 6 : index
      %c0_84 = arith.constant 0 : index
      %c0_85 = arith.constant 0 : index
      %254 = vector.load %arg4[%c0_82, %c6_83, %c0_84, %c0_85] : memref<1x8x16x128xbf16, #tpu.memory_space<vmem>>, vector<1x1x16x128xbf16>
      %255 = vector.shape_cast %254 : vector<1x1x16x128xbf16> to vector<16x128xbf16>
      %256 = vector.shape_cast %253 : vector<16x128xbf16> to vector<1x1x16x128xbf16>
      tpu.vector_store %arg4[%c0_82, %c6_83, %c0_84, %c0_85], %256 {strides = array<i32>} : memref<1x8x16x128xbf16, #tpu.memory_space<vmem>>, vector<1x1x16x128xbf16>,
      %c0_86 = arith.constant 0 : index
      %c7 = arith.constant 7 : index
      %c0_87 = arith.constant 0 : index
      %c0_88 = arith.constant 0 : index
      %257 = vector.load %arg2[%c0_86, %c7, %c0_87, %c0_88] : memref<1x8x16x512xbf16, #tpu.memory_space<vmem>>, vector<1x1x16x512xbf16>
      %258 = vector.shape_cast %257 : vector<1x1x16x512xbf16> to vector<16x512xbf16>
      %259 = arith.extf %258 : vector<16x512xbf16> to vector<16x512xf32>
      %260 = arith.truncf %252 : vector<16x128xf32> to vector<16x128xbf16>
      %cst_89 = arith.constant dense<0.000000e+00> : vector<16x512xf32>
      %261 = tpu.matmul %260, %3, %cst_89 {dimension_numbers = #tpu.dot_dimension_numbers<[1], [0], [0], [1], [0, 0, 1, 1], [], []>} : vector<16x128xbf16>, vector<128x512xbf16>, vector<16x512xf32> -> vector<16x512xf32>
      %262 = arith.addf %259, %261 : vector<16x512xf32>
      %263 = vector.extract_strided_slice %262 {offsets = [0, 0], sizes = [16, 128], strides = [1, 1]} : vector<16x512xf32> to vector<16x128xf32>
      %264 = arith.negf %263 : vector<16x128xf32>
      %265 = math.exp %264 : vector<16x128xf32>
      %cst_90 = arith.constant 1.000000e+00 : f32
      %266 = vector.broadcast %cst_90 : f32 to vector<16x128xf32>
      %267 = arith.addf %266, %265 : vector<16x128xf32>
      %268 = arith.divf %266, %267 : vector<16x128xf32>
      %269 = vector.extract_strided_slice %262 {offsets = [0, 128], sizes = [16, 128], strides = [1, 1]} : vector<16x512xf32> to vector<16x128xf32>
      %270 = arith.negf %269 : vector<16x128xf32>
      %271 = math.exp %270 : vector<16x128xf32>
      %cst_91 = arith.constant 1.000000e+00 : f32
      %272 = vector.broadcast %cst_91 : f32 to vector<16x128xf32>
      %273 = arith.addf %272, %271 : vector<16x128xf32>
      %274 = arith.divf %272, %273 : vector<16x128xf32>
      %275 = vector.extract_strided_slice %262 {offsets = [0, 256], sizes = [16, 128], strides = [1, 1]} : vector<16x512xf32> to vector<16x128xf32>
      %276 = math.tanh %275 : vector<16x128xf32>
      %277 = vector.extract_strided_slice %262 {offsets = [0, 384], sizes = [16, 128], strides = [1, 1]} : vector<16x512xf32> to vector<16x128xf32>
      %278 = arith.negf %277 : vector<16x128xf32>
      %279 = math.exp %278 : vector<16x128xf32>
      %cst_92 = arith.constant 1.000000e+00 : f32
      %280 = vector.broadcast %cst_92 : f32 to vector<16x128xf32>
      %281 = arith.addf %280, %279 : vector<16x128xf32>
      %282 = arith.divf %280, %281 : vector<16x128xf32>
      %283 = arith.mulf %274, %250 : vector<16x128xf32>
      %284 = arith.mulf %268, %276 : vector<16x128xf32>
      %285 = arith.addf %283, %284 : vector<16x128xf32>
      %286 = math.tanh %285 : vector<16x128xf32>
      %287 = arith.mulf %282, %286 : vector<16x128xf32>
      %288 = arith.truncf %287 : vector<16x128xf32> to vector<16x128xbf16>
      %c0_93 = arith.constant 0 : index
      %c7_94 = arith.constant 7 : index
      %c0_95 = arith.constant 0 : index
      %c0_96 = arith.constant 0 : index
      %289 = vector.load %arg4[%c0_93, %c7_94, %c0_95, %c0_96] : memref<1x8x16x128xbf16, #tpu.memory_space<vmem>>, vector<1x1x16x128xbf16>
      %290 = vector.shape_cast %289 : vector<1x1x16x128xbf16> to vector<16x128xbf16>
      %291 = vector.shape_cast %288 : vector<16x128xbf16> to vector<1x1x16x128xbf16>
      tpu.vector_store %arg4[%c0_93, %c7_94, %c0_95, %c0_96], %291 {strides = array<i32>} : memref<1x8x16x128xbf16, #tpu.memory_space<vmem>>, vector<1x1x16x128xbf16>,
      %c0_97 = arith.constant 0 : index
      %c0_98 = arith.constant 0 : index
      %292 = vector.load %arg6[%c0_97, %c0_98] : memref<16x128xf32, #tpu.memory_space<vmem>>, vector<16x128xf32>
      tpu.vector_store %arg6[%c0_97, %c0_98], %287 {strides = array<i32>} : memref<16x128xf32, #tpu.memory_space<vmem>>, vector<16x128xf32>,
      %c0_99 = arith.constant 0 : index
      %c0_100 = arith.constant 0 : index
      %293 = vector.load %arg7[%c0_99, %c0_100] : memref<16x128xf32, #tpu.memory_space<vmem>>, vector<16x128xf32>
      tpu.vector_store %arg7[%c0_99, %c0_100], %285 {strides = array<i32>} : memref<16x128xf32, #tpu.memory_space<vmem>>, vector<16x128xf32>,
    } else {
    }
    %c1_i32 = arith.constant 1 : i32
    %7 = arith.cmpi eq, %arg0, %c1_i32 : i32
    %8 = arith.extui %7 : i1 to i32
    %c0_i32_4 = arith.constant 0 : i32
    %9 = arith.cmpi ne, %8, %c0_i32_4 : i32
    scf.if %9 {
      %c0_5 = arith.constant 0 : index
      %c0_6 = arith.constant 0 : index
      %10 = vector.load %arg6[%c0_5, %c0_6] : memref<16x128xf32, #tpu.memory_space<vmem>>, vector<16x128xf32>
      %c0_7 = arith.constant 0 : index
      %c0_8 = arith.constant 0 : index
      %11 = vector.load %arg7[%c0_7, %c0_8] : memref<16x128xf32, #tpu.memory_space<vmem>>, vector<16x128xf32>
      %c0_9 = arith.constant 0 : index
      %c7 = arith.constant 7 : index
      %c0_10 = arith.constant 0 : index
      %c0_11 = arith.constant 0 : index
      %12 = vector.load %arg2[%c0_9, %c7, %c0_10, %c0_11] : memref<1x8x16x512xbf16, #tpu.memory_space<vmem>>, vector<1x1x16x512xbf16>
      %13 = vector.shape_cast %12 : vector<1x1x16x512xbf16> to vector<16x512xbf16>
      %14 = arith.extf %13 : vector<16x512xbf16> to vector<16x512xf32>
      %15 = arith.truncf %10 : vector<16x128xf32> to vector<16x128xbf16>
      %cst = arith.constant dense<0.000000e+00> : vector<16x512xf32>
      %16 = tpu.matmul %15, %3, %cst {dimension_numbers = #tpu.dot_dimension_numbers<[1], [0], [0], [1], [0, 0, 1, 1], [], []>} : vector<16x128xbf16>, vector<128x512xbf16>, vector<16x512xf32> -> vector<16x512xf32>
      %17 = arith.addf %14, %16 : vector<16x512xf32>
      %18 = vector.extract_strided_slice %17 {offsets = [0, 0], sizes = [16, 128], strides = [1, 1]} : vector<16x512xf32> to vector<16x128xf32>
      %19 = arith.negf %18 : vector<16x128xf32>
      %20 = math.exp %19 : vector<16x128xf32>
      %cst_12 = arith.constant 1.000000e+00 : f32
      %21 = vector.broadcast %cst_12 : f32 to vector<16x128xf32>
      %22 = arith.addf %21, %20 : vector<16x128xf32>
      %23 = arith.divf %21, %22 : vector<16x128xf32>
      %24 = vector.extract_strided_slice %17 {offsets = [0, 128], sizes = [16, 128], strides = [1, 1]} : vector<16x512xf32> to vector<16x128xf32>
      %25 = arith.negf %24 : vector<16x128xf32>
      %26 = math.exp %25 : vector<16x128xf32>
      %cst_13 = arith.constant 1.000000e+00 : f32
      %27 = vector.broadcast %cst_13 : f32 to vector<16x128xf32>
      %28 = arith.addf %27, %26 : vector<16x128xf32>
      %29 = arith.divf %27, %28 : vector<16x128xf32>
      %30 = vector.extract_strided_slice %17 {offsets = [0, 256], sizes = [16, 128], strides = [1, 1]} : vector<16x512xf32> to vector<16x128xf32>
      %31 = math.tanh %30 : vector<16x128xf32>
      %32 = vector.extract_strided_slice %17 {offsets = [0, 384], sizes = [16, 128], strides = [1, 1]} : vector<16x512xf32> to vector<16x128xf32>
      %33 = arith.negf %32 : vector<16x128xf32>
      %34 = math.exp %33 : vector<16x128xf32>
      %cst_14 = arith.constant 1.000000e+00 : f32
      %35 = vector.broadcast %cst_14 : f32 to vector<16x128xf32>
      %36 = arith.addf %35, %34 : vector<16x128xf32>
      %37 = arith.divf %35, %36 : vector<16x128xf32>
      %38 = arith.mulf %29, %11 : vector<16x128xf32>
      %39 = arith.mulf %23, %31 : vector<16x128xf32>
      %40 = arith.addf %38, %39 : vector<16x128xf32>
      %41 = math.tanh %40 : vector<16x128xf32>
      %42 = arith.mulf %37, %41 : vector<16x128xf32>
      %43 = arith.truncf %42 : vector<16x128xf32> to vector<16x128xbf16>
      %c0_15 = arith.constant 0 : index
      %c7_16 = arith.constant 7 : index
      %c0_17 = arith.constant 0 : index
      %c0_18 = arith.constant 0 : index
      %44 = vector.load %arg4[%c0_15, %c7_16, %c0_17, %c0_18] : memref<1x8x16x128xbf16, #tpu.memory_space<vmem>>, vector<1x1x16x128xbf16>
      %45 = vector.shape_cast %44 : vector<1x1x16x128xbf16> to vector<16x128xbf16>
      %46 = vector.shape_cast %43 : vector<16x128xbf16> to vector<1x1x16x128xbf16>
      tpu.vector_store %arg4[%c0_15, %c7_16, %c0_17, %c0_18], %46 {strides = array<i32>} : memref<1x8x16x128xbf16, #tpu.memory_space<vmem>>, vector<1x1x16x128xbf16>,
      %c0_19 = arith.constant 0 : index
      %c6 = arith.constant 6 : index
      %c0_20 = arith.constant 0 : index
      %c0_21 = arith.constant 0 : index
      %47 = vector.load %arg2[%c0_19, %c6, %c0_20, %c0_21] : memref<1x8x16x512xbf16, #tpu.memory_space<vmem>>, vector<1x1x16x512xbf16>
      %48 = vector.shape_cast %47 : vector<1x1x16x512xbf16> to vector<16x512xbf16>
      %49 = arith.extf %48 : vector<16x512xbf16> to vector<16x512xf32>
      %50 = arith.truncf %42 : vector<16x128xf32> to vector<16x128xbf16>
      %cst_22 = arith.constant dense<0.000000e+00> : vector<16x512xf32>
      %51 = tpu.matmul %50, %3, %cst_22 {dimension_numbers = #tpu.dot_dimension_numbers<[1], [0], [0], [1], [0, 0, 1, 1], [], []>} : vector<16x128xbf16>, vector<128x512xbf16>, vector<16x512xf32> -> vector<16x512xf32>
      %52 = arith.addf %49, %51 : vector<16x512xf32>
      %53 = vector.extract_strided_slice %52 {offsets = [0, 0], sizes = [16, 128], strides = [1, 1]} : vector<16x512xf32> to vector<16x128xf32>
      %54 = arith.negf %53 : vector<16x128xf32>
      %55 = math.exp %54 : vector<16x128xf32>
      %cst_23 = arith.constant 1.000000e+00 : f32
      %56 = vector.broadcast %cst_23 : f32 to vector<16x128xf32>
      %57 = arith.addf %56, %55 : vector<16x128xf32>
      %58 = arith.divf %56, %57 : vector<16x128xf32>
      %59 = vector.extract_strided_slice %52 {offsets = [0, 128], sizes = [16, 128], strides = [1, 1]} : vector<16x512xf32> to vector<16x128xf32>
      %60 = arith.negf %59 : vector<16x128xf32>
      %61 = math.exp %60 : vector<16x128xf32>
      %cst_24 = arith.constant 1.000000e+00 : f32
      %62 = vector.broadcast %cst_24 : f32 to vector<16x128xf32>
      %63 = arith.addf %62, %61 : vector<16x128xf32>
      %64 = arith.divf %62, %63 : vector<16x128xf32>
      %65 = vector.extract_strided_slice %52 {offsets = [0, 256], sizes = [16, 128], strides = [1, 1]} : vector<16x512xf32> to vector<16x128xf32>
      %66 = math.tanh %65 : vector<16x128xf32>
      %67 = vector.extract_strided_slice %52 {offsets = [0, 384], sizes = [16, 128], strides = [1, 1]} : vector<16x512xf32> to vector<16x128xf32>
      %68 = arith.negf %67 : vector<16x128xf32>
      %69 = math.exp %68 : vector<16x128xf32>
      %cst_25 = arith.constant 1.000000e+00 : f32
      %70 = vector.broadcast %cst_25 : f32 to vector<16x128xf32>
      %71 = arith.addf %70, %69 : vector<16x128xf32>
      %72 = arith.divf %70, %71 : vector<16x128xf32>
      %73 = arith.mulf %64, %40 : vector<16x128xf32>
      %74 = arith.mulf %58, %66 : vector<16x128xf32>
      %75 = arith.addf %73, %74 : vector<16x128xf32>
      %76 = math.tanh %75 : vector<16x128xf32>
      %77 = arith.mulf %72, %76 : vector<16x128xf32>
      %78 = arith.truncf %77 : vector<16x128xf32> to vector<16x128xbf16>
      %c0_26 = arith.constant 0 : index
      %c6_27 = arith.constant 6 : index
      %c0_28 = arith.constant 0 : index
      %c0_29 = arith.constant 0 : index
      %79 = vector.load %arg4[%c0_26, %c6_27, %c0_28, %c0_29] : memref<1x8x16x128xbf16, #tpu.memory_space<vmem>>, vector<1x1x16x128xbf16>
      %80 = vector.shape_cast %79 : vector<1x1x16x128xbf16> to vector<16x128xbf16>
      %81 = vector.shape_cast %78 : vector<16x128xbf16> to vector<1x1x16x128xbf16>
      tpu.vector_store %arg4[%c0_26, %c6_27, %c0_28, %c0_29], %81 {strides = array<i32>} : memref<1x8x16x128xbf16, #tpu.memory_space<vmem>>, vector<1x1x16x128xbf16>,
      %c0_30 = arith.constant 0 : index
      %c5 = arith.constant 5 : index
      %c0_31 = arith.constant 0 : index
      %c0_32 = arith.constant 0 : index
      %82 = vector.load %arg2[%c0_30, %c5, %c0_31, %c0_32] : memref<1x8x16x512xbf16, #tpu.memory_space<vmem>>, vector<1x1x16x512xbf16>
      %83 = vector.shape_cast %82 : vector<1x1x16x512xbf16> to vector<16x512xbf16>
      %84 = arith.extf %83 : vector<16x512xbf16> to vector<16x512xf32>
      %85 = arith.truncf %77 : vector<16x128xf32> to vector<16x128xbf16>
      %cst_33 = arith.constant dense<0.000000e+00> : vector<16x512xf32>
      %86 = tpu.matmul %85, %3, %cst_33 {dimension_numbers = #tpu.dot_dimension_numbers<[1], [0], [0], [1], [0, 0, 1, 1], [], []>} : vector<16x128xbf16>, vector<128x512xbf16>, vector<16x512xf32> -> vector<16x512xf32>
      %87 = arith.addf %84, %86 : vector<16x512xf32>
      %88 = vector.extract_strided_slice %87 {offsets = [0, 0], sizes = [16, 128], strides = [1, 1]} : vector<16x512xf32> to vector<16x128xf32>
      %89 = arith.negf %88 : vector<16x128xf32>
      %90 = math.exp %89 : vector<16x128xf32>
      %cst_34 = arith.constant 1.000000e+00 : f32
      %91 = vector.broadcast %cst_34 : f32 to vector<16x128xf32>
      %92 = arith.addf %91, %90 : vector<16x128xf32>
      %93 = arith.divf %91, %92 : vector<16x128xf32>
      %94 = vector.extract_strided_slice %87 {offsets = [0, 128], sizes = [16, 128], strides = [1, 1]} : vector<16x512xf32> to vector<16x128xf32>
      %95 = arith.negf %94 : vector<16x128xf32>
      %96 = math.exp %95 : vector<16x128xf32>
      %cst_35 = arith.constant 1.000000e+00 : f32
      %97 = vector.broadcast %cst_35 : f32 to vector<16x128xf32>
      %98 = arith.addf %97, %96 : vector<16x128xf32>
      %99 = arith.divf %97, %98 : vector<16x128xf32>
      %100 = vector.extract_strided_slice %87 {offsets = [0, 256], sizes = [16, 128], strides = [1, 1]} : vector<16x512xf32> to vector<16x128xf32>
      %101 = math.tanh %100 : vector<16x128xf32>
      %102 = vector.extract_strided_slice %87 {offsets = [0, 384], sizes = [16, 128], strides = [1, 1]} : vector<16x512xf32> to vector<16x128xf32>
      %103 = arith.negf %102 : vector<16x128xf32>
      %104 = math.exp %103 : vector<16x128xf32>
      %cst_36 = arith.constant 1.000000e+00 : f32
      %105 = vector.broadcast %cst_36 : f32 to vector<16x128xf32>
      %106 = arith.addf %105, %104 : vector<16x128xf32>
      %107 = arith.divf %105, %106 : vector<16x128xf32>
      %108 = arith.mulf %99, %75 : vector<16x128xf32>
      %109 = arith.mulf %93, %101 : vector<16x128xf32>
      %110 = arith.addf %108, %109 : vector<16x128xf32>
      %111 = math.tanh %110 : vector<16x128xf32>
      %112 = arith.mulf %107, %111 : vector<16x128xf32>
      %113 = arith.truncf %112 : vector<16x128xf32> to vector<16x128xbf16>
      %c0_37 = arith.constant 0 : index
      %c5_38 = arith.constant 5 : index
      %c0_39 = arith.constant 0 : index
      %c0_40 = arith.constant 0 : index
      %114 = vector.load %arg4[%c0_37, %c5_38, %c0_39, %c0_40] : memref<1x8x16x128xbf16, #tpu.memory_space<vmem>>, vector<1x1x16x128xbf16>
      %115 = vector.shape_cast %114 : vector<1x1x16x128xbf16> to vector<16x128xbf16>
      %116 = vector.shape_cast %113 : vector<16x128xbf16> to vector<1x1x16x128xbf16>
      tpu.vector_store %arg4[%c0_37, %c5_38, %c0_39, %c0_40], %116 {strides = array<i32>} : memref<1x8x16x128xbf16, #tpu.memory_space<vmem>>, vector<1x1x16x128xbf16>,
      %c0_41 = arith.constant 0 : index
      %c4 = arith.constant 4 : index
      %c0_42 = arith.constant 0 : index
      %c0_43 = arith.constant 0 : index
      %117 = vector.load %arg2[%c0_41, %c4, %c0_42, %c0_43] : memref<1x8x16x512xbf16, #tpu.memory_space<vmem>>, vector<1x1x16x512xbf16>
      %118 = vector.shape_cast %117 : vector<1x1x16x512xbf16> to vector<16x512xbf16>
      %119 = arith.extf %118 : vector<16x512xbf16> to vector<16x512xf32>
      %120 = arith.truncf %112 : vector<16x128xf32> to vector<16x128xbf16>
      %cst_44 = arith.constant dense<0.000000e+00> : vector<16x512xf32>
      %121 = tpu.matmul %120, %3, %cst_44 {dimension_numbers = #tpu.dot_dimension_numbers<[1], [0], [0], [1], [0, 0, 1, 1], [], []>} : vector<16x128xbf16>, vector<128x512xbf16>, vector<16x512xf32> -> vector<16x512xf32>
      %122 = arith.addf %119, %121 : vector<16x512xf32>
      %123 = vector.extract_strided_slice %122 {offsets = [0, 0], sizes = [16, 128], strides = [1, 1]} : vector<16x512xf32> to vector<16x128xf32>
      %124 = arith.negf %123 : vector<16x128xf32>
      %125 = math.exp %124 : vector<16x128xf32>
      %cst_45 = arith.constant 1.000000e+00 : f32
      %126 = vector.broadcast %cst_45 : f32 to vector<16x128xf32>
      %127 = arith.addf %126, %125 : vector<16x128xf32>
      %128 = arith.divf %126, %127 : vector<16x128xf32>
      %129 = vector.extract_strided_slice %122 {offsets = [0, 128], sizes = [16, 128], strides = [1, 1]} : vector<16x512xf32> to vector<16x128xf32>
      %130 = arith.negf %129 : vector<16x128xf32>
      %131 = math.exp %130 : vector<16x128xf32>
      %cst_46 = arith.constant 1.000000e+00 : f32
      %132 = vector.broadcast %cst_46 : f32 to vector<16x128xf32>
      %133 = arith.addf %132, %131 : vector<16x128xf32>
      %134 = arith.divf %132, %133 : vector<16x128xf32>
      %135 = vector.extract_strided_slice %122 {offsets = [0, 256], sizes = [16, 128], strides = [1, 1]} : vector<16x512xf32> to vector<16x128xf32>
      %136 = math.tanh %135 : vector<16x128xf32>
      %137 = vector.extract_strided_slice %122 {offsets = [0, 384], sizes = [16, 128], strides = [1, 1]} : vector<16x512xf32> to vector<16x128xf32>
      %138 = arith.negf %137 : vector<16x128xf32>
      %139 = math.exp %138 : vector<16x128xf32>
      %cst_47 = arith.constant 1.000000e+00 : f32
      %140 = vector.broadcast %cst_47 : f32 to vector<16x128xf32>
      %141 = arith.addf %140, %139 : vector<16x128xf32>
      %142 = arith.divf %140, %141 : vector<16x128xf32>
      %143 = arith.mulf %134, %110 : vector<16x128xf32>
      %144 = arith.mulf %128, %136 : vector<16x128xf32>
      %145 = arith.addf %143, %144 : vector<16x128xf32>
      %146 = math.tanh %145 : vector<16x128xf32>
      %147 = arith.mulf %142, %146 : vector<16x128xf32>
      %148 = arith.truncf %147 : vector<16x128xf32> to vector<16x128xbf16>
      %c0_48 = arith.constant 0 : index
      %c4_49 = arith.constant 4 : index
      %c0_50 = arith.constant 0 : index
      %c0_51 = arith.constant 0 : index
      %149 = vector.load %arg4[%c0_48, %c4_49, %c0_50, %c0_51] : memref<1x8x16x128xbf16, #tpu.memory_space<vmem>>, vector<1x1x16x128xbf16>
      %150 = vector.shape_cast %149 : vector<1x1x16x128xbf16> to vector<16x128xbf16>
      %151 = vector.shape_cast %148 : vector<16x128xbf16> to vector<1x1x16x128xbf16>
      tpu.vector_store %arg4[%c0_48, %c4_49, %c0_50, %c0_51], %151 {strides = array<i32>} : memref<1x8x16x128xbf16, #tpu.memory_space<vmem>>, vector<1x1x16x128xbf16>,
      %c0_52 = arith.constant 0 : index
      %c3 = arith.constant 3 : index
      %c0_53 = arith.constant 0 : index
      %c0_54 = arith.constant 0 : index
      %152 = vector.load %arg2[%c0_52, %c3, %c0_53, %c0_54] : memref<1x8x16x512xbf16, #tpu.memory_space<vmem>>, vector<1x1x16x512xbf16>
      %153 = vector.shape_cast %152 : vector<1x1x16x512xbf16> to vector<16x512xbf16>
      %154 = arith.extf %153 : vector<16x512xbf16> to vector<16x512xf32>
      %155 = arith.truncf %147 : vector<16x128xf32> to vector<16x128xbf16>
      %cst_55 = arith.constant dense<0.000000e+00> : vector<16x512xf32>
      %156 = tpu.matmul %155, %3, %cst_55 {dimension_numbers = #tpu.dot_dimension_numbers<[1], [0], [0], [1], [0, 0, 1, 1], [], []>} : vector<16x128xbf16>, vector<128x512xbf16>, vector<16x512xf32> -> vector<16x512xf32>
      %157 = arith.addf %154, %156 : vector<16x512xf32>
      %158 = vector.extract_strided_slice %157 {offsets = [0, 0], sizes = [16, 128], strides = [1, 1]} : vector<16x512xf32> to vector<16x128xf32>
      %159 = arith.negf %158 : vector<16x128xf32>
      %160 = math.exp %159 : vector<16x128xf32>
      %cst_56 = arith.constant 1.000000e+00 : f32
      %161 = vector.broadcast %cst_56 : f32 to vector<16x128xf32>
      %162 = arith.addf %161, %160 : vector<16x128xf32>
      %163 = arith.divf %161, %162 : vector<16x128xf32>
      %164 = vector.extract_strided_slice %157 {offsets = [0, 128], sizes = [16, 128], strides = [1, 1]} : vector<16x512xf32> to vector<16x128xf32>
      %165 = arith.negf %164 : vector<16x128xf32>
      %166 = math.exp %165 : vector<16x128xf32>
      %cst_57 = arith.constant 1.000000e+00 : f32
      %167 = vector.broadcast %cst_57 : f32 to vector<16x128xf32>
      %168 = arith.addf %167, %166 : vector<16x128xf32>
      %169 = arith.divf %167, %168 : vector<16x128xf32>
      %170 = vector.extract_strided_slice %157 {offsets = [0, 256], sizes = [16, 128], strides = [1, 1]} : vector<16x512xf32> to vector<16x128xf32>
      %171 = math.tanh %170 : vector<16x128xf32>
      %172 = vector.extract_strided_slice %157 {offsets = [0, 384], sizes = [16, 128], strides = [1, 1]} : vector<16x512xf32> to vector<16x128xf32>
      %173 = arith.negf %172 : vector<16x128xf32>
      %174 = math.exp %173 : vector<16x128xf32>
      %cst_58 = arith.constant 1.000000e+00 : f32
      %175 = vector.broadcast %cst_58 : f32 to vector<16x128xf32>
      %176 = arith.addf %175, %174 : vector<16x128xf32>
      %177 = arith.divf %175, %176 : vector<16x128xf32>
      %178 = arith.mulf %169, %145 : vector<16x128xf32>
      %179 = arith.mulf %163, %171 : vector<16x128xf32>
      %180 = arith.addf %178, %179 : vector<16x128xf32>
      %181 = math.tanh %180 : vector<16x128xf32>
      %182 = arith.mulf %177, %181 : vector<16x128xf32>
      %183 = arith.truncf %182 : vector<16x128xf32> to vector<16x128xbf16>
      %c0_59 = arith.constant 0 : index
      %c3_60 = arith.constant 3 : index
      %c0_61 = arith.constant 0 : index
      %c0_62 = arith.constant 0 : index
      %184 = vector.load %arg4[%c0_59, %c3_60, %c0_61, %c0_62] : memref<1x8x16x128xbf16, #tpu.memory_space<vmem>>, vector<1x1x16x128xbf16>
      %185 = vector.shape_cast %184 : vector<1x1x16x128xbf16> to vector<16x128xbf16>
      %186 = vector.shape_cast %183 : vector<16x128xbf16> to vector<1x1x16x128xbf16>
      tpu.vector_store %arg4[%c0_59, %c3_60, %c0_61, %c0_62], %186 {strides = array<i32>} : memref<1x8x16x128xbf16, #tpu.memory_space<vmem>>, vector<1x1x16x128xbf16>,
      %c0_63 = arith.constant 0 : index
      %c2 = arith.constant 2 : index
      %c0_64 = arith.constant 0 : index
      %c0_65 = arith.constant 0 : index
      %187 = vector.load %arg2[%c0_63, %c2, %c0_64, %c0_65] : memref<1x8x16x512xbf16, #tpu.memory_space<vmem>>, vector<1x1x16x512xbf16>
      %188 = vector.shape_cast %187 : vector<1x1x16x512xbf16> to vector<16x512xbf16>
      %189 = arith.extf %188 : vector<16x512xbf16> to vector<16x512xf32>
      %190 = arith.truncf %182 : vector<16x128xf32> to vector<16x128xbf16>
      %cst_66 = arith.constant dense<0.000000e+00> : vector<16x512xf32>
      %191 = tpu.matmul %190, %3, %cst_66 {dimension_numbers = #tpu.dot_dimension_numbers<[1], [0], [0], [1], [0, 0, 1, 1], [], []>} : vector<16x128xbf16>, vector<128x512xbf16>, vector<16x512xf32> -> vector<16x512xf32>
      %192 = arith.addf %189, %191 : vector<16x512xf32>
      %193 = vector.extract_strided_slice %192 {offsets = [0, 0], sizes = [16, 128], strides = [1, 1]} : vector<16x512xf32> to vector<16x128xf32>
      %194 = arith.negf %193 : vector<16x128xf32>
      %195 = math.exp %194 : vector<16x128xf32>
      %cst_67 = arith.constant 1.000000e+00 : f32
      %196 = vector.broadcast %cst_67 : f32 to vector<16x128xf32>
      %197 = arith.addf %196, %195 : vector<16x128xf32>
      %198 = arith.divf %196, %197 : vector<16x128xf32>
      %199 = vector.extract_strided_slice %192 {offsets = [0, 128], sizes = [16, 128], strides = [1, 1]} : vector<16x512xf32> to vector<16x128xf32>
      %200 = arith.negf %199 : vector<16x128xf32>
      %201 = math.exp %200 : vector<16x128xf32>
      %cst_68 = arith.constant 1.000000e+00 : f32
      %202 = vector.broadcast %cst_68 : f32 to vector<16x128xf32>
      %203 = arith.addf %202, %201 : vector<16x128xf32>
      %204 = arith.divf %202, %203 : vector<16x128xf32>
      %205 = vector.extract_strided_slice %192 {offsets = [0, 256], sizes = [16, 128], strides = [1, 1]} : vector<16x512xf32> to vector<16x128xf32>
      %206 = math.tanh %205 : vector<16x128xf32>
      %207 = vector.extract_strided_slice %192 {offsets = [0, 384], sizes = [16, 128], strides = [1, 1]} : vector<16x512xf32> to vector<16x128xf32>
      %208 = arith.negf %207 : vector<16x128xf32>
      %209 = math.exp %208 : vector<16x128xf32>
      %cst_69 = arith.constant 1.000000e+00 : f32
      %210 = vector.broadcast %cst_69 : f32 to vector<16x128xf32>
      %211 = arith.addf %210, %209 : vector<16x128xf32>
      %212 = arith.divf %210, %211 : vector<16x128xf32>
      %213 = arith.mulf %204, %180 : vector<16x128xf32>
      %214 = arith.mulf %198, %206 : vector<16x128xf32>
      %215 = arith.addf %213, %214 : vector<16x128xf32>
      %216 = math.tanh %215 : vector<16x128xf32>
      %217 = arith.mulf %212, %216 : vector<16x128xf32>
      %218 = arith.truncf %217 : vector<16x128xf32> to vector<16x128xbf16>
      %c0_70 = arith.constant 0 : index
      %c2_71 = arith.constant 2 : index
      %c0_72 = arith.constant 0 : index
      %c0_73 = arith.constant 0 : index
      %219 = vector.load %arg4[%c0_70, %c2_71, %c0_72, %c0_73] : memref<1x8x16x128xbf16, #tpu.memory_space<vmem>>, vector<1x1x16x128xbf16>
      %220 = vector.shape_cast %219 : vector<1x1x16x128xbf16> to vector<16x128xbf16>
      %221 = vector.shape_cast %218 : vector<16x128xbf16> to vector<1x1x16x128xbf16>
      tpu.vector_store %arg4[%c0_70, %c2_71, %c0_72, %c0_73], %221 {strides = array<i32>} : memref<1x8x16x128xbf16, #tpu.memory_space<vmem>>, vector<1x1x16x128xbf16>,
      %c0_74 = arith.constant 0 : index
      %c1 = arith.constant 1 : index
      %c0_75 = arith.constant 0 : index
      %c0_76 = arith.constant 0 : index
      %222 = vector.load %arg2[%c0_74, %c1, %c0_75, %c0_76] : memref<1x8x16x512xbf16, #tpu.memory_space<vmem>>, vector<1x1x16x512xbf16>
      %223 = vector.shape_cast %222 : vector<1x1x16x512xbf16> to vector<16x512xbf16>
      %224 = arith.extf %223 : vector<16x512xbf16> to vector<16x512xf32>
      %225 = arith.truncf %217 : vector<16x128xf32> to vector<16x128xbf16>
      %cst_77 = arith.constant dense<0.000000e+00> : vector<16x512xf32>
      %226 = tpu.matmul %225, %3, %cst_77 {dimension_numbers = #tpu.dot_dimension_numbers<[1], [0], [0], [1], [0, 0, 1, 1], [], []>} : vector<16x128xbf16>, vector<128x512xbf16>, vector<16x512xf32> -> vector<16x512xf32>
      %227 = arith.addf %224, %226 : vector<16x512xf32>
      %228 = vector.extract_strided_slice %227 {offsets = [0, 0], sizes = [16, 128], strides = [1, 1]} : vector<16x512xf32> to vector<16x128xf32>
      %229 = arith.negf %228 : vector<16x128xf32>
      %230 = math.exp %229 : vector<16x128xf32>
      %cst_78 = arith.constant 1.000000e+00 : f32
      %231 = vector.broadcast %cst_78 : f32 to vector<16x128xf32>
      %232 = arith.addf %231, %230 : vector<16x128xf32>
      %233 = arith.divf %231, %232 : vector<16x128xf32>
      %234 = vector.extract_strided_slice %227 {offsets = [0, 128], sizes = [16, 128], strides = [1, 1]} : vector<16x512xf32> to vector<16x128xf32>
      %235 = arith.negf %234 : vector<16x128xf32>
      %236 = math.exp %235 : vector<16x128xf32>
      %cst_79 = arith.constant 1.000000e+00 : f32
      %237 = vector.broadcast %cst_79 : f32 to vector<16x128xf32>
      %238 = arith.addf %237, %236 : vector<16x128xf32>
      %239 = arith.divf %237, %238 : vector<16x128xf32>
      %240 = vector.extract_strided_slice %227 {offsets = [0, 256], sizes = [16, 128], strides = [1, 1]} : vector<16x512xf32> to vector<16x128xf32>
      %241 = math.tanh %240 : vector<16x128xf32>
      %242 = vector.extract_strided_slice %227 {offsets = [0, 384], sizes = [16, 128], strides = [1, 1]} : vector<16x512xf32> to vector<16x128xf32>
      %243 = arith.negf %242 : vector<16x128xf32>
      %244 = math.exp %243 : vector<16x128xf32>
      %cst_80 = arith.constant 1.000000e+00 : f32
      %245 = vector.broadcast %cst_80 : f32 to vector<16x128xf32>
      %246 = arith.addf %245, %244 : vector<16x128xf32>
      %247 = arith.divf %245, %246 : vector<16x128xf32>
      %248 = arith.mulf %239, %215 : vector<16x128xf32>
      %249 = arith.mulf %233, %241 : vector<16x128xf32>
      %250 = arith.addf %248, %249 : vector<16x128xf32>
      %251 = math.tanh %250 : vector<16x128xf32>
      %252 = arith.mulf %247, %251 : vector<16x128xf32>
      %253 = arith.truncf %252 : vector<16x128xf32> to vector<16x128xbf16>
      %c0_81 = arith.constant 0 : index
      %c1_82 = arith.constant 1 : index
      %c0_83 = arith.constant 0 : index
      %c0_84 = arith.constant 0 : index
      %254 = vector.load %arg4[%c0_81, %c1_82, %c0_83, %c0_84] : memref<1x8x16x128xbf16, #tpu.memory_space<vmem>>, vector<1x1x16x128xbf16>
      %255 = vector.shape_cast %254 : vector<1x1x16x128xbf16> to vector<16x128xbf16>
      %256 = vector.shape_cast %253 : vector<16x128xbf16> to vector<1x1x16x128xbf16>
      tpu.vector_store %arg4[%c0_81, %c1_82, %c0_83, %c0_84], %256 {strides = array<i32>} : memref<1x8x16x128xbf16, #tpu.memory_space<vmem>>, vector<1x1x16x128xbf16>,
      %c0_85 = arith.constant 0 : index
      %c0_86 = arith.constant 0 : index
      %c0_87 = arith.constant 0 : index
      %c0_88 = arith.constant 0 : index
      %257 = vector.load %arg2[%c0_85, %c0_86, %c0_87, %c0_88] : memref<1x8x16x512xbf16, #tpu.memory_space<vmem>>, vector<1x1x16x512xbf16>
      %258 = vector.shape_cast %257 : vector<1x1x16x512xbf16> to vector<16x512xbf16>
      %259 = arith.extf %258 : vector<16x512xbf16> to vector<16x512xf32>
      %260 = arith.truncf %252 : vector<16x128xf32> to vector<16x128xbf16>
      %cst_89 = arith.constant dense<0.000000e+00> : vector<16x512xf32>
      %261 = tpu.matmul %260, %3, %cst_89 {dimension_numbers = #tpu.dot_dimension_numbers<[1], [0], [0], [1], [0, 0, 1, 1], [], []>} : vector<16x128xbf16>, vector<128x512xbf16>, vector<16x512xf32> -> vector<16x512xf32>
      %262 = arith.addf %259, %261 : vector<16x512xf32>
      %263 = vector.extract_strided_slice %262 {offsets = [0, 0], sizes = [16, 128], strides = [1, 1]} : vector<16x512xf32> to vector<16x128xf32>
      %264 = arith.negf %263 : vector<16x128xf32>
      %265 = math.exp %264 : vector<16x128xf32>
      %cst_90 = arith.constant 1.000000e+00 : f32
      %266 = vector.broadcast %cst_90 : f32 to vector<16x128xf32>
      %267 = arith.addf %266, %265 : vector<16x128xf32>
      %268 = arith.divf %266, %267 : vector<16x128xf32>
      %269 = vector.extract_strided_slice %262 {offsets = [0, 128], sizes = [16, 128], strides = [1, 1]} : vector<16x512xf32> to vector<16x128xf32>
      %270 = arith.negf %269 : vector<16x128xf32>
      %271 = math.exp %270 : vector<16x128xf32>
      %cst_91 = arith.constant 1.000000e+00 : f32
      %272 = vector.broadcast %cst_91 : f32 to vector<16x128xf32>
      %273 = arith.addf %272, %271 : vector<16x128xf32>
      %274 = arith.divf %272, %273 : vector<16x128xf32>
      %275 = vector.extract_strided_slice %262 {offsets = [0, 256], sizes = [16, 128], strides = [1, 1]} : vector<16x512xf32> to vector<16x128xf32>
      %276 = math.tanh %275 : vector<16x128xf32>
      %277 = vector.extract_strided_slice %262 {offsets = [0, 384], sizes = [16, 128], strides = [1, 1]} : vector<16x512xf32> to vector<16x128xf32>
      %278 = arith.negf %277 : vector<16x128xf32>
      %279 = math.exp %278 : vector<16x128xf32>
      %cst_92 = arith.constant 1.000000e+00 : f32
      %280 = vector.broadcast %cst_92 : f32 to vector<16x128xf32>
      %281 = arith.addf %280, %279 : vector<16x128xf32>
      %282 = arith.divf %280, %281 : vector<16x128xf32>
      %283 = arith.mulf %274, %250 : vector<16x128xf32>
      %284 = arith.mulf %268, %276 : vector<16x128xf32>
      %285 = arith.addf %283, %284 : vector<16x128xf32>
      %286 = math.tanh %285 : vector<16x128xf32>
      %287 = arith.mulf %282, %286 : vector<16x128xf32>
      %288 = arith.truncf %287 : vector<16x128xf32> to vector<16x128xbf16>
      %c0_93 = arith.constant 0 : index
      %c0_94 = arith.constant 0 : index
      %c0_95 = arith.constant 0 : index
      %c0_96 = arith.constant 0 : index
      %289 = vector.load %arg4[%c0_93, %c0_94, %c0_95, %c0_96] : memref<1x8x16x128xbf16, #tpu.memory_space<vmem>>, vector<1x1x16x128xbf16>
      %290 = vector.shape_cast %289 : vector<1x1x16x128xbf16> to vector<16x128xbf16>
      %291 = vector.shape_cast %288 : vector<16x128xbf16> to vector<1x1x16x128xbf16>
      tpu.vector_store %arg4[%c0_93, %c0_94, %c0_95, %c0_96], %291 {strides = array<i32>} : memref<1x8x16x128xbf16, #tpu.memory_space<vmem>>, vector<1x1x16x128xbf16>,
      %c0_97 = arith.constant 0 : index
      %c0_98 = arith.constant 0 : index
      %292 = vector.load %arg6[%c0_97, %c0_98] : memref<16x128xf32, #tpu.memory_space<vmem>>, vector<16x128xf32>
      tpu.vector_store %arg6[%c0_97, %c0_98], %287 {strides = array<i32>} : memref<16x128xf32, #tpu.memory_space<vmem>>, vector<16x128xf32>,
      %c0_99 = arith.constant 0 : index
      %c0_100 = arith.constant 0 : index
      %293 = vector.load %arg7[%c0_99, %c0_100] : memref<16x128xf32, #tpu.memory_space<vmem>>, vector<16x128xf32>
      tpu.vector_store %arg7[%c0_99, %c0_100], %285 {strides = array<i32>} : memref<16x128xf32, #tpu.memory_space<vmem>>, vector<16x128xf32>,
    } else {
    }
    return
  }
  func.func @transform_0(%arg0: i32, %arg1: i32) -> (i32, i32, i32, i32) {
    %c2_i32 = arith.constant 2 : i32
    %0 = arith.muli %c2_i32, %arg1 : i32
    %c0_i32 = arith.constant 0 : i32
    %1 = arith.subi %c0_i32, %0 : i32
    %2 = arith.muli %arg0, %1 : i32
    %3 = arith.addi %arg1, %2 : i32
    %c0_i32_0 = arith.constant 0 : i32
    %c0_i32_1 = arith.constant 0 : i32
    %c0_i32_2 = arith.constant 0 : i32
    return %arg0, %3, %c0_i32_0, %c0_i32_1 : i32, i32, i32, i32
  }
  func.func @transform_2(%arg0: i32, %arg1: i32) -> (i32, i32, i32, i32) {
    %c2_i32 = arith.constant 2 : i32
    %0 = arith.muli %c2_i32, %arg1 : i32
    %c0_i32 = arith.constant 0 : i32
    %1 = arith.subi %c0_i32, %0 : i32
    %2 = arith.muli %arg0, %1 : i32
    %3 = arith.addi %arg1, %2 : i32
    %c0_i32_0 = arith.constant 0 : i32
    %c0_i32_1 = arith.constant 0 : i32
    %c0_i32_2 = arith.constant 0 : i32
    return %arg0, %3, %c0_i32_0, %c0_i32_1 : i32, i32, i32, i32
  }
}

module attributes {stable_mosaic.version = 11 : i64} {
  func.func @_lstm_chunk_kernel(%arg0: i32, %arg1: i32, %arg2: memref<1x8x16x512xbf16, #tpu.memory_space<vmem>>, %arg3: memref<2x128x512xbf16, #tpu.memory_space<any>>, %arg4: memref<1x8x16x128xbf16, #tpu.memory_space<vmem>>, %arg5: memref<128x512xbf16, #tpu.memory_space<vmem>>, %arg6: memref<16x128xf32, #tpu.memory_space<vmem>>, %arg7: memref<16x128xf32, #tpu.memory_space<vmem>>, %arg8: memref<!tpu.dma_semaphore, #tpu.memory_space<semaphore_mem>>) attributes {dimension_semantics = [#tpu.dimension_semantics<parallel>, #tpu.dimension_semantics<arbitrary>], iteration_bounds = array<i64: 2, 1>, scalar_prefetch = 0 : i64, scratch_operands = 4 : i64, tpu.core_type = #tpu.core_type<tc>, window_params = [{transform_indices = @transform_0, window_bounds = array<i64: 1, 8, 16, 512>}, {}, {transform_indices = @transform_2, window_bounds = array<i64: 1, 8, 16, 128>}]} {
    %c0_i32 = arith.constant 0 : i32
    %0 = arith.cmpi eq, %arg1, %c0_i32 : i32
    %1 = arith.extui %0 : i1 to i32
    %c0_i32_0 = arith.constant 0 : i32
    %2 = arith.cmpi ne, %1, %c0_i32_0 : i32
    scf.if %2 {
      %c0_i32_5 = arith.constant 0 : i32
      %c0_i32_6 = arith.constant 0 : i32
      %10 = tpu.memref_slice %arg3[%arg0, %c0_i32_5, %c0_i32_6] : memref<2x128x512xbf16, #tpu.memory_space<any>> -> memref<1x128x512xbf16, #tpu.memory_space<any>>
      %11 = tpu.memref_squeeze %10 : memref<1x128x512xbf16, #tpu.memory_space<any>> -> memref<128x512xbf16, #tpu.memory_space<any>>
      tpu.enqueue_dma source(%11 : memref<128x512xbf16, #tpu.memory_space<any>>) target(%arg5 : memref<128x512xbf16, #tpu.memory_space<vmem>>) target_semaphore(%arg8 : memref<!tpu.dma_semaphore, #tpu.memory_space<semaphore_mem>>)
      %c0_i32_7 = arith.constant 0 : i32
      %c0_i32_8 = arith.constant 0 : i32
      %12 = tpu.memref_slice %arg3[%arg0, %c0_i32_7, %c0_i32_8] : memref<2x128x512xbf16, #tpu.memory_space<any>> -> memref<1x128x512xbf16, #tpu.memory_space<any>>
      %13 = tpu.memref_squeeze %12 : memref<1x128x512xbf16, #tpu.memory_space<any>> -> memref<128x512xbf16, #tpu.memory_space<any>>
      tpu.wait_dma2 semaphore(%arg8 : memref<!tpu.dma_semaphore, #tpu.memory_space<semaphore_mem>>) src(%13 : memref<128x512xbf16, #tpu.memory_space<any>>) dst(%arg5 : memref<128x512xbf16, #tpu.memory_space<vmem>>)
      %cst = arith.constant 0.000000e+00 : f32
      %14 = vector.broadcast %cst : f32 to vector<16x128xf32>
      %c0_9 = arith.constant 0 : index
      %c0_10 = arith.constant 0 : index
      %15 = vector.load %arg6[%c0_9, %c0_10] : memref<16x128xf32, #tpu.memory_space<vmem>>, vector<16x128xf32>
      tpu.vector_store %arg6[%c0_9, %c0_10], %14 {strides = array<i32>} : memref<16x128xf32, #tpu.memory_space<vmem>>, vector<16x128xf32>,
      %cst_11 = arith.constant 0.000000e+00 : f32
      %16 = vector.broadcast %cst_11 : f32 to vector<16x128xf32>
      %c0_12 = arith.constant 0 : index
      %c0_13 = arith.constant 0 : index
      %17 = vector.load %arg7[%c0_12, %c0_13] : memref<16x128xf32, #tpu.memory_space<vmem>>, vector<16x128xf32>
      tpu.vector_store %arg7[%c0_12, %c0_13], %16 {strides = array<i32>} : memref<16x128xf32, #tpu.memory_space<vmem>>, vector<16x128xf32>,
    } else {
    }
    %c0 = arith.constant 0 : index
    %c0_1 = arith.constant 0 : index
    %3 = vector.load %arg5[%c0, %c0_1] : memref<128x512xbf16, #tpu.memory_space<vmem>>, vector<128x512xbf16>
    %c0_i32_2 = arith.constant 0 : i32
    %4 = arith.cmpi eq, %arg0, %c0_i32_2 : i32
    %5 = arith.extui %4 : i1 to i32
    %c0_i32_3 = arith.constant 0 : i32
    %6 = arith.cmpi ne, %5, %c0_i32_3 : i32
    scf.if %6 {
      %c0_5 = arith.constant 0 : index
      %c0_6 = arith.constant 0 : index
      %10 = vector.load %arg6[%c0_5, %c0_6] : memref<16x128xf32, #tpu.memory_space<vmem>>, vector<16x128xf32>
      %c0_7 = arith.constant 0 : index
      %c0_8 = arith.constant 0 : index
      %11 = vector.load %arg7[%c0_7, %c0_8] : memref<16x128xf32, #tpu.memory_space<vmem>>, vector<16x128xf32>
      %c0_9 = arith.constant 0 : index
      %c0_10 = arith.constant 0 : index
      %c0_11 = arith.constant 0 : index
      %c0_12 = arith.constant 0 : index
      %12 = vector.load %arg2[%c0_9, %c0_10, %c0_11, %c0_12] : memref<1x8x16x512xbf16, #tpu.memory_space<vmem>>, vector<1x1x16x512xbf16>
      %13 = vector.shape_cast %12 : vector<1x1x16x512xbf16> to vector<16x512xbf16>
      %14 = arith.extf %13 : vector<16x512xbf16> to vector<16x512xf32>
      %15 = arith.truncf %10 : vector<16x128xf32> to vector<16x128xbf16>
      %cst = arith.constant dense<0.000000e+00> : vector<16x512xf32>
      %16 = tpu.matmul %15, %3, %cst {dimension_numbers = #tpu.dot_dimension_numbers<[1], [0], [0], [1], [0, 0, 1, 1], [], []>} : vector<16x128xbf16>, vector<128x512xbf16>, vector<16x512xf32> -> vector<16x512xf32>
      %17 = arith.addf %14, %16 : vector<16x512xf32>
      %18 = vector.extract_strided_slice %17 {offsets = [0, 0], sizes = [16, 128], strides = [1, 1]} : vector<16x512xf32> to vector<16x128xf32>
      %19 = arith.negf %18 : vector<16x128xf32>
      %20 = math.exp %19 : vector<16x128xf32>
      %cst_13 = arith.constant 1.000000e+00 : f32
      %21 = vector.broadcast %cst_13 : f32 to vector<16x128xf32>
      %22 = arith.addf %21, %20 : vector<16x128xf32>
      %23 = arith.divf %21, %22 : vector<16x128xf32>
      %24 = vector.extract_strided_slice %17 {offsets = [0, 128], sizes = [16, 128], strides = [1, 1]} : vector<16x512xf32> to vector<16x128xf32>
      %25 = arith.negf %24 : vector<16x128xf32>
      %26 = math.exp %25 : vector<16x128xf32>
      %cst_14 = arith.constant 1.000000e+00 : f32
      %27 = vector.broadcast %cst_14 : f32 to vector<16x128xf32>
      %28 = arith.addf %27, %26 : vector<16x128xf32>
      %29 = arith.divf %27, %28 : vector<16x128xf32>
      %30 = vector.extract_strided_slice %17 {offsets = [0, 256], sizes = [16, 128], strides = [1, 1]} : vector<16x512xf32> to vector<16x128xf32>
      %31 = math.tanh %30 : vector<16x128xf32>
      %32 = vector.extract_strided_slice %17 {offsets = [0, 384], sizes = [16, 128], strides = [1, 1]} : vector<16x512xf32> to vector<16x128xf32>
      %33 = arith.negf %32 : vector<16x128xf32>
      %34 = math.exp %33 : vector<16x128xf32>
      %cst_15 = arith.constant 1.000000e+00 : f32
      %35 = vector.broadcast %cst_15 : f32 to vector<16x128xf32>
      %36 = arith.addf %35, %34 : vector<16x128xf32>
      %37 = arith.divf %35, %36 : vector<16x128xf32>
      %38 = arith.mulf %29, %11 : vector<16x128xf32>
      %39 = arith.mulf %23, %31 : vector<16x128xf32>
      %40 = arith.addf %38, %39 : vector<16x128xf32>
      %41 = math.tanh %40 : vector<16x128xf32>
      %42 = arith.mulf %37, %41 : vector<16x128xf32>
      %43 = arith.truncf %42 : vector<16x128xf32> to vector<16x128xbf16>
      %c0_16 = arith.constant 0 : index
      %c0_17 = arith.constant 0 : index
      %c0_18 = arith.constant 0 : index
      %c0_19 = arith.constant 0 : index
      %44 = vector.load %arg4[%c0_16, %c0_17, %c0_18, %c0_19] : memref<1x8x16x128xbf16, #tpu.memory_space<vmem>>, vector<1x1x16x128xbf16>
      %45 = vector.shape_cast %44 : vector<1x1x16x128xbf16> to vector<16x128xbf16>
      %46 = vector.shape_cast %43 : vector<16x128xbf16> to vector<1x1x16x128xbf16>
      tpu.vector_store %arg4[%c0_16, %c0_17, %c0_18, %c0_19], %46 {strides = array<i32>} : memref<1x8x16x128xbf16, #tpu.memory_space<vmem>>, vector<1x1x16x128xbf16>,
      %c0_20 = arith.constant 0 : index
      %c1 = arith.constant 1 : index
      %c0_21 = arith.constant 0 : index
      %c0_22 = arith.constant 0 : index
      %47 = vector.load %arg2[%c0_20, %c1, %c0_21, %c0_22] : memref<1x8x16x512xbf16, #tpu.memory_space<vmem>>, vector<1x1x16x512xbf16>
      %48 = vector.shape_cast %47 : vector<1x1x16x512xbf16> to vector<16x512xbf16>
      %49 = arith.extf %48 : vector<16x512xbf16> to vector<16x512xf32>
      %50 = arith.truncf %42 : vector<16x128xf32> to vector<16x128xbf16>
      %cst_23 = arith.constant dense<0.000000e+00> : vector<16x512xf32>
      %51 = tpu.matmul %50, %3, %cst_23 {dimension_numbers = #tpu.dot_dimension_numbers<[1], [0], [0], [1], [0, 0, 1, 1], [], []>} : vector<16x128xbf16>, vector<128x512xbf16>, vector<16x512xf32> -> vector<16x512xf32>
      %52 = arith.addf %49, %51 : vector<16x512xf32>
      %53 = vector.extract_strided_slice %52 {offsets = [0, 0], sizes = [16, 128], strides = [1, 1]} : vector<16x512xf32> to vector<16x128xf32>
      %54 = arith.negf %53 : vector<16x128xf32>
      %55 = math.exp %54 : vector<16x128xf32>
      %cst_24 = arith.constant 1.000000e+00 : f32
      %56 = vector.broadcast %cst_24 : f32 to vector<16x128xf32>
      %57 = arith.addf %56, %55 : vector<16x128xf32>
      %58 = arith.divf %56, %57 : vector<16x128xf32>
      %59 = vector.extract_strided_slice %52 {offsets = [0, 128], sizes = [16, 128], strides = [1, 1]} : vector<16x512xf32> to vector<16x128xf32>
      %60 = arith.negf %59 : vector<16x128xf32>
      %61 = math.exp %60 : vector<16x128xf32>
      %cst_25 = arith.constant 1.000000e+00 : f32
      %62 = vector.broadcast %cst_25 : f32 to vector<16x128xf32>
      %63 = arith.addf %62, %61 : vector<16x128xf32>
      %64 = arith.divf %62, %63 : vector<16x128xf32>
      %65 = vector.extract_strided_slice %52 {offsets = [0, 256], sizes = [16, 128], strides = [1, 1]} : vector<16x512xf32> to vector<16x128xf32>
      %66 = math.tanh %65 : vector<16x128xf32>
      %67 = vector.extract_strided_slice %52 {offsets = [0, 384], sizes = [16, 128], strides = [1, 1]} : vector<16x512xf32> to vector<16x128xf32>
      %68 = arith.negf %67 : vector<16x128xf32>
      %69 = math.exp %68 : vector<16x128xf32>
      %cst_26 = arith.constant 1.000000e+00 : f32
      %70 = vector.broadcast %cst_26 : f32 to vector<16x128xf32>
      %71 = arith.addf %70, %69 : vector<16x128xf32>
      %72 = arith.divf %70, %71 : vector<16x128xf32>
      %73 = arith.mulf %64, %40 : vector<16x128xf32>
      %74 = arith.mulf %58, %66 : vector<16x128xf32>
      %75 = arith.addf %73, %74 : vector<16x128xf32>
      %76 = math.tanh %75 : vector<16x128xf32>
      %77 = arith.mulf %72, %76 : vector<16x128xf32>
      %78 = arith.truncf %77 : vector<16x128xf32> to vector<16x128xbf16>
      %c0_27 = arith.constant 0 : index
      %c1_28 = arith.constant 1 : index
      %c0_29 = arith.constant 0 : index
      %c0_30 = arith.constant 0 : index
      %79 = vector.load %arg4[%c0_27, %c1_28, %c0_29, %c0_30] : memref<1x8x16x128xbf16, #tpu.memory_space<vmem>>, vector<1x1x16x128xbf16>
      %80 = vector.shape_cast %79 : vector<1x1x16x128xbf16> to vector<16x128xbf16>
      %81 = vector.shape_cast %78 : vector<16x128xbf16> to vector<1x1x16x128xbf16>
      tpu.vector_store %arg4[%c0_27, %c1_28, %c0_29, %c0_30], %81 {strides = array<i32>} : memref<1x8x16x128xbf16, #tpu.memory_space<vmem>>, vector<1x1x16x128xbf16>,
      %c0_31 = arith.constant 0 : index
      %c2 = arith.constant 2 : index
      %c0_32 = arith.constant 0 : index
      %c0_33 = arith.constant 0 : index
      %82 = vector.load %arg2[%c0_31, %c2, %c0_32, %c0_33] : memref<1x8x16x512xbf16, #tpu.memory_space<vmem>>, vector<1x1x16x512xbf16>
      %83 = vector.shape_cast %82 : vector<1x1x16x512xbf16> to vector<16x512xbf16>
      %84 = arith.extf %83 : vector<16x512xbf16> to vector<16x512xf32>
      %85 = arith.truncf %77 : vector<16x128xf32> to vector<16x128xbf16>
      %cst_34 = arith.constant dense<0.000000e+00> : vector<16x512xf32>
      %86 = tpu.matmul %85, %3, %cst_34 {dimension_numbers = #tpu.dot_dimension_numbers<[1], [0], [0], [1], [0, 0, 1, 1], [], []>} : vector<16x128xbf16>, vector<128x512xbf16>, vector<16x512xf32> -> vector<16x512xf32>
      %87 = arith.addf %84, %86 : vector<16x512xf32>
      %88 = vector.extract_strided_slice %87 {offsets = [0, 0], sizes = [16, 128], strides = [1, 1]} : vector<16x512xf32> to vector<16x128xf32>
      %89 = arith.negf %88 : vector<16x128xf32>
      %90 = math.exp %89 : vector<16x128xf32>
      %cst_35 = arith.constant 1.000000e+00 : f32
      %91 = vector.broadcast %cst_35 : f32 to vector<16x128xf32>
      %92 = arith.addf %91, %90 : vector<16x128xf32>
      %93 = arith.divf %91, %92 : vector<16x128xf32>
      %94 = vector.extract_strided_slice %87 {offsets = [0, 128], sizes = [16, 128], strides = [1, 1]} : vector<16x512xf32> to vector<16x128xf32>
      %95 = arith.negf %94 : vector<16x128xf32>
      %96 = math.exp %95 : vector<16x128xf32>
      %cst_36 = arith.constant 1.000000e+00 : f32
      %97 = vector.broadcast %cst_36 : f32 to vector<16x128xf32>
      %98 = arith.addf %97, %96 : vector<16x128xf32>
      %99 = arith.divf %97, %98 : vector<16x128xf32>
      %100 = vector.extract_strided_slice %87 {offsets = [0, 256], sizes = [16, 128], strides = [1, 1]} : vector<16x512xf32> to vector<16x128xf32>
      %101 = math.tanh %100 : vector<16x128xf32>
      %102 = vector.extract_strided_slice %87 {offsets = [0, 384], sizes = [16, 128], strides = [1, 1]} : vector<16x512xf32> to vector<16x128xf32>
      %103 = arith.negf %102 : vector<16x128xf32>
      %104 = math.exp %103 : vector<16x128xf32>
      %cst_37 = arith.constant 1.000000e+00 : f32
      %105 = vector.broadcast %cst_37 : f32 to vector<16x128xf32>
      %106 = arith.addf %105, %104 : vector<16x128xf32>
      %107 = arith.divf %105, %106 : vector<16x128xf32>
      %108 = arith.mulf %99, %75 : vector<16x128xf32>
      %109 = arith.mulf %93, %101 : vector<16x128xf32>
      %110 = arith.addf %108, %109 : vector<16x128xf32>
      %111 = math.tanh %110 : vector<16x128xf32>
      %112 = arith.mulf %107, %111 : vector<16x128xf32>
      %113 = arith.truncf %112 : vector<16x128xf32> to vector<16x128xbf16>
      %c0_38 = arith.constant 0 : index
      %c2_39 = arith.constant 2 : index
      %c0_40 = arith.constant 0 : index
      %c0_41 = arith.constant 0 : index
      %114 = vector.load %arg4[%c0_38, %c2_39, %c0_40, %c0_41] : memref<1x8x16x128xbf16, #tpu.memory_space<vmem>>, vector<1x1x16x128xbf16>
      %115 = vector.shape_cast %114 : vector<1x1x16x128xbf16> to vector<16x128xbf16>
      %116 = vector.shape_cast %113 : vector<16x128xbf16> to vector<1x1x16x128xbf16>
      tpu.vector_store %arg4[%c0_38, %c2_39, %c0_40, %c0_41], %116 {strides = array<i32>} : memref<1x8x16x128xbf16, #tpu.memory_space<vmem>>, vector<1x1x16x128xbf16>,
      %c0_42 = arith.constant 0 : index
      %c3 = arith.constant 3 : index
      %c0_43 = arith.constant 0 : index
      %c0_44 = arith.constant 0 : index
      %117 = vector.load %arg2[%c0_42, %c3, %c0_43, %c0_44] : memref<1x8x16x512xbf16, #tpu.memory_space<vmem>>, vector<1x1x16x512xbf16>
      %118 = vector.shape_cast %117 : vector<1x1x16x512xbf16> to vector<16x512xbf16>
      %119 = arith.extf %118 : vector<16x512xbf16> to vector<16x512xf32>
      %120 = arith.truncf %112 : vector<16x128xf32> to vector<16x128xbf16>
      %cst_45 = arith.constant dense<0.000000e+00> : vector<16x512xf32>
      %121 = tpu.matmul %120, %3, %cst_45 {dimension_numbers = #tpu.dot_dimension_numbers<[1], [0], [0], [1], [0, 0, 1, 1], [], []>} : vector<16x128xbf16>, vector<128x512xbf16>, vector<16x512xf32> -> vector<16x512xf32>
      %122 = arith.addf %119, %121 : vector<16x512xf32>
      %123 = vector.extract_strided_slice %122 {offsets = [0, 0], sizes = [16, 128], strides = [1, 1]} : vector<16x512xf32> to vector<16x128xf32>
      %124 = arith.negf %123 : vector<16x128xf32>
      %125 = math.exp %124 : vector<16x128xf32>
      %cst_46 = arith.constant 1.000000e+00 : f32
      %126 = vector.broadcast %cst_46 : f32 to vector<16x128xf32>
      %127 = arith.addf %126, %125 : vector<16x128xf32>
      %128 = arith.divf %126, %127 : vector<16x128xf32>
      %129 = vector.extract_strided_slice %122 {offsets = [0, 128], sizes = [16, 128], strides = [1, 1]} : vector<16x512xf32> to vector<16x128xf32>
      %130 = arith.negf %129 : vector<16x128xf32>
      %131 = math.exp %130 : vector<16x128xf32>
      %cst_47 = arith.constant 1.000000e+00 : f32
      %132 = vector.broadcast %cst_47 : f32 to vector<16x128xf32>
      %133 = arith.addf %132, %131 : vector<16x128xf32>
      %134 = arith.divf %132, %133 : vector<16x128xf32>
      %135 = vector.extract_strided_slice %122 {offsets = [0, 256], sizes = [16, 128], strides = [1, 1]} : vector<16x512xf32> to vector<16x128xf32>
      %136 = math.tanh %135 : vector<16x128xf32>
      %137 = vector.extract_strided_slice %122 {offsets = [0, 384], sizes = [16, 128], strides = [1, 1]} : vector<16x512xf32> to vector<16x128xf32>
      %138 = arith.negf %137 : vector<16x128xf32>
      %139 = math.exp %138 : vector<16x128xf32>
      %cst_48 = arith.constant 1.000000e+00 : f32
      %140 = vector.broadcast %cst_48 : f32 to vector<16x128xf32>
      %141 = arith.addf %140, %139 : vector<16x128xf32>
      %142 = arith.divf %140, %141 : vector<16x128xf32>
      %143 = arith.mulf %134, %110 : vector<16x128xf32>
      %144 = arith.mulf %128, %136 : vector<16x128xf32>
      %145 = arith.addf %143, %144 : vector<16x128xf32>
      %146 = math.tanh %145 : vector<16x128xf32>
      %147 = arith.mulf %142, %146 : vector<16x128xf32>
      %148 = arith.truncf %147 : vector<16x128xf32> to vector<16x128xbf16>
      %c0_49 = arith.constant 0 : index
      %c3_50 = arith.constant 3 : index
      %c0_51 = arith.constant 0 : index
      %c0_52 = arith.constant 0 : index
      %149 = vector.load %arg4[%c0_49, %c3_50, %c0_51, %c0_52] : memref<1x8x16x128xbf16, #tpu.memory_space<vmem>>, vector<1x1x16x128xbf16>
      %150 = vector.shape_cast %149 : vector<1x1x16x128xbf16> to vector<16x128xbf16>
      %151 = vector.shape_cast %148 : vector<16x128xbf16> to vector<1x1x16x128xbf16>
      tpu.vector_store %arg4[%c0_49, %c3_50, %c0_51, %c0_52], %151 {strides = array<i32>} : memref<1x8x16x128xbf16, #tpu.memory_space<vmem>>, vector<1x1x16x128xbf16>,
      %c0_53 = arith.constant 0 : index
      %c4 = arith.constant 4 : index
      %c0_54 = arith.constant 0 : index
      %c0_55 = arith.constant 0 : index
      %152 = vector.load %arg2[%c0_53, %c4, %c0_54, %c0_55] : memref<1x8x16x512xbf16, #tpu.memory_space<vmem>>, vector<1x1x16x512xbf16>
      %153 = vector.shape_cast %152 : vector<1x1x16x512xbf16> to vector<16x512xbf16>
      %154 = arith.extf %153 : vector<16x512xbf16> to vector<16x512xf32>
      %155 = arith.truncf %147 : vector<16x128xf32> to vector<16x128xbf16>
      %cst_56 = arith.constant dense<0.000000e+00> : vector<16x512xf32>
      %156 = tpu.matmul %155, %3, %cst_56 {dimension_numbers = #tpu.dot_dimension_numbers<[1], [0], [0], [1], [0, 0, 1, 1], [], []>} : vector<16x128xbf16>, vector<128x512xbf16>, vector<16x512xf32> -> vector<16x512xf32>
      %157 = arith.addf %154, %156 : vector<16x512xf32>
      %158 = vector.extract_strided_slice %157 {offsets = [0, 0], sizes = [16, 128], strides = [1, 1]} : vector<16x512xf32> to vector<16x128xf32>
      %159 = arith.negf %158 : vector<16x128xf32>
      %160 = math.exp %159 : vector<16x128xf32>
      %cst_57 = arith.constant 1.000000e+00 : f32
      %161 = vector.broadcast %cst_57 : f32 to vector<16x128xf32>
      %162 = arith.addf %161, %160 : vector<16x128xf32>
      %163 = arith.divf %161, %162 : vector<16x128xf32>
      %164 = vector.extract_strided_slice %157 {offsets = [0, 128], sizes = [16, 128], strides = [1, 1]} : vector<16x512xf32> to vector<16x128xf32>
      %165 = arith.negf %164 : vector<16x128xf32>
      %166 = math.exp %165 : vector<16x128xf32>
      %cst_58 = arith.constant 1.000000e+00 : f32
      %167 = vector.broadcast %cst_58 : f32 to vector<16x128xf32>
      %168 = arith.addf %167, %166 : vector<16x128xf32>
      %169 = arith.divf %167, %168 : vector<16x128xf32>
      %170 = vector.extract_strided_slice %157 {offsets = [0, 256], sizes = [16, 128], strides = [1, 1]} : vector<16x512xf32> to vector<16x128xf32>
      %171 = math.tanh %170 : vector<16x128xf32>
      %172 = vector.extract_strided_slice %157 {offsets = [0, 384], sizes = [16, 128], strides = [1, 1]} : vector<16x512xf32> to vector<16x128xf32>
      %173 = arith.negf %172 : vector<16x128xf32>
      %174 = math.exp %173 : vector<16x128xf32>
      %cst_59 = arith.constant 1.000000e+00 : f32
      %175 = vector.broadcast %cst_59 : f32 to vector<16x128xf32>
      %176 = arith.addf %175, %174 : vector<16x128xf32>
      %177 = arith.divf %175, %176 : vector<16x128xf32>
      %178 = arith.mulf %169, %145 : vector<16x128xf32>
      %179 = arith.mulf %163, %171 : vector<16x128xf32>
      %180 = arith.addf %178, %179 : vector<16x128xf32>
      %181 = math.tanh %180 : vector<16x128xf32>
      %182 = arith.mulf %177, %181 : vector<16x128xf32>
      %183 = arith.truncf %182 : vector<16x128xf32> to vector<16x128xbf16>
      %c0_60 = arith.constant 0 : index
      %c4_61 = arith.constant 4 : index
      %c0_62 = arith.constant 0 : index
      %c0_63 = arith.constant 0 : index
      %184 = vector.load %arg4[%c0_60, %c4_61, %c0_62, %c0_63] : memref<1x8x16x128xbf16, #tpu.memory_space<vmem>>, vector<1x1x16x128xbf16>
      %185 = vector.shape_cast %184 : vector<1x1x16x128xbf16> to vector<16x128xbf16>
      %186 = vector.shape_cast %183 : vector<16x128xbf16> to vector<1x1x16x128xbf16>
      tpu.vector_store %arg4[%c0_60, %c4_61, %c0_62, %c0_63], %186 {strides = array<i32>} : memref<1x8x16x128xbf16, #tpu.memory_space<vmem>>, vector<1x1x16x128xbf16>,
      %c0_64 = arith.constant 0 : index
      %c5 = arith.constant 5 : index
      %c0_65 = arith.constant 0 : index
      %c0_66 = arith.constant 0 : index
      %187 = vector.load %arg2[%c0_64, %c5, %c0_65, %c0_66] : memref<1x8x16x512xbf16, #tpu.memory_space<vmem>>, vector<1x1x16x512xbf16>
      %188 = vector.shape_cast %187 : vector<1x1x16x512xbf16> to vector<16x512xbf16>
      %189 = arith.extf %188 : vector<16x512xbf16> to vector<16x512xf32>
      %190 = arith.truncf %182 : vector<16x128xf32> to vector<16x128xbf16>
      %cst_67 = arith.constant dense<0.000000e+00> : vector<16x512xf32>
      %191 = tpu.matmul %190, %3, %cst_67 {dimension_numbers = #tpu.dot_dimension_numbers<[1], [0], [0], [1], [0, 0, 1, 1], [], []>} : vector<16x128xbf16>, vector<128x512xbf16>, vector<16x512xf32> -> vector<16x512xf32>
      %192 = arith.addf %189, %191 : vector<16x512xf32>
      %193 = vector.extract_strided_slice %192 {offsets = [0, 0], sizes = [16, 128], strides = [1, 1]} : vector<16x512xf32> to vector<16x128xf32>
      %194 = arith.negf %193 : vector<16x128xf32>
      %195 = math.exp %194 : vector<16x128xf32>
      %cst_68 = arith.constant 1.000000e+00 : f32
      %196 = vector.broadcast %cst_68 : f32 to vector<16x128xf32>
      %197 = arith.addf %196, %195 : vector<16x128xf32>
      %198 = arith.divf %196, %197 : vector<16x128xf32>
      %199 = vector.extract_strided_slice %192 {offsets = [0, 128], sizes = [16, 128], strides = [1, 1]} : vector<16x512xf32> to vector<16x128xf32>
      %200 = arith.negf %199 : vector<16x128xf32>
      %201 = math.exp %200 : vector<16x128xf32>
      %cst_69 = arith.constant 1.000000e+00 : f32
      %202 = vector.broadcast %cst_69 : f32 to vector<16x128xf32>
      %203 = arith.addf %202, %201 : vector<16x128xf32>
      %204 = arith.divf %202, %203 : vector<16x128xf32>
      %205 = vector.extract_strided_slice %192 {offsets = [0, 256], sizes = [16, 128], strides = [1, 1]} : vector<16x512xf32> to vector<16x128xf32>
      %206 = math.tanh %205 : vector<16x128xf32>
      %207 = vector.extract_strided_slice %192 {offsets = [0, 384], sizes = [16, 128], strides = [1, 1]} : vector<16x512xf32> to vector<16x128xf32>
      %208 = arith.negf %207 : vector<16x128xf32>
      %209 = math.exp %208 : vector<16x128xf32>
      %cst_70 = arith.constant 1.000000e+00 : f32
      %210 = vector.broadcast %cst_70 : f32 to vector<16x128xf32>
      %211 = arith.addf %210, %209 : vector<16x128xf32>
      %212 = arith.divf %210, %211 : vector<16x128xf32>
      %213 = arith.mulf %204, %180 : vector<16x128xf32>
      %214 = arith.mulf %198, %206 : vector<16x128xf32>
      %215 = arith.addf %213, %214 : vector<16x128xf32>
      %216 = math.tanh %215 : vector<16x128xf32>
      %217 = arith.mulf %212, %216 : vector<16x128xf32>
      %218 = arith.truncf %217 : vector<16x128xf32> to vector<16x128xbf16>
      %c0_71 = arith.constant 0 : index
      %c5_72 = arith.constant 5 : index
      %c0_73 = arith.constant 0 : index
      %c0_74 = arith.constant 0 : index
      %219 = vector.load %arg4[%c0_71, %c5_72, %c0_73, %c0_74] : memref<1x8x16x128xbf16, #tpu.memory_space<vmem>>, vector<1x1x16x128xbf16>
      %220 = vector.shape_cast %219 : vector<1x1x16x128xbf16> to vector<16x128xbf16>
      %221 = vector.shape_cast %218 : vector<16x128xbf16> to vector<1x1x16x128xbf16>
      tpu.vector_store %arg4[%c0_71, %c5_72, %c0_73, %c0_74], %221 {strides = array<i32>} : memref<1x8x16x128xbf16, #tpu.memory_space<vmem>>, vector<1x1x16x128xbf16>,
      %c0_75 = arith.constant 0 : index
      %c6 = arith.constant 6 : index
      %c0_76 = arith.constant 0 : index
      %c0_77 = arith.constant 0 : index
      %222 = vector.load %arg2[%c0_75, %c6, %c0_76, %c0_77] : memref<1x8x16x512xbf16, #tpu.memory_space<vmem>>, vector<1x1x16x512xbf16>
      %223 = vector.shape_cast %222 : vector<1x1x16x512xbf16> to vector<16x512xbf16>
      %224 = arith.extf %223 : vector<16x512xbf16> to vector<16x512xf32>
      %225 = arith.truncf %217 : vector<16x128xf32> to vector<16x128xbf16>
      %cst_78 = arith.constant dense<0.000000e+00> : vector<16x512xf32>
      %226 = tpu.matmul %225, %3, %cst_78 {dimension_numbers = #tpu.dot_dimension_numbers<[1], [0], [0], [1], [0, 0, 1, 1], [], []>} : vector<16x128xbf16>, vector<128x512xbf16>, vector<16x512xf32> -> vector<16x512xf32>
      %227 = arith.addf %224, %226 : vector<16x512xf32>
      %228 = vector.extract_strided_slice %227 {offsets = [0, 0], sizes = [16, 128], strides = [1, 1]} : vector<16x512xf32> to vector<16x128xf32>
      %229 = arith.negf %228 : vector<16x128xf32>
      %230 = math.exp %229 : vector<16x128xf32>
      %cst_79 = arith.constant 1.000000e+00 : f32
      %231 = vector.broadcast %cst_79 : f32 to vector<16x128xf32>
      %232 = arith.addf %231, %230 : vector<16x128xf32>
      %233 = arith.divf %231, %232 : vector<16x128xf32>
      %234 = vector.extract_strided_slice %227 {offsets = [0, 128], sizes = [16, 128], strides = [1, 1]} : vector<16x512xf32> to vector<16x128xf32>
      %235 = arith.negf %234 : vector<16x128xf32>
      %236 = math.exp %235 : vector<16x128xf32>
      %cst_80 = arith.constant 1.000000e+00 : f32
      %237 = vector.broadcast %cst_80 : f32 to vector<16x128xf32>
      %238 = arith.addf %237, %236 : vector<16x128xf32>
      %239 = arith.divf %237, %238 : vector<16x128xf32>
      %240 = vector.extract_strided_slice %227 {offsets = [0, 256], sizes = [16, 128], strides = [1, 1]} : vector<16x512xf32> to vector<16x128xf32>
      %241 = math.tanh %240 : vector<16x128xf32>
      %242 = vector.extract_strided_slice %227 {offsets = [0, 384], sizes = [16, 128], strides = [1, 1]} : vector<16x512xf32> to vector<16x128xf32>
      %243 = arith.negf %242 : vector<16x128xf32>
      %244 = math.exp %243 : vector<16x128xf32>
      %cst_81 = arith.constant 1.000000e+00 : f32
      %245 = vector.broadcast %cst_81 : f32 to vector<16x128xf32>
      %246 = arith.addf %245, %244 : vector<16x128xf32>
      %247 = arith.divf %245, %246 : vector<16x128xf32>
      %248 = arith.mulf %239, %215 : vector<16x128xf32>
      %249 = arith.mulf %233, %241 : vector<16x128xf32>
      %250 = arith.addf %248, %249 : vector<16x128xf32>
      %251 = math.tanh %250 : vector<16x128xf32>
      %252 = arith.mulf %247, %251 : vector<16x128xf32>
      %253 = arith.truncf %252 : vector<16x128xf32> to vector<16x128xbf16>
      %c0_82 = arith.constant 0 : index
      %c6_83 = arith.constant 6 : index
      %c0_84 = arith.constant 0 : index
      %c0_85 = arith.constant 0 : index
      %254 = vector.load %arg4[%c0_82, %c6_83, %c0_84, %c0_85] : memref<1x8x16x128xbf16, #tpu.memory_space<vmem>>, vector<1x1x16x128xbf16>
      %255 = vector.shape_cast %254 : vector<1x1x16x128xbf16> to vector<16x128xbf16>
      %256 = vector.shape_cast %253 : vector<16x128xbf16> to vector<1x1x16x128xbf16>
      tpu.vector_store %arg4[%c0_82, %c6_83, %c0_84, %c0_85], %256 {strides = array<i32>} : memref<1x8x16x128xbf16, #tpu.memory_space<vmem>>, vector<1x1x16x128xbf16>,
      %c0_86 = arith.constant 0 : index
      %c7 = arith.constant 7 : index
      %c0_87 = arith.constant 0 : index
      %c0_88 = arith.constant 0 : index
      %257 = vector.load %arg2[%c0_86, %c7, %c0_87, %c0_88] : memref<1x8x16x512xbf16, #tpu.memory_space<vmem>>, vector<1x1x16x512xbf16>
      %258 = vector.shape_cast %257 : vector<1x1x16x512xbf16> to vector<16x512xbf16>
      %259 = arith.extf %258 : vector<16x512xbf16> to vector<16x512xf32>
      %260 = arith.truncf %252 : vector<16x128xf32> to vector<16x128xbf16>
      %cst_89 = arith.constant dense<0.000000e+00> : vector<16x512xf32>
      %261 = tpu.matmul %260, %3, %cst_89 {dimension_numbers = #tpu.dot_dimension_numbers<[1], [0], [0], [1], [0, 0, 1, 1], [], []>} : vector<16x128xbf16>, vector<128x512xbf16>, vector<16x512xf32> -> vector<16x512xf32>
      %262 = arith.addf %259, %261 : vector<16x512xf32>
      %263 = vector.extract_strided_slice %262 {offsets = [0, 0], sizes = [16, 128], strides = [1, 1]} : vector<16x512xf32> to vector<16x128xf32>
      %264 = arith.negf %263 : vector<16x128xf32>
      %265 = math.exp %264 : vector<16x128xf32>
      %cst_90 = arith.constant 1.000000e+00 : f32
      %266 = vector.broadcast %cst_90 : f32 to vector<16x128xf32>
      %267 = arith.addf %266, %265 : vector<16x128xf32>
      %268 = arith.divf %266, %267 : vector<16x128xf32>
      %269 = vector.extract_strided_slice %262 {offsets = [0, 128], sizes = [16, 128], strides = [1, 1]} : vector<16x512xf32> to vector<16x128xf32>
      %270 = arith.negf %269 : vector<16x128xf32>
      %271 = math.exp %270 : vector<16x128xf32>
      %cst_91 = arith.constant 1.000000e+00 : f32
      %272 = vector.broadcast %cst_91 : f32 to vector<16x128xf32>
      %273 = arith.addf %272, %271 : vector<16x128xf32>
      %274 = arith.divf %272, %273 : vector<16x128xf32>
      %275 = vector.extract_strided_slice %262 {offsets = [0, 256], sizes = [16, 128], strides = [1, 1]} : vector<16x512xf32> to vector<16x128xf32>
      %276 = math.tanh %275 : vector<16x128xf32>
      %277 = vector.extract_strided_slice %262 {offsets = [0, 384], sizes = [16, 128], strides = [1, 1]} : vector<16x512xf32> to vector<16x128xf32>
      %278 = arith.negf %277 : vector<16x128xf32>
      %279 = math.exp %278 : vector<16x128xf32>
      %cst_92 = arith.constant 1.000000e+00 : f32
      %280 = vector.broadcast %cst_92 : f32 to vector<16x128xf32>
      %281 = arith.addf %280, %279 : vector<16x128xf32>
      %282 = arith.divf %280, %281 : vector<16x128xf32>
      %283 = arith.mulf %274, %250 : vector<16x128xf32>
      %284 = arith.mulf %268, %276 : vector<16x128xf32>
      %285 = arith.addf %283, %284 : vector<16x128xf32>
      %286 = math.tanh %285 : vector<16x128xf32>
      %287 = arith.mulf %282, %286 : vector<16x128xf32>
      %288 = arith.truncf %287 : vector<16x128xf32> to vector<16x128xbf16>
      %c0_93 = arith.constant 0 : index
      %c7_94 = arith.constant 7 : index
      %c0_95 = arith.constant 0 : index
      %c0_96 = arith.constant 0 : index
      %289 = vector.load %arg4[%c0_93, %c7_94, %c0_95, %c0_96] : memref<1x8x16x128xbf16, #tpu.memory_space<vmem>>, vector<1x1x16x128xbf16>
      %290 = vector.shape_cast %289 : vector<1x1x16x128xbf16> to vector<16x128xbf16>
      %291 = vector.shape_cast %288 : vector<16x128xbf16> to vector<1x1x16x128xbf16>
      tpu.vector_store %arg4[%c0_93, %c7_94, %c0_95, %c0_96], %291 {strides = array<i32>} : memref<1x8x16x128xbf16, #tpu.memory_space<vmem>>, vector<1x1x16x128xbf16>,
      %c0_97 = arith.constant 0 : index
      %c0_98 = arith.constant 0 : index
      %292 = vector.load %arg6[%c0_97, %c0_98] : memref<16x128xf32, #tpu.memory_space<vmem>>, vector<16x128xf32>
      tpu.vector_store %arg6[%c0_97, %c0_98], %287 {strides = array<i32>} : memref<16x128xf32, #tpu.memory_space<vmem>>, vector<16x128xf32>,
      %c0_99 = arith.constant 0 : index
      %c0_100 = arith.constant 0 : index
      %293 = vector.load %arg7[%c0_99, %c0_100] : memref<16x128xf32, #tpu.memory_space<vmem>>, vector<16x128xf32>
      tpu.vector_store %arg7[%c0_99, %c0_100], %285 {strides = array<i32>} : memref<16x128xf32, #tpu.memory_space<vmem>>, vector<16x128xf32>,
    } else {
    }
    %c1_i32 = arith.constant 1 : i32
    %7 = arith.cmpi eq, %arg0, %c1_i32 : i32
    %8 = arith.extui %7 : i1 to i32
    %c0_i32_4 = arith.constant 0 : i32
    %9 = arith.cmpi ne, %8, %c0_i32_4 : i32
    scf.if %9 {
      %c0_5 = arith.constant 0 : index
      %c0_6 = arith.constant 0 : index
      %10 = vector.load %arg6[%c0_5, %c0_6] : memref<16x128xf32, #tpu.memory_space<vmem>>, vector<16x128xf32>
      %c0_7 = arith.constant 0 : index
      %c0_8 = arith.constant 0 : index
      %11 = vector.load %arg7[%c0_7, %c0_8] : memref<16x128xf32, #tpu.memory_space<vmem>>, vector<16x128xf32>
      %c0_9 = arith.constant 0 : index
      %c7 = arith.constant 7 : index
      %c0_10 = arith.constant 0 : index
      %c0_11 = arith.constant 0 : index
      %12 = vector.load %arg2[%c0_9, %c7, %c0_10, %c0_11] : memref<1x8x16x512xbf16, #tpu.memory_space<vmem>>, vector<1x1x16x512xbf16>
      %13 = vector.shape_cast %12 : vector<1x1x16x512xbf16> to vector<16x512xbf16>
      %14 = arith.extf %13 : vector<16x512xbf16> to vector<16x512xf32>
      %15 = arith.truncf %10 : vector<16x128xf32> to vector<16x128xbf16>
      %cst = arith.constant dense<0.000000e+00> : vector<16x512xf32>
      %16 = tpu.matmul %15, %3, %cst {dimension_numbers = #tpu.dot_dimension_numbers<[1], [0], [0], [1], [0, 0, 1, 1], [], []>} : vector<16x128xbf16>, vector<128x512xbf16>, vector<16x512xf32> -> vector<16x512xf32>
      %17 = arith.addf %14, %16 : vector<16x512xf32>
      %18 = vector.extract_strided_slice %17 {offsets = [0, 0], sizes = [16, 128], strides = [1, 1]} : vector<16x512xf32> to vector<16x128xf32>
      %19 = arith.negf %18 : vector<16x128xf32>
      %20 = math.exp %19 : vector<16x128xf32>
      %cst_12 = arith.constant 1.000000e+00 : f32
      %21 = vector.broadcast %cst_12 : f32 to vector<16x128xf32>
      %22 = arith.addf %21, %20 : vector<16x128xf32>
      %23 = arith.divf %21, %22 : vector<16x128xf32>
      %24 = vector.extract_strided_slice %17 {offsets = [0, 128], sizes = [16, 128], strides = [1, 1]} : vector<16x512xf32> to vector<16x128xf32>
      %25 = arith.negf %24 : vector<16x128xf32>
      %26 = math.exp %25 : vector<16x128xf32>
      %cst_13 = arith.constant 1.000000e+00 : f32
      %27 = vector.broadcast %cst_13 : f32 to vector<16x128xf32>
      %28 = arith.addf %27, %26 : vector<16x128xf32>
      %29 = arith.divf %27, %28 : vector<16x128xf32>
      %30 = vector.extract_strided_slice %17 {offsets = [0, 256], sizes = [16, 128], strides = [1, 1]} : vector<16x512xf32> to vector<16x128xf32>
      %31 = math.tanh %30 : vector<16x128xf32>
      %32 = vector.extract_strided_slice %17 {offsets = [0, 384], sizes = [16, 128], strides = [1, 1]} : vector<16x512xf32> to vector<16x128xf32>
      %33 = arith.negf %32 : vector<16x128xf32>
      %34 = math.exp %33 : vector<16x128xf32>
      %cst_14 = arith.constant 1.000000e+00 : f32
      %35 = vector.broadcast %cst_14 : f32 to vector<16x128xf32>
      %36 = arith.addf %35, %34 : vector<16x128xf32>
      %37 = arith.divf %35, %36 : vector<16x128xf32>
      %38 = arith.mulf %29, %11 : vector<16x128xf32>
      %39 = arith.mulf %23, %31 : vector<16x128xf32>
      %40 = arith.addf %38, %39 : vector<16x128xf32>
      %41 = math.tanh %40 : vector<16x128xf32>
      %42 = arith.mulf %37, %41 : vector<16x128xf32>
      %43 = arith.truncf %42 : vector<16x128xf32> to vector<16x128xbf16>
      %c0_15 = arith.constant 0 : index
      %c7_16 = arith.constant 7 : index
      %c0_17 = arith.constant 0 : index
      %c0_18 = arith.constant 0 : index
      %44 = vector.load %arg4[%c0_15, %c7_16, %c0_17, %c0_18] : memref<1x8x16x128xbf16, #tpu.memory_space<vmem>>, vector<1x1x16x128xbf16>
      %45 = vector.shape_cast %44 : vector<1x1x16x128xbf16> to vector<16x128xbf16>
      %46 = vector.shape_cast %43 : vector<16x128xbf16> to vector<1x1x16x128xbf16>
      tpu.vector_store %arg4[%c0_15, %c7_16, %c0_17, %c0_18], %46 {strides = array<i32>} : memref<1x8x16x128xbf16, #tpu.memory_space<vmem>>, vector<1x1x16x128xbf16>,
      %c0_19 = arith.constant 0 : index
      %c6 = arith.constant 6 : index
      %c0_20 = arith.constant 0 : index
      %c0_21 = arith.constant 0 : index
      %47 = vector.load %arg2[%c0_19, %c6, %c0_20, %c0_21] : memref<1x8x16x512xbf16, #tpu.memory_space<vmem>>, vector<1x1x16x512xbf16>
      %48 = vector.shape_cast %47 : vector<1x1x16x512xbf16> to vector<16x512xbf16>
      %49 = arith.extf %48 : vector<16x512xbf16> to vector<16x512xf32>
      %50 = arith.truncf %42 : vector<16x128xf32> to vector<16x128xbf16>
      %cst_22 = arith.constant dense<0.000000e+00> : vector<16x512xf32>
      %51 = tpu.matmul %50, %3, %cst_22 {dimension_numbers = #tpu.dot_dimension_numbers<[1], [0], [0], [1], [0, 0, 1, 1], [], []>} : vector<16x128xbf16>, vector<128x512xbf16>, vector<16x512xf32> -> vector<16x512xf32>
      %52 = arith.addf %49, %51 : vector<16x512xf32>
      %53 = vector.extract_strided_slice %52 {offsets = [0, 0], sizes = [16, 128], strides = [1, 1]} : vector<16x512xf32> to vector<16x128xf32>
      %54 = arith.negf %53 : vector<16x128xf32>
      %55 = math.exp %54 : vector<16x128xf32>
      %cst_23 = arith.constant 1.000000e+00 : f32
      %56 = vector.broadcast %cst_23 : f32 to vector<16x128xf32>
      %57 = arith.addf %56, %55 : vector<16x128xf32>
      %58 = arith.divf %56, %57 : vector<16x128xf32>
      %59 = vector.extract_strided_slice %52 {offsets = [0, 128], sizes = [16, 128], strides = [1, 1]} : vector<16x512xf32> to vector<16x128xf32>
      %60 = arith.negf %59 : vector<16x128xf32>
      %61 = math.exp %60 : vector<16x128xf32>
      %cst_24 = arith.constant 1.000000e+00 : f32
      %62 = vector.broadcast %cst_24 : f32 to vector<16x128xf32>
      %63 = arith.addf %62, %61 : vector<16x128xf32>
      %64 = arith.divf %62, %63 : vector<16x128xf32>
      %65 = vector.extract_strided_slice %52 {offsets = [0, 256], sizes = [16, 128], strides = [1, 1]} : vector<16x512xf32> to vector<16x128xf32>
      %66 = math.tanh %65 : vector<16x128xf32>
      %67 = vector.extract_strided_slice %52 {offsets = [0, 384], sizes = [16, 128], strides = [1, 1]} : vector<16x512xf32> to vector<16x128xf32>
      %68 = arith.negf %67 : vector<16x128xf32>
      %69 = math.exp %68 : vector<16x128xf32>
      %cst_25 = arith.constant 1.000000e+00 : f32
      %70 = vector.broadcast %cst_25 : f32 to vector<16x128xf32>
      %71 = arith.addf %70, %69 : vector<16x128xf32>
      %72 = arith.divf %70, %71 : vector<16x128xf32>
      %73 = arith.mulf %64, %40 : vector<16x128xf32>
      %74 = arith.mulf %58, %66 : vector<16x128xf32>
      %75 = arith.addf %73, %74 : vector<16x128xf32>
      %76 = math.tanh %75 : vector<16x128xf32>
      %77 = arith.mulf %72, %76 : vector<16x128xf32>
      %78 = arith.truncf %77 : vector<16x128xf32> to vector<16x128xbf16>
      %c0_26 = arith.constant 0 : index
      %c6_27 = arith.constant 6 : index
      %c0_28 = arith.constant 0 : index
      %c0_29 = arith.constant 0 : index
      %79 = vector.load %arg4[%c0_26, %c6_27, %c0_28, %c0_29] : memref<1x8x16x128xbf16, #tpu.memory_space<vmem>>, vector<1x1x16x128xbf16>
      %80 = vector.shape_cast %79 : vector<1x1x16x128xbf16> to vector<16x128xbf16>
      %81 = vector.shape_cast %78 : vector<16x128xbf16> to vector<1x1x16x128xbf16>
      tpu.vector_store %arg4[%c0_26, %c6_27, %c0_28, %c0_29], %81 {strides = array<i32>} : memref<1x8x16x128xbf16, #tpu.memory_space<vmem>>, vector<1x1x16x128xbf16>,
      %c0_30 = arith.constant 0 : index
      %c5 = arith.constant 5 : index
      %c0_31 = arith.constant 0 : index
      %c0_32 = arith.constant 0 : index
      %82 = vector.load %arg2[%c0_30, %c5, %c0_31, %c0_32] : memref<1x8x16x512xbf16, #tpu.memory_space<vmem>>, vector<1x1x16x512xbf16>
      %83 = vector.shape_cast %82 : vector<1x1x16x512xbf16> to vector<16x512xbf16>
      %84 = arith.extf %83 : vector<16x512xbf16> to vector<16x512xf32>
      %85 = arith.truncf %77 : vector<16x128xf32> to vector<16x128xbf16>
      %cst_33 = arith.constant dense<0.000000e+00> : vector<16x512xf32>
      %86 = tpu.matmul %85, %3, %cst_33 {dimension_numbers = #tpu.dot_dimension_numbers<[1], [0], [0], [1], [0, 0, 1, 1], [], []>} : vector<16x128xbf16>, vector<128x512xbf16>, vector<16x512xf32> -> vector<16x512xf32>
      %87 = arith.addf %84, %86 : vector<16x512xf32>
      %88 = vector.extract_strided_slice %87 {offsets = [0, 0], sizes = [16, 128], strides = [1, 1]} : vector<16x512xf32> to vector<16x128xf32>
      %89 = arith.negf %88 : vector<16x128xf32>
      %90 = math.exp %89 : vector<16x128xf32>
      %cst_34 = arith.constant 1.000000e+00 : f32
      %91 = vector.broadcast %cst_34 : f32 to vector<16x128xf32>
      %92 = arith.addf %91, %90 : vector<16x128xf32>
      %93 = arith.divf %91, %92 : vector<16x128xf32>
      %94 = vector.extract_strided_slice %87 {offsets = [0, 128], sizes = [16, 128], strides = [1, 1]} : vector<16x512xf32> to vector<16x128xf32>
      %95 = arith.negf %94 : vector<16x128xf32>
      %96 = math.exp %95 : vector<16x128xf32>
      %cst_35 = arith.constant 1.000000e+00 : f32
      %97 = vector.broadcast %cst_35 : f32 to vector<16x128xf32>
      %98 = arith.addf %97, %96 : vector<16x128xf32>
      %99 = arith.divf %97, %98 : vector<16x128xf32>
      %100 = vector.extract_strided_slice %87 {offsets = [0, 256], sizes = [16, 128], strides = [1, 1]} : vector<16x512xf32> to vector<16x128xf32>
      %101 = math.tanh %100 : vector<16x128xf32>
      %102 = vector.extract_strided_slice %87 {offsets = [0, 384], sizes = [16, 128], strides = [1, 1]} : vector<16x512xf32> to vector<16x128xf32>
      %103 = arith.negf %102 : vector<16x128xf32>
      %104 = math.exp %103 : vector<16x128xf32>
      %cst_36 = arith.constant 1.000000e+00 : f32
      %105 = vector.broadcast %cst_36 : f32 to vector<16x128xf32>
      %106 = arith.addf %105, %104 : vector<16x128xf32>
      %107 = arith.divf %105, %106 : vector<16x128xf32>
      %108 = arith.mulf %99, %75 : vector<16x128xf32>
      %109 = arith.mulf %93, %101 : vector<16x128xf32>
      %110 = arith.addf %108, %109 : vector<16x128xf32>
      %111 = math.tanh %110 : vector<16x128xf32>
      %112 = arith.mulf %107, %111 : vector<16x128xf32>
      %113 = arith.truncf %112 : vector<16x128xf32> to vector<16x128xbf16>
      %c0_37 = arith.constant 0 : index
      %c5_38 = arith.constant 5 : index
      %c0_39 = arith.constant 0 : index
      %c0_40 = arith.constant 0 : index
      %114 = vector.load %arg4[%c0_37, %c5_38, %c0_39, %c0_40] : memref<1x8x16x128xbf16, #tpu.memory_space<vmem>>, vector<1x1x16x128xbf16>
      %115 = vector.shape_cast %114 : vector<1x1x16x128xbf16> to vector<16x128xbf16>
      %116 = vector.shape_cast %113 : vector<16x128xbf16> to vector<1x1x16x128xbf16>
      tpu.vector_store %arg4[%c0_37, %c5_38, %c0_39, %c0_40], %116 {strides = array<i32>} : memref<1x8x16x128xbf16, #tpu.memory_space<vmem>>, vector<1x1x16x128xbf16>,
      %c0_41 = arith.constant 0 : index
      %c4 = arith.constant 4 : index
      %c0_42 = arith.constant 0 : index
      %c0_43 = arith.constant 0 : index
      %117 = vector.load %arg2[%c0_41, %c4, %c0_42, %c0_43] : memref<1x8x16x512xbf16, #tpu.memory_space<vmem>>, vector<1x1x16x512xbf16>
      %118 = vector.shape_cast %117 : vector<1x1x16x512xbf16> to vector<16x512xbf16>
      %119 = arith.extf %118 : vector<16x512xbf16> to vector<16x512xf32>
      %120 = arith.truncf %112 : vector<16x128xf32> to vector<16x128xbf16>
      %cst_44 = arith.constant dense<0.000000e+00> : vector<16x512xf32>
      %121 = tpu.matmul %120, %3, %cst_44 {dimension_numbers = #tpu.dot_dimension_numbers<[1], [0], [0], [1], [0, 0, 1, 1], [], []>} : vector<16x128xbf16>, vector<128x512xbf16>, vector<16x512xf32> -> vector<16x512xf32>
      %122 = arith.addf %119, %121 : vector<16x512xf32>
      %123 = vector.extract_strided_slice %122 {offsets = [0, 0], sizes = [16, 128], strides = [1, 1]} : vector<16x512xf32> to vector<16x128xf32>
      %124 = arith.negf %123 : vector<16x128xf32>
      %125 = math.exp %124 : vector<16x128xf32>
      %cst_45 = arith.constant 1.000000e+00 : f32
      %126 = vector.broadcast %cst_45 : f32 to vector<16x128xf32>
      %127 = arith.addf %126, %125 : vector<16x128xf32>
      %128 = arith.divf %126, %127 : vector<16x128xf32>
      %129 = vector.extract_strided_slice %122 {offsets = [0, 128], sizes = [16, 128], strides = [1, 1]} : vector<16x512xf32> to vector<16x128xf32>
      %130 = arith.negf %129 : vector<16x128xf32>
      %131 = math.exp %130 : vector<16x128xf32>
      %cst_46 = arith.constant 1.000000e+00 : f32
      %132 = vector.broadcast %cst_46 : f32 to vector<16x128xf32>
      %133 = arith.addf %132, %131 : vector<16x128xf32>
      %134 = arith.divf %132, %133 : vector<16x128xf32>
      %135 = vector.extract_strided_slice %122 {offsets = [0, 256], sizes = [16, 128], strides = [1, 1]} : vector<16x512xf32> to vector<16x128xf32>
      %136 = math.tanh %135 : vector<16x128xf32>
      %137 = vector.extract_strided_slice %122 {offsets = [0, 384], sizes = [16, 128], strides = [1, 1]} : vector<16x512xf32> to vector<16x128xf32>
      %138 = arith.negf %137 : vector<16x128xf32>
      %139 = math.exp %138 : vector<16x128xf32>
      %cst_47 = arith.constant 1.000000e+00 : f32
      %140 = vector.broadcast %cst_47 : f32 to vector<16x128xf32>
      %141 = arith.addf %140, %139 : vector<16x128xf32>
      %142 = arith.divf %140, %141 : vector<16x128xf32>
      %143 = arith.mulf %134, %110 : vector<16x128xf32>
      %144 = arith.mulf %128, %136 : vector<16x128xf32>
      %145 = arith.addf %143, %144 : vector<16x128xf32>
      %146 = math.tanh %145 : vector<16x128xf32>
      %147 = arith.mulf %142, %146 : vector<16x128xf32>
      %148 = arith.truncf %147 : vector<16x128xf32> to vector<16x128xbf16>
      %c0_48 = arith.constant 0 : index
      %c4_49 = arith.constant 4 : index
      %c0_50 = arith.constant 0 : index
      %c0_51 = arith.constant 0 : index
      %149 = vector.load %arg4[%c0_48, %c4_49, %c0_50, %c0_51] : memref<1x8x16x128xbf16, #tpu.memory_space<vmem>>, vector<1x1x16x128xbf16>
      %150 = vector.shape_cast %149 : vector<1x1x16x128xbf16> to vector<16x128xbf16>
      %151 = vector.shape_cast %148 : vector<16x128xbf16> to vector<1x1x16x128xbf16>
      tpu.vector_store %arg4[%c0_48, %c4_49, %c0_50, %c0_51], %151 {strides = array<i32>} : memref<1x8x16x128xbf16, #tpu.memory_space<vmem>>, vector<1x1x16x128xbf16>,
      %c0_52 = arith.constant 0 : index
      %c3 = arith.constant 3 : index
      %c0_53 = arith.constant 0 : index
      %c0_54 = arith.constant 0 : index
      %152 = vector.load %arg2[%c0_52, %c3, %c0_53, %c0_54] : memref<1x8x16x512xbf16, #tpu.memory_space<vmem>>, vector<1x1x16x512xbf16>
      %153 = vector.shape_cast %152 : vector<1x1x16x512xbf16> to vector<16x512xbf16>
      %154 = arith.extf %153 : vector<16x512xbf16> to vector<16x512xf32>
      %155 = arith.truncf %147 : vector<16x128xf32> to vector<16x128xbf16>
      %cst_55 = arith.constant dense<0.000000e+00> : vector<16x512xf32>
      %156 = tpu.matmul %155, %3, %cst_55 {dimension_numbers = #tpu.dot_dimension_numbers<[1], [0], [0], [1], [0, 0, 1, 1], [], []>} : vector<16x128xbf16>, vector<128x512xbf16>, vector<16x512xf32> -> vector<16x512xf32>
      %157 = arith.addf %154, %156 : vector<16x512xf32>
      %158 = vector.extract_strided_slice %157 {offsets = [0, 0], sizes = [16, 128], strides = [1, 1]} : vector<16x512xf32> to vector<16x128xf32>
      %159 = arith.negf %158 : vector<16x128xf32>
      %160 = math.exp %159 : vector<16x128xf32>
      %cst_56 = arith.constant 1.000000e+00 : f32
      %161 = vector.broadcast %cst_56 : f32 to vector<16x128xf32>
      %162 = arith.addf %161, %160 : vector<16x128xf32>
      %163 = arith.divf %161, %162 : vector<16x128xf32>
      %164 = vector.extract_strided_slice %157 {offsets = [0, 128], sizes = [16, 128], strides = [1, 1]} : vector<16x512xf32> to vector<16x128xf32>
      %165 = arith.negf %164 : vector<16x128xf32>
      %166 = math.exp %165 : vector<16x128xf32>
      %cst_57 = arith.constant 1.000000e+00 : f32
      %167 = vector.broadcast %cst_57 : f32 to vector<16x128xf32>
      %168 = arith.addf %167, %166 : vector<16x128xf32>
      %169 = arith.divf %167, %168 : vector<16x128xf32>
      %170 = vector.extract_strided_slice %157 {offsets = [0, 256], sizes = [16, 128], strides = [1, 1]} : vector<16x512xf32> to vector<16x128xf32>
      %171 = math.tanh %170 : vector<16x128xf32>
      %172 = vector.extract_strided_slice %157 {offsets = [0, 384], sizes = [16, 128], strides = [1, 1]} : vector<16x512xf32> to vector<16x128xf32>
      %173 = arith.negf %172 : vector<16x128xf32>
      %174 = math.exp %173 : vector<16x128xf32>
      %cst_58 = arith.constant 1.000000e+00 : f32
      %175 = vector.broadcast %cst_58 : f32 to vector<16x128xf32>
      %176 = arith.addf %175, %174 : vector<16x128xf32>
      %177 = arith.divf %175, %176 : vector<16x128xf32>
      %178 = arith.mulf %169, %145 : vector<16x128xf32>
      %179 = arith.mulf %163, %171 : vector<16x128xf32>
      %180 = arith.addf %178, %179 : vector<16x128xf32>
      %181 = math.tanh %180 : vector<16x128xf32>
      %182 = arith.mulf %177, %181 : vector<16x128xf32>
      %183 = arith.truncf %182 : vector<16x128xf32> to vector<16x128xbf16>
      %c0_59 = arith.constant 0 : index
      %c3_60 = arith.constant 3 : index
      %c0_61 = arith.constant 0 : index
      %c0_62 = arith.constant 0 : index
      %184 = vector.load %arg4[%c0_59, %c3_60, %c0_61, %c0_62] : memref<1x8x16x128xbf16, #tpu.memory_space<vmem>>, vector<1x1x16x128xbf16>
      %185 = vector.shape_cast %184 : vector<1x1x16x128xbf16> to vector<16x128xbf16>
      %186 = vector.shape_cast %183 : vector<16x128xbf16> to vector<1x1x16x128xbf16>
      tpu.vector_store %arg4[%c0_59, %c3_60, %c0_61, %c0_62], %186 {strides = array<i32>} : memref<1x8x16x128xbf16, #tpu.memory_space<vmem>>, vector<1x1x16x128xbf16>,
      %c0_63 = arith.constant 0 : index
      %c2 = arith.constant 2 : index
      %c0_64 = arith.constant 0 : index
      %c0_65 = arith.constant 0 : index
      %187 = vector.load %arg2[%c0_63, %c2, %c0_64, %c0_65] : memref<1x8x16x512xbf16, #tpu.memory_space<vmem>>, vector<1x1x16x512xbf16>
      %188 = vector.shape_cast %187 : vector<1x1x16x512xbf16> to vector<16x512xbf16>
      %189 = arith.extf %188 : vector<16x512xbf16> to vector<16x512xf32>
      %190 = arith.truncf %182 : vector<16x128xf32> to vector<16x128xbf16>
      %cst_66 = arith.constant dense<0.000000e+00> : vector<16x512xf32>
      %191 = tpu.matmul %190, %3, %cst_66 {dimension_numbers = #tpu.dot_dimension_numbers<[1], [0], [0], [1], [0, 0, 1, 1], [], []>} : vector<16x128xbf16>, vector<128x512xbf16>, vector<16x512xf32> -> vector<16x512xf32>
      %192 = arith.addf %189, %191 : vector<16x512xf32>
      %193 = vector.extract_strided_slice %192 {offsets = [0, 0], sizes = [16, 128], strides = [1, 1]} : vector<16x512xf32> to vector<16x128xf32>
      %194 = arith.negf %193 : vector<16x128xf32>
      %195 = math.exp %194 : vector<16x128xf32>
      %cst_67 = arith.constant 1.000000e+00 : f32
      %196 = vector.broadcast %cst_67 : f32 to vector<16x128xf32>
      %197 = arith.addf %196, %195 : vector<16x128xf32>
      %198 = arith.divf %196, %197 : vector<16x128xf32>
      %199 = vector.extract_strided_slice %192 {offsets = [0, 128], sizes = [16, 128], strides = [1, 1]} : vector<16x512xf32> to vector<16x128xf32>
      %200 = arith.negf %199 : vector<16x128xf32>
      %201 = math.exp %200 : vector<16x128xf32>
      %cst_68 = arith.constant 1.000000e+00 : f32
      %202 = vector.broadcast %cst_68 : f32 to vector<16x128xf32>
      %203 = arith.addf %202, %201 : vector<16x128xf32>
      %204 = arith.divf %202, %203 : vector<16x128xf32>
      %205 = vector.extract_strided_slice %192 {offsets = [0, 256], sizes = [16, 128], strides = [1, 1]} : vector<16x512xf32> to vector<16x128xf32>
      %206 = math.tanh %205 : vector<16x128xf32>
      %207 = vector.extract_strided_slice %192 {offsets = [0, 384], sizes = [16, 128], strides = [1, 1]} : vector<16x512xf32> to vector<16x128xf32>
      %208 = arith.negf %207 : vector<16x128xf32>
      %209 = math.exp %208 : vector<16x128xf32>
      %cst_69 = arith.constant 1.000000e+00 : f32
      %210 = vector.broadcast %cst_69 : f32 to vector<16x128xf32>
      %211 = arith.addf %210, %209 : vector<16x128xf32>
      %212 = arith.divf %210, %211 : vector<16x128xf32>
      %213 = arith.mulf %204, %180 : vector<16x128xf32>
      %214 = arith.mulf %198, %206 : vector<16x128xf32>
      %215 = arith.addf %213, %214 : vector<16x128xf32>
      %216 = math.tanh %215 : vector<16x128xf32>
      %217 = arith.mulf %212, %216 : vector<16x128xf32>
      %218 = arith.truncf %217 : vector<16x128xf32> to vector<16x128xbf16>
      %c0_70 = arith.constant 0 : index
      %c2_71 = arith.constant 2 : index
      %c0_72 = arith.constant 0 : index
      %c0_73 = arith.constant 0 : index
      %219 = vector.load %arg4[%c0_70, %c2_71, %c0_72, %c0_73] : memref<1x8x16x128xbf16, #tpu.memory_space<vmem>>, vector<1x1x16x128xbf16>
      %220 = vector.shape_cast %219 : vector<1x1x16x128xbf16> to vector<16x128xbf16>
      %221 = vector.shape_cast %218 : vector<16x128xbf16> to vector<1x1x16x128xbf16>
      tpu.vector_store %arg4[%c0_70, %c2_71, %c0_72, %c0_73], %221 {strides = array<i32>} : memref<1x8x16x128xbf16, #tpu.memory_space<vmem>>, vector<1x1x16x128xbf16>,
      %c0_74 = arith.constant 0 : index
      %c1 = arith.constant 1 : index
      %c0_75 = arith.constant 0 : index
      %c0_76 = arith.constant 0 : index
      %222 = vector.load %arg2[%c0_74, %c1, %c0_75, %c0_76] : memref<1x8x16x512xbf16, #tpu.memory_space<vmem>>, vector<1x1x16x512xbf16>
      %223 = vector.shape_cast %222 : vector<1x1x16x512xbf16> to vector<16x512xbf16>
      %224 = arith.extf %223 : vector<16x512xbf16> to vector<16x512xf32>
      %225 = arith.truncf %217 : vector<16x128xf32> to vector<16x128xbf16>
      %cst_77 = arith.constant dense<0.000000e+00> : vector<16x512xf32>
      %226 = tpu.matmul %225, %3, %cst_77 {dimension_numbers = #tpu.dot_dimension_numbers<[1], [0], [0], [1], [0, 0, 1, 1], [], []>} : vector<16x128xbf16>, vector<128x512xbf16>, vector<16x512xf32> -> vector<16x512xf32>
      %227 = arith.addf %224, %226 : vector<16x512xf32>
      %228 = vector.extract_strided_slice %227 {offsets = [0, 0], sizes = [16, 128], strides = [1, 1]} : vector<16x512xf32> to vector<16x128xf32>
      %229 = arith.negf %228 : vector<16x128xf32>
      %230 = math.exp %229 : vector<16x128xf32>
      %cst_78 = arith.constant 1.000000e+00 : f32
      %231 = vector.broadcast %cst_78 : f32 to vector<16x128xf32>
      %232 = arith.addf %231, %230 : vector<16x128xf32>
      %233 = arith.divf %231, %232 : vector<16x128xf32>
      %234 = vector.extract_strided_slice %227 {offsets = [0, 128], sizes = [16, 128], strides = [1, 1]} : vector<16x512xf32> to vector<16x128xf32>
      %235 = arith.negf %234 : vector<16x128xf32>
      %236 = math.exp %235 : vector<16x128xf32>
      %cst_79 = arith.constant 1.000000e+00 : f32
      %237 = vector.broadcast %cst_79 : f32 to vector<16x128xf32>
      %238 = arith.addf %237, %236 : vector<16x128xf32>
      %239 = arith.divf %237, %238 : vector<16x128xf32>
      %240 = vector.extract_strided_slice %227 {offsets = [0, 256], sizes = [16, 128], strides = [1, 1]} : vector<16x512xf32> to vector<16x128xf32>
      %241 = math.tanh %240 : vector<16x128xf32>
      %242 = vector.extract_strided_slice %227 {offsets = [0, 384], sizes = [16, 128], strides = [1, 1]} : vector<16x512xf32> to vector<16x128xf32>
      %243 = arith.negf %242 : vector<16x128xf32>
      %244 = math.exp %243 : vector<16x128xf32>
      %cst_80 = arith.constant 1.000000e+00 : f32
      %245 = vector.broadcast %cst_80 : f32 to vector<16x128xf32>
      %246 = arith.addf %245, %244 : vector<16x128xf32>
      %247 = arith.divf %245, %246 : vector<16x128xf32>
      %248 = arith.mulf %239, %215 : vector<16x128xf32>
      %249 = arith.mulf %233, %241 : vector<16x128xf32>
      %250 = arith.addf %248, %249 : vector<16x128xf32>
      %251 = math.tanh %250 : vector<16x128xf32>
      %252 = arith.mulf %247, %251 : vector<16x128xf32>
      %253 = arith.truncf %252 : vector<16x128xf32> to vector<16x128xbf16>
      %c0_81 = arith.constant 0 : index
      %c1_82 = arith.constant 1 : index
      %c0_83 = arith.constant 0 : index
      %c0_84 = arith.constant 0 : index
      %254 = vector.load %arg4[%c0_81, %c1_82, %c0_83, %c0_84] : memref<1x8x16x128xbf16, #tpu.memory_space<vmem>>, vector<1x1x16x128xbf16>
      %255 = vector.shape_cast %254 : vector<1x1x16x128xbf16> to vector<16x128xbf16>
      %256 = vector.shape_cast %253 : vector<16x128xbf16> to vector<1x1x16x128xbf16>
      tpu.vector_store %arg4[%c0_81, %c1_82, %c0_83, %c0_84], %256 {strides = array<i32>} : memref<1x8x16x128xbf16, #tpu.memory_space<vmem>>, vector<1x1x16x128xbf16>,
      %c0_85 = arith.constant 0 : index
      %c0_86 = arith.constant 0 : index
      %c0_87 = arith.constant 0 : index
      %c0_88 = arith.constant 0 : index
      %257 = vector.load %arg2[%c0_85, %c0_86, %c0_87, %c0_88] : memref<1x8x16x512xbf16, #tpu.memory_space<vmem>>, vector<1x1x16x512xbf16>
      %258 = vector.shape_cast %257 : vector<1x1x16x512xbf16> to vector<16x512xbf16>
      %259 = arith.extf %258 : vector<16x512xbf16> to vector<16x512xf32>
      %260 = arith.truncf %252 : vector<16x128xf32> to vector<16x128xbf16>
      %cst_89 = arith.constant dense<0.000000e+00> : vector<16x512xf32>
      %261 = tpu.matmul %260, %3, %cst_89 {dimension_numbers = #tpu.dot_dimension_numbers<[1], [0], [0], [1], [0, 0, 1, 1], [], []>} : vector<16x128xbf16>, vector<128x512xbf16>, vector<16x512xf32> -> vector<16x512xf32>
      %262 = arith.addf %259, %261 : vector<16x512xf32>
      %263 = vector.extract_strided_slice %262 {offsets = [0, 0], sizes = [16, 128], strides = [1, 1]} : vector<16x512xf32> to vector<16x128xf32>
      %264 = arith.negf %263 : vector<16x128xf32>
      %265 = math.exp %264 : vector<16x128xf32>
      %cst_90 = arith.constant 1.000000e+00 : f32
      %266 = vector.broadcast %cst_90 : f32 to vector<16x128xf32>
      %267 = arith.addf %266, %265 : vector<16x128xf32>
      %268 = arith.divf %266, %267 : vector<16x128xf32>
      %269 = vector.extract_strided_slice %262 {offsets = [0, 128], sizes = [16, 128], strides = [1, 1]} : vector<16x512xf32> to vector<16x128xf32>
      %270 = arith.negf %269 : vector<16x128xf32>
      %271 = math.exp %270 : vector<16x128xf32>
      %cst_91 = arith.constant 1.000000e+00 : f32
      %272 = vector.broadcast %cst_91 : f32 to vector<16x128xf32>
      %273 = arith.addf %272, %271 : vector<16x128xf32>
      %274 = arith.divf %272, %273 : vector<16x128xf32>
      %275 = vector.extract_strided_slice %262 {offsets = [0, 256], sizes = [16, 128], strides = [1, 1]} : vector<16x512xf32> to vector<16x128xf32>
      %276 = math.tanh %275 : vector<16x128xf32>
      %277 = vector.extract_strided_slice %262 {offsets = [0, 384], sizes = [16, 128], strides = [1, 1]} : vector<16x512xf32> to vector<16x128xf32>
      %278 = arith.negf %277 : vector<16x128xf32>
      %279 = math.exp %278 : vector<16x128xf32>
      %cst_92 = arith.constant 1.000000e+00 : f32
      %280 = vector.broadcast %cst_92 : f32 to vector<16x128xf32>
      %281 = arith.addf %280, %279 : vector<16x128xf32>
      %282 = arith.divf %280, %281 : vector<16x128xf32>
      %283 = arith.mulf %274, %250 : vector<16x128xf32>
      %284 = arith.mulf %268, %276 : vector<16x128xf32>
      %285 = arith.addf %283, %284 : vector<16x128xf32>
      %286 = math.tanh %285 : vector<16x128xf32>
      %287 = arith.mulf %282, %286 : vector<16x128xf32>
      %288 = arith.truncf %287 : vector<16x128xf32> to vector<16x128xbf16>
      %c0_93 = arith.constant 0 : index
      %c0_94 = arith.constant 0 : index
      %c0_95 = arith.constant 0 : index
      %c0_96 = arith.constant 0 : index
      %289 = vector.load %arg4[%c0_93, %c0_94, %c0_95, %c0_96] : memref<1x8x16x128xbf16, #tpu.memory_space<vmem>>, vector<1x1x16x128xbf16>
      %290 = vector.shape_cast %289 : vector<1x1x16x128xbf16> to vector<16x128xbf16>
      %291 = vector.shape_cast %288 : vector<16x128xbf16> to vector<1x1x16x128xbf16>
      tpu.vector_store %arg4[%c0_93, %c0_94, %c0_95, %c0_96], %291 {strides = array<i32>} : memref<1x8x16x128xbf16, #tpu.memory_space<vmem>>, vector<1x1x16x128xbf16>,
      %c0_97 = arith.constant 0 : index
      %c0_98 = arith.constant 0 : index
      %292 = vector.load %arg6[%c0_97, %c0_98] : memref<16x128xf32, #tpu.memory_space<vmem>>, vector<16x128xf32>
      tpu.vector_store %arg6[%c0_97, %c0_98], %287 {strides = array<i32>} : memref<16x128xf32, #tpu.memory_space<vmem>>, vector<16x128xf32>,
      %c0_99 = arith.constant 0 : index
      %c0_100 = arith.constant 0 : index
      %293 = vector.load %arg7[%c0_99, %c0_100] : memref<16x128xf32, #tpu.memory_space<vmem>>, vector<16x128xf32>
      tpu.vector_store %arg7[%c0_99, %c0_100], %285 {strides = array<i32>} : memref<16x128xf32, #tpu.memory_space<vmem>>, vector<16x128xf32>,
    } else {
    }
    return
  }
  func.func @transform_0(%arg0: i32, %arg1: i32) -> (i32, i32, i32, i32) {
    %c2_i32 = arith.constant 2 : i32
    %0 = arith.muli %c2_i32, %arg1 : i32
    %c0_i32 = arith.constant 0 : i32
    %1 = arith.subi %c0_i32, %0 : i32
    %2 = arith.muli %arg0, %1 : i32
    %3 = arith.addi %arg1, %2 : i32
    %c0_i32_0 = arith.constant 0 : i32
    %c0_i32_1 = arith.constant 0 : i32
    %c0_i32_2 = arith.constant 0 : i32
    return %arg0, %3, %c0_i32_0, %c0_i32_1 : i32, i32, i32, i32
  }
  func.func @transform_2(%arg0: i32, %arg1: i32) -> (i32, i32, i32, i32) {
    %c2_i32 = arith.constant 2 : i32
    %0 = arith.muli %c2_i32, %arg1 : i32
    %c0_i32 = arith.constant 0 : i32
    %1 = arith.subi %c0_i32, %0 : i32
    %2 = arith.muli %arg0, %1 : i32
    %3 = arith.addi %arg1, %2 : i32
    %c0_i32_0 = arith.constant 0 : i32
    %c0_i32_1 = arith.constant 0 : i32
    %c0_i32_2 = arith.constant 0 : i32
    return %arg0, %3, %c0_i32_0, %c0_i32_1 : i32, i32, i32, i32
  }
}

</mosaic_0001>

<bundles_post_ra>
// kernel: encoder_forward.3
= control target key start
LH: loop header
LB: loop body
LE: loop exit
PB: predicated region body
PF: predicated region fallthrough
CT: control target
= control target key end

     0   :  { %s4310_s9 = smov 0   ;;  %s4312_s10 = smov 0   ;;  %s5216_s0 = inlined_call_operand.vmem [shape: bf16[2,8,16,512], index: 0, kind: input, shape index: {}]   ;;  %s5217_s1 = inlined_call_operand.vmem [shape: bf16[2,128,512], index: 1, kind: input, shape index: {}]   ;;  %s5218_s2 = inlined_call_operand.vmem [shape: bf16[2,8,16,128], index: 2, kind: output, shape index: {}]  }
   0x1   :  { %s4314_s11 = smov 0  }
   0x2 LB: > { %s24_s12 = sadd.s32 1, %s4286_s10  ;;  %p3374_p0 = scmp.ge.s32.totalorder %s4290_s11, 1  ;;  %s4290_s11 = sphi %s4314_s11, %s12_s11   ;;  %s4286_s10 = sphi %s4312_s10, %s5220_s10   ;;  %s4282_s9 = sphi %s4310_s9, %s5219_s9  }
   0x3   : > { %p26_p1 = scmp.ge.s32.totalorder %s24_s12, 2  ;;  %p134_p2 = scmp.lt.s32.totalorder %s4290_s11, 3 }
   0x5   : > { %s5222_s12 = smov (%p26_p1, %s24_s12), 0  ;;  %p135_p3 = pnand %p3374_p0, %p134_p2 }
   0x6   : > { %p177_p4 = scmp.lt.s32.totalorder (!%p135_p3), %s4282_s9, 1  ;;  %s3600_s13 = sshll.u32 (!%p135_p3), %s4282_s9, 8 }
   0x7   : > { %138 = sbr.rel (%p135_p3) target bundleno = 4321 (0x10e1), region = 24  ;;  %s4335_s16 = scalar_lea.vmem (!%p135_p3), %s5217_s1, %s3600_s13 }
   0x8   : > { %v235_v0 = vld [vmem:[%s4335_s16] sm:$0xf] (!%p135_p3)  ;;  %v237_v1 = vld [vmem:[%s4335_s16 + $0x10] sm:$0xf] (!%p135_p3)  ;;  %v239_v3 = vld [vmem:[%s4335_s16 + $0x4] sm:$0xf] (!%p135_p3) }
   0x9   : > { %v249_v2 = vld [vmem:[%s4335_s16 + $0x1c] sm:$0xff] (!%p135_p3)   ;;  %236 = vst [vmem:[#allocation2] sm:$0xf] (!%p135_p3), %v235_v0  ;;  %238 = vst [vmem:[#allocation2 + $0x4] sm:$0xf] (!%p135_p3), %v237_v1 }
   0xa   : > { %v241_v4 = vld [vmem:[%s4335_s16 + $0x14] sm:$0xf] (!%p135_p3)  ;;  %v243_v5 = vld [vmem:[%s4335_s16 + $0x8] sm:$0xf] (!%p135_p3)  ;;  %250 = vst [vmem:[#allocation2 + $0x1c] sm:$0xff] (!%p135_p3), %v249_v2   ;;  %v265_v14 = vld [vmem:[%s4335_s16 + $0x3c] sm:$0xff] (!%p135_p3)  }
   0xb   : > { %240 = vst [vmem:[#allocation2 + $0x8] sm:$0xf] (!%p135_p3), %v239_v3  ;;  %242 = vst [vmem:[#allocation2 + $0xc] sm:$0xf] (!%p135_p3), %v241_v4  ;;  %v245_v6 = vld [vmem:[%s4335_s16 + $0x18] sm:$0xf] (!%p135_p3) }
   0xc   : > { %244 = vst [vmem:[#allocation2 + $0x10] sm:$0xf] (!%p135_p3), %v243_v5  ;;  %v247_v7 = vld [vmem:[%s4335_s16 + $0xc] sm:$0xf] (!%p135_p3)  ;;  %246 = vst [vmem:[#allocation2 + $0x14] sm:$0xf] (!%p135_p3), %v245_v6 }
   0xd   : > { %248 = vst [vmem:[#allocation2 + $0x18] sm:$0xf] (!%p135_p3), %v247_v7  ;;  %v253_v8 = vld [vmem:[%s4335_s16 + $0x30] sm:$0xf] (!%p135_p3)  ;;  %v255_v9 = vld [vmem:[%s4335_s16 + $0x24] sm:$0xf] (!%p135_p3) }
   0xe   : > { %s178_s17 = scalar_select %p177_p4, %s4282_s9, 1  ;;  %v257_v10 = vld [vmem:[%s4335_s16 + $0x34] sm:$0xf]  ;;  %254 = vst [vmem:[#allocation2 + $0x24] sm:$0xf] %v253_v8  ;;  %266 = vst [vmem:[#allocation2 + $0x3c] sm:$0xff] %v265_v14  }
   0xf   : > { %256 = vst [vmem:[#allocation2 + $0x28] sm:$0xf] %v255_v9  ;;  %258 = vst [vmem:[#allocation2 + $0x2c] sm:$0xf] %v257_v10  ;;  %v259_v11 = vld [vmem:[%s4335_s16 + $0x28] sm:$0xf] }
  0x10   : > { %s3598_s18 = sshll.u32 %s178_s17, 8  ;;  %s3599_s19 = sshll.u32 %s178_s17, 6  ;;  %v261_v12 = vld [vmem:[%s4335_s16 + $0x38] sm:$0xf]  ;;  %v263_v13 = vld [vmem:[%s4335_s16 + $0x2c] sm:$0xf] }
  0x11   : > { %s4349_s22 = scalar_lea.vmem %s5216_s0, %s3598_s18  ;;  %s4354_s25 = scalar_lea.vmem %s5218_s2, %s3599_s19  ;;  %260 = vst [vmem:[#allocation2 + $0x30] sm:$0xf] %v259_v11  ;;  %262 = vst [vmem:[#allocation2 + $0x34] sm:$0xf] %v261_v12  ;;  %v269_v15 = vld [vmem:[%s4335_s16 + $0x50] sm:$0xf] }
  0x12   : > { %264 = vst [vmem:[#allocation2 + $0x38] sm:$0xf] %v263_v13  ;;  %v271_v16 = vld [vmem:[%s4335_s16 + $0x44] sm:$0xf]  ;;  %270 = vst [vmem:[#allocation2 + $0x44] sm:$0xf] %v269_v15 }
  0x13   : > { %272 = vst [vmem:[#allocation2 + $0x48] sm:$0xf] %v271_v16  ;;  %v273_v17 = vld [vmem:[%s4335_s16 + $0x54] sm:$0xf]  ;;  %v275_v18 = vld [vmem:[%s4335_s16 + $0x48] sm:$0xf] }
  0x14   : > { %v277_v19 = vld [vmem:[%s4335_s16 + $0x58] sm:$0xf]  ;;  %274 = vst [vmem:[#allocation2 + $0x4c] sm:$0xf] %v273_v17  ;;  %276 = vst [vmem:[#allocation2 + $0x50] sm:$0xf] %v275_v18 }
  0x15   : > { %278 = vst [vmem:[#allocation2 + $0x54] sm:$0xf] %v277_v19  ;;  %v279_v20 = vld [vmem:[%s4335_s16 + $0x4c] sm:$0xf]  ;;  %v281_v21 = vld [vmem:[%s4335_s16 + $0x5c] sm:$0xff]  }
  0x16   : > { %v285_v22 = vld [vmem:[%s4335_s16 + $0x70] sm:$0xf]  ;;  %280 = vst [vmem:[#allocation2 + $0x58] sm:$0xf] %v279_v20  ;;  %282 = vst [vmem:[#allocation2 + $0x5c] sm:$0xff] %v281_v21   ;;  %v297_v28 = vld [vmem:[%s4335_s16 + $0x7c] sm:$0xff]  }
  0x17   : > { %286 = vst [vmem:[#allocation2 + $0x64] sm:$0xf] %v285_v22  ;;  %v287_v23 = vld [vmem:[%s4335_s16 + $0x64] sm:$0xf]  ;;  %v289_v24 = vld [vmem:[%s4335_s16 + $0x74] sm:$0xf] }
  0x18   : > { %v291_v25 = vld [vmem:[%s4335_s16 + $0x68] sm:$0xf]  ;;  %288 = vst [vmem:[#allocation2 + $0x68] sm:$0xf] %v287_v23  ;;  %290 = vst [vmem:[#allocation2 + $0x6c] sm:$0xf] %v289_v24 }
  0x19   : > { %292 = vst [vmem:[#allocation2 + $0x70] sm:$0xf] %v291_v25  ;;  %v293_v26 = vld [vmem:[%s4335_s16 + $0x78] sm:$0xf]  ;;  %v295_v27 = vld [vmem:[%s4335_s16 + $0x6c] sm:$0xf] }
  0x1a   : > { %294 = vst [vmem:[#allocation2 + $0x74] sm:$0xf] %v293_v26  ;;  %296 = vst [vmem:[#allocation2 + $0x78] sm:$0xf] %v295_v27  ;;  %v301_v29 = vld [vmem:[%s4335_s16 + $0x90] sm:$0xf] }
  0x1b   : > { %298 = vst [vmem:[#allocation2 + $0x7c] sm:$0xff] %v297_v28   ;;  %v303_v30 = vld [vmem:[%s4335_s16 + $0x84] sm:$0xf]  ;;  %v305_v31 = vld [vmem:[%s4335_s16 + $0x94] sm:$0xf]  ;;  %v313_v35 = vld [vmem:[%s4335_s16 + $0x9c] sm:$0xff]  }
  0x1c   : > { %302 = vst [vmem:[#allocation2 + $0x84] sm:$0xf] %v301_v29  ;;  %304 = vst [vmem:[#allocation2 + $0x88] sm:$0xf] %v303_v30  ;;  %v307_v32 = vld [vmem:[%s4335_s16 + $0x88] sm:$0xf] }
  0x1d   : > { %306 = vst [vmem:[#allocation2 + $0x8c] sm:$0xf] %v305_v31  ;;  %v309_v33 = vld [vmem:[%s4335_s16 + $0x98] sm:$0xf]  ;;  %v311_v34 = vld [vmem:[%s4335_s16 + $0x8c] sm:$0xf] }
  0x1e   : > { %308 = vst [vmem:[#allocation2 + $0x90] sm:$0xf] %v307_v32  ;;  %310 = vst [vmem:[#allocation2 + $0x94] sm:$0xf] %v309_v33  ;;  %v317_v36 = vld [vmem:[%s4335_s16 + $0xb0] sm:$0xf] }
  0x1f   : > { %312 = vst [vmem:[#allocation2 + $0x98] sm:$0xf] %v311_v34  ;;  %v319_v37 = vld [vmem:[%s4335_s16 + $0xa4] sm:$0xf]  ;;  %314 = vst [vmem:[#allocation2 + $0x9c] sm:$0xff] %v313_v35   ;;  %v329_v42 = vld [vmem:[%s4335_s16 + $0xbc] sm:$0xff]  }
  0x20   : > { %318 = vst [vmem:[#allocation2 + $0xa4] sm:$0xf] %v317_v36  ;;  %320 = vst [vmem:[#allocation2 + $0xa8] sm:$0xf] %v319_v37  ;;  %v321_v38 = vld [vmem:[%s4335_s16 + $0xb4] sm:$0xf] }
  0x21   : > { %v323_v39 = vld [vmem:[%s4335_s16 + $0xa8] sm:$0xf]  ;;  %v325_v40 = vld [vmem:[%s4335_s16 + $0xb8] sm:$0xf]  ;;  %322 = vst [vmem:[#allocation2 + $0xac] sm:$0xf] %v321_v38 }
  0x22   : > { %324 = vst [vmem:[#allocation2 + $0xb0] sm:$0xf] %v323_v39  ;;  %326 = vst [vmem:[#allocation2 + $0xb4] sm:$0xf] %v325_v40  ;;  %v327_v41 = vld [vmem:[%s4335_s16 + $0xac] sm:$0xf] }
  0x23   : > { %v333_v43 = vld [vmem:[%s4335_s16 + $0xd0] sm:$0xf]  ;;  %328 = vst [vmem:[#allocation2 + $0xb8] sm:$0xf] %v327_v41  ;;  %330 = vst [vmem:[#allocation2 + $0xbc] sm:$0xff] %v329_v42   ;;  %v345_v49 = vld [vmem:[%s4335_s16 + $0xdc] sm:$0xff]  }
  0x24   : > { %334 = vst [vmem:[#allocation2 + $0xc4] sm:$0xf] %v333_v43  ;;  %v335_v44 = vld [vmem:[%s4335_s16 + $0xc4] sm:$0xf]  ;;  %v337_v45 = vld [vmem:[%s4335_s16 + $0xd4] sm:$0xf] }
  0x25   : > { %v339_v46 = vld [vmem:[%s4335_s16 + $0xc8] sm:$0xf]  ;;  %336 = vst [vmem:[#allocation2 + $0xc8] sm:$0xf] %v335_v44  ;;  %338 = vst [vmem:[#allocation2 + $0xcc] sm:$0xf] %v337_v45 }
  0x26   : > { %340 = vst [vmem:[#allocation2 + $0xd0] sm:$0xf] %v339_v46  ;;  %v341_v47 = vld [vmem:[%s4335_s16 + $0xd8] sm:$0xf]  ;;  %v343_v48 = vld [vmem:[%s4335_s16 + $0xcc] sm:$0xf] }
  0x27   : > { %342 = vst [vmem:[#allocation2 + $0xd4] sm:$0xf] %v341_v47  ;;  %344 = vst [vmem:[#allocation2 + $0xd8] sm:$0xf] %v343_v48  ;;  %v349_v50 = vld [vmem:[%s4335_s16 + $0xf0] sm:$0xf] }
  0x28   : > { %346 = vst [vmem:[#allocation2 + $0xdc] sm:$0xff] %v345_v49   ;;  %v351_v51 = vld [vmem:[%s4335_s16 + $0xe4] sm:$0xf]  ;;  %v353_v52 = vld [vmem:[%s4335_s16 + $0xf4] sm:$0xf] }
  0x29   : > { %350 = vst [vmem:[#allocation2 + $0xe4] sm:$0xf] %v349_v50  ;;  %352 = vst [vmem:[#allocation2 + $0xe8] sm:$0xf] %v351_v51  ;;  %v355_v53 = vld [vmem:[%s4335_s16 + $0xe8] sm:$0xf] }
  0x2a   : > { %354 = vst [vmem:[#allocation2 + $0xec] sm:$0xf] %v353_v52  ;;  %v357_v54 = vld [vmem:[%s4335_s16 + $0xf8] sm:$0xf]  ;;  %v359_v55 = vld [vmem:[%s4335_s16 + $0xec] sm:$0xf] }
  0x2b   : > { %356 = vst [vmem:[#allocation2 + $0xf0] sm:$0xf] %v355_v53  ;;  %358 = vst [vmem:[#allocation2 + $0xf4] sm:$0xf] %v357_v54  ;;  %v361_v56 = vld [vmem:[%s4335_s16 + $0xfc] sm:$0xf] }
  0x2c   : > { %360 = vst [vmem:[#allocation2 + $0xf8] sm:$0xf] %v359_v55  ;;  %362 = vst [vmem:[#allocation2 + $0xfc] sm:$0xf] %v361_v56 }
  0x2d   : > { %521 = vsyncadd [#allocation5], 4096 }
  0x2e   : > { %4278 = dma.done.wait [#allocation5], 4096 }
  0x2f   : > { %4279 = vsyncadd [#allocation5], 4294963200  ;;  %v4292_v57 = vmov 0.0   ;;  %v4405_v58 = vld [vmem:[#allocation2] sm:$0xff]  ;;  %v4407_v59 = vld [vmem:[#allocation2 + $0x8] sm:$0xff]  ;;  %p3381_p5 = scmp.ne.s32.totalorder %s4282_s9, 0 }
  0x30   : > { %526 = vst [vmem:[#allocation3] sm:$0xff] %v4292_v57  ;;  %527 = vst [vmem:[#allocation3 + $0x8] sm:$0xff] %v4292_v57  ;;  %v4409_v60 = vld [vmem:[#allocation2 + $0x10] sm:$0xff]  ;;  %v4411_v61 = vld [vmem:[#allocation2 + $0x18] sm:$0xff]  ;;  %583 = vmatprep.subr.bf16.mxu0 (!%p3381_p5), %v4407_v59  ;;  %v4293_v26 = vmov (!%p3381_p5), 0  }
  0x31   : > { %528 = vst [vmem:[#allocation4] sm:$0xff] %v4292_v57  ;;  %529 = vst [vmem:[#allocation4 + $0x8] sm:$0xff] %v4292_v57  ;;  %v4413_v62 = vld [vmem:[#allocation2 + $0x20] sm:$0xff]  ;;  %v4415_v63 = vld [vmem:[#allocation2 + $0x28] sm:$0xff]  ;;  %626 = vmatprep.subr.bf16.mxu1 (!%p3381_p5), %v4411_v61  ;;  %584 = vmatpush1.bf16.msra.mxu0 (!%p3381_p5), %v4405_v58 }
  0x32   : > { %v4417_v0 = vld [vmem:[#allocation2 + $0x30] sm:$0xff]  ;;  %v4419_v1 = vld [vmem:[#allocation2 + $0x38] sm:$0xff]  ;;  %v4421_v2 = vld [vmem:[#allocation2 + $0x40] sm:$0xff]  ;;  %627 = vmatpush1.bf16.msra.mxu1 (!%p3381_p5), %v4409_v60  ;;  %585 = vmatprep.subr.bf16.mxu0 (!%p3381_p5), %v4415_v63 }
  0x33   : > { %v4423_v3 = vld [vmem:[#allocation2 + $0x48] sm:$0xff]  ;;  %v4425_v4 = vld [vmem:[#allocation2 + $0x50] sm:$0xff]  ;;  %v4427_v5 = vld [vmem:[#allocation2 + $0x58] sm:$0xff]  ;;  %628 = vmatprep.subr.bf16.mxu1 (!%p3381_p5), %v4419_v1  ;;  %615 = vmatprep.mubr.bf16.mxu0 (!%p3381_p5), %v4293_v26 }
  0x34   : > { %v4429_v6 = vld [vmem:[#allocation2 + $0x60] sm:$0xff]  ;;  %v4431_v7 = vld [vmem:[#allocation2 + $0x68] sm:$0xff]  ;;  %v4433_v8 = vld [vmem:[#allocation2 + $0x70] sm:$0xff]  ;;  %565 = sbr.rel (%p3381_p5) target bundleno = 2184 (0x888), region = 69  ;;  %658 = vmatprep.mubr.bf16.mxu1 (!%p3381_p5), %v4293_v26 }
  0x35   : > { %v4435_v9 = vld [vmem:[#allocation2 + $0x78] sm:$0xff]  ;;  %v4437_v10 = vld [vmem:[#allocation2 + $0x80] sm:$0xff]  ;;  %v4439_v11 = vld [vmem:[#allocation2 + $0x88] sm:$0xff]  ;;  %586 = vmatpush1.bf16.msra.mxu0 (!%p3381_p5), %v4413_v62 }
  0x36   : > { %v4441_v12 = vld [vmem:[#allocation2 + $0x90] sm:$0xff]  ;;  %v4443_v13 = vld [vmem:[#allocation2 + $0x98] sm:$0xff]  ;;  %v4445_v14 = vld [vmem:[#allocation2 + $0xa0] sm:$0xff]  ;;  %629 = vmatpush1.bf16.msra.mxu1 (!%p3381_p5), %v4417_v0  ;;  %587 = vmatprep.subr.bf16.mxu0 (!%p3381_p5), %v4423_v3 }
  0x37   : > { %v4447_v15 = vld [vmem:[#allocation2 + $0xa8] sm:$0xff]  ;;  %v4449_v16 = vld [vmem:[#allocation2 + $0xb0] sm:$0xff]  ;;  %v4451_v17 = vld [vmem:[#allocation2 + $0xb8] sm:$0xff]  ;;  %630 = vmatprep.subr.bf16.mxu1 (!%p3381_p5), %v4427_v5 }
  0x38   : > { %v4453_v18 = vld [vmem:[#allocation2 + $0xc0] sm:$0xff]  ;;  %v4455_v19 = vld [vmem:[#allocation2 + $0xc8] sm:$0xff]  ;;  %v4457_v20 = vld [vmem:[#allocation2 + $0xd0] sm:$0xff] }
  0x39   : > { %v4459_v21 = vld [vmem:[#allocation2 + $0xd8] sm:$0xff]  ;;  %v4461_v22 = vld [vmem:[#allocation2 + $0xe0] sm:$0xff]  ;;  %v4463_v23 = vld [vmem:[#allocation2 + $0xe8] sm:$0xff]  ;;  %588 = vmatpush1.bf16.msra.mxu0 (!%p3381_p5), %v4421_v2 }
  0x3a   : > { %v4465_v24 = vld [vmem:[#allocation2 + $0xf0] sm:$0xff]  ;;  %v4467_v25 = vld [vmem:[#allocation2 + $0xf8] sm:$0xff]  ;;  %631 = vmatpush1.bf16.msra.mxu1 (!%p3381_p5), %v4425_v4  ;;  %589 = vmatprep.subr.bf16.mxu0 (!%p3381_p5), %v4431_v7  ;;  %v566_v27 = vld [vmem:[#allocation3] sm:$0xff] (!%p3381_p5) }
  0x3b   : > { %632 = vmatprep.subr.bf16.mxu1 %v4435_v9  ;;  %v567_v28 = vld [vmem:[#allocation3 + $0x8] sm:$0xff]  ;;  %v570_v30 = vld [vmem:[%s4349_s22] sm:$0xff]  ;;  %v572_v31 = vld [vmem:[%s4349_s22 + $0x10] sm:$0xff] }
  0x3c   : > { %v582_v29 = vpack.c.bf16 %v567_v28, %v566_v27  ;;  %v574_v32 = vunpack.c.l.bf16 %v570_v30  ;;  %v575_v33 = vunpack.c.h.bf16 %v570_v30  ;;  %v578_v34 = vunpack.c.l.bf16 %v572_v31  ;;  %v571_v37 = vld [vmem:[%s4349_s22 + $0x8] sm:$0xff]  ;;  %v573_v44 = vld [vmem:[%s4349_s22 + $0x18] sm:$0xff] }
  0x3d   : > { %590 = vmatpush1.bf16.msra.mxu0 %v4429_v6  ;;  %v579_v36 = vunpack.c.h.bf16 %v572_v31  ;;  %v577_v49 = vunpack.c.h.bf16 %v571_v37  ;;  %v581_v54 = vunpack.c.h.bf16 %v573_v44  ;;  %v576_v56 = vunpack.c.l.bf16 %v571_v37 }
  0x3e   : > { %633 = vmatpush1.bf16.msra.mxu1 %v4433_v8  ;;  %591 = vmatprep.subr.bf16.mxu0 %v4439_v11  ;;  %v580_v27 = vunpack.c.l.bf16 %v573_v44 }
  0x3f   : > { %634 = vmatprep.subr.bf16.mxu1 %v4443_v13 }
  0x41   : > { %592 = vmatpush1.bf16.msra.mxu0 %v4437_v10 }
  0x42   : > { %635 = vmatpush1.bf16.msra.mxu1 %v4441_v12  ;;  %593 = vmatprep.subr.bf16.mxu0 %v4447_v15 }
  0x43   : > { %636 = vmatprep.subr.bf16.mxu1 %v4451_v17 }
  0x45   : > { %594 = vmatpush1.bf16.msra.mxu0 %v4445_v14 }
  0x46   : > { %637 = vmatpush1.bf16.msra.mxu1 %v4449_v16  ;;  %595 = vmatprep.subr.bf16.mxu0 %v4455_v19 }
  0x47   : > { %638 = vmatprep.subr.bf16.mxu1 %v4459_v21 }
  0x49   : > { %596 = vmatpush1.bf16.msra.mxu0 %v4453_v18 }
  0x4a   : > { %639 = vmatpush1.bf16.msra.mxu1 %v4457_v20  ;;  %597 = vmatprep.subr.bf16.mxu0 %v4463_v23 }
  0x4b   : > { %640 = vmatprep.subr.bf16.mxu1 %v4467_v25 }
  0x4d   : > { %598 = vmatpush1.bf16.msra.mxu0 %v4461_v22 }
  0x4e   : > { %641 = vmatpush1.bf16.msra.mxu1 %v4465_v24  ;;  %748 = vmatprep.subr.bf16.mxu0 %v4407_v59 }
  0x4f   : > { %791 = vmatprep.subr.bf16.mxu1 %v4411_v61 }
  0x50   : > { %616 = vmatmul.mubr.bf16.vlgmr.msra.gmra.mrb[0].mxu0 %v582_v29 }
  0x51   : > { %659 = vmatmul.mubr.bf16.vlgmr.msra.gmra.mrb[0].mxu1 %v582_v29  ;;  %749 = vmatpush1.bf16.msra.mxu0 %v4405_v58 }
  0x52   : > { %792 = vmatpush1.bf16.msra.mxu1 %v4409_v60  ;;  %750 = vmatprep.subr.bf16.mxu0 %v4415_v63 }
  0x53   : > { %793 = vmatprep.subr.bf16.mxu1 %v4419_v1  ;;  %780 = vmatprep.mubr.bf16.mxu0 %v4293_v26 }
  0x54   : > { %823 = vmatprep.mubr.bf16.mxu1 %v4293_v26 }
  0x55   : > { %751 = vmatpush1.bf16.msra.mxu0 %v4413_v62 }
  0x56   : > { %794 = vmatpush1.bf16.msra.mxu1 %v4417_v0  ;;  %752 = vmatprep.subr.bf16.mxu0 %v4423_v3 }
  0x57   : > { %795 = vmatprep.subr.bf16.mxu1 %v4427_v5 }
  0x59   : > { %753 = vmatpush1.bf16.msra.mxu0 %v4421_v2 }
  0x5a   : > { %796 = vmatpush1.bf16.msra.mxu1 %v4425_v4  ;;  %754 = vmatprep.subr.bf16.mxu0 %v4431_v7 }
  0x5b   : > { %797 = vmatprep.subr.bf16.mxu1 %v4435_v9 }
  0x5d   : > { %755 = vmatpush1.bf16.msra.mxu0 %v4429_v6 }
  0x5e   : > { %798 = vmatpush1.bf16.msra.mxu1 %v4433_v8  ;;  %756 = vmatprep.subr.bf16.mxu0 %v4439_v11 }
  0x5f   : > { %799 = vmatprep.subr.bf16.mxu1 %v4443_v13 }
  0x61   : > { %757 = vmatpush1.bf16.msra.mxu0 %v4437_v10 }
  0x62   : > { %800 = vmatpush1.bf16.msra.mxu1 %v4441_v12  ;;  %758 = vmatprep.subr.bf16.mxu0 %v4447_v15 }
  0x63   : > { %801 = vmatprep.subr.bf16.mxu1 %v4451_v17 }
  0x65   : > { %759 = vmatpush1.bf16.msra.mxu0 %v4445_v14 }
  0x66   : > { %802 = vmatpush1.bf16.msra.mxu1 %v4449_v16  ;;  %760 = vmatprep.subr.bf16.mxu0 %v4455_v19 }
  0x67   : > { %803 = vmatprep.subr.bf16.mxu1 %v4459_v21 }
  0x69   : > { %761 = vmatpush1.bf16.msra.mxu0 %v4453_v18 }
  0x6a   : > { %804 = vmatpush1.bf16.msra.mxu1 %v4457_v20  ;;  %762 = vmatprep.subr.bf16.mxu0 %v4463_v23 }
  0x6b   : > { %805 = vmatprep.subr.bf16.mxu1 %v4467_v25 }
  0x6d   : > { %763 = vmatpush1.bf16.msra.mxu0 %v4461_v22 }
  0x6e   : > { %806 = vmatpush1.bf16.msra.mxu1 %v4465_v24  ;;  %914 = vmatprep.subr.bf16.mxu0 %v4407_v59 }
  0x6f   : > { %957 = vmatprep.subr.bf16.mxu1 %v4411_v61 }
 0x123   : > { %v617_v35 = vpop.f32.mrb[0].mxu0 }
 0x124   : > { %v660_v38 = vpop.f32.mrb[0].mxu1  ;;  %v669_v39 = vadd.f32 %v617_v35, %v574_v32  ;;  %v619_v40 = vpop.f32.mrb[1].mxu0 }
 0x125   : > { %v662_v41 = vpop.f32.mrb[1].mxu1  ;;  %v670_v42 = vadd.f32 %v619_v40, %v575_v33  ;;  %v621_v43 = vpop.f32.mrb[2].mxu0  ;;  %v671_v29 = vadd.f32 %v660_v38, %v576_v56 }
 0x126   : > { %v664_v45 = vpop.f32.mrb[2].mxu1  ;;  %v3382_v46 = vmul.f32 -1.442695, %v669_v39  ;;  %v673_v47 = vadd.f32 %v621_v43, %v578_v34  ;;  %v623_v48 = vpop.f32.mrb[3].mxu0  ;;  %v672_v57 = vadd.f32 %v662_v41, %v577_v49 }
 0x127   : > { %v666_v50 = vpop.f32.mrb[3].mxu1  ;;  %v3384_v51 = vmul.f32 -1.442695, %v670_v42  ;;  %v674_v52 = vadd.f32 %v623_v48, %v579_v36  ;;  %v675_v31 = vadd.f32 %v664_v45, %v580_v27  ;;  %v568_v45 = vld [vmem:[#allocation4] sm:$0xff]  ;;  %v569_v48 = vld [vmem:[#allocation4 + $0x8] sm:$0xff] }
 0x128   : > { %3754 = vpow2.f32 %v3382_v46  ;;  %v3383_v53 = vmul.f32 -1.442695, %v673_v47  ;;  %v676_v28 = vadd.f32 %v666_v50, %v581_v54  ;;  %v3386_v30 = vmul.f32 -1.442695, %v672_v57 }
 0x129   : > { %3756 = vpow2.f32 %v3384_v51  ;;  %v3385_v55 = vmul.f32 -1.442695, %v674_v52 }
 0x12a   : > { %3758 = vpow2.f32 %v3383_v53  ;;  %v3387_v32 = vmul.f32 -1.442695, %v676_v28 }
 0x12b   : > { %3760 = vpow2.f32 %v3385_v55 }
 0x12c   : > { %3762 = vtanh.f32 %v671_v29 }
 0x12d   : > { %3764 = vpow2.f32 %v3386_v30 }
 0x12e   : > { %3766 = vtanh.f32 %v675_v31 }
 0x12f   : > { %3768 = vpow2.f32 %v3387_v32 }
 0x132   : > { %v3755_v33 = vpop.eup %3754 }
 0x133   : > { %v3757_v34 = vpop.eup %3756  ;;  %v683_v35 = vadd.f32 1.0, %v3755_v33 }
 0x134   : > { %v3759_v36 = vpop.eup %3758  ;;  %v695_v39 = vadd.f32 1.0, %v3757_v34 }
 0x135   : > { %v3761_v40 = vpop.eup %3760  ;;  %3770 = vrcp.f32 %v683_v35  ;;  %v684_v37 = vadd.f32 1.0, %v3759_v36  ;;  %v3390_v35 = vld [vmem:[%s4349_s22 + $0x20] sm:$0xff]  ;;  %v3392_v36 = vld [vmem:[%s4349_s22 + $0x30] sm:$0xff] }
 0x136   : > { %3772 = vrcp.f32 %v695_v39  ;;  %v696_v41 = vadd.f32 1.0, %v3761_v40  ;;  %v3763_v38 = vpop.eup %3762  ;;  %v740_v39 = vunpack.c.l.bf16 %v3390_v35  ;;  %v741_v40 = vunpack.c.h.bf16 %v3390_v35 }
 0x137   : > { %3774 = vrcp.f32 %v684_v37  ;;  %v3765_v42 = vpop.eup %3764  ;;  %v744_v37 = vunpack.c.l.bf16 %v3392_v36 }
 0x138   : > { %3776 = vrcp.f32 %v696_v41  ;;  %v3767_v43 = vpop.eup %3766  ;;  %v709_v50 = vadd.f32 1.0, %v3765_v42  ;;  %v745_v42 = vunpack.c.h.bf16 %v3392_v36 }
 0x139   : > { %v3769_v44 = vpop.eup %3768 }
 0x13a   : > { %v710_v55 = vadd.f32 1.0, %v3769_v44  ;;  %3778 = vrcp.f32 %v709_v50  ;;  %v3391_v44 = vld [vmem:[%s4349_s22 + $0x28] sm:$0xff] }
 0x13f   : > { %v3771_v46 = vpop.eup %3770 }
 0x140   : > { %v3773_v47 = vpop.eup %3772  ;;  %v717_v49 = vmul.f32 %v3771_v46, %v3763_v38 }
 0x141   : > { %v3775_v51 = vpop.eup %3774  ;;  %v715_v52 = vmul.f32 %v3773_v47, %v568_v45 }
 0x142   : > { %v3777_v53 = vpop.eup %3776  ;;  %v718_v54 = vmul.f32 %v3775_v51, %v3767_v43 }
 0x143   : > { %v716_v56 = vmul.f32 %v3777_v53, %v569_v48  ;;  %v4544_v57 = vadd.f32 %v717_v49, %v715_v52 }
 0x144   : > { %v3779_v28 = vpop.eup %3778 }
 0x145   : > { %3780 = vtanh.f32 %v4544_v57  ;;  %v4547_v27 = vadd.f32 %v718_v54, %v716_v56 }
 0x146   : > { %3782 = vrcp.f32 %v710_v55  ;;  %v743_v55 = vunpack.c.h.bf16 %v3391_v44 }
 0x147   : > { %3784 = vtanh.f32 %v4547_v27 }
 0x14f   : > { %v3781_v29 = vpop.eup %3780 }
 0x150   : > { %v3783_v30 = vpop.eup %3782  ;;  %v723_v32 = vmul.f32 %v3781_v29, %v3779_v28  ;;  %v3393_v29 = vld [vmem:[%s4349_s22 + $0x38] sm:$0xff] }
 0x151   : > { %v3785_v31 = vpop.eup %3784 }
 0x152   : > { %v724_v33 = vmul.f32 %v3785_v31, %v3783_v30  ;;  %v742_v31 = vunpack.c.l.bf16 %v3391_v44 }
 0x154   : > { %v725_v34 = vpack.c.bf16 %v724_v33, %v723_v32  ;;  %v747_v33 = vunpack.c.h.bf16 %v3393_v29 }
 0x156   : > { %3637 = vst [vmem:[%s4354_s25] sm:$0xff] %v725_v34   ;;  %781 = vmatmul.mubr.bf16.vlgmr.msra.gmra.mrb[4].mxu0 %v725_v34  ;;  %824 = vmatmul.mubr.bf16.vlgmr.msra.gmra.mrb[4].mxu1 %v725_v34  ;;  %v746_v34 = vunpack.c.l.bf16 %v3393_v29 }
 0x157   : > { %915 = vmatpush1.bf16.msra.mxu0 %v4405_v58  ;;  %958 = vmatpush1.bf16.msra.mxu1 %v4409_v60 }
 0x158   : > { %916 = vmatprep.subr.bf16.mxu0 %v4415_v63  ;;  %959 = vmatprep.subr.bf16.mxu1 %v4419_v1 }
 0x159   : > { %946 = vmatprep.mubr.bf16.mxu0 %v4293_v26  ;;  %989 = vmatprep.mubr.bf16.mxu1 %v4293_v26 }
 0x15b   : > { %917 = vmatpush1.bf16.msra.mxu0 %v4413_v62  ;;  %960 = vmatpush1.bf16.msra.mxu1 %v4417_v0 }
 0x15c   : > { %918 = vmatprep.subr.bf16.mxu0 %v4423_v3  ;;  %961 = vmatprep.subr.bf16.mxu1 %v4427_v5 }
 0x15f   : > { %919 = vmatpush1.bf16.msra.mxu0 %v4421_v2  ;;  %962 = vmatpush1.bf16.msra.mxu1 %v4425_v4 }
 0x160   : > { %920 = vmatprep.subr.bf16.mxu0 %v4431_v7  ;;  %963 = vmatprep.subr.bf16.mxu1 %v4435_v9 }
 0x163   : > { %921 = vmatpush1.bf16.msra.mxu0 %v4429_v6  ;;  %964 = vmatpush1.bf16.msra.mxu1 %v4433_v8 }
 0x164   : > { %922 = vmatprep.subr.bf16.mxu0 %v4439_v11  ;;  %965 = vmatprep.subr.bf16.mxu1 %v4443_v13 }
 0x167   : > { %923 = vmatpush1.bf16.msra.mxu0 %v4437_v10  ;;  %966 = vmatpush1.bf16.msra.mxu1 %v4441_v12 }
 0x168   : > { %924 = vmatprep.subr.bf16.mxu0 %v4447_v15  ;;  %967 = vmatprep.subr.bf16.mxu1 %v4451_v17 }
 0x16b   : > { %925 = vmatpush1.bf16.msra.mxu0 %v4445_v14  ;;  %968 = vmatpush1.bf16.msra.mxu1 %v4449_v16 }
 0x16c   : > { %926 = vmatprep.subr.bf16.mxu0 %v4455_v19  ;;  %969 = vmatprep.subr.bf16.mxu1 %v4459_v21 }
 0x16f   : > { %927 = vmatpush1.bf16.msra.mxu0 %v4453_v18  ;;  %970 = vmatpush1.bf16.msra.mxu1 %v4457_v20 }
 0x170   : > { %928 = vmatprep.subr.bf16.mxu0 %v4463_v23  ;;  %971 = vmatprep.subr.bf16.mxu1 %v4467_v25 }
 0x173   : > { %929 = vmatpush1.bf16.msra.mxu0 %v4461_v22  ;;  %972 = vmatpush1.bf16.msra.mxu1 %v4465_v24 }
 0x174   : > { %1080 = vmatprep.subr.bf16.mxu0 %v4407_v59  ;;  %1123 = vmatprep.subr.bf16.mxu1 %v4411_v61 }
 0x229   : > { %v782_v41 = vpop.f32.mrb[4].mxu0  ;;  %v825_v38 = vpop.f32.mrb[4].mxu1 }
 0x22a   : > { %v834_v43 = vadd.f32 %v782_v41, %v740_v39  ;;  %v784_v45 = vpop.f32.mrb[5].mxu0  ;;  %v827_v46 = vpop.f32.mrb[5].mxu1  ;;  %v836_v35 = vadd.f32 %v825_v38, %v742_v31 }
 0x22b   : > { %v835_v47 = vadd.f32 %v784_v45, %v741_v40  ;;  %v786_v48 = vpop.f32.mrb[6].mxu0  ;;  %v829_v49 = vpop.f32.mrb[6].mxu1  ;;  %v837_v32 = vadd.f32 %v827_v46, %v743_v55 }
 0x22c   : > { %v3394_v50 = vmul.f32 -1.442695, %v834_v43  ;;  %v838_v51 = vadd.f32 %v786_v48, %v744_v37  ;;  %v788_v52 = vpop.f32.mrb[7].mxu0  ;;  %v831_v53 = vpop.f32.mrb[7].mxu1  ;;  %v840_v40 = vadd.f32 %v829_v49, %v746_v34 }
 0x22d   : > { %v3396_v54 = vmul.f32 -1.442695, %v835_v47  ;;  %v839_v56 = vadd.f32 %v788_v52, %v745_v42  ;;  %v3398_v36 = vmul.f32 -1.442695, %v837_v32  ;;  %v841_v39 = vadd.f32 %v831_v53, %v747_v33 }
 0x22e   : > { %3786 = vpow2.f32 %v3394_v50  ;;  %v3395_v28 = vmul.f32 -1.442695, %v838_v51 }
 0x22f   : > { %3788 = vpow2.f32 %v3396_v54  ;;  %v3397_v30 = vmul.f32 -1.442695, %v839_v56  ;;  %v3399_v42 = vmul.f32 -1.442695, %v841_v39 }
 0x230   : > { %3790 = vpow2.f32 %v3395_v28 }
 0x231   : > { %3792 = vpow2.f32 %v3397_v30 }
 0x232   : > { %3794 = vtanh.f32 %v836_v35 }
 0x233   : > { %3796 = vpow2.f32 %v3398_v36 }
 0x234   : > { %3798 = vtanh.f32 %v840_v40 }
 0x238   : > { %v3787_v37 = vpop.eup %3786 }
 0x239   : > { %v3789_v41 = vpop.eup %3788  ;;  %v848_v43 = vadd.f32 1.0, %v3787_v37 }
 0x23a   : > { %v860_v45 = vadd.f32 1.0, %v3789_v41  ;;  %v3791_v47 = vpop.eup %3790 }
 0x23b   : > { %3800 = vrcp.f32 %v848_v43  ;;  %v849_v44 = vadd.f32 1.0, %v3791_v47  ;;  %v3793_v46 = vpop.eup %3792  ;;  %v3406_v43 = vld [vmem:[%s4349_s22 + $0x50] sm:$0xff] }
 0x23c   : > { %3802 = vrcp.f32 %v860_v45  ;;  %v861_v48 = vadd.f32 1.0, %v3793_v46  ;;  %v3795_v38 = vpop.eup %3794  ;;  %v910_v47 = vunpack.c.l.bf16 %v3406_v43 }
 0x23d   : > { %3804 = vpow2.f32 %v3399_v42  ;;  %v3797_v50 = vpop.eup %3796 }
 0x23e   : > { %3806 = vrcp.f32 %v849_v44  ;;  %v3799_v49 = vpop.eup %3798  ;;  %v874_v28 = vadd.f32 1.0, %v3797_v50  ;;  %v3405_v50 = vld [vmem:[%s4349_s22 + $0x48] sm:$0xff] }
 0x23f   : > { %3808 = vrcp.f32 %v861_v48  ;;  %v911_v48 = vunpack.c.h.bf16 %v3406_v43 }
 0x240   : > { %3810 = vrcp.f32 %v874_v28 }
 0x245   : > { %v3801_v51 = vpop.eup %3800 }
 0x246   : > { %v3803_v52 = vpop.eup %3802  ;;  %v882_v53 = vmul.f32 %v3801_v51, %v3795_v38 }
 0x247   : > { %v3805_v54 = vpop.eup %3804  ;;  %v880_v55 = vmul.f32 %v3803_v52, %v4544_v57 }
 0x248   : > { %v3807_v56 = vpop.eup %3806  ;;  %v875_v32 = vadd.f32 1.0, %v3805_v54 }
 0x249   : > { %v4590_v29 = vadd.f32 %v882_v53, %v880_v55  ;;  %v883_v30 = vmul.f32 %v3807_v56, %v3799_v49  ;;  %v3809_v31 = vpop.eup %3808 }
 0x24a   : > { %v881_v33 = vmul.f32 %v3809_v31, %v4547_v27  ;;  %v3811_v35 = vpop.eup %3810  ;;  %v3404_v27 = vld [vmem:[%s4349_s22 + $0x40] sm:$0xff] }
 0x24b   : > { %3812 = vtanh.f32 %v4590_v29  ;;  %v906_v42 = vunpack.c.l.bf16 %v3404_v27  ;;  %v907_v45 = vunpack.c.h.bf16 %v3404_v27 }
 0x24c   : > { %v4594_v34 = vadd.f32 %v883_v30, %v881_v33  ;;  %3814 = vrcp.f32 %v875_v32  ;;  %v909_v32 = vunpack.c.h.bf16 %v3405_v50 }
 0x24e   : > { %3816 = vtanh.f32 %v4594_v34 }
 0x255   : > { %v3813_v57 = vpop.eup %3812 }
 0x256   : > { %v3815_v36 = vpop.eup %3814  ;;  %v888_v40 = vmul.f32 %v3813_v57, %v3811_v35  ;;  %v3407_v57 = vld [vmem:[%s4349_s22 + $0x58] sm:$0xff] }
 0x258   : > { %v3817_v39 = vpop.eup %3816 }
 0x259   : > { %v889_v37 = vmul.f32 %v3817_v39, %v3815_v36  ;;  %v908_v39 = vunpack.c.l.bf16 %v3405_v50 }
 0x25b   : > { %v890_v41 = vpack.c.bf16 %v889_v37, %v888_v40  ;;  %v913_v37 = vunpack.c.h.bf16 %v3407_v57 }
 0x25d   : > { %3713 = vst [vmem:[%s4354_s25 + $0x8] sm:$0xff] %v890_v41   ;;  %947 = vmatmul.mubr.bf16.vlgmr.msra.gmra.mrb[8].mxu0 %v890_v41  ;;  %990 = vmatmul.mubr.bf16.vlgmr.msra.gmra.mrb[8].mxu1 %v890_v41  ;;  %v912_v41 = vunpack.c.l.bf16 %v3407_v57 }
 0x25e   : > { %1081 = vmatpush1.bf16.msra.mxu0 %v4405_v58  ;;  %1124 = vmatpush1.bf16.msra.mxu1 %v4409_v60 }
 0x25f   : > { %1082 = vmatprep.subr.bf16.mxu0 %v4415_v63  ;;  %1125 = vmatprep.subr.bf16.mxu1 %v4419_v1 }
 0x260   : > { %1112 = vmatprep.mubr.bf16.mxu0 %v4293_v26  ;;  %1155 = vmatprep.mubr.bf16.mxu1 %v4293_v26 }
 0x262   : > { %1083 = vmatpush1.bf16.msra.mxu0 %v4413_v62  ;;  %1126 = vmatpush1.bf16.msra.mxu1 %v4417_v0 }
 0x263   : > { %1084 = vmatprep.subr.bf16.mxu0 %v4423_v3  ;;  %1127 = vmatprep.subr.bf16.mxu1 %v4427_v5 }
 0x266   : > { %1085 = vmatpush1.bf16.msra.mxu0 %v4421_v2  ;;  %1128 = vmatpush1.bf16.msra.mxu1 %v4425_v4 }
 0x267   : > { %1086 = vmatprep.subr.bf16.mxu0 %v4431_v7  ;;  %1129 = vmatprep.subr.bf16.mxu1 %v4435_v9 }
 0x26a   : > { %1087 = vmatpush1.bf16.msra.mxu0 %v4429_v6  ;;  %1130 = vmatpush1.bf16.msra.mxu1 %v4433_v8 }
 0x26b   : > { %1088 = vmatprep.subr.bf16.mxu0 %v4439_v11  ;;  %1131 = vmatprep.subr.bf16.mxu1 %v4443_v13 }
 0x26e   : > { %1089 = vmatpush1.bf16.msra.mxu0 %v4437_v10  ;;  %1132 = vmatpush1.bf16.msra.mxu1 %v4441_v12 }
 0x26f   : > { %1090 = vmatprep.subr.bf16.mxu0 %v4447_v15  ;;  %1133 = vmatprep.subr.bf16.mxu1 %v4451_v17 }
 0x272   : > { %1091 = vmatpush1.bf16.msra.mxu0 %v4445_v14  ;;  %1134 = vmatpush1.bf16.msra.mxu1 %v4449_v16 }
 0x273   : > { %1092 = vmatprep.subr.bf16.mxu0 %v4455_v19  ;;  %1135 = vmatprep.subr.bf16.mxu1 %v4459_v21 }
 0x276   : > { %1093 = vmatpush1.bf16.msra.mxu0 %v4453_v18  ;;  %1136 = vmatpush1.bf16.msra.mxu1 %v4457_v20 }
 0x277   : > { %1094 = vmatprep.subr.bf16.mxu0 %v4463_v23  ;;  %1137 = vmatprep.subr.bf16.mxu1 %v4467_v25 }
 0x27a   : > { %1095 = vmatpush1.bf16.msra.mxu0 %v4461_v22  ;;  %1138 = vmatpush1.bf16.msra.mxu1 %v4465_v24 }
 0x27b   : > { %1246 = vmatprep.subr.bf16.mxu0 %v4407_v59  ;;  %1289 = vmatprep.subr.bf16.mxu1 %v4411_v61 }
 0x330   : > { %v948_v44 = vpop.f32.mrb[8].mxu0  ;;  %v991_v46 = vpop.f32.mrb[8].mxu1 }
 0x331   : > { %v1000_v38 = vadd.f32 %v948_v44, %v906_v42  ;;  %v950_v49 = vpop.f32.mrb[9].mxu0  ;;  %v993_v51 = vpop.f32.mrb[9].mxu1  ;;  %v1002_v27 = vadd.f32 %v991_v46, %v908_v39 }
 0x332   : > { %v1001_v52 = vadd.f32 %v950_v49, %v907_v45  ;;  %v952_v53 = vpop.f32.mrb[10].mxu0  ;;  %v995_v54 = vpop.f32.mrb[10].mxu1  ;;  %v1003_v40 = vadd.f32 %v993_v51, %v909_v32 }
 0x333   : > { %v3408_v55 = vmul.f32 -1.442695, %v1000_v38  ;;  %v1004_v56 = vadd.f32 %v952_v53, %v910_v47  ;;  %v954_v28 = vpop.f32.mrb[11].mxu0  ;;  %v997_v30 = vpop.f32.mrb[11].mxu1  ;;  %v1006_v45 = vadd.f32 %v995_v54, %v912_v41 }
 0x334   : > { %v3410_v31 = vmul.f32 -1.442695, %v1001_v52  ;;  %v1005_v33 = vadd.f32 %v954_v28, %v911_v48  ;;  %v3412_v43 = vmul.f32 -1.442695, %v1003_v40  ;;  %v1007_v42 = vadd.f32 %v997_v30, %v913_v37 }
 0x335   : > { %3818 = vpow2.f32 %v3408_v55  ;;  %v3409_v35 = vmul.f32 -1.442695, %v1004_v56 }
 0x336   : > { %3820 = vpow2.f32 %v3410_v31  ;;  %v3411_v36 = vmul.f32 -1.442695, %v1005_v33  ;;  %v3413_v48 = vmul.f32 -1.442695, %v1007_v42 }
 0x337   : > { %3822 = vpow2.f32 %v3409_v35 }
 0x338   : > { %3824 = vpow2.f32 %v3411_v36 }
 0x339   : > { %3826 = vtanh.f32 %v1002_v27 }
 0x33a   : > { %3828 = vpow2.f32 %v3412_v43 }
 0x33b   : > { %3830 = vtanh.f32 %v1006_v45 }
 0x33f   : > { %v3819_v47 = vpop.eup %3818 }
 0x340   : > { %v3821_v44 = vpop.eup %3820  ;;  %v1014_v38 = vadd.f32 1.0, %v3819_v47 }
 0x341   : > { %v1026_v49 = vadd.f32 1.0, %v3821_v44  ;;  %v3823_v52 = vpop.eup %3822 }
 0x342   : > { %3832 = vrcp.f32 %v1014_v38  ;;  %v1015_v50 = vadd.f32 1.0, %v3823_v52  ;;  %v3825_v51 = vpop.eup %3824  ;;  %v3420_v38 = vld [vmem:[%s4349_s22 + $0x70] sm:$0xff] }
 0x343   : > { %3834 = vrcp.f32 %v1026_v49  ;;  %v1027_v53 = vadd.f32 1.0, %v3825_v51  ;;  %v3827_v46 = vpop.eup %3826  ;;  %v1076_v52 = vunpack.c.l.bf16 %v3420_v38 }
 0x344   : > { %3836 = vpow2.f32 %v3413_v48  ;;  %v3829_v55 = vpop.eup %3828 }
 0x345   : > { %3838 = vrcp.f32 %v1015_v50  ;;  %v3831_v54 = vpop.eup %3830  ;;  %v1040_v35 = vadd.f32 1.0, %v3829_v55  ;;  %v3419_v55 = vld [vmem:[%s4349_s22 + $0x68] sm:$0xff] }
 0x346   : > { %3840 = vrcp.f32 %v1027_v53  ;;  %v1077_v53 = vunpack.c.h.bf16 %v3420_v38 }
 0x347   : > { %3842 = vrcp.f32 %v1040_v35 }
 0x34c   : > { %v3833_v56 = vpop.eup %3832 }
 0x34d   : > { %v3835_v28 = vpop.eup %3834  ;;  %v1048_v30 = vmul.f32 %v3833_v56, %v3827_v46 }
 0x34e   : > { %v3837_v31 = vpop.eup %3836  ;;  %v1046_v32 = vmul.f32 %v3835_v28, %v4590_v29 }
 0x34f   : > { %v3839_v33 = vpop.eup %3838  ;;  %v1041_v40 = vadd.f32 1.0, %v3837_v31 }
 0x350   : > { %v4637_v57 = vadd.f32 %v1048_v30, %v1046_v32  ;;  %v1049_v36 = vmul.f32 %v3839_v33, %v3831_v54  ;;  %v3841_v39 = vpop.eup %3840 }
 0x351   : > { %v1047_v37 = vmul.f32 %v3841_v39, %v4594_v34  ;;  %v3843_v27 = vpop.eup %3842  ;;  %v3418_v34 = vld [vmem:[%s4349_s22 + $0x60] sm:$0xff] }
 0x352   : > { %3844 = vtanh.f32 %v4637_v57  ;;  %v1072_v48 = vunpack.c.l.bf16 %v3418_v34  ;;  %v1073_v49 = vunpack.c.h.bf16 %v3418_v34 }
 0x353   : > { %v4641_v41 = vadd.f32 %v1049_v36, %v1047_v37  ;;  %3846 = vrcp.f32 %v1041_v40  ;;  %v1075_v40 = vunpack.c.h.bf16 %v3419_v55 }
 0x355   : > { %3848 = vtanh.f32 %v4641_v41 }
 0x35c   : > { %v3845_v29 = vpop.eup %3844 }
 0x35d   : > { %v3847_v43 = vpop.eup %3846  ;;  %v1054_v45 = vmul.f32 %v3845_v29, %v3843_v27  ;;  %v3421_v29 = vld [vmem:[%s4349_s22 + $0x78] sm:$0xff] }
 0x35f   : > { %v3849_v42 = vpop.eup %3848 }
 0x360   : > { %v1055_v47 = vmul.f32 %v3849_v42, %v3847_v43  ;;  %v1074_v42 = vunpack.c.l.bf16 %v3419_v55 }
 0x362   : > { %v1056_v44 = vpack.c.bf16 %v1055_v47, %v1054_v45  ;;  %v1079_v47 = vunpack.c.h.bf16 %v3421_v29 }
 0x364   : > { %3714 = vst [vmem:[%s4354_s25 + $0x10] sm:$0xff] %v1056_v44   ;;  %1113 = vmatmul.mubr.bf16.vlgmr.msra.gmra.mrb[12].mxu0 %v1056_v44  ;;  %1156 = vmatmul.mubr.bf16.vlgmr.msra.gmra.mrb[12].mxu1 %v1056_v44  ;;  %v1078_v44 = vunpack.c.l.bf16 %v3421_v29 }
 0x365   : > { %1247 = vmatpush1.bf16.msra.mxu0 %v4405_v58  ;;  %1290 = vmatpush1.bf16.msra.mxu1 %v4409_v60 }
 0x366   : > { %1248 = vmatprep.subr.bf16.mxu0 %v4415_v63  ;;  %1291 = vmatprep.subr.bf16.mxu1 %v4419_v1 }
 0x367   : > { %1278 = vmatprep.mubr.bf16.mxu0 %v4293_v26  ;;  %1321 = vmatprep.mubr.bf16.mxu1 %v4293_v26 }
 0x369   : > { %1249 = vmatpush1.bf16.msra.mxu0 %v4413_v62  ;;  %1292 = vmatpush1.bf16.msra.mxu1 %v4417_v0 }
 0x36a   : > { %1250 = vmatprep.subr.bf16.mxu0 %v4423_v3  ;;  %1293 = vmatprep.subr.bf16.mxu1 %v4427_v5 }
 0x36d   : > { %1251 = vmatpush1.bf16.msra.mxu0 %v4421_v2  ;;  %1294 = vmatpush1.bf16.msra.mxu1 %v4425_v4 }
 0x36e   : > { %1252 = vmatprep.subr.bf16.mxu0 %v4431_v7  ;;  %1295 = vmatprep.subr.bf16.mxu1 %v4435_v9 }
 0x371   : > { %1253 = vmatpush1.bf16.msra.mxu0 %v4429_v6  ;;  %1296 = vmatpush1.bf16.msra.mxu1 %v4433_v8 }
 0x372   : > { %1254 = vmatprep.subr.bf16.mxu0 %v4439_v11  ;;  %1297 = vmatprep.subr.bf16.mxu1 %v4443_v13 }
 0x375   : > { %1255 = vmatpush1.bf16.msra.mxu0 %v4437_v10  ;;  %1298 = vmatpush1.bf16.msra.mxu1 %v4441_v12 }
 0x376   : > { %1256 = vmatprep.subr.bf16.mxu0 %v4447_v15  ;;  %1299 = vmatprep.subr.bf16.mxu1 %v4451_v17 }
 0x379   : > { %1257 = vmatpush1.bf16.msra.mxu0 %v4445_v14  ;;  %1300 = vmatpush1.bf16.msra.mxu1 %v4449_v16 }
 0x37a   : > { %1258 = vmatprep.subr.bf16.mxu0 %v4455_v19  ;;  %1301 = vmatprep.subr.bf16.mxu1 %v4459_v21 }
 0x37d   : > { %1259 = vmatpush1.bf16.msra.mxu0 %v4453_v18  ;;  %1302 = vmatpush1.bf16.msra.mxu1 %v4457_v20 }
 0x37e   : > { %1260 = vmatprep.subr.bf16.mxu0 %v4463_v23  ;;  %1303 = vmatprep.subr.bf16.mxu1 %v4467_v25 }
 0x381   : > { %1261 = vmatpush1.bf16.msra.mxu0 %v4461_v22  ;;  %1304 = vmatpush1.bf16.msra.mxu1 %v4465_v24 }
 0x382   : > { %1412 = vmatprep.subr.bf16.mxu0 %v4407_v59  ;;  %1455 = vmatprep.subr.bf16.mxu1 %v4411_v61 }
 0x437   : > { %v1114_v50 = vpop.f32.mrb[12].mxu0  ;;  %v1157_v51 = vpop.f32.mrb[12].mxu1 }
 0x438   : > { %v1166_v46 = vadd.f32 %v1114_v50, %v1072_v48  ;;  %v1116_v54 = vpop.f32.mrb[13].mxu0  ;;  %v1159_v56 = vpop.f32.mrb[13].mxu1  ;;  %v1168_v34 = vadd.f32 %v1157_v51, %v1074_v42 }
 0x439   : > { %v1167_v28 = vadd.f32 %v1116_v54, %v1073_v49  ;;  %v1118_v30 = vpop.f32.mrb[14].mxu0  ;;  %v1161_v31 = vpop.f32.mrb[14].mxu1  ;;  %v1169_v45 = vadd.f32 %v1159_v56, %v1075_v40 }
 0x43a   : > { %v3422_v32 = vmul.f32 -1.442695, %v1166_v46  ;;  %v1170_v33 = vadd.f32 %v1118_v30, %v1076_v52  ;;  %v1120_v35 = vpop.f32.mrb[15].mxu0  ;;  %v1163_v36 = vpop.f32.mrb[15].mxu1  ;;  %v1172_v49 = vadd.f32 %v1161_v31, %v1078_v44 }
 0x43b   : > { %v3424_v39 = vmul.f32 -1.442695, %v1167_v28  ;;  %v1171_v37 = vadd.f32 %v1120_v35, %v1077_v53  ;;  %v3426_v38 = vmul.f32 -1.442695, %v1169_v45  ;;  %v1173_v48 = vadd.f32 %v1163_v36, %v1079_v47 }
 0x43c   : > { %3850 = vpow2.f32 %v3422_v32  ;;  %v3423_v27 = vmul.f32 -1.442695, %v1170_v33 }
 0x43d   : > { %3852 = vpow2.f32 %v3424_v39  ;;  %v3425_v43 = vmul.f32 -1.442695, %v1171_v37  ;;  %v3427_v53 = vmul.f32 -1.442695, %v1173_v48 }
 0x43e   : > { %3854 = vpow2.f32 %v3423_v27 }
 0x43f   : > { %3856 = vpow2.f32 %v3425_v43 }
 0x440   : > { %3858 = vtanh.f32 %v1168_v34 }
 0x441   : > { %3860 = vpow2.f32 %v3426_v38 }
 0x442   : > { %3862 = vtanh.f32 %v1172_v49 }
 0x446   : > { %v3851_v52 = vpop.eup %3850 }
 0x447   : > { %v3853_v50 = vpop.eup %3852  ;;  %v1180_v46 = vadd.f32 1.0, %v3851_v52 }
 0x448   : > { %v1192_v54 = vadd.f32 1.0, %v3853_v50  ;;  %v3855_v28 = vpop.eup %3854 }
 0x449   : > { %3864 = vrcp.f32 %v1180_v46  ;;  %v1181_v55 = vadd.f32 1.0, %v3855_v28  ;;  %v3857_v56 = vpop.eup %3856  ;;  %v3434_v46 = vld [vmem:[%s4349_s22 + $0x90] sm:$0xff] }
 0x44a   : > { %3866 = vrcp.f32 %v1192_v54  ;;  %v1193_v30 = vadd.f32 1.0, %v3857_v56  ;;  %v3859_v51 = vpop.eup %3858  ;;  %v1242_v28 = vunpack.c.l.bf16 %v3434_v46 }
 0x44b   : > { %3868 = vpow2.f32 %v3427_v53  ;;  %v3861_v32 = vpop.eup %3860 }
 0x44c   : > { %3870 = vrcp.f32 %v1181_v55  ;;  %v3863_v31 = vpop.eup %3862  ;;  %v1206_v27 = vadd.f32 1.0, %v3861_v32  ;;  %v3433_v32 = vld [vmem:[%s4349_s22 + $0x88] sm:$0xff] }
 0x44d   : > { %3872 = vrcp.f32 %v1193_v30  ;;  %v1243_v30 = vunpack.c.h.bf16 %v3434_v46 }
 0x44e   : > { %3874 = vrcp.f32 %v1206_v27 }
 0x453   : > { %v3865_v33 = vpop.eup %3864 }
 0x454   : > { %v3867_v35 = vpop.eup %3866  ;;  %v1214_v36 = vmul.f32 %v3865_v33, %v3859_v51 }
 0x455   : > { %v3869_v39 = vpop.eup %3868  ;;  %v1212_v40 = vmul.f32 %v3867_v35, %v4637_v57 }
 0x456   : > { %v3871_v37 = vpop.eup %3870  ;;  %v1207_v45 = vadd.f32 1.0, %v3869_v39 }
 0x457   : > { %v4684_v29 = vadd.f32 %v1214_v36, %v1212_v40  ;;  %v1215_v43 = vmul.f32 %v3871_v37, %v3863_v31  ;;  %v3873_v42 = vpop.eup %3872 }
 0x458   : > { %v1213_v47 = vmul.f32 %v3873_v42, %v4641_v41  ;;  %v3875_v34 = vpop.eup %3874  ;;  %v3432_v41 = vld [vmem:[%s4349_s22 + $0x80] sm:$0xff] }
 0x459   : > { %3876 = vtanh.f32 %v4684_v29  ;;  %v1238_v53 = vunpack.c.l.bf16 %v3432_v41  ;;  %v1239_v54 = vunpack.c.h.bf16 %v3432_v41 }
 0x45a   : > { %v4688_v44 = vadd.f32 %v1215_v43, %v1213_v47  ;;  %3878 = vrcp.f32 %v1207_v45  ;;  %v1241_v45 = vunpack.c.h.bf16 %v3433_v32 }
 0x45c   : > { %3880 = vtanh.f32 %v4688_v44 }
 0x463   : > { %v3877_v57 = vpop.eup %3876 }
 0x464   : > { %v3879_v38 = vpop.eup %3878  ;;  %v1220_v49 = vmul.f32 %v3877_v57, %v3875_v34  ;;  %v3435_v57 = vld [vmem:[%s4349_s22 + $0x98] sm:$0xff] }
 0x466   : > { %v3881_v48 = vpop.eup %3880 }
 0x467   : > { %v1221_v52 = vmul.f32 %v3881_v48, %v3879_v38  ;;  %v1240_v48 = vunpack.c.l.bf16 %v3433_v32 }
 0x469   : > { %v1222_v50 = vpack.c.bf16 %v1221_v52, %v1220_v49  ;;  %v1245_v52 = vunpack.c.h.bf16 %v3435_v57 }
 0x46b   : > { %3715 = vst [vmem:[%s4354_s25 + $0x18] sm:$0xff] %v1222_v50   ;;  %1279 = vmatmul.mubr.bf16.vlgmr.msra.gmra.mrb[16].mxu0 %v1222_v50  ;;  %1322 = vmatmul.mubr.bf16.vlgmr.msra.gmra.mrb[16].mxu1 %v1222_v50  ;;  %v1244_v50 = vunpack.c.l.bf16 %v3435_v57 }
 0x46c   : > { %1413 = vmatpush1.bf16.msra.mxu0 %v4405_v58  ;;  %1456 = vmatpush1.bf16.msra.mxu1 %v4409_v60 }
 0x46d   : > { %1414 = vmatprep.subr.bf16.mxu0 %v4415_v63  ;;  %1457 = vmatprep.subr.bf16.mxu1 %v4419_v1 }
 0x46e   : > { %1444 = vmatprep.mubr.bf16.mxu0 %v4293_v26  ;;  %1487 = vmatprep.mubr.bf16.mxu1 %v4293_v26 }
 0x470   : > { %1415 = vmatpush1.bf16.msra.mxu0 %v4413_v62  ;;  %1458 = vmatpush1.bf16.msra.mxu1 %v4417_v0 }
 0x471   : > { %1416 = vmatprep.subr.bf16.mxu0 %v4423_v3  ;;  %1459 = vmatprep.subr.bf16.mxu1 %v4427_v5 }
 0x474   : > { %1417 = vmatpush1.bf16.msra.mxu0 %v4421_v2  ;;  %1460 = vmatpush1.bf16.msra.mxu1 %v4425_v4 }
 0x475   : > { %1418 = vmatprep.subr.bf16.mxu0 %v4431_v7  ;;  %1461 = vmatprep.subr.bf16.mxu1 %v4435_v9 }
 0x478   : > { %1419 = vmatpush1.bf16.msra.mxu0 %v4429_v6  ;;  %1462 = vmatpush1.bf16.msra.mxu1 %v4433_v8 }
 0x479   : > { %1420 = vmatprep.subr.bf16.mxu0 %v4439_v11  ;;  %1463 = vmatprep.subr.bf16.mxu1 %v4443_v13 }
 0x47c   : > { %1421 = vmatpush1.bf16.msra.mxu0 %v4437_v10  ;;  %1464 = vmatpush1.bf16.msra.mxu1 %v4441_v12 }
 0x47d   : > { %1422 = vmatprep.subr.bf16.mxu0 %v4447_v15  ;;  %1465 = vmatprep.subr.bf16.mxu1 %v4451_v17 }
 0x480   : > { %1423 = vmatpush1.bf16.msra.mxu0 %v4445_v14  ;;  %1466 = vmatpush1.bf16.msra.mxu1 %v4449_v16 }
 0x481   : > { %1424 = vmatprep.subr.bf16.mxu0 %v4455_v19  ;;  %1467 = vmatprep.subr.bf16.mxu1 %v4459_v21 }
 0x484   : > { %1425 = vmatpush1.bf16.msra.mxu0 %v4453_v18  ;;  %1468 = vmatpush1.bf16.msra.mxu1 %v4457_v20 }
 0x485   : > { %1426 = vmatprep.subr.bf16.mxu0 %v4463_v23  ;;  %1469 = vmatprep.subr.bf16.mxu1 %v4467_v25 }
 0x488   : > { %1427 = vmatpush1.bf16.msra.mxu0 %v4461_v22  ;;  %1470 = vmatpush1.bf16.msra.mxu1 %v4465_v24 }
 0x489   : > { %1578 = vmatprep.subr.bf16.mxu0 %v4407_v59  ;;  %1621 = vmatprep.subr.bf16.mxu1 %v4411_v61 }
 0x53e   : > { %v1280_v55 = vpop.f32.mrb[16].mxu0  ;;  %v1323_v56 = vpop.f32.mrb[16].mxu1 }
 0x53f   : > { %v1332_v51 = vadd.f32 %v1280_v55, %v1238_v53  ;;  %v1282_v31 = vpop.f32.mrb[17].mxu0  ;;  %v1325_v33 = vpop.f32.mrb[17].mxu1  ;;  %v1334_v41 = vadd.f32 %v1323_v56, %v1240_v48 }
 0x540   : > { %v1333_v35 = vadd.f32 %v1282_v31, %v1239_v54  ;;  %v1284_v36 = vpop.f32.mrb[18].mxu0  ;;  %v1327_v39 = vpop.f32.mrb[18].mxu1  ;;  %v1335_v49 = vadd.f32 %v1325_v33, %v1241_v45 }
 0x541   : > { %v3436_v40 = vmul.f32 -1.442695, %v1332_v51  ;;  %v1336_v37 = vadd.f32 %v1284_v36, %v1242_v28  ;;  %v1286_v27 = vpop.f32.mrb[19].mxu0  ;;  %v1329_v43 = vpop.f32.mrb[19].mxu1  ;;  %v1338_v54 = vadd.f32 %v1327_v39, %v1244_v50 }
 0x542   : > { %v3438_v42 = vmul.f32 -1.442695, %v1333_v35  ;;  %v1337_v47 = vadd.f32 %v1286_v27, %v1243_v30  ;;  %v3440_v46 = vmul.f32 -1.442695, %v1335_v49  ;;  %v1339_v53 = vadd.f32 %v1329_v43, %v1245_v52 }
 0x543   : > { %3882 = vpow2.f32 %v3436_v40  ;;  %v3437_v34 = vmul.f32 -1.442695, %v1336_v37 }
 0x544   : > { %3884 = vpow2.f32 %v3438_v42  ;;  %v3439_v38 = vmul.f32 -1.442695, %v1337_v47  ;;  %v3441_v30 = vmul.f32 -1.442695, %v1339_v53 }
 0x545   : > { %3886 = vpow2.f32 %v3437_v34 }
 0x546   : > { %3888 = vpow2.f32 %v3439_v38 }
 0x547   : > { %3890 = vtanh.f32 %v1334_v41 }
 0x548   : > { %3892 = vpow2.f32 %v3440_v46 }
 0x549   : > { %3894 = vtanh.f32 %v1338_v54 }
 0x54d   : > { %v3883_v28 = vpop.eup %3882 }
 0x54e   : > { %v3885_v55 = vpop.eup %3884  ;;  %v1346_v51 = vadd.f32 1.0, %v3883_v28 }
 0x54f   : > { %v1358_v31 = vadd.f32 1.0, %v3885_v55  ;;  %v3887_v35 = vpop.eup %3886 }
 0x550   : > { %3896 = vrcp.f32 %v1346_v51  ;;  %v1347_v32 = vadd.f32 1.0, %v3887_v35  ;;  %v3889_v33 = vpop.eup %3888  ;;  %v3448_v51 = vld [vmem:[%s4349_s22 + $0xb0] sm:$0xff] }
 0x551   : > { %3898 = vrcp.f32 %v1358_v31  ;;  %v1359_v36 = vadd.f32 1.0, %v3889_v33  ;;  %v3891_v56 = vpop.eup %3890  ;;  %v1408_v35 = vunpack.c.l.bf16 %v3448_v51 }
 0x552   : > { %3900 = vpow2.f32 %v3441_v30  ;;  %v3893_v40 = vpop.eup %3892 }
 0x553   : > { %3902 = vrcp.f32 %v1347_v32  ;;  %v3895_v39 = vpop.eup %3894  ;;  %v1372_v34 = vadd.f32 1.0, %v3893_v40  ;;  %v3447_v40 = vld [vmem:[%s4349_s22 + $0xa8] sm:$0xff] }
 0x554   : > { %3904 = vrcp.f32 %v1359_v36  ;;  %v1409_v36 = vunpack.c.h.bf16 %v3448_v51 }
 0x555   : > { %3906 = vrcp.f32 %v1372_v34 }
 0x55a   : > { %v3897_v37 = vpop.eup %3896 }
 0x55b   : > { %v3899_v27 = vpop.eup %3898  ;;  %v1380_v43 = vmul.f32 %v3897_v37, %v3891_v56 }
 0x55c   : > { %v3901_v42 = vpop.eup %3900  ;;  %v1378_v45 = vmul.f32 %v3899_v27, %v4684_v29 }
 0x55d   : > { %v3903_v47 = vpop.eup %3902  ;;  %v1373_v49 = vadd.f32 1.0, %v3901_v42 }
 0x55e   : > { %v4731_v57 = vadd.f32 %v1380_v43, %v1378_v45  ;;  %v1381_v38 = vmul.f32 %v3903_v47, %v3895_v39  ;;  %v3905_v48 = vpop.eup %3904 }
 0x55f   : > { %v1379_v52 = vmul.f32 %v3905_v48, %v4688_v44  ;;  %v3907_v41 = vpop.eup %3906  ;;  %v3446_v44 = vld [vmem:[%s4349_s22 + $0xa0] sm:$0xff] }
 0x560   : > { %3908 = vtanh.f32 %v4731_v57  ;;  %v1404_v30 = vunpack.c.l.bf16 %v3446_v44  ;;  %v1405_v31 = vunpack.c.h.bf16 %v3446_v44 }
 0x561   : > { %v4735_v50 = vadd.f32 %v1381_v38, %v1379_v52  ;;  %3910 = vrcp.f32 %v1373_v49  ;;  %v1407_v49 = vunpack.c.h.bf16 %v3447_v40 }
 0x563   : > { %3912 = vtanh.f32 %v4735_v50 }
 0x56a   : > { %v3909_v29 = vpop.eup %3908 }
 0x56b   : > { %v3911_v46 = vpop.eup %3910  ;;  %v1386_v54 = vmul.f32 %v3909_v29, %v3907_v41  ;;  %v3449_v29 = vld [vmem:[%s4349_s22 + $0xb8] sm:$0xff] }
 0x56d   : > { %v3913_v53 = vpop.eup %3912 }
 0x56e   : > { %v1387_v28 = vmul.f32 %v3913_v53, %v3911_v46  ;;  %v1406_v53 = vunpack.c.l.bf16 %v3447_v40 }
 0x570   : > { %v1388_v55 = vpack.c.bf16 %v1387_v28, %v1386_v54  ;;  %v1411_v28 = vunpack.c.h.bf16 %v3449_v29 }
 0x572   : > { %3716 = vst [vmem:[%s4354_s25 + $0x20] sm:$0xff] %v1388_v55   ;;  %1445 = vmatmul.mubr.bf16.vlgmr.msra.gmra.mrb[20].mxu0 %v1388_v55  ;;  %1488 = vmatmul.mubr.bf16.vlgmr.msra.gmra.mrb[20].mxu1 %v1388_v55  ;;  %v1410_v55 = vunpack.c.l.bf16 %v3449_v29 }
 0x573   : > { %1579 = vmatpush1.bf16.msra.mxu0 %v4405_v58  ;;  %1622 = vmatpush1.bf16.msra.mxu1 %v4409_v60 }
 0x574   : > { %1580 = vmatprep.subr.bf16.mxu0 %v4415_v63  ;;  %1623 = vmatprep.subr.bf16.mxu1 %v4419_v1 }
 0x575   : > { %1610 = vmatprep.mubr.bf16.mxu0 %v4293_v26  ;;  %1653 = vmatprep.mubr.bf16.mxu1 %v4293_v26 }
 0x577   : > { %1581 = vmatpush1.bf16.msra.mxu0 %v4413_v62  ;;  %1624 = vmatpush1.bf16.msra.mxu1 %v4417_v0 }
 0x578   : > { %1582 = vmatprep.subr.bf16.mxu0 %v4423_v3  ;;  %1625 = vmatprep.subr.bf16.mxu1 %v4427_v5 }
 0x57b   : > { %1583 = vmatpush1.bf16.msra.mxu0 %v4421_v2  ;;  %1626 = vmatpush1.bf16.msra.mxu1 %v4425_v4 }
 0x57c   : > { %1584 = vmatprep.subr.bf16.mxu0 %v4431_v7  ;;  %1627 = vmatprep.subr.bf16.mxu1 %v4435_v9 }
 0x57f   : > { %1585 = vmatpush1.bf16.msra.mxu0 %v4429_v6  ;;  %1628 = vmatpush1.bf16.msra.mxu1 %v4433_v8 }
 0x580   : > { %1586 = vmatprep.subr.bf16.mxu0 %v4439_v11  ;;  %1629 = vmatprep.subr.bf16.mxu1 %v4443_v13 }
 0x583   : > { %1587 = vmatpush1.bf16.msra.mxu0 %v4437_v10  ;;  %1630 = vmatpush1.bf16.msra.mxu1 %v4441_v12 }
 0x584   : > { %1588 = vmatprep.subr.bf16.mxu0 %v4447_v15  ;;  %1631 = vmatprep.subr.bf16.mxu1 %v4451_v17 }
 0x587   : > { %1589 = vmatpush1.bf16.msra.mxu0 %v4445_v14  ;;  %1632 = vmatpush1.bf16.msra.mxu1 %v4449_v16 }
 0x588   : > { %1590 = vmatprep.subr.bf16.mxu0 %v4455_v19  ;;  %1633 = vmatprep.subr.bf16.mxu1 %v4459_v21 }
 0x58b   : > { %1591 = vmatpush1.bf16.msra.mxu0 %v4453_v18  ;;  %1634 = vmatpush1.bf16.msra.mxu1 %v4457_v20 }
 0x58c   : > { %1592 = vmatprep.subr.bf16.mxu0 %v4463_v23  ;;  %1635 = vmatprep.subr.bf16.mxu1 %v4467_v25 }
 0x58f   : > { %1593 = vmatpush1.bf16.msra.mxu0 %v4461_v22  ;;  %1636 = vmatpush1.bf16.msra.mxu1 %v4465_v24 }
 0x590   : > { %1744 = vmatprep.subr.bf16.mxu0 %v4407_v59  ;;  %1787 = vmatprep.subr.bf16.mxu1 %v4411_v61 }
 0x645   : > { %v1446_v32 = vpop.f32.mrb[20].mxu0  ;;  %v1489_v33 = vpop.f32.mrb[20].mxu1 }
 0x646   : > { %v1498_v56 = vadd.f32 %v1446_v32, %v1404_v30  ;;  %v1448_v39 = vpop.f32.mrb[21].mxu0  ;;  %v1491_v37 = vpop.f32.mrb[21].mxu1  ;;  %v1500_v44 = vadd.f32 %v1489_v33, %v1406_v53 }
 0x647   : > { %v1499_v27 = vadd.f32 %v1448_v39, %v1405_v31  ;;  %v1450_v43 = vpop.f32.mrb[22].mxu0  ;;  %v1493_v42 = vpop.f32.mrb[22].mxu1  ;;  %v1501_v54 = vadd.f32 %v1491_v37, %v1407_v49 }
 0x648   : > { %v3450_v45 = vmul.f32 -1.442695, %v1498_v56  ;;  %v1502_v47 = vadd.f32 %v1450_v43, %v1408_v35  ;;  %v1452_v34 = vpop.f32.mrb[23].mxu0  ;;  %v1495_v38 = vpop.f32.mrb[23].mxu1  ;;  %v1504_v31 = vadd.f32 %v1493_v42, %v1410_v55 }
 0x649   : > { %v3452_v48 = vmul.f32 -1.442695, %v1499_v27  ;;  %v1503_v52 = vadd.f32 %v1452_v34, %v1409_v36  ;;  %v3454_v51 = vmul.f32 -1.442695, %v1501_v54  ;;  %v1505_v30 = vadd.f32 %v1495_v38, %v1411_v28 }
 0x64a   : > { %3914 = vpow2.f32 %v3450_v45  ;;  %v3451_v41 = vmul.f32 -1.442695, %v1502_v47 }
 0x64b   : > { %3916 = vpow2.f32 %v3452_v48  ;;  %v3453_v46 = vmul.f32 -1.442695, %v1503_v52  ;;  %v3455_v36 = vmul.f32 -1.442695, %v1505_v30 }
 0x64c   : > { %3918 = vpow2.f32 %v3451_v41 }
 0x64d   : > { %3920 = vpow2.f32 %v3453_v46 }
 0x64e   : > { %3922 = vtanh.f32 %v1500_v44 }
 0x64f   : > { %3924 = vpow2.f32 %v3454_v51 }
 0x650   : > { %3926 = vtanh.f32 %v1504_v31 }
 0x654   : > { %v3915_v35 = vpop.eup %3914 }
 0x655   : > { %v3917_v32 = vpop.eup %3916  ;;  %v1512_v56 = vadd.f32 1.0, %v3915_v35 }
 0x656   : > { %v1524_v39 = vadd.f32 1.0, %v3917_v32  ;;  %v3919_v27 = vpop.eup %3918 }
 0x657   : > { %3928 = vrcp.f32 %v1512_v56  ;;  %v1513_v40 = vadd.f32 1.0, %v3919_v27  ;;  %v3921_v37 = vpop.eup %3920 }
 0x658   : > { %3930 = vrcp.f32 %v1524_v39  ;;  %v1525_v43 = vadd.f32 1.0, %v3921_v37  ;;  %v3923_v33 = vpop.eup %3922 }
 0x659   : > { %3932 = vpow2.f32 %v3455_v36  ;;  %v3925_v45 = vpop.eup %3924 }
 0x65a   : > { %3934 = vrcp.f32 %v1513_v40  ;;  %v3927_v42 = vpop.eup %3926  ;;  %v1538_v41 = vadd.f32 1.0, %v3925_v45 }
 0x65b   : > { %3936 = vrcp.f32 %v1525_v43 }
 0x65c   : > { %3938 = vrcp.f32 %v1538_v41 }
 0x661   : > { %v3929_v47 = vpop.eup %3928 }
 0x662   : > { %v3931_v34 = vpop.eup %3930  ;;  %v1546_v38 = vmul.f32 %v3929_v47, %v3923_v33  ;;  %v3461_v33 = vld [vmem:[%s4349_s22 + $0xc8] sm:$0xff] }
 0x663   : > { %v3933_v48 = vpop.eup %3932  ;;  %v1544_v49 = vmul.f32 %v3931_v34, %v4731_v57 }
 0x664   : > { %v3935_v52 = vpop.eup %3934  ;;  %v1539_v54 = vadd.f32 1.0, %v3933_v48 }
 0x665   : > { %v4778_v29 = vadd.f32 %v1546_v38, %v1544_v49  ;;  %v1547_v46 = vmul.f32 %v3935_v52, %v3927_v42  ;;  %v3937_v53 = vpop.eup %3936 }
 0x666   : > { %v1545_v28 = vmul.f32 %v3937_v53, %v4735_v50  ;;  %v3939_v44 = vpop.eup %3938  ;;  %v3462_v50 = vld [vmem:[%s4349_s22 + $0xd0] sm:$0xff]  ;;  %v1573_v53 = vunpack.c.h.bf16 %v3461_v33 }
 0x667   : > { %3940 = vtanh.f32 %v4778_v29  ;;  %v1574_v39 = vunpack.c.l.bf16 %v3462_v50  ;;  %v1575_v37 = vunpack.c.h.bf16 %v3462_v50 }
 0x668   : > { %v4782_v55 = vadd.f32 %v1547_v46, %v1545_v28  ;;  %3942 = vrcp.f32 %v1539_v54 }
 0x66a   : > { %3944 = vtanh.f32 %v4782_v55 }
 0x671   : > { %v3941_v57 = vpop.eup %3940 }
 0x672   : > { %v3943_v51 = vpop.eup %3942  ;;  %v1552_v31 = vmul.f32 %v3941_v57, %v3939_v44  ;;  %v3463_v44 = vld [vmem:[%s4349_s22 + $0xd8] sm:$0xff] }
 0x674   : > { %v3945_v30 = vpop.eup %3944 }
 0x675   : > { %v1553_v35 = vmul.f32 %v3945_v30, %v3943_v51  ;;  %v1572_v51 = vunpack.c.l.bf16 %v3461_v33 }
 0x677   : > { %v1554_v32 = vpack.c.bf16 %v1553_v35, %v1552_v31  ;;  %v1577_v31 = vunpack.c.h.bf16 %v3463_v44  ;;  %v1576_v35 = vunpack.c.l.bf16 %v3463_v44 }
 0x679   : > { %3717 = vst [vmem:[%s4354_s25 + $0x28] sm:$0xff] %v1554_v32   ;;  %1611 = vmatmul.mubr.bf16.vlgmr.msra.gmra.mrb[24].mxu0 %v1554_v32  ;;  %1654 = vmatmul.mubr.bf16.vlgmr.msra.gmra.mrb[24].mxu1 %v1554_v32 }
 0x67a   : > { %1745 = vmatpush1.bf16.msra.mxu0 %v4405_v58  ;;  %1788 = vmatpush1.bf16.msra.mxu1 %v4409_v60 }
 0x67b   : > { %1746 = vmatprep.subr.bf16.mxu0 %v4415_v63  ;;  %1789 = vmatprep.subr.bf16.mxu1 %v4419_v1 }
 0x67c   : > { %1776 = vmatprep.mubr.bf16.mxu0 %v4293_v26  ;;  %1819 = vmatprep.mubr.bf16.mxu1 %v4293_v26  ;;  %v3460_v26 = vld [vmem:[%s4349_s22 + $0xc0] sm:$0xff] }
 0x67d   : > { %v1570_v56 = vunpack.c.l.bf16 %v3460_v26  ;;  %v1571_v36 = vunpack.c.h.bf16 %v3460_v26 }
 0x67e   : > { %1747 = vmatpush1.bf16.msra.mxu0 %v4413_v62  ;;  %1790 = vmatpush1.bf16.msra.mxu1 %v4417_v0 }
 0x67f   : > { %1748 = vmatprep.subr.bf16.mxu0 %v4423_v3  ;;  %1791 = vmatprep.subr.bf16.mxu1 %v4427_v5 }
 0x682   : > { %1749 = vmatpush1.bf16.msra.mxu0 %v4421_v2  ;;  %1792 = vmatpush1.bf16.msra.mxu1 %v4425_v4 }
 0x683   : > { %1750 = vmatprep.subr.bf16.mxu0 %v4431_v7  ;;  %1793 = vmatprep.subr.bf16.mxu1 %v4435_v9 }
 0x686   : > { %1751 = vmatpush1.bf16.msra.mxu0 %v4429_v6  ;;  %1794 = vmatpush1.bf16.msra.mxu1 %v4433_v8 }
 0x687   : > { %1752 = vmatprep.subr.bf16.mxu0 %v4439_v11  ;;  %1795 = vmatprep.subr.bf16.mxu1 %v4443_v13 }
 0x68a   : > { %1753 = vmatpush1.bf16.msra.mxu0 %v4437_v10  ;;  %1796 = vmatpush1.bf16.msra.mxu1 %v4441_v12 }
 0x68b   : > { %1754 = vmatprep.subr.bf16.mxu0 %v4447_v15  ;;  %1797 = vmatprep.subr.bf16.mxu1 %v4451_v17 }
 0x68e   : > { %1755 = vmatpush1.bf16.msra.mxu0 %v4445_v14  ;;  %1798 = vmatpush1.bf16.msra.mxu1 %v4449_v16 }
 0x68f   : > { %1756 = vmatprep.subr.bf16.mxu0 %v4455_v19  ;;  %1799 = vmatprep.subr.bf16.mxu1 %v4459_v21 }
 0x692   : > { %1757 = vmatpush1.bf16.msra.mxu0 %v4453_v18  ;;  %1800 = vmatpush1.bf16.msra.mxu1 %v4457_v20 }
 0x693   : > { %1758 = vmatprep.subr.bf16.mxu0 %v4463_v23  ;;  %1801 = vmatprep.subr.bf16.mxu1 %v4467_v25 }
 0x696   : > { %1759 = vmatpush1.bf16.msra.mxu0 %v4461_v22  ;;  %1802 = vmatpush1.bf16.msra.mxu1 %v4465_v24 }
 0x74c   : > { %v1612_v27 = vpop.f32.mrb[24].mxu0  ;;  %v1655_v40 = vpop.f32.mrb[24].mxu1 }
 0x74d   : > { %v1664_v43 = vadd.f32 %v1612_v27, %v1570_v56  ;;  %v1614_v45 = vpop.f32.mrb[25].mxu0  ;;  %v1657_v42 = vpop.f32.mrb[25].mxu1  ;;  %v1666_v32 = vadd.f32 %v1655_v40, %v1572_v51 }
 0x74e   : > { %v1665_v47 = vadd.f32 %v1614_v45, %v1571_v36  ;;  %v1616_v34 = vpop.f32.mrb[26].mxu0  ;;  %v1659_v38 = vpop.f32.mrb[26].mxu1  ;;  %v1667_v30 = vadd.f32 %v1657_v42, %v1573_v53 }
 0x74f   : > { %v3464_v48 = vmul.f32 -1.442695, %v1664_v43  ;;  %v1668_v49 = vadd.f32 %v1616_v34, %v1574_v39  ;;  %v1618_v52 = vpop.f32.mrb[27].mxu0  ;;  %v1661_v41 = vpop.f32.mrb[27].mxu1  ;;  %v1670_v56 = vadd.f32 %v1659_v38, %v1576_v35 }
 0x750   : > { %v3466_v46 = vmul.f32 -1.442695, %v1665_v47  ;;  %v1669_v54 = vadd.f32 %v1618_v52, %v1575_v37  ;;  %v3468_v26 = vmul.f32 -1.442695, %v1667_v30  ;;  %v1671_v50 = vadd.f32 %v1661_v41, %v1577_v31 }
 0x751   : > { %3946 = vpow2.f32 %v3464_v48  ;;  %v3465_v28 = vmul.f32 -1.442695, %v1668_v49 }
 0x752   : > { %3948 = vpow2.f32 %v3466_v46  ;;  %v3467_v57 = vmul.f32 -1.442695, %v1669_v54  ;;  %v3469_v37 = vmul.f32 -1.442695, %v1671_v50 }
 0x753   : > { %3950 = vpow2.f32 %v3465_v28 }
 0x754   : > { %3952 = vpow2.f32 %v3467_v57 }
 0x755   : > { %3954 = vtanh.f32 %v1666_v32 }
 0x756   : > { %3956 = vpow2.f32 %v3468_v26 }
 0x757   : > { %3958 = vtanh.f32 %v1670_v56 }
 0x75b   : > { %v3947_v36 = vpop.eup %3946 }
 0x75c   : > { %v3949_v39 = vpop.eup %3948  ;;  %v1678_v27 = vadd.f32 1.0, %v3947_v36 }
 0x75d   : > { %v1690_v43 = vadd.f32 1.0, %v3949_v39  ;;  %v3951_v45 = vpop.eup %3950  ;;  %v3476_v39 = vld [vmem:[%s4349_s22 + $0xf0] sm:$0xff] }
 0x75e   : > { %3960 = vrcp.f32 %v1678_v27  ;;  %v1679_v33 = vadd.f32 1.0, %v3951_v45  ;;  %v3953_v42 = vpop.eup %3952 }
 0x75f   : > { %3962 = vrcp.f32 %v1690_v43  ;;  %v1691_v47 = vadd.f32 1.0, %v3953_v42  ;;  %v3955_v40 = vpop.eup %3954  ;;  %v1740_v43 = vunpack.c.l.bf16 %v3476_v39  ;;  %v1741_v42 = vunpack.c.h.bf16 %v3476_v39 }
 0x760   : > { %3964 = vpow2.f32 %v3469_v37  ;;  %v3957_v34 = vpop.eup %3956 }
 0x761   : > { %3966 = vrcp.f32 %v1679_v33  ;;  %v3959_v38 = vpop.eup %3958  ;;  %v1704_v54 = vadd.f32 1.0, %v3957_v34 }
 0x762   : > { %3968 = vrcp.f32 %v1691_v47 }
 0x763   : > { %3970 = vrcp.f32 %v1704_v54 }
 0x768   : > { %v3961_v48 = vpop.eup %3960 }
 0x769   : > { %v3963_v49 = vpop.eup %3962  ;;  %v1712_v52 = vmul.f32 %v3961_v48, %v3955_v40  ;;  %v3475_v40 = vld [vmem:[%s4349_s22 + $0xe8] sm:$0xff] }
 0x76a   : > { %v3965_v41 = vpop.eup %3964  ;;  %v1710_v46 = vmul.f32 %v3963_v49, %v4778_v29 }
 0x76b   : > { %v3967_v53 = vpop.eup %3966  ;;  %v1705_v51 = vadd.f32 1.0, %v3965_v41 }
 0x76c   : > { %v4823_v28 = vadd.f32 %v1712_v52, %v1710_v46  ;;  %v1713_v44 = vmul.f32 %v3967_v53, %v3959_v38  ;;  %v3969_v57 = vpop.eup %3968 }
 0x76d   : > { %v1711_v30 = vmul.f32 %v3969_v57, %v4782_v55  ;;  %v3971_v29 = vpop.eup %3970  ;;  %v3474_v55 = vld [vmem:[%s4349_s22 + $0xe0] sm:$0xff]  ;;  %v1739_v57 = vunpack.c.h.bf16 %v3475_v40 }
 0x76e   : > { %3972 = vtanh.f32 %v4823_v28  ;;  %v1736_v27 = vunpack.c.l.bf16 %v3474_v55  ;;  %v1737_v37 = vunpack.c.h.bf16 %v3474_v55 }
 0x76f   : > { %v4827_v31 = vadd.f32 %v1713_v44, %v1711_v30  ;;  %3974 = vrcp.f32 %v1705_v51 }
 0x771   : > { %3976 = vtanh.f32 %v4827_v31 }
 0x778   : > { %v3973_v35 = vpop.eup %3972 }
 0x779   : > { %v3975_v32 = vpop.eup %3974  ;;  %v1718_v50 = vmul.f32 %v3973_v35, %v3971_v29  ;;  %v3477_v29 = vld [vmem:[%s4349_s22 + $0xf8] sm:$0xff] }
 0x77b   : > { %v3977_v26 = vpop.eup %3976 }
 0x77c   : > { %v1719_v56 = vmul.f32 %v3977_v26, %v3975_v32  ;;  %v1738_v32 = vunpack.c.l.bf16 %v3475_v40 }
 0x77e   : > { %v1720_v36 = vpack.c.bf16 %v1719_v56, %v1718_v50  ;;  %v1743_v50 = vunpack.c.h.bf16 %v3477_v29  ;;  %v1742_v56 = vunpack.c.l.bf16 %v3477_v29 }
 0x780   : > { %3718 = vst [vmem:[%s4354_s25 + $0x30] sm:$0xff] %v1720_v36   ;;  %1777 = vmatmul.mubr.bf16.vlgmr.msra.gmra.mrb[28].mxu0 %v1720_v36  ;;  %1820 = vmatmul.mubr.bf16.vlgmr.msra.gmra.mrb[28].mxu1 %v1720_v36 }
 0x853   : > { %v1778_v45 = vpop.f32.mrb[28].mxu0  ;;  %v1821_v33 = vpop.f32.mrb[28].mxu1 }
 0x854   : > { %v1830_v47 = vadd.f32 %v1778_v45, %v1736_v27  ;;  %v1780_v34 = vpop.f32.mrb[29].mxu0  ;;  %v1823_v38 = vpop.f32.mrb[29].mxu1  ;;  %v1832_v36 = vadd.f32 %v1821_v33, %v1738_v32 }
 0x855   : > { %v1831_v48 = vadd.f32 %v1780_v34, %v1737_v37  ;;  %v1782_v49 = vpop.f32.mrb[30].mxu0  ;;  %v1825_v52 = vpop.f32.mrb[30].mxu1  ;;  %v1833_v26 = vadd.f32 %v1823_v38, %v1739_v57 }
 0x856   : > { %v3478_v41 = vmul.f32 -1.442695, %v1830_v47  ;;  %v1834_v46 = vadd.f32 %v1782_v49, %v1740_v43  ;;  %v1784_v53 = vpop.f32.mrb[31].mxu0  ;;  %v1827_v54 = vpop.f32.mrb[31].mxu1  ;;  %v1836_v27 = vadd.f32 %v1825_v52, %v1742_v56 }
 0x857   : > { %v3480_v44 = vmul.f32 -1.442695, %v1831_v48  ;;  %v1835_v51 = vadd.f32 %v1784_v53, %v1741_v42  ;;  %v3482_v55 = vmul.f32 -1.442695, %v1833_v26  ;;  %v1837_v39 = vadd.f32 %v1827_v54, %v1743_v50 }
 0x858   : > { %3978 = vpow2.f32 %v3478_v41  ;;  %v3479_v30 = vmul.f32 -1.442695, %v1834_v46 }
 0x859   : > { %3980 = vpow2.f32 %v3480_v44  ;;  %v3481_v35 = vmul.f32 -1.442695, %v1835_v51  ;;  %v3483_v42 = vmul.f32 -1.442695, %v1837_v39 }
 0x85a   : > { %3982 = vpow2.f32 %v3479_v30 }
 0x85b   : > { %3984 = vpow2.f32 %v3481_v35 }
 0x85c   : > { %3986 = vtanh.f32 %v1832_v36 }
 0x85d   : > { %3988 = vpow2.f32 %v3482_v55 }
 0x85e   : > { %3990 = vtanh.f32 %v1836_v27 }
 0x862   : > { %v3979_v37 = vpop.eup %3978 }
 0x863   : > { %v3981_v43 = vpop.eup %3980  ;;  %v1844_v45 = vadd.f32 1.0, %v3979_v37 }
 0x864   : > { %v1856_v47 = vadd.f32 1.0, %v3981_v43  ;;  %v3983_v34 = vpop.eup %3982 }
 0x865   : > { %3992 = vrcp.f32 %v1844_v45  ;;  %v1845_v40 = vadd.f32 1.0, %v3983_v34  ;;  %v3985_v38 = vpop.eup %3984 }
 0x866   : > { %3994 = vrcp.f32 %v1856_v47  ;;  %v1857_v48 = vadd.f32 1.0, %v3985_v38  ;;  %v3987_v33 = vpop.eup %3986 }
 0x867   : > { %3996 = vpow2.f32 %v3483_v42  ;;  %v3989_v49 = vpop.eup %3988 }
 0x868   : > { %3998 = vrcp.f32 %v1845_v40  ;;  %v3991_v52 = vpop.eup %3990  ;;  %v1870_v54 = vadd.f32 1.0, %v3989_v49 }
 0x869   : > { %4000 = vrcp.f32 %v1857_v48 }
 0x86a   : > { %4002 = vrcp.f32 %v1870_v54 }
 0x86f   : > { %v3993_v41 = vpop.eup %3992 }
 0x870   : > { %v3995_v46 = vpop.eup %3994  ;;  %v1878_v53 = vmul.f32 %v3993_v41, %v3987_v33 }
 0x871   : > { %v3997_v44 = vpop.eup %3996  ;;  %v1876_v57 = vmul.f32 %v3995_v46, %v4823_v28 }
 0x872   : > { %v3999_v51 = vpop.eup %3998  ;;  %v1871_v32 = vadd.f32 1.0, %v3997_v44 }
 0x873   : > { %v1880_v30 = vadd.f32 %v1878_v53, %v1876_v57  ;;  %v1879_v29 = vmul.f32 %v3999_v51, %v3991_v52  ;;  %v4001_v35 = vpop.eup %4000 }
 0x874   : > { %v1877_v26 = vmul.f32 %v4001_v35, %v4827_v31  ;;  %v4003_v56 = vpop.eup %4002 }
 0x875   : > { %4004 = vtanh.f32 %v1880_v30  ;;  %1899 = vst [vmem:[#allocation4] sm:$0xff] %v1880_v30 }
 0x876   : > { %v1881_v50 = vadd.f32 %v1879_v29, %v1877_v26  ;;  %4006 = vrcp.f32 %v1871_v32 }
 0x878   : > { %4008 = vtanh.f32 %v1881_v50  ;;  %1900 = vst [vmem:[#allocation4 + $0x8] sm:$0xff] %v1881_v50 }
 0x87f   : > { %v4005_v36 = vpop.eup %4004 }
 0x880   : > { %v1884_v55 = vmul.f32 %v4005_v36, %v4003_v56  ;;  %v4007_v39 = vpop.eup %4006 }
 0x882   : > { %1897 = vst [vmem:[#allocation3] sm:$0xff] %v1884_v55  ;;  %v4009_v28 = vpop.eup %4008 }
 0x883   : > { %v1885_v27 = vmul.f32 %v4009_v28, %v4007_v39 }
 0x885   : > { %v3671_v37 = vpack.c.bf16 %v1885_v27, %v1884_v55  ;;  %1898 = vst [vmem:[#allocation3 + $0x8] sm:$0xff] %v1885_v27 }
 0x887   : > { %3719 = vst [vmem:[%s4354_s25 + $0x38] sm:$0xff] %v3671_v37  }
 0x888 PF: > { %p3488_p6 = scmp.ne.s32.totalorder %s4282_s9, 1 }
 0x889   : > { %1923 = vmatprep.subr.bf16.mxu0 (!%p3488_p6), %v4407_v59  ;;  %1966 = vmatprep.subr.bf16.mxu1 (!%p3488_p6), %v4411_v61  ;;  %v4294_v31 = vmov (!%p3488_p6), 0   ;;  %v1905_v43 = vld [vmem:[#allocation3] sm:$0xff] (!%p3488_p6)  ;;  %v3491_v34 = vld [vmem:[%s4349_s22 + $0xf0] sm:$0xff] (!%p3488_p6)  ;;  %v3490_v52 = vld [vmem:[%s4349_s22 + $0xe8] sm:$0xff] (!%p3488_p6) }
 0x88a   : > { %1904 = sbr.rel (%p3488_p6) target bundleno = 4321 (0x10e1), region = 73  ;;  %1924 = vmatpush1.bf16.msra.mxu0 (!%p3488_p6), %v4405_v58  ;;  %1967 = vmatpush1.bf16.msra.mxu1 (!%p3488_p6), %v4409_v60  ;;  %v3489_v47 = vld [vmem:[%s4349_s22 + $0xe0] sm:$0xff] (!%p3488_p6)  ;;  %v1918_v48 = vunpack.c.l.bf16 (!%p3488_p6), %v3491_v34  ;;  %v1919_v49 = vunpack.c.h.bf16 (!%p3488_p6), %v3491_v34  ;;  %v3492_v51 = vld [vmem:[%s4349_s22 + $0xf8] sm:$0xff] (!%p3488_p6)  ;;  %v1917_v26 = vunpack.c.h.bf16 (!%p3488_p6), %v3490_v52  ;;  %v1916_v27 = vunpack.c.l.bf16 (!%p3488_p6), %v3490_v52 }
 0x88b   : > { %1925 = vmatprep.subr.bf16.mxu0 (!%p3488_p6), %v4415_v63  ;;  %1968 = vmatprep.subr.bf16.mxu1 (!%p3488_p6), %v4419_v1  ;;  %v1914_v40 = vunpack.c.l.bf16 (!%p3488_p6), %v3489_v47  ;;  %v1915_v38 = vunpack.c.h.bf16 (!%p3488_p6), %v3489_v47  ;;  %v1921_v39 = vunpack.c.h.bf16 (!%p3488_p6), %v3492_v51 }
 0x88c   : > { %1955 = vmatprep.mubr.bf16.mxu0 (!%p3488_p6), %v4294_v31  ;;  %1998 = vmatprep.mubr.bf16.mxu1 (!%p3488_p6), %v4294_v31  ;;  %v1906_v45 = vld [vmem:[#allocation3 + $0x8] sm:$0xff] (!%p3488_p6) }
 0x88d   : > { %v1922_v42 = vpack.c.bf16 (!%p3488_p6), %v1906_v45, %v1905_v43  ;;  %v1920_v43 = vunpack.c.l.bf16 (!%p3488_p6), %v3492_v51 }
 0x88e   : > { %1926 = vmatpush1.bf16.msra.mxu0 (!%p3488_p6), %v4413_v62  ;;  %1969 = vmatpush1.bf16.msra.mxu1 (!%p3488_p6), %v4417_v0 }
 0x88f   : > { %1927 = vmatprep.subr.bf16.mxu0 (!%p3488_p6), %v4423_v3  ;;  %1970 = vmatprep.subr.bf16.mxu1 (!%p3488_p6), %v4427_v5 }
 0x892   : > { %1928 = vmatpush1.bf16.msra.mxu0 %v4421_v2  ;;  %1971 = vmatpush1.bf16.msra.mxu1 %v4425_v4 }
 0x893   : > { %1929 = vmatprep.subr.bf16.mxu0 %v4431_v7  ;;  %1972 = vmatprep.subr.bf16.mxu1 %v4435_v9 }
 0x896   : > { %1930 = vmatpush1.bf16.msra.mxu0 %v4429_v6  ;;  %1973 = vmatpush1.bf16.msra.mxu1 %v4433_v8 }
 0x897   : > { %1931 = vmatprep.subr.bf16.mxu0 %v4439_v11  ;;  %1974 = vmatprep.subr.bf16.mxu1 %v4443_v13 }
 0x89a   : > { %1932 = vmatpush1.bf16.msra.mxu0 %v4437_v10  ;;  %1975 = vmatpush1.bf16.msra.mxu1 %v4441_v12 }
 0x89b   : > { %1933 = vmatprep.subr.bf16.mxu0 %v4447_v15  ;;  %1976 = vmatprep.subr.bf16.mxu1 %v4451_v17 }
 0x89e   : > { %1934 = vmatpush1.bf16.msra.mxu0 %v4445_v14  ;;  %1977 = vmatpush1.bf16.msra.mxu1 %v4449_v16 }
 0x89f   : > { %1935 = vmatprep.subr.bf16.mxu0 %v4455_v19  ;;  %1978 = vmatprep.subr.bf16.mxu1 %v4459_v21 }
 0x8a2   : > { %1936 = vmatpush1.bf16.msra.mxu0 %v4453_v18  ;;  %1979 = vmatpush1.bf16.msra.mxu1 %v4457_v20 }
 0x8a3   : > { %1937 = vmatprep.subr.bf16.mxu0 %v4463_v23  ;;  %1980 = vmatprep.subr.bf16.mxu1 %v4467_v25 }
 0x8a6   : > { %1938 = vmatpush1.bf16.msra.mxu0 %v4461_v22  ;;  %1981 = vmatpush1.bf16.msra.mxu1 %v4465_v24 }
 0x8a7   : > { %2089 = vmatprep.subr.bf16.mxu0 %v4407_v59  ;;  %2132 = vmatprep.subr.bf16.mxu1 %v4411_v61 }
 0x8a9   : > { %1956 = vmatmul.mubr.bf16.vlgmr.msra.gmra.mrb[0].mxu0 %v1922_v42  ;;  %1999 = vmatmul.mubr.bf16.vlgmr.msra.gmra.mrb[0].mxu1 %v1922_v42 }
 0x8aa   : > { %2090 = vmatpush1.bf16.msra.mxu0 %v4405_v58  ;;  %2133 = vmatpush1.bf16.msra.mxu1 %v4409_v60 }
 0x8ab   : > { %2091 = vmatprep.subr.bf16.mxu0 %v4415_v63  ;;  %2134 = vmatprep.subr.bf16.mxu1 %v4419_v1 }
 0x8ac   : > { %2121 = vmatprep.mubr.bf16.mxu0 %v4294_v31  ;;  %2164 = vmatprep.mubr.bf16.mxu1 %v4294_v31 }
 0x8ae   : > { %2092 = vmatpush1.bf16.msra.mxu0 %v4413_v62  ;;  %2135 = vmatpush1.bf16.msra.mxu1 %v4417_v0 }
 0x8af   : > { %2093 = vmatprep.subr.bf16.mxu0 %v4423_v3  ;;  %2136 = vmatprep.subr.bf16.mxu1 %v4427_v5 }
 0x8b2   : > { %2094 = vmatpush1.bf16.msra.mxu0 %v4421_v2  ;;  %2137 = vmatpush1.bf16.msra.mxu1 %v4425_v4 }
 0x8b3   : > { %2095 = vmatprep.subr.bf16.mxu0 %v4431_v7  ;;  %2138 = vmatprep.subr.bf16.mxu1 %v4435_v9 }
 0x8b6   : > { %2096 = vmatpush1.bf16.msra.mxu0 %v4429_v6  ;;  %2139 = vmatpush1.bf16.msra.mxu1 %v4433_v8 }
 0x8b7   : > { %2097 = vmatprep.subr.bf16.mxu0 %v4439_v11  ;;  %2140 = vmatprep.subr.bf16.mxu1 %v4443_v13 }
 0x8ba   : > { %2098 = vmatpush1.bf16.msra.mxu0 %v4437_v10  ;;  %2141 = vmatpush1.bf16.msra.mxu1 %v4441_v12 }
 0x8bb   : > { %2099 = vmatprep.subr.bf16.mxu0 %v4447_v15  ;;  %2142 = vmatprep.subr.bf16.mxu1 %v4451_v17 }
 0x8be   : > { %2100 = vmatpush1.bf16.msra.mxu0 %v4445_v14  ;;  %2143 = vmatpush1.bf16.msra.mxu1 %v4449_v16 }
 0x8bf   : > { %2101 = vmatprep.subr.bf16.mxu0 %v4455_v19  ;;  %2144 = vmatprep.subr.bf16.mxu1 %v4459_v21 }
 0x8c2   : > { %2102 = vmatpush1.bf16.msra.mxu0 %v4453_v18  ;;  %2145 = vmatpush1.bf16.msra.mxu1 %v4457_v20 }
 0x8c3   : > { %2103 = vmatprep.subr.bf16.mxu0 %v4463_v23  ;;  %2146 = vmatprep.subr.bf16.mxu1 %v4467_v25 }
 0x8c6   : > { %2104 = vmatpush1.bf16.msra.mxu0 %v4461_v22  ;;  %2147 = vmatpush1.bf16.msra.mxu1 %v4465_v24 }
 0x8c7   : > { %2255 = vmatprep.subr.bf16.mxu0 %v4407_v59  ;;  %2298 = vmatprep.subr.bf16.mxu1 %v4411_v61 }
 0x97c   : > { %v1957_v33 = vpop.f32.mrb[0].mxu0  ;;  %v2000_v41 = vpop.f32.mrb[0].mxu1 }
 0x97d   : > { %v2009_v46 = vadd.f32 %v1957_v33, %v1914_v40  ;;  %v1959_v53 = vpop.f32.mrb[1].mxu0  ;;  %v2002_v54 = vpop.f32.mrb[1].mxu1  ;;  %v2011_v42 = vadd.f32 %v2000_v41, %v1916_v27 }
 0x97e   : > { %v2010_v44 = vadd.f32 %v1959_v53, %v1915_v38  ;;  %v1961_v57 = vpop.f32.mrb[2].mxu0  ;;  %v2004_v30 = vpop.f32.mrb[2].mxu1  ;;  %v2012_v37 = vadd.f32 %v2002_v54, %v1917_v26 }
 0x97f   : > { %v3493_v29 = vmul.f32 -1.442695, %v2009_v46  ;;  %v2013_v35 = vadd.f32 %v1961_v57, %v1918_v48  ;;  %v1963_v32 = vpop.f32.mrb[3].mxu0  ;;  %v2006_v50 = vpop.f32.mrb[3].mxu1  ;;  %v2015_v34 = vadd.f32 %v2004_v30, %v1920_v43  ;;  %v1907_v30 = vld [vmem:[#allocation4] sm:$0xff] }
 0x980   : > { %v3495_v56 = vmul.f32 -1.442695, %v2010_v44  ;;  %v2014_v36 = vadd.f32 %v1963_v32, %v1919_v49  ;;  %v2016_v45 = vadd.f32 %v2006_v50, %v1921_v39  ;;  %v3497_v47 = vmul.f32 -1.442695, %v2012_v37  ;;  %v1908_v32 = vld [vmem:[#allocation4 + $0x8] sm:$0xff] }
 0x981   : > { %4010 = vpow2.f32 %v3493_v29  ;;  %v3494_v55 = vmul.f32 -1.442695, %v2013_v35 }
 0x982   : > { %4012 = vpow2.f32 %v3495_v56  ;;  %v3496_v28 = vmul.f32 -1.442695, %v2014_v36  ;;  %v3498_v40 = vmul.f32 -1.442695, %v2016_v45 }
 0x983   : > { %4014 = vpow2.f32 %v3494_v55 }
 0x984   : > { %4016 = vpow2.f32 %v3496_v28 }
 0x985   : > { %4018 = vtanh.f32 %v2011_v42 }
 0x986   : > { %4020 = vpow2.f32 %v3497_v47 }
 0x987   : > { %4022 = vtanh.f32 %v2015_v34 }
 0x988   : > { %4024 = vpow2.f32 %v3498_v40 }
 0x98b   : > { %v4011_v38 = vpop.eup %4010 }
 0x98c   : > { %v4013_v48 = vpop.eup %4012  ;;  %v2023_v33 = vadd.f32 1.0, %v4011_v38 }
 0x98d   : > { %v4015_v49 = vpop.eup %4014  ;;  %v2035_v46 = vadd.f32 1.0, %v4013_v48 }
 0x98e   : > { %v4017_v53 = vpop.eup %4016  ;;  %4026 = vrcp.f32 %v2023_v33  ;;  %v2024_v52 = vadd.f32 1.0, %v4015_v49  ;;  %v3503_v33 = vld [vmem:[%s4349_s22 + $0xc0] sm:$0xff]  ;;  %v3505_v49 = vld [vmem:[%s4349_s22 + $0xd0] sm:$0xff] }
 0x98f   : > { %4028 = vrcp.f32 %v2035_v46  ;;  %v2036_v54 = vadd.f32 1.0, %v4017_v53  ;;  %v4019_v41 = vpop.eup %4018  ;;  %v2081_v46 = vunpack.c.l.bf16 %v3503_v33  ;;  %v2082_v53 = vunpack.c.h.bf16 %v3503_v33 }
 0x990   : > { %4030 = vrcp.f32 %v2024_v52  ;;  %v4021_v44 = vpop.eup %4020  ;;  %v2085_v52 = vunpack.c.l.bf16 %v3505_v49 }
 0x991   : > { %4032 = vrcp.f32 %v2036_v54  ;;  %v4023_v57 = vpop.eup %4022  ;;  %v2049_v50 = vadd.f32 1.0, %v4021_v44  ;;  %v2086_v44 = vunpack.c.h.bf16 %v3505_v49 }
 0x992   : > { %v4025_v51 = vpop.eup %4024 }
 0x993   : > { %v2050_v28 = vadd.f32 1.0, %v4025_v51  ;;  %4034 = vrcp.f32 %v2049_v50  ;;  %v3504_v51 = vld [vmem:[%s4349_s22 + $0xc8] sm:$0xff] }
 0x998   : > { %v4027_v29 = vpop.eup %4026 }
 0x999   : > { %v4029_v35 = vpop.eup %4028  ;;  %v2057_v26 = vmul.f32 %v4027_v29, %v4019_v41 }
 0x99a   : > { %v4031_v56 = vpop.eup %4030  ;;  %v2055_v36 = vmul.f32 %v4029_v35, %v1907_v30 }
 0x99b   : > { %v4033_v55 = vpop.eup %4032  ;;  %v2058_v39 = vmul.f32 %v4031_v56, %v4023_v57 }
 0x99c   : > { %v2056_v27 = vmul.f32 %v4033_v55, %v1908_v32  ;;  %v4913_v37 = vadd.f32 %v2057_v26, %v2055_v36 }
 0x99d   : > { %v4035_v45 = vpop.eup %4034 }
 0x99e   : > { %4036 = vtanh.f32 %v4913_v37  ;;  %v4916_v43 = vadd.f32 %v2058_v39, %v2056_v27 }
 0x99f   : > { %4038 = vrcp.f32 %v2050_v28  ;;  %v2084_v28 = vunpack.c.h.bf16 %v3504_v51 }
 0x9a0   : > { %4040 = vtanh.f32 %v4916_v43 }
 0x9a8   : > { %v4037_v42 = vpop.eup %4036 }
 0x9a9   : > { %v4039_v47 = vpop.eup %4038  ;;  %v2063_v40 = vmul.f32 %v4037_v42, %v4035_v45  ;;  %v3506_v42 = vld [vmem:[%s4349_s22 + $0xd8] sm:$0xff] }
 0x9aa   : > { %v4041_v34 = vpop.eup %4040 }
 0x9ab   : > { %v2064_v38 = vmul.f32 %v4041_v34, %v4039_v47  ;;  %v2083_v34 = vunpack.c.l.bf16 %v3504_v51 }
 0x9ad   : > { %v2065_v48 = vpack.c.bf16 %v2064_v38, %v2063_v40  ;;  %v2088_v38 = vunpack.c.h.bf16 %v3506_v42 }
 0x9af   : > { %3720 = vst [vmem:[%s4354_s25 + $0x38] sm:$0xff] %v2065_v48   ;;  %2122 = vmatmul.mubr.bf16.vlgmr.msra.gmra.mrb[4].mxu0 %v2065_v48  ;;  %2165 = vmatmul.mubr.bf16.vlgmr.msra.gmra.mrb[4].mxu1 %v2065_v48  ;;  %v2087_v48 = vunpack.c.l.bf16 %v3506_v42 }
 0x9b0   : > { %2256 = vmatpush1.bf16.msra.mxu0 %v4405_v58  ;;  %2299 = vmatpush1.bf16.msra.mxu1 %v4409_v60 }
 0x9b1   : > { %2257 = vmatprep.subr.bf16.mxu0 %v4415_v63  ;;  %2300 = vmatprep.subr.bf16.mxu1 %v4419_v1 }
 0x9b2   : > { %2287 = vmatprep.mubr.bf16.mxu0 %v4294_v31  ;;  %2330 = vmatprep.mubr.bf16.mxu1 %v4294_v31 }
 0x9b4   : > { %2258 = vmatpush1.bf16.msra.mxu0 %v4413_v62  ;;  %2301 = vmatpush1.bf16.msra.mxu1 %v4417_v0 }
 0x9b5   : > { %2259 = vmatprep.subr.bf16.mxu0 %v4423_v3  ;;  %2302 = vmatprep.subr.bf16.mxu1 %v4427_v5 }
 0x9b8   : > { %2260 = vmatpush1.bf16.msra.mxu0 %v4421_v2  ;;  %2303 = vmatpush1.bf16.msra.mxu1 %v4425_v4 }
 0x9b9   : > { %2261 = vmatprep.subr.bf16.mxu0 %v4431_v7  ;;  %2304 = vmatprep.subr.bf16.mxu1 %v4435_v9 }
 0x9bc   : > { %2262 = vmatpush1.bf16.msra.mxu0 %v4429_v6  ;;  %2305 = vmatpush1.bf16.msra.mxu1 %v4433_v8 }
 0x9bd   : > { %2263 = vmatprep.subr.bf16.mxu0 %v4439_v11  ;;  %2306 = vmatprep.subr.bf16.mxu1 %v4443_v13 }
 0x9c0   : > { %2264 = vmatpush1.bf16.msra.mxu0 %v4437_v10  ;;  %2307 = vmatpush1.bf16.msra.mxu1 %v4441_v12 }
 0x9c1   : > { %2265 = vmatprep.subr.bf16.mxu0 %v4447_v15  ;;  %2308 = vmatprep.subr.bf16.mxu1 %v4451_v17 }
 0x9c4   : > { %2266 = vmatpush1.bf16.msra.mxu0 %v4445_v14  ;;  %2309 = vmatpush1.bf16.msra.mxu1 %v4449_v16 }
 0x9c5   : > { %2267 = vmatprep.subr.bf16.mxu0 %v4455_v19  ;;  %2310 = vmatprep.subr.bf16.mxu1 %v4459_v21 }
 0x9c8   : > { %2268 = vmatpush1.bf16.msra.mxu0 %v4453_v18  ;;  %2311 = vmatpush1.bf16.msra.mxu1 %v4457_v20 }
 0x9c9   : > { %2269 = vmatprep.subr.bf16.mxu0 %v4463_v23  ;;  %2312 = vmatprep.subr.bf16.mxu1 %v4467_v25 }
 0x9cc   : > { %2270 = vmatpush1.bf16.msra.mxu0 %v4461_v22  ;;  %2313 = vmatpush1.bf16.msra.mxu1 %v4465_v24 }
 0x9cd   : > { %2421 = vmatprep.subr.bf16.mxu0 %v4407_v59  ;;  %2464 = vmatprep.subr.bf16.mxu1 %v4411_v61 }
 0xa82   : > { %v2123_v54 = vpop.f32.mrb[4].mxu0  ;;  %v2166_v41 = vpop.f32.mrb[4].mxu1 }
 0xa83   : > { %v2175_v57 = vadd.f32 %v2123_v54, %v2081_v46  ;;  %v2125_v30 = vpop.f32.mrb[5].mxu0  ;;  %v2168_v29 = vpop.f32.mrb[5].mxu1  ;;  %v2177_v33 = vadd.f32 %v2166_v41, %v2083_v34 }
 0xa84   : > { %v2176_v35 = vadd.f32 %v2125_v30, %v2082_v53  ;;  %v2127_v32 = vpop.f32.mrb[6].mxu0  ;;  %v2170_v26 = vpop.f32.mrb[6].mxu1  ;;  %v2178_v40 = vadd.f32 %v2168_v29, %v2084_v28 }
 0xa85   : > { %v3507_v50 = vmul.f32 -1.442695, %v2175_v57  ;;  %v2179_v56 = vadd.f32 %v2127_v32, %v2085_v52  ;;  %v2129_v36 = vpop.f32.mrb[7].mxu0  ;;  %v2172_v55 = vpop.f32.mrb[7].mxu1  ;;  %v2181_v53 = vadd.f32 %v2170_v26, %v2087_v48 }
 0xa86   : > { %v3509_v39 = vmul.f32 -1.442695, %v2176_v35  ;;  %v2180_v27 = vadd.f32 %v2129_v36, %v2086_v44  ;;  %v3511_v49 = vmul.f32 -1.442695, %v2178_v40  ;;  %v2182_v46 = vadd.f32 %v2172_v55, %v2088_v38 }
 0xa87   : > { %4042 = vpow2.f32 %v3507_v50  ;;  %v3508_v45 = vmul.f32 -1.442695, %v2179_v56 }
 0xa88   : > { %4044 = vpow2.f32 %v3509_v39  ;;  %v3510_v47 = vmul.f32 -1.442695, %v2180_v27  ;;  %v3512_v44 = vmul.f32 -1.442695, %v2182_v46 }
 0xa89   : > { %4046 = vpow2.f32 %v3508_v45 }
 0xa8a   : > { %4048 = vpow2.f32 %v3510_v47 }
 0xa8b   : > { %4050 = vtanh.f32 %v2177_v33 }
 0xa8c   : > { %4052 = vpow2.f32 %v3511_v49 }
 0xa8d   : > { %4054 = vtanh.f32 %v2181_v53 }
 0xa91   : > { %v4043_v52 = vpop.eup %4042 }
 0xa92   : > { %v4045_v54 = vpop.eup %4044  ;;  %v2189_v57 = vadd.f32 1.0, %v4043_v52 }
 0xa93   : > { %v2201_v30 = vadd.f32 1.0, %v4045_v54  ;;  %v4047_v35 = vpop.eup %4046 }
 0xa94   : > { %4056 = vrcp.f32 %v2189_v57  ;;  %v2190_v51 = vadd.f32 1.0, %v4047_v35  ;;  %v4049_v29 = vpop.eup %4048  ;;  %v3519_v57 = vld [vmem:[%s4349_s22 + $0xb0] sm:$0xff] }
 0xa95   : > { %4058 = vrcp.f32 %v2201_v30  ;;  %v2202_v32 = vadd.f32 1.0, %v4049_v29  ;;  %v4051_v41 = vpop.eup %4050  ;;  %v2251_v35 = vunpack.c.l.bf16 %v3519_v57 }
 0xa96   : > { %4060 = vpow2.f32 %v3512_v44  ;;  %v4053_v50 = vpop.eup %4052 }
 0xa97   : > { %4062 = vrcp.f32 %v2190_v51  ;;  %v4055_v26 = vpop.eup %4054  ;;  %v2215_v45 = vadd.f32 1.0, %v4053_v50  ;;  %v3518_v50 = vld [vmem:[%s4349_s22 + $0xa8] sm:$0xff] }
 0xa98   : > { %4064 = vrcp.f32 %v2202_v32  ;;  %v2252_v32 = vunpack.c.h.bf16 %v3519_v57 }
 0xa99   : > { %4066 = vrcp.f32 %v2215_v45 }
 0xa9e   : > { %v4057_v56 = vpop.eup %4056 }
 0xa9f   : > { %v4059_v36 = vpop.eup %4058  ;;  %v2223_v55 = vmul.f32 %v4057_v56, %v4051_v41 }
 0xaa0   : > { %v4061_v39 = vpop.eup %4060  ;;  %v2221_v28 = vmul.f32 %v4059_v36, %v4913_v37 }
 0xaa1   : > { %v4063_v27 = vpop.eup %4062  ;;  %v2216_v40 = vadd.f32 1.0, %v4061_v39 }
 0xaa2   : > { %v4959_v42 = vadd.f32 %v2223_v55, %v2221_v28  ;;  %v2224_v47 = vmul.f32 %v4063_v27, %v4055_v26  ;;  %v4065_v34 = vpop.eup %4064 }
 0xaa3   : > { %v2222_v38 = vmul.f32 %v4065_v34, %v4916_v43  ;;  %v4067_v33 = vpop.eup %4066  ;;  %v3517_v43 = vld [vmem:[%s4349_s22 + $0xa0] sm:$0xff] }
 0xaa4   : > { %4068 = vtanh.f32 %v4959_v42  ;;  %v2247_v44 = vunpack.c.l.bf16 %v3517_v43  ;;  %v2248_v30 = vunpack.c.h.bf16 %v3517_v43 }
 0xaa5   : > { %v4963_v48 = vadd.f32 %v2224_v47, %v2222_v38  ;;  %4070 = vrcp.f32 %v2216_v40  ;;  %v2250_v40 = vunpack.c.h.bf16 %v3518_v50 }
 0xaa7   : > { %4072 = vtanh.f32 %v4963_v48 }
 0xaae   : > { %v4069_v37 = vpop.eup %4068 }
 0xaaf   : > { %v4071_v49 = vpop.eup %4070  ;;  %v2229_v53 = vmul.f32 %v4069_v37, %v4067_v33  ;;  %v3520_v37 = vld [vmem:[%s4349_s22 + $0xb8] sm:$0xff] }
 0xab1   : > { %v4073_v46 = vpop.eup %4072 }
 0xab2   : > { %v2230_v52 = vmul.f32 %v4073_v46, %v4071_v49  ;;  %v2249_v46 = vunpack.c.l.bf16 %v3518_v50 }
 0xab4   : > { %v2231_v54 = vpack.c.bf16 %v2230_v52, %v2229_v53  ;;  %v2254_v52 = vunpack.c.h.bf16 %v3520_v37 }
 0xab6   : > { %3721 = vst [vmem:[%s4354_s25 + $0x30] sm:$0xff] %v2231_v54   ;;  %2288 = vmatmul.mubr.bf16.vlgmr.msra.gmra.mrb[8].mxu0 %v2231_v54  ;;  %2331 = vmatmul.mubr.bf16.vlgmr.msra.gmra.mrb[8].mxu1 %v2231_v54  ;;  %v2253_v54 = vunpack.c.l.bf16 %v3520_v37 }
 0xab7   : > { %2422 = vmatpush1.bf16.msra.mxu0 %v4405_v58  ;;  %2465 = vmatpush1.bf16.msra.mxu1 %v4409_v60 }
 0xab8   : > { %2423 = vmatprep.subr.bf16.mxu0 %v4415_v63  ;;  %2466 = vmatprep.subr.bf16.mxu1 %v4419_v1 }
 0xab9   : > { %2453 = vmatprep.mubr.bf16.mxu0 %v4294_v31  ;;  %2496 = vmatprep.mubr.bf16.mxu1 %v4294_v31 }
 0xabb   : > { %2424 = vmatpush1.bf16.msra.mxu0 %v4413_v62  ;;  %2467 = vmatpush1.bf16.msra.mxu1 %v4417_v0 }
 0xabc   : > { %2425 = vmatprep.subr.bf16.mxu0 %v4423_v3  ;;  %2468 = vmatprep.subr.bf16.mxu1 %v4427_v5 }
 0xabf   : > { %2426 = vmatpush1.bf16.msra.mxu0 %v4421_v2  ;;  %2469 = vmatpush1.bf16.msra.mxu1 %v4425_v4 }
 0xac0   : > { %2427 = vmatprep.subr.bf16.mxu0 %v4431_v7  ;;  %2470 = vmatprep.subr.bf16.mxu1 %v4435_v9 }
 0xac3   : > { %2428 = vmatpush1.bf16.msra.mxu0 %v4429_v6  ;;  %2471 = vmatpush1.bf16.msra.mxu1 %v4433_v8 }
 0xac4   : > { %2429 = vmatprep.subr.bf16.mxu0 %v4439_v11  ;;  %2472 = vmatprep.subr.bf16.mxu1 %v4443_v13 }
 0xac7   : > { %2430 = vmatpush1.bf16.msra.mxu0 %v4437_v10  ;;  %2473 = vmatpush1.bf16.msra.mxu1 %v4441_v12 }
 0xac8   : > { %2431 = vmatprep.subr.bf16.mxu0 %v4447_v15  ;;  %2474 = vmatprep.subr.bf16.mxu1 %v4451_v17 }
 0xacb   : > { %2432 = vmatpush1.bf16.msra.mxu0 %v4445_v14  ;;  %2475 = vmatpush1.bf16.msra.mxu1 %v4449_v16 }
 0xacc   : > { %2433 = vmatprep.subr.bf16.mxu0 %v4455_v19  ;;  %2476 = vmatprep.subr.bf16.mxu1 %v4459_v21 }
 0xacf   : > { %2434 = vmatpush1.bf16.msra.mxu0 %v4453_v18  ;;  %2477 = vmatpush1.bf16.msra.mxu1 %v4457_v20 }
 0xad0   : > { %2435 = vmatprep.subr.bf16.mxu0 %v4463_v23  ;;  %2478 = vmatprep.subr.bf16.mxu1 %v4467_v25 }
 0xad3   : > { %2436 = vmatpush1.bf16.msra.mxu0 %v4461_v22  ;;  %2479 = vmatpush1.bf16.msra.mxu1 %v4465_v24 }
 0xad4   : > { %2587 = vmatprep.subr.bf16.mxu0 %v4407_v59  ;;  %2630 = vmatprep.subr.bf16.mxu1 %v4411_v61 }
 0xb89   : > { %v2289_v51 = vpop.f32.mrb[8].mxu0  ;;  %v2332_v29 = vpop.f32.mrb[8].mxu1 }
 0xb8a   : > { %v2341_v41 = vadd.f32 %v2289_v51, %v2247_v44  ;;  %v2291_v26 = vpop.f32.mrb[9].mxu0  ;;  %v2334_v56 = vpop.f32.mrb[9].mxu1  ;;  %v2343_v43 = vadd.f32 %v2332_v29, %v2249_v46 }
 0xb8b   : > { %v2342_v36 = vadd.f32 %v2291_v26, %v2248_v30  ;;  %v2293_v55 = vpop.f32.mrb[10].mxu0  ;;  %v2336_v39 = vpop.f32.mrb[10].mxu1  ;;  %v2344_v53 = vadd.f32 %v2334_v56, %v2250_v40 }
 0xb8c   : > { %v3521_v28 = vmul.f32 -1.442695, %v2341_v41  ;;  %v2345_v27 = vadd.f32 %v2293_v55, %v2251_v35  ;;  %v2295_v45 = vpop.f32.mrb[11].mxu0  ;;  %v2338_v47 = vpop.f32.mrb[11].mxu1  ;;  %v2347_v30 = vadd.f32 %v2336_v39, %v2253_v54 }
 0xb8d   : > { %v3523_v34 = vmul.f32 -1.442695, %v2342_v36  ;;  %v2346_v38 = vadd.f32 %v2295_v45, %v2252_v32  ;;  %v3525_v57 = vmul.f32 -1.442695, %v2344_v53  ;;  %v2348_v44 = vadd.f32 %v2338_v47, %v2254_v52 }
 0xb8e   : > { %4074 = vpow2.f32 %v3521_v28  ;;  %v3522_v33 = vmul.f32 -1.442695, %v2345_v27 }
 0xb8f   : > { %4076 = vpow2.f32 %v3523_v34  ;;  %v3524_v49 = vmul.f32 -1.442695, %v2346_v38  ;;  %v3526_v32 = vmul.f32 -1.442695, %v2348_v44 }
 0xb90   : > { %4078 = vpow2.f32 %v3522_v33 }
 0xb91   : > { %4080 = vpow2.f32 %v3524_v49 }
 0xb92   : > { %4082 = vtanh.f32 %v2343_v43 }
 0xb93   : > { %4084 = vpow2.f32 %v3525_v57 }
 0xb94   : > { %4086 = vtanh.f32 %v2347_v30 }
 0xb98   : > { %v4075_v35 = vpop.eup %4074 }
 0xb99   : > { %v4077_v51 = vpop.eup %4076  ;;  %v2355_v41 = vadd.f32 1.0, %v4075_v35 }
 0xb9a   : > { %v2367_v26 = vadd.f32 1.0, %v4077_v51  ;;  %v4079_v36 = vpop.eup %4078 }
 0xb9b   : > { %4088 = vrcp.f32 %v2355_v41  ;;  %v2356_v50 = vadd.f32 1.0, %v4079_v36  ;;  %v4081_v56 = vpop.eup %4080  ;;  %v3533_v41 = vld [vmem:[%s4349_s22 + $0x90] sm:$0xff] }
 0xb9c   : > { %4090 = vrcp.f32 %v2367_v26  ;;  %v2368_v55 = vadd.f32 1.0, %v4081_v56  ;;  %v4083_v29 = vpop.eup %4082  ;;  %v2417_v36 = vunpack.c.l.bf16 %v3533_v41 }
 0xb9d   : > { %4092 = vpow2.f32 %v3526_v32  ;;  %v4085_v28 = vpop.eup %4084 }
 0xb9e   : > { %4094 = vrcp.f32 %v2356_v50  ;;  %v4087_v39 = vpop.eup %4086  ;;  %v2381_v33 = vadd.f32 1.0, %v4085_v28  ;;  %v3532_v28 = vld [vmem:[%s4349_s22 + $0x88] sm:$0xff] }
 0xb9f   : > { %4096 = vrcp.f32 %v2368_v55  ;;  %v2418_v55 = vunpack.c.h.bf16 %v3533_v41 }
 0xba0   : > { %4098 = vrcp.f32 %v2381_v33 }
 0xba5   : > { %v4089_v27 = vpop.eup %4088 }
 0xba6   : > { %v4091_v45 = vpop.eup %4090  ;;  %v2389_v47 = vmul.f32 %v4089_v27, %v4083_v29 }
 0xba7   : > { %v4093_v34 = vpop.eup %4092  ;;  %v2387_v40 = vmul.f32 %v4091_v45, %v4959_v42 }
 0xba8   : > { %v4095_v38 = vpop.eup %4094  ;;  %v2382_v53 = vadd.f32 1.0, %v4093_v34 }
 0xba9   : > { %v5006_v37 = vadd.f32 %v2389_v47, %v2387_v40  ;;  %v2390_v49 = vmul.f32 %v4095_v38, %v4087_v39  ;;  %v4097_v46 = vpop.eup %4096 }
 0xbaa   : > { %v2388_v52 = vmul.f32 %v4097_v46, %v4963_v48  ;;  %v4099_v43 = vpop.eup %4098  ;;  %v3531_v48 = vld [vmem:[%s4349_s22 + $0x80] sm:$0xff] }
 0xbab   : > { %4100 = vtanh.f32 %v5006_v37  ;;  %v2413_v32 = vunpack.c.l.bf16 %v3531_v48  ;;  %v2414_v26 = vunpack.c.h.bf16 %v3531_v48 }
 0xbac   : > { %v5010_v54 = vadd.f32 %v2390_v49, %v2388_v52  ;;  %4102 = vrcp.f32 %v2382_v53  ;;  %v2416_v53 = vunpack.c.h.bf16 %v3532_v28 }
 0xbae   : > { %4104 = vtanh.f32 %v5010_v54 }
 0xbb5   : > { %v4101_v42 = vpop.eup %4100 }
 0xbb6   : > { %v4103_v57 = vpop.eup %4102  ;;  %v2395_v30 = vmul.f32 %v4101_v42, %v4099_v43  ;;  %v3534_v42 = vld [vmem:[%s4349_s22 + $0x98] sm:$0xff] }
 0xbb8   : > { %v4105_v44 = vpop.eup %4104 }
 0xbb9   : > { %v2396_v35 = vmul.f32 %v4105_v44, %v4103_v57  ;;  %v2415_v44 = vunpack.c.l.bf16 %v3532_v28 }
 0xbbb   : > { %v2397_v51 = vpack.c.bf16 %v2396_v35, %v2395_v30  ;;  %v2420_v35 = vunpack.c.h.bf16 %v3534_v42 }
 0xbbd   : > { %3722 = vst [vmem:[%s4354_s25 + $0x28] sm:$0xff] %v2397_v51   ;;  %2454 = vmatmul.mubr.bf16.vlgmr.msra.gmra.mrb[12].mxu0 %v2397_v51  ;;  %2497 = vmatmul.mubr.bf16.vlgmr.msra.gmra.mrb[12].mxu1 %v2397_v51  ;;  %v2419_v51 = vunpack.c.l.bf16 %v3534_v42 }
 0xbbe   : > { %2588 = vmatpush1.bf16.msra.mxu0 %v4405_v58  ;;  %2631 = vmatpush1.bf16.msra.mxu1 %v4409_v60 }
 0xbbf   : > { %2589 = vmatprep.subr.bf16.mxu0 %v4415_v63  ;;  %2632 = vmatprep.subr.bf16.mxu1 %v4419_v1 }
 0xbc0   : > { %2619 = vmatprep.mubr.bf16.mxu0 %v4294_v31  ;;  %2662 = vmatprep.mubr.bf16.mxu1 %v4294_v31 }
 0xbc2   : > { %2590 = vmatpush1.bf16.msra.mxu0 %v4413_v62  ;;  %2633 = vmatpush1.bf16.msra.mxu1 %v4417_v0 }
 0xbc3   : > { %2591 = vmatprep.subr.bf16.mxu0 %v4423_v3  ;;  %2634 = vmatprep.subr.bf16.mxu1 %v4427_v5 }
 0xbc6   : > { %2592 = vmatpush1.bf16.msra.mxu0 %v4421_v2  ;;  %2635 = vmatpush1.bf16.msra.mxu1 %v4425_v4 }
 0xbc7   : > { %2593 = vmatprep.subr.bf16.mxu0 %v4431_v7  ;;  %2636 = vmatprep.subr.bf16.mxu1 %v4435_v9 }
 0xbca   : > { %2594 = vmatpush1.bf16.msra.mxu0 %v4429_v6  ;;  %2637 = vmatpush1.bf16.msra.mxu1 %v4433_v8 }
 0xbcb   : > { %2595 = vmatprep.subr.bf16.mxu0 %v4439_v11  ;;  %2638 = vmatprep.subr.bf16.mxu1 %v4443_v13 }
 0xbce   : > { %2596 = vmatpush1.bf16.msra.mxu0 %v4437_v10  ;;  %2639 = vmatpush1.bf16.msra.mxu1 %v4441_v12 }
 0xbcf   : > { %2597 = vmatprep.subr.bf16.mxu0 %v4447_v15  ;;  %2640 = vmatprep.subr.bf16.mxu1 %v4451_v17 }
 0xbd2   : > { %2598 = vmatpush1.bf16.msra.mxu0 %v4445_v14  ;;  %2641 = vmatpush1.bf16.msra.mxu1 %v4449_v16 }
 0xbd3   : > { %2599 = vmatprep.subr.bf16.mxu0 %v4455_v19  ;;  %2642 = vmatprep.subr.bf16.mxu1 %v4459_v21 }
 0xbd6   : > { %2600 = vmatpush1.bf16.msra.mxu0 %v4453_v18  ;;  %2643 = vmatpush1.bf16.msra.mxu1 %v4457_v20 }
 0xbd7   : > { %2601 = vmatprep.subr.bf16.mxu0 %v4463_v23  ;;  %2644 = vmatprep.subr.bf16.mxu1 %v4467_v25 }
 0xbda   : > { %2602 = vmatpush1.bf16.msra.mxu0 %v4461_v22  ;;  %2645 = vmatpush1.bf16.msra.mxu1 %v4465_v24 }
 0xbdb   : > { %2753 = vmatprep.subr.bf16.mxu0 %v4407_v59  ;;  %2796 = vmatprep.subr.bf16.mxu1 %v4411_v61 }
 0xc90   : > { %v2455_v50 = vpop.f32.mrb[12].mxu0  ;;  %v2498_v56 = vpop.f32.mrb[12].mxu1 }
 0xc91   : > { %v2507_v29 = vadd.f32 %v2455_v50, %v2413_v32  ;;  %v2457_v39 = vpop.f32.mrb[13].mxu0  ;;  %v2500_v27 = vpop.f32.mrb[13].mxu1  ;;  %v2509_v48 = vadd.f32 %v2498_v56, %v2415_v44 }
 0xc92   : > { %v2508_v45 = vadd.f32 %v2457_v39, %v2414_v26  ;;  %v2459_v47 = vpop.f32.mrb[14].mxu0  ;;  %v2502_v34 = vpop.f32.mrb[14].mxu1  ;;  %v2510_v30 = vadd.f32 %v2500_v27, %v2416_v53 }
 0xc93   : > { %v3535_v40 = vmul.f32 -1.442695, %v2507_v29  ;;  %v2511_v38 = vadd.f32 %v2459_v47, %v2417_v36  ;;  %v2461_v33 = vpop.f32.mrb[15].mxu0  ;;  %v2504_v49 = vpop.f32.mrb[15].mxu1  ;;  %v2513_v26 = vadd.f32 %v2502_v34, %v2419_v51 }
 0xc94   : > { %v3537_v46 = vmul.f32 -1.442695, %v2508_v45  ;;  %v2512_v52 = vadd.f32 %v2461_v33, %v2418_v55  ;;  %v3539_v41 = vmul.f32 -1.442695, %v2510_v30  ;;  %v2514_v32 = vadd.f32 %v2504_v49, %v2420_v35 }
 0xc95   : > { %4106 = vpow2.f32 %v3535_v40  ;;  %v3536_v43 = vmul.f32 -1.442695, %v2511_v38 }
 0xc96   : > { %4108 = vpow2.f32 %v3537_v46  ;;  %v3538_v57 = vmul.f32 -1.442695, %v2512_v52  ;;  %v3540_v55 = vmul.f32 -1.442695, %v2514_v32 }
 0xc97   : > { %4110 = vpow2.f32 %v3536_v43 }
 0xc98   : > { %4112 = vpow2.f32 %v3538_v57 }
 0xc99   : > { %4114 = vtanh.f32 %v2509_v48 }
 0xc9a   : > { %4116 = vpow2.f32 %v3539_v41 }
 0xc9b   : > { %4118 = vtanh.f32 %v2513_v26 }
 0xc9f   : > { %v4107_v36 = vpop.eup %4106 }
 0xca0   : > { %v4109_v50 = vpop.eup %4108  ;;  %v2521_v29 = vadd.f32 1.0, %v4107_v36 }
 0xca1   : > { %v2533_v39 = vadd.f32 1.0, %v4109_v50  ;;  %v4111_v45 = vpop.eup %4110 }
 0xca2   : > { %4120 = vrcp.f32 %v2521_v29  ;;  %v2522_v28 = vadd.f32 1.0, %v4111_v45  ;;  %v4113_v27 = vpop.eup %4112  ;;  %v3547_v29 = vld [vmem:[%s4349_s22 + $0x70] sm:$0xff] }
 0xca3   : > { %4122 = vrcp.f32 %v2533_v39  ;;  %v2534_v47 = vadd.f32 1.0, %v4113_v27  ;;  %v4115_v56 = vpop.eup %4114  ;;  %v2583_v45 = vunpack.c.l.bf16 %v3547_v29 }
 0xca4   : > { %4124 = vpow2.f32 %v3540_v55  ;;  %v4117_v40 = vpop.eup %4116 }
 0xca5   : > { %4126 = vrcp.f32 %v2522_v28  ;;  %v4119_v34 = vpop.eup %4118  ;;  %v2547_v43 = vadd.f32 1.0, %v4117_v40  ;;  %v3546_v40 = vld [vmem:[%s4349_s22 + $0x68] sm:$0xff] }
 0xca6   : > { %4128 = vrcp.f32 %v2534_v47  ;;  %v2584_v47 = vunpack.c.h.bf16 %v3547_v29 }
 0xca7   : > { %4130 = vrcp.f32 %v2547_v43 }
 0xcac   : > { %v4121_v38 = vpop.eup %4120 }
 0xcad   : > { %v4123_v33 = vpop.eup %4122  ;;  %v2555_v49 = vmul.f32 %v4121_v38, %v4115_v56 }
 0xcae   : > { %v4125_v46 = vpop.eup %4124  ;;  %v2553_v53 = vmul.f32 %v4123_v33, %v5006_v37 }
 0xcaf   : > { %v4127_v52 = vpop.eup %4126  ;;  %v2548_v30 = vadd.f32 1.0, %v4125_v46 }
 0xcb0   : > { %v5053_v42 = vadd.f32 %v2555_v49, %v2553_v53  ;;  %v2556_v57 = vmul.f32 %v4127_v52, %v4119_v34  ;;  %v4129_v44 = vpop.eup %4128 }
 0xcb1   : > { %v2554_v35 = vmul.f32 %v4129_v44, %v5010_v54  ;;  %v4131_v48 = vpop.eup %4130  ;;  %v3545_v54 = vld [vmem:[%s4349_s22 + $0x60] sm:$0xff] }
 0xcb2   : > { %4132 = vtanh.f32 %v5053_v42  ;;  %v2579_v55 = vunpack.c.l.bf16 %v3545_v54  ;;  %v2580_v39 = vunpack.c.h.bf16 %v3545_v54 }
 0xcb3   : > { %v5057_v51 = vadd.f32 %v2556_v57, %v2554_v35  ;;  %4134 = vrcp.f32 %v2548_v30  ;;  %v2582_v30 = vunpack.c.h.bf16 %v3546_v40 }
 0xcb5   : > { %4136 = vtanh.f32 %v5057_v51 }
 0xcbc   : > { %v4133_v37 = vpop.eup %4132 }
 0xcbd   : > { %v4135_v41 = vpop.eup %4134  ;;  %v2561_v26 = vmul.f32 %v4133_v37, %v4131_v48  ;;  %v3548_v37 = vld [vmem:[%s4349_s22 + $0x78] sm:$0xff] }
 0xcbf   : > { %v4137_v32 = vpop.eup %4136 }
 0xcc0   : > { %v2562_v36 = vmul.f32 %v4137_v32, %v4135_v41  ;;  %v2581_v32 = vunpack.c.l.bf16 %v3546_v40 }
 0xcc2   : > { %v2563_v50 = vpack.c.bf16 %v2562_v36, %v2561_v26  ;;  %v2586_v36 = vunpack.c.h.bf16 %v3548_v37 }
 0xcc4   : > { %3723 = vst [vmem:[%s4354_s25 + $0x20] sm:$0xff] %v2563_v50   ;;  %2620 = vmatmul.mubr.bf16.vlgmr.msra.gmra.mrb[16].mxu0 %v2563_v50  ;;  %2663 = vmatmul.mubr.bf16.vlgmr.msra.gmra.mrb[16].mxu1 %v2563_v50  ;;  %v2585_v50 = vunpack.c.l.bf16 %v3548_v37 }
 0xcc5   : > { %2754 = vmatpush1.bf16.msra.mxu0 %v4405_v58  ;;  %2797 = vmatpush1.bf16.msra.mxu1 %v4409_v60 }
 0xcc6   : > { %2755 = vmatprep.subr.bf16.mxu0 %v4415_v63  ;;  %2798 = vmatprep.subr.bf16.mxu1 %v4419_v1 }
 0xcc7   : > { %2785 = vmatprep.mubr.bf16.mxu0 %v4294_v31  ;;  %2828 = vmatprep.mubr.bf16.mxu1 %v4294_v31 }
 0xcc9   : > { %2756 = vmatpush1.bf16.msra.mxu0 %v4413_v62  ;;  %2799 = vmatpush1.bf16.msra.mxu1 %v4417_v0 }
 0xcca   : > { %2757 = vmatprep.subr.bf16.mxu0 %v4423_v3  ;;  %2800 = vmatprep.subr.bf16.mxu1 %v4427_v5 }
 0xccd   : > { %2758 = vmatpush1.bf16.msra.mxu0 %v4421_v2  ;;  %2801 = vmatpush1.bf16.msra.mxu1 %v4425_v4 }
 0xcce   : > { %2759 = vmatprep.subr.bf16.mxu0 %v4431_v7  ;;  %2802 = vmatprep.subr.bf16.mxu1 %v4435_v9 }
 0xcd1   : > { %2760 = vmatpush1.bf16.msra.mxu0 %v4429_v6  ;;  %2803 = vmatpush1.bf16.msra.mxu1 %v4433_v8 }
 0xcd2   : > { %2761 = vmatprep.subr.bf16.mxu0 %v4439_v11  ;;  %2804 = vmatprep.subr.bf16.mxu1 %v4443_v13 }
 0xcd5   : > { %2762 = vmatpush1.bf16.msra.mxu0 %v4437_v10  ;;  %2805 = vmatpush1.bf16.msra.mxu1 %v4441_v12 }
 0xcd6   : > { %2763 = vmatprep.subr.bf16.mxu0 %v4447_v15  ;;  %2806 = vmatprep.subr.bf16.mxu1 %v4451_v17 }
 0xcd9   : > { %2764 = vmatpush1.bf16.msra.mxu0 %v4445_v14  ;;  %2807 = vmatpush1.bf16.msra.mxu1 %v4449_v16 }
 0xcda   : > { %2765 = vmatprep.subr.bf16.mxu0 %v4455_v19  ;;  %2808 = vmatprep.subr.bf16.mxu1 %v4459_v21 }
 0xcdd   : > { %2766 = vmatpush1.bf16.msra.mxu0 %v4453_v18  ;;  %2809 = vmatpush1.bf16.msra.mxu1 %v4457_v20 }
 0xcde   : > { %2767 = vmatprep.subr.bf16.mxu0 %v4463_v23  ;;  %2810 = vmatprep.subr.bf16.mxu1 %v4467_v25 }
 0xce1   : > { %2768 = vmatpush1.bf16.msra.mxu0 %v4461_v22  ;;  %2811 = vmatpush1.bf16.msra.mxu1 %v4465_v24 }
 0xce2   : > { %2919 = vmatprep.subr.bf16.mxu0 %v4407_v59  ;;  %2962 = vmatprep.subr.bf16.mxu1 %v4411_v61 }
 0xd97   : > { %v2621_v28 = vpop.f32.mrb[16].mxu0  ;;  %v2664_v27 = vpop.f32.mrb[16].mxu1 }
 0xd98   : > { %v2673_v56 = vadd.f32 %v2621_v28, %v2579_v55  ;;  %v2623_v34 = vpop.f32.mrb[17].mxu0  ;;  %v2666_v38 = vpop.f32.mrb[17].mxu1  ;;  %v2675_v54 = vadd.f32 %v2664_v27, %v2581_v32 }
 0xd99   : > { %v2674_v33 = vadd.f32 %v2623_v34, %v2580_v39  ;;  %v2625_v49 = vpop.f32.mrb[18].mxu0  ;;  %v2668_v46 = vpop.f32.mrb[18].mxu1  ;;  %v2676_v26 = vadd.f32 %v2666_v38, %v2582_v30 }
 0xd9a   : > { %v3549_v53 = vmul.f32 -1.442695, %v2673_v56  ;;  %v2677_v52 = vadd.f32 %v2625_v49, %v2583_v45  ;;  %v2627_v43 = vpop.f32.mrb[19].mxu0  ;;  %v2670_v57 = vpop.f32.mrb[19].mxu1  ;;  %v2679_v39 = vadd.f32 %v2668_v46, %v2585_v50 }
 0xd9b   : > { %v3551_v44 = vmul.f32 -1.442695, %v2674_v33  ;;  %v2678_v35 = vadd.f32 %v2627_v43, %v2584_v47  ;;  %v3553_v29 = vmul.f32 -1.442695, %v2676_v26  ;;  %v2680_v55 = vadd.f32 %v2670_v57, %v2586_v36 }
 0xd9c   : > { %4138 = vpow2.f32 %v3549_v53  ;;  %v3550_v48 = vmul.f32 -1.442695, %v2677_v52 }
 0xd9d   : > { %4140 = vpow2.f32 %v3551_v44  ;;  %v3552_v41 = vmul.f32 -1.442695, %v2678_v35  ;;  %v3554_v47 = vmul.f32 -1.442695, %v2680_v55 }
 0xd9e   : > { %4142 = vpow2.f32 %v3550_v48 }
 0xd9f   : > { %4144 = vpow2.f32 %v3552_v41 }
 0xda0   : > { %4146 = vtanh.f32 %v2675_v54 }
 0xda1   : > { %4148 = vpow2.f32 %v3553_v29 }
 0xda2   : > { %4150 = vtanh.f32 %v2679_v39 }
 0xda6   : > { %v4139_v45 = vpop.eup %4138 }
 0xda7   : > { %v4141_v28 = vpop.eup %4140  ;;  %v2687_v56 = vadd.f32 1.0, %v4139_v45 }
 0xda8   : > { %v2699_v34 = vadd.f32 1.0, %v4141_v28  ;;  %v4143_v33 = vpop.eup %4142 }
 0xda9   : > { %4152 = vrcp.f32 %v2687_v56  ;;  %v2688_v40 = vadd.f32 1.0, %v4143_v33  ;;  %v4145_v38 = vpop.eup %4144  ;;  %v3561_v56 = vld [vmem:[%s4349_s22 + $0x50] sm:$0xff] }
 0xdaa   : > { %4154 = vrcp.f32 %v2699_v34  ;;  %v2700_v49 = vadd.f32 1.0, %v4145_v38  ;;  %v4147_v27 = vpop.eup %4146  ;;  %v2749_v33 = vunpack.c.l.bf16 %v3561_v56 }
 0xdab   : > { %4156 = vpow2.f32 %v3554_v47  ;;  %v4149_v53 = vpop.eup %4148 }
 0xdac   : > { %4158 = vrcp.f32 %v2688_v40  ;;  %v4151_v46 = vpop.eup %4150  ;;  %v2713_v48 = vadd.f32 1.0, %v4149_v53  ;;  %v3560_v53 = vld [vmem:[%s4349_s22 + $0x48] sm:$0xff] }
 0xdad   : > { %4160 = vrcp.f32 %v2700_v49  ;;  %v2750_v49 = vunpack.c.h.bf16 %v3561_v56 }
 0xdae   : > { %4162 = vrcp.f32 %v2713_v48 }
 0xdb3   : > { %v4153_v52 = vpop.eup %4152 }
 0xdb4   : > { %v4155_v43 = vpop.eup %4154  ;;  %v2721_v57 = vmul.f32 %v4153_v52, %v4147_v27 }
 0xdb5   : > { %v4157_v44 = vpop.eup %4156  ;;  %v2719_v30 = vmul.f32 %v4155_v43, %v5053_v42 }
 0xdb6   : > { %v4159_v35 = vpop.eup %4158  ;;  %v2714_v26 = vadd.f32 1.0, %v4157_v44 }
 0xdb7   : > { %v5100_v37 = vadd.f32 %v2721_v57, %v2719_v30  ;;  %v2722_v41 = vmul.f32 %v4159_v35, %v4151_v46  ;;  %v4161_v32 = vpop.eup %4160 }
 0xdb8   : > { %v2720_v36 = vmul.f32 %v4161_v32, %v5057_v51  ;;  %v4163_v54 = vpop.eup %4162  ;;  %v3559_v51 = vld [vmem:[%s4349_s22 + $0x40] sm:$0xff] }
 0xdb9   : > { %4164 = vtanh.f32 %v5100_v37  ;;  %v2745_v47 = vunpack.c.l.bf16 %v3559_v51  ;;  %v2746_v34 = vunpack.c.h.bf16 %v3559_v51 }
 0xdba   : > { %v5104_v50 = vadd.f32 %v2722_v41, %v2720_v36  ;;  %4166 = vrcp.f32 %v2714_v26  ;;  %v2748_v41 = vunpack.c.h.bf16 %v3560_v53  ;;  %v3562_v36 = vld [vmem:[%s4349_s22 + $0x58] sm:$0xff] }
 0xdbc   : > { %4168 = vtanh.f32 %v5104_v50 }
 0xdc3   : > { %v4165_v42 = vpop.eup %4164 }
 0xdc4   : > { %v4167_v29 = vpop.eup %4166  ;;  %v2727_v39 = vmul.f32 %v4165_v42, %v4163_v54  ;;  %v2747_v42 = vunpack.c.l.bf16 %v3560_v53 }
 0xdc6   : > { %v4169_v55 = vpop.eup %4168 }
 0xdc7   : > { %v2728_v45 = vmul.f32 %v4169_v55, %v4167_v29  ;;  %v2752_v55 = vunpack.c.h.bf16 %v3562_v36 }
 0xdc9   : > { %v2729_v28 = vpack.c.bf16 %v2728_v45, %v2727_v39  ;;  %v2751_v39 = vunpack.c.l.bf16 %v3562_v36 }
 0xdcb   : > { %3724 = vst [vmem:[%s4354_s25 + $0x18] sm:$0xff] %v2729_v28   ;;  %2786 = vmatmul.mubr.bf16.vlgmr.msra.gmra.mrb[20].mxu0 %v2729_v28  ;;  %2829 = vmatmul.mubr.bf16.vlgmr.msra.gmra.mrb[20].mxu1 %v2729_v28 }
 0xdcc   : > { %2920 = vmatpush1.bf16.msra.mxu0 %v4405_v58  ;;  %2963 = vmatpush1.bf16.msra.mxu1 %v4409_v60 }
 0xdcd   : > { %2921 = vmatprep.subr.bf16.mxu0 %v4415_v63  ;;  %2964 = vmatprep.subr.bf16.mxu1 %v4419_v1 }
 0xdce   : > { %2951 = vmatprep.mubr.bf16.mxu0 %v4294_v31  ;;  %2994 = vmatprep.mubr.bf16.mxu1 %v4294_v31 }
 0xdd0   : > { %2922 = vmatpush1.bf16.msra.mxu0 %v4413_v62  ;;  %2965 = vmatpush1.bf16.msra.mxu1 %v4417_v0 }
 0xdd1   : > { %2923 = vmatprep.subr.bf16.mxu0 %v4423_v3  ;;  %2966 = vmatprep.subr.bf16.mxu1 %v4427_v5 }
 0xdd4   : > { %2924 = vmatpush1.bf16.msra.mxu0 %v4421_v2  ;;  %2967 = vmatpush1.bf16.msra.mxu1 %v4425_v4 }
 0xdd5   : > { %2925 = vmatprep.subr.bf16.mxu0 %v4431_v7  ;;  %2968 = vmatprep.subr.bf16.mxu1 %v4435_v9 }
 0xdd8   : > { %2926 = vmatpush1.bf16.msra.mxu0 %v4429_v6  ;;  %2969 = vmatpush1.bf16.msra.mxu1 %v4433_v8 }
 0xdd9   : > { %2927 = vmatprep.subr.bf16.mxu0 %v4439_v11  ;;  %2970 = vmatprep.subr.bf16.mxu1 %v4443_v13 }
 0xddc   : > { %2928 = vmatpush1.bf16.msra.mxu0 %v4437_v10  ;;  %2971 = vmatpush1.bf16.msra.mxu1 %v4441_v12 }
 0xddd   : > { %2929 = vmatprep.subr.bf16.mxu0 %v4447_v15  ;;  %2972 = vmatprep.subr.bf16.mxu1 %v4451_v17 }
 0xde0   : > { %2930 = vmatpush1.bf16.msra.mxu0 %v4445_v14  ;;  %2973 = vmatpush1.bf16.msra.mxu1 %v4449_v16 }
 0xde1   : > { %2931 = vmatprep.subr.bf16.mxu0 %v4455_v19  ;;  %2974 = vmatprep.subr.bf16.mxu1 %v4459_v21 }
 0xde4   : > { %2932 = vmatpush1.bf16.msra.mxu0 %v4453_v18  ;;  %2975 = vmatpush1.bf16.msra.mxu1 %v4457_v20 }
 0xde5   : > { %2933 = vmatprep.subr.bf16.mxu0 %v4463_v23  ;;  %2976 = vmatprep.subr.bf16.mxu1 %v4467_v25 }
 0xde8   : > { %2934 = vmatpush1.bf16.msra.mxu0 %v4461_v22  ;;  %2977 = vmatpush1.bf16.msra.mxu1 %v4465_v24 }
 0xde9   : > { %3084 = vmatprep.subr.bf16.mxu0 %v4407_v59  ;;  %3127 = vmatprep.subr.bf16.mxu1 %v4411_v61 }
 0xe9e   : > { %v2787_v40 = vpop.f32.mrb[20].mxu0  ;;  %v2830_v38 = vpop.f32.mrb[20].mxu1 }
 0xe9f   : > { %v2839_v27 = vadd.f32 %v2787_v40, %v2745_v47  ;;  %v2789_v46 = vpop.f32.mrb[21].mxu0  ;;  %v2832_v52 = vpop.f32.mrb[21].mxu1  ;;  %v2841_v45 = vadd.f32 %v2830_v38, %v2747_v42 }
 0xea0   : > { %v2840_v43 = vadd.f32 %v2789_v46, %v2746_v34  ;;  %v2791_v57 = vpop.f32.mrb[22].mxu0  ;;  %v2834_v44 = vpop.f32.mrb[22].mxu1  ;;  %v2842_v29 = vadd.f32 %v2832_v52, %v2748_v41 }
 0xea1   : > { %v3563_v30 = vmul.f32 -1.442695, %v2839_v27  ;;  %v2843_v59 = vadd.f32 %v2791_v57, %v2749_v33  ;;  %v2793_v35 = vpop.f32.mrb[23].mxu0  ;;  %v2836_v61 = vpop.f32.mrb[23].mxu1  ;;  %v2845_v56 = vadd.f32 %v2834_v44, %v2751_v39 }
 0xea2   : > { %v3565_v48 = vmul.f32 -1.442695, %v2840_v43  ;;  %v2844_v32 = vadd.f32 %v2793_v35, %v2750_v49  ;;  %v3567_v28 = vmul.f32 -1.442695, %v2842_v29  ;;  %v2846_v51 = vadd.f32 %v2836_v61, %v2752_v55 }
 0xea3   : > { %4170 = vpow2.f32 %v3563_v30  ;;  %v3564_v26 = vmul.f32 -1.442695, %v2843_v59 }
 0xea4   : > { %4172 = vpow2.f32 %v3565_v48  ;;  %v3566_v54 = vmul.f32 -1.442695, %v2844_v32  ;;  %v3568_v40 = vmul.f32 -1.442695, %v2846_v51 }
 0xea5   : > { %4174 = vpow2.f32 %v3564_v26 }
 0xea6   : > { %4176 = vpow2.f32 %v3566_v54 }
 0xea7   : > { %4178 = vtanh.f32 %v2841_v45 }
 0xea8   : > { %4180 = vpow2.f32 %v3567_v28 }
 0xea9   : > { %4182 = vtanh.f32 %v2845_v56 }
 0xead   : > { %v4171_v47 = vpop.eup %4170 }
 0xeae   : > { %v4173_v34 = vpop.eup %4172  ;;  %v2853_v33 = vadd.f32 1.0, %v4171_v47 }
 0xeaf   : > { %v2865_v49 = vadd.f32 1.0, %v4173_v34  ;;  %v4175_v27 = vpop.eup %4174 }
 0xeb0   : > { %4184 = vrcp.f32 %v2853_v33  ;;  %v2854_v53 = vadd.f32 1.0, %v4175_v27  ;;  %v4177_v46 = vpop.eup %4176 }
 0xeb1   : > { %4186 = vrcp.f32 %v2865_v49  ;;  %v2866_v52 = vadd.f32 1.0, %v4177_v46  ;;  %v4179_v38 = vpop.eup %4178 }
 0xeb2   : > { %4188 = vpow2.f32 %v3568_v40  ;;  %v4181_v43 = vpop.eup %4180 }
 0xeb3   : > { %4190 = vrcp.f32 %v2854_v53  ;;  %v4183_v57 = vpop.eup %4182  ;;  %v2879_v41 = vadd.f32 1.0, %v4181_v43 }
 0xeb4   : > { %4192 = vrcp.f32 %v2866_v52 }
 0xeb5   : > { %4194 = vrcp.f32 %v2879_v41 }
 0xeba   : > { %v4185_v44 = vpop.eup %4184 }
 0xebb   : > { %v4187_v30 = vpop.eup %4186  ;;  %v2887_v59 = vmul.f32 %v4185_v44, %v4179_v38 }
 0xebc   : > { %v4189_v35 = vpop.eup %4188  ;;  %v2885_v61 = vmul.f32 %v4187_v30, %v5100_v37 }
 0xebd   : > { %v4191_v48 = vpop.eup %4190  ;;  %v2880_v54 = vadd.f32 1.0, %v4189_v35 }
 0xebe   : > { %v5147_v32 = vadd.f32 %v2887_v59, %v2885_v61  ;;  %v2888_v26 = vmul.f32 %v4191_v48, %v4183_v57  ;;  %v4193_v36 = vpop.eup %4192 }
 0xebf   : > { %v2886_v42 = vmul.f32 %v4193_v36, %v5104_v50  ;;  %v4195_v55 = vpop.eup %4194 }
 0xec0   : > { %4196 = vtanh.f32 %v5147_v32 }
 0xec1   : > { %v5151_v29 = vadd.f32 %v2888_v26, %v2886_v42  ;;  %4198 = vrcp.f32 %v2880_v54 }
 0xec3   : > { %4200 = vtanh.f32 %v5151_v29 }
 0xeca   : > { %v4197_v37 = vpop.eup %4196 }
 0xecb   : > { %v4199_v39 = vpop.eup %4198  ;;  %v2893_v28 = vmul.f32 %v4197_v37, %v4195_v55 }
 0xecd   : > { %v4201_v45 = vpop.eup %4200 }
 0xece   : > { %v2894_v51 = vmul.f32 %v4201_v45, %v4199_v39 }
 0xed0   : > { %v2895_v56 = vpack.c.bf16 %v2894_v51, %v2893_v28 }
 0xed2   : > { %3725 = vst [vmem:[%s4354_s25 + $0x10] sm:$0xff] %v2895_v56   ;;  %2952 = vmatmul.mubr.bf16.vlgmr.msra.gmra.mrb[24].mxu0 %v2895_v56  ;;  %2995 = vmatmul.mubr.bf16.vlgmr.msra.gmra.mrb[24].mxu1 %v2895_v56 }
 0xed3   : > { %3085 = vmatpush1.bf16.msra.mxu0 %v4405_v58  ;;  %3128 = vmatpush1.bf16.msra.mxu1 %v4409_v60  ;;  %v3573_v58 = vld [vmem:[%s4349_s22 + $0x20] sm:$0xff]  ;;  %v3575_v60 = vld [vmem:[%s4349_s22 + $0x30] sm:$0xff] }
 0xed4   : > { %3086 = vmatprep.subr.bf16.mxu0 %v4415_v63  ;;  %3129 = vmatprep.subr.bf16.mxu1 %v4419_v1  ;;  %v2912_v63 = vunpack.c.h.bf16 %v3573_v58 }
 0xed5   : > { %3116 = vmatprep.mubr.bf16.mxu0 %v4294_v31  ;;  %3159 = vmatprep.mubr.bf16.mxu1 %v4294_v31 }
 0xed7   : > { %3087 = vmatpush1.bf16.msra.mxu0 %v4413_v62  ;;  %3130 = vmatpush1.bf16.msra.mxu1 %v4417_v0  ;;  %v2911_v62 = vunpack.c.l.bf16 %v3573_v58  ;;  %v2915_v0 = vunpack.c.l.bf16 %v3575_v60 }
 0xed8   : > { %3088 = vmatprep.subr.bf16.mxu0 %v4423_v3  ;;  %3131 = vmatprep.subr.bf16.mxu1 %v4427_v5  ;;  %v2916_v3 = vunpack.c.h.bf16 %v3575_v60  ;;  %v3574_v5 = vld [vmem:[%s4349_s22 + $0x28] sm:$0xff] }
 0xedb   : > { %3089 = vmatpush1.bf16.msra.mxu0 %v4421_v2  ;;  %3132 = vmatpush1.bf16.msra.mxu1 %v4425_v4 }
 0xedc   : > { %3090 = vmatprep.subr.bf16.mxu0 %v4431_v7  ;;  %3133 = vmatprep.subr.bf16.mxu1 %v4435_v9 }
 0xedf   : > { %3091 = vmatpush1.bf16.msra.mxu0 %v4429_v6  ;;  %3134 = vmatpush1.bf16.msra.mxu1 %v4433_v8 }
 0xee0   : > { %3092 = vmatprep.subr.bf16.mxu0 %v4439_v11  ;;  %3135 = vmatprep.subr.bf16.mxu1 %v4443_v13 }
 0xee3   : > { %3093 = vmatpush1.bf16.msra.mxu0 %v4437_v10  ;;  %3136 = vmatpush1.bf16.msra.mxu1 %v4441_v12 }
 0xee4   : > { %3094 = vmatprep.subr.bf16.mxu0 %v4447_v15  ;;  %3137 = vmatprep.subr.bf16.mxu1 %v4451_v17 }
 0xee7   : > { %3095 = vmatpush1.bf16.msra.mxu0 %v4445_v14  ;;  %3138 = vmatpush1.bf16.msra.mxu1 %v4449_v16  ;;  %v2914_v16 = vunpack.c.h.bf16 %v3574_v5 }
 0xee8   : > { %3096 = vmatprep.subr.bf16.mxu0 %v4455_v19  ;;  %3139 = vmatprep.subr.bf16.mxu1 %v4459_v21  ;;  %v3576_v19 = vld [vmem:[%s4349_s22 + $0x38] sm:$0xff]  ;;  %v2913_v21 = vunpack.c.l.bf16 %v3574_v5 }
 0xeeb   : > { %3097 = vmatpush1.bf16.msra.mxu0 %v4453_v18  ;;  %3140 = vmatpush1.bf16.msra.mxu1 %v4457_v20 }
 0xeec   : > { %3098 = vmatprep.subr.bf16.mxu0 %v4463_v23  ;;  %3141 = vmatprep.subr.bf16.mxu1 %v4467_v25  ;;  %v2918_v23 = vunpack.c.h.bf16 %v3576_v19 }
 0xeef   : > { %3099 = vmatpush1.bf16.msra.mxu0 %v4461_v22  ;;  %3142 = vmatpush1.bf16.msra.mxu1 %v4465_v24  ;;  %v2917_v24 = vunpack.c.l.bf16 %v3576_v19 }
 0xfa5   : > { %v2953_v1 = vpop.f32.mrb[24].mxu0  ;;  %v2996_v2 = vpop.f32.mrb[24].mxu1 }
 0xfa6   : > { %v3005_v4 = vadd.f32 %v2953_v1, %v2911_v62  ;;  %v2955_v6 = vpop.f32.mrb[25].mxu0  ;;  %v2998_v7 = vpop.f32.mrb[25].mxu1  ;;  %v3007_v25 = vadd.f32 %v2996_v2, %v2913_v21  ;;  %v3074_v62 = vld [vmem:[%s4349_s22 + $0x10] sm:$0xff] }
 0xfa7   : > { %v3006_v8 = vadd.f32 %v2955_v6, %v2912_v63  ;;  %v2957_v9 = vpop.f32.mrb[26].mxu0  ;;  %v3000_v10 = vpop.f32.mrb[26].mxu1  ;;  %v3008_v22 = vadd.f32 %v2998_v7, %v2914_v16  ;;  %v3080_v1 = vunpack.c.l.bf16 %v3074_v62  ;;  %v3073_v6 = vld [vmem:[%s4349_s22 + $0x8] sm:$0xff] }
 0xfa8   : > { %v3577_v11 = vmul.f32 -1.442695, %v3005_v4  ;;  %v3009_v12 = vadd.f32 %v2957_v9, %v2915_v0  ;;  %v2959_v13 = vpop.f32.mrb[27].mxu0  ;;  %v3002_v14 = vpop.f32.mrb[27].mxu1  ;;  %v3011_v47 = vadd.f32 %v3000_v10, %v2917_v24  ;;  %v3081_v4 = vunpack.c.h.bf16 %v3074_v62 }
 0xfa9   : > { %v3579_v15 = vmul.f32 -1.442695, %v3006_v8  ;;  %v3010_v17 = vadd.f32 %v2959_v13, %v2916_v3  ;;  %v3581_v31 = vmul.f32 -1.442695, %v3008_v22  ;;  %v3012_v50 = vadd.f32 %v3002_v14, %v2918_v23 }
 0xfaa   : > { %4202 = vpow2.f32 %v3577_v11  ;;  %v3578_v18 = vmul.f32 -1.442695, %v3009_v12  ;;  %v3078_v22 = vunpack.c.l.bf16 %v3073_v6 }
 0xfab   : > { %4204 = vpow2.f32 %v3579_v15  ;;  %v3580_v20 = vmul.f32 -1.442695, %v3010_v17  ;;  %v3582_v49 = vmul.f32 -1.442695, %v3012_v50  ;;  %v3079_v17 = vunpack.c.h.bf16 %v3073_v6 }
 0xfac   : > { %4206 = vpow2.f32 %v3578_v18 }
 0xfad   : > { %4208 = vpow2.f32 %v3580_v20  ;;  %v3075_v20 = vld [vmem:[%s4349_s22 + $0x18] sm:$0xff] }
 0xfae   : > { %4210 = vtanh.f32 %v3007_v25  ;;  %v3083_v24 = vunpack.c.h.bf16 %v3075_v20  ;;  %v3082_v25 = vunpack.c.l.bf16 %v3075_v20 }
 0xfaf   : > { %4212 = vpow2.f32 %v3581_v31 }
 0xfb0   : > { %4214 = vtanh.f32 %v3011_v47 }
 0xfb4   : > { %v4203_v34 = vpop.eup %4202 }
 0xfb5   : > { %v4205_v33 = vpop.eup %4204  ;;  %v3019_v40 = vadd.f32 1.0, %v4203_v34 }
 0xfb6   : > { %v3031_v27 = vadd.f32 1.0, %v4205_v33  ;;  %v4207_v53 = vpop.eup %4206 }
 0xfb7   : > { %4216 = vrcp.f32 %v3019_v40  ;;  %v3020_v46 = vadd.f32 1.0, %v4207_v53  ;;  %v4209_v52 = vpop.eup %4208 }
 0xfb8   : > { %4218 = vrcp.f32 %v3031_v27  ;;  %v3032_v38 = vadd.f32 1.0, %v4209_v52  ;;  %v4211_v43 = vpop.eup %4210 }
 0xfb9   : > { %4220 = vpow2.f32 %v3582_v49  ;;  %v4213_v57 = vpop.eup %4212 }
 0xfba   : > { %4222 = vrcp.f32 %v3020_v46  ;;  %v4215_v44 = vpop.eup %4214  ;;  %v3045_v26 = vadd.f32 1.0, %v4213_v57 }
 0xfbb   : > { %4224 = vrcp.f32 %v3032_v38 }
 0xfbc   : > { %4226 = vrcp.f32 %v3045_v26 }
 0xfc1   : > { %v4217_v30 = vpop.eup %4216 }
 0xfc2   : > { %v4219_v59 = vpop.eup %4218  ;;  %v3053_v35 = vmul.f32 %v4217_v30, %v4211_v43 }
 0xfc3   : > { %v4221_v61 = vpop.eup %4220  ;;  %v3051_v48 = vmul.f32 %v4219_v59, %v5147_v32 }
 0xfc4   : > { %v4223_v41 = vpop.eup %4222  ;;  %v3046_v55 = vadd.f32 1.0, %v4221_v61 }
 0xfc5   : > { %v5192_v36 = vadd.f32 %v3053_v35, %v3051_v48  ;;  %v3054_v54 = vmul.f32 %v4223_v41, %v4215_v44  ;;  %v4225_v42 = vpop.eup %4224 }
 0xfc6   : > { %v3052_v37 = vmul.f32 %v4225_v42, %v5151_v29  ;;  %v4227_v32 = vpop.eup %4226  ;;  %v3072_v29 = vld [vmem:[%s4349_s22] sm:$0xff] }
 0xfc7   : > { %4228 = vtanh.f32 %v5192_v36  ;;  %v3076_v63 = vunpack.c.l.bf16 %v3072_v29  ;;  %v3077_v0 = vunpack.c.h.bf16 %v3072_v29 }
 0xfc8   : > { %v5196_v39 = vadd.f32 %v3054_v54, %v3052_v37  ;;  %4230 = vrcp.f32 %v3046_v55 }
 0xfca   : > { %4232 = vtanh.f32 %v5196_v39 }
 0xfd1   : > { %v4229_v45 = vpop.eup %4228 }
 0xfd2   : > { %v4231_v28 = vpop.eup %4230  ;;  %v3059_v56 = vmul.f32 %v4229_v45, %v4227_v32 }
 0xfd4   : > { %v4233_v51 = vpop.eup %4232 }
 0xfd5   : > { %v3060_v58 = vmul.f32 %v4233_v51, %v4231_v28 }
 0xfd7   : > { %v3061_v60 = vpack.c.bf16 %v3060_v58, %v3059_v56 }
 0xfd9   : > { %3726 = vst [vmem:[%s4354_s25 + $0x8] sm:$0xff] %v3061_v60   ;;  %3117 = vmatmul.mubr.bf16.vlgmr.msra.gmra.mrb[28].mxu0 %v3061_v60  ;;  %3160 = vmatmul.mubr.bf16.vlgmr.msra.gmra.mrb[28].mxu1 %v3061_v60 }
0x10ac   : > { %v3118_v2 = vpop.f32.mrb[28].mxu0  ;;  %v3161_v3 = vpop.f32.mrb[28].mxu1 }
0x10ad   : > { %v3170_v5 = vadd.f32 %v3118_v2, %v3076_v63  ;;  %v3120_v7 = vpop.f32.mrb[29].mxu0  ;;  %v3163_v8 = vpop.f32.mrb[29].mxu1  ;;  %v3172_v31 = vadd.f32 %v3161_v3, %v3078_v22 }
0x10ae   : > { %v3171_v9 = vadd.f32 %v3120_v7, %v3077_v0  ;;  %v3122_v10 = vpop.f32.mrb[30].mxu0  ;;  %v3165_v11 = vpop.f32.mrb[30].mxu1  ;;  %v3173_v23 = vadd.f32 %v3163_v8, %v3079_v17 }
0x10af   : > { %v3587_v12 = vmul.f32 -1.442695, %v3170_v5  ;;  %v3174_v13 = vadd.f32 %v3122_v10, %v3080_v1  ;;  %v3124_v14 = vpop.f32.mrb[31].mxu0  ;;  %v3167_v15 = vpop.f32.mrb[31].mxu1  ;;  %v3176_v34 = vadd.f32 %v3165_v11, %v3082_v25 }
0x10b0   : > { %v3589_v16 = vmul.f32 -1.442695, %v3171_v9  ;;  %v3175_v18 = vadd.f32 %v3124_v14, %v3081_v4  ;;  %v3591_v50 = vmul.f32 -1.442695, %v3173_v23  ;;  %v3177_v47 = vadd.f32 %v3167_v15, %v3083_v24 }
0x10b1   : > { %4234 = vpow2.f32 %v3587_v12  ;;  %v3588_v19 = vmul.f32 -1.442695, %v3174_v13 }
0x10b2   : > { %4236 = vpow2.f32 %v3589_v16  ;;  %v3590_v21 = vmul.f32 -1.442695, %v3175_v18  ;;  %v3592_v27 = vmul.f32 -1.442695, %v3177_v47 }
0x10b3   : > { %4238 = vpow2.f32 %v3588_v19 }
0x10b4   : > { %4240 = vpow2.f32 %v3590_v21 }
0x10b5   : > { %4242 = vtanh.f32 %v3172_v31 }
0x10b6   : > { %4244 = vpow2.f32 %v3591_v50 }
0x10b7   : > { %4246 = vtanh.f32 %v3176_v34 }
0x10bb   : > { %v4235_v33 = vpop.eup %4234 }
0x10bc   : > { %v4237_v40 = vpop.eup %4236  ;;  %v3184_v49 = vadd.f32 1.0, %v4235_v33 }
0x10bd   : > { %v3196_v53 = vadd.f32 1.0, %v4237_v40  ;;  %v4239_v46 = vpop.eup %4238 }
0x10be   : > { %4248 = vrcp.f32 %v3184_v49  ;;  %v3185_v52 = vadd.f32 1.0, %v4239_v46  ;;  %v4241_v38 = vpop.eup %4240 }
0x10bf   : > { %4250 = vrcp.f32 %v3196_v53  ;;  %v3197_v43 = vadd.f32 1.0, %v4241_v38  ;;  %v4243_v57 = vpop.eup %4242 }
0x10c0   : > { %4252 = vpow2.f32 %v3592_v27  ;;  %v4245_v44 = vpop.eup %4244 }
0x10c1   : > { %4254 = vrcp.f32 %v3185_v52  ;;  %v4247_v30 = vpop.eup %4246  ;;  %v3210_v48 = vadd.f32 1.0, %v4245_v44 }
0x10c2   : > { %4256 = vrcp.f32 %v3197_v43 }
0x10c3   : > { %4258 = vrcp.f32 %v3210_v48 }
0x10c8   : > { %v4249_v59 = vpop.eup %4248 }
0x10c9   : > { %v4251_v35 = vpop.eup %4250  ;;  %v3218_v61 = vmul.f32 %v4249_v59, %v4243_v57 }
0x10ca   : > { %v4253_v41 = vpop.eup %4252  ;;  %v3216_v26 = vmul.f32 %v4251_v35, %v5192_v36 }
0x10cb   : > { %v4255_v54 = vpop.eup %4254  ;;  %v3211_v32 = vadd.f32 1.0, %v4253_v41 }
0x10cc   : > { %v3220_v42 = vadd.f32 %v3218_v61, %v3216_v26  ;;  %v3219_v55 = vmul.f32 %v4255_v54, %v4247_v30  ;;  %v4257_v37 = vpop.eup %4256 }
0x10cd   : > { %v3217_v45 = vmul.f32 %v4257_v37, %v5196_v39  ;;  %v4259_v51 = vpop.eup %4258 }
0x10ce   : > { %4260 = vtanh.f32 %v3220_v42  ;;  %3238 = vst [vmem:[#allocation4] sm:$0xff] %v3220_v42 }
0x10cf   : > { %v3221_v28 = vadd.f32 %v3219_v55, %v3217_v45  ;;  %4262 = vrcp.f32 %v3211_v32 }
0x10d1   : > { %4264 = vtanh.f32 %v3221_v28  ;;  %3239 = vst [vmem:[#allocation4 + $0x8] sm:$0xff] %v3221_v28 }
0x10d8   : > { %v4261_v56 = vpop.eup %4260 }
0x10d9   : > { %v3224_v58 = vmul.f32 %v4261_v56, %v4259_v51  ;;  %v4263_v60 = vpop.eup %4262 }
0x10db   : > { %3236 = vst [vmem:[#allocation3] sm:$0xff] %v3224_v58  ;;  %v4265_v36 = vpop.eup %4264 }
0x10dc   : > { %v3225_v29 = vmul.f32 %v4265_v36, %v4263_v60 }
0x10de   : > { %v3711_v62 = vpack.c.bf16 %v3225_v29, %v3224_v58  ;;  %3237 = vst [vmem:[#allocation3 + $0x8] sm:$0xff] %v3225_v29 }
0x10e0   : > { %3712 = vst [vmem:[%s4354_s25] sm:$0xff] %v3711_v62  }
0x10e1 PF: > { %s12_s11 = sadd.s32 1, %s4290_s11   ;;  %s5219_s9 = smov %s4286_s10 }
0x10e2   : > { %p9_p7 = scmp.ge.s32.totalorder %s12_s11, 4   ;;  %s5220_s10 = smov %s5222_s12 }
0x10e4   :  { %11 = sbr.rel (!%p9_p7) target bundleno = 2 (0x2), region = 146 }
0x10eb   :  { %3284 = vsyncmov [#allocation5] }
0x10ee   :  { %s3285_s26 = vpop.sfrf %3284 }
0x10ef   :  { %p3597_p8 = scmp.ne.s32.totalorder %s3285_s26, 0 }
0x10f1   :  { %3289 = shalt.err (%p3597_p8)  }

// kernel: encoder_forward.2
= control target key start
LH: loop header
LB: loop body
LE: loop exit
PB: predicated region body
PF: predicated region fallthrough
CT: control target
= control target key end

     0   :  { %s4002_s9 = smov 0   ;;  %s4004_s10 = smov 0   ;;  %s4908_s0 = inlined_call_operand.vmem [shape: bf16[2,8,16,512], index: 0, kind: input, shape index: {}]   ;;  %s4909_s1 = inlined_call_operand.vmem [shape: bf16[2,128,512], index: 1, kind: input, shape index: {}]   ;;  %s4910_s2 = inlined_call_operand.vmem [shape: bf16[2,8,16,128], index: 2, kind: output, shape index: {}]  }
   0x1   :  { %s4006_s11 = smov 0  }
   0x2 LB: > { %s24_s12 = sadd.s32 1, %s3978_s10  ;;  %p3238_p0 = scmp.ge.s32.totalorder %s3982_s11, 1  ;;  %s3982_s11 = sphi %s4006_s11, %s12_s11   ;;  %s3978_s10 = sphi %s4004_s10, %s4912_s10   ;;  %s3974_s9 = sphi %s4002_s9, %s4911_s9  }
   0x3   : > { %p26_p1 = scmp.ge.s32.totalorder %s24_s12, 2  ;;  %p134_p2 = scmp.lt.s32.totalorder %s3982_s11, 3 }
   0x5   : > { %s4914_s12 = smov (%p26_p1, %s24_s12), 0  ;;  %p135_p3 = pnand %p3238_p0, %p134_p2 }
   0x6   : > { %p176_p4 = scmp.lt.s32.totalorder (!%p135_p3), %s3974_s9, 1  ;;  %s3418_s13 = sshll.u32 (!%p135_p3), %s3974_s9, 8 }
   0x7   : > { %138 = sbr.rel (%p135_p3) target bundleno = 4321 (0x10e1), region = 24  ;;  %s4027_s16 = scalar_lea.vmem (!%p135_p3), %s4909_s1, %s3418_s13 }
   0x8   : > { %v233_v0 = vld [vmem:[%s4027_s16] sm:$0xf] (!%p135_p3)  ;;  %v235_v1 = vld [vmem:[%s4027_s16 + $0x10] sm:$0xf] (!%p135_p3)  ;;  %v237_v3 = vld [vmem:[%s4027_s16 + $0x4] sm:$0xf] (!%p135_p3) }
   0x9   : > { %v247_v2 = vld [vmem:[%s4027_s16 + $0x1c] sm:$0xff] (!%p135_p3)   ;;  %234 = vst [vmem:[#allocation2] sm:$0xf] (!%p135_p3), %v233_v0  ;;  %236 = vst [vmem:[#allocation2 + $0x4] sm:$0xf] (!%p135_p3), %v235_v1 }
   0xa   : > { %v239_v4 = vld [vmem:[%s4027_s16 + $0x14] sm:$0xf] (!%p135_p3)  ;;  %v241_v5 = vld [vmem:[%s4027_s16 + $0x8] sm:$0xf] (!%p135_p3)  ;;  %248 = vst [vmem:[#allocation2 + $0x1c] sm:$0xff] (!%p135_p3), %v247_v2   ;;  %v263_v14 = vld [vmem:[%s4027_s16 + $0x3c] sm:$0xff] (!%p135_p3)  }
   0xb   : > { %238 = vst [vmem:[#allocation2 + $0x8] sm:$0xf] (!%p135_p3), %v237_v3  ;;  %240 = vst [vmem:[#allocation2 + $0xc] sm:$0xf] (!%p135_p3), %v239_v4  ;;  %v243_v6 = vld [vmem:[%s4027_s16 + $0x18] sm:$0xf] (!%p135_p3) }
   0xc   : > { %242 = vst [vmem:[#allocation2 + $0x10] sm:$0xf] (!%p135_p3), %v241_v5  ;;  %v245_v7 = vld [vmem:[%s4027_s16 + $0xc] sm:$0xf] (!%p135_p3)  ;;  %244 = vst [vmem:[#allocation2 + $0x14] sm:$0xf] (!%p135_p3), %v243_v6 }
   0xd   : > { %246 = vst [vmem:[#allocation2 + $0x18] sm:$0xf] (!%p135_p3), %v245_v7  ;;  %v251_v8 = vld [vmem:[%s4027_s16 + $0x30] sm:$0xf] (!%p135_p3)  ;;  %v253_v9 = vld [vmem:[%s4027_s16 + $0x24] sm:$0xf] (!%p135_p3) }
   0xe   : > { %s177_s17 = scalar_select %p176_p4, %s3974_s9, 1  ;;  %v255_v10 = vld [vmem:[%s4027_s16 + $0x34] sm:$0xf]  ;;  %252 = vst [vmem:[#allocation2 + $0x24] sm:$0xf] %v251_v8  ;;  %264 = vst [vmem:[#allocation2 + $0x3c] sm:$0xff] %v263_v14  }
   0xf   : > { %254 = vst [vmem:[#allocation2 + $0x28] sm:$0xf] %v253_v9  ;;  %256 = vst [vmem:[#allocation2 + $0x2c] sm:$0xf] %v255_v10  ;;  %v257_v11 = vld [vmem:[%s4027_s16 + $0x28] sm:$0xf] }
  0x10   : > { %s3416_s18 = sshll.u32 %s177_s17, 8  ;;  %s3417_s19 = sshll.u32 %s177_s17, 6  ;;  %v259_v12 = vld [vmem:[%s4027_s16 + $0x38] sm:$0xf]  ;;  %v261_v13 = vld [vmem:[%s4027_s16 + $0x2c] sm:$0xf] }
  0x11   : > { %s4041_s22 = scalar_lea.vmem %s4908_s0, %s3416_s18  ;;  %s4046_s25 = scalar_lea.vmem %s4910_s2, %s3417_s19  ;;  %258 = vst [vmem:[#allocation2 + $0x30] sm:$0xf] %v257_v11  ;;  %260 = vst [vmem:[#allocation2 + $0x34] sm:$0xf] %v259_v12  ;;  %v267_v15 = vld [vmem:[%s4027_s16 + $0x50] sm:$0xf] }
  0x12   : > { %262 = vst [vmem:[#allocation2 + $0x38] sm:$0xf] %v261_v13  ;;  %v269_v16 = vld [vmem:[%s4027_s16 + $0x44] sm:$0xf]  ;;  %268 = vst [vmem:[#allocation2 + $0x44] sm:$0xf] %v267_v15 }
  0x13   : > { %270 = vst [vmem:[#allocation2 + $0x48] sm:$0xf] %v269_v16  ;;  %v271_v17 = vld [vmem:[%s4027_s16 + $0x54] sm:$0xf]  ;;  %v273_v18 = vld [vmem:[%s4027_s16 + $0x48] sm:$0xf] }
  0x14   : > { %v275_v19 = vld [vmem:[%s4027_s16 + $0x58] sm:$0xf]  ;;  %272 = vst [vmem:[#allocation2 + $0x4c] sm:$0xf] %v271_v17  ;;  %274 = vst [vmem:[#allocation2 + $0x50] sm:$0xf] %v273_v18 }
  0x15   : > { %276 = vst [vmem:[#allocation2 + $0x54] sm:$0xf] %v275_v19  ;;  %v277_v20 = vld [vmem:[%s4027_s16 + $0x4c] sm:$0xf]  ;;  %v279_v21 = vld [vmem:[%s4027_s16 + $0x5c] sm:$0xff]  }
  0x16   : > { %v283_v22 = vld [vmem:[%s4027_s16 + $0x70] sm:$0xf]  ;;  %278 = vst [vmem:[#allocation2 + $0x58] sm:$0xf] %v277_v20  ;;  %280 = vst [vmem:[#allocation2 + $0x5c] sm:$0xff] %v279_v21   ;;  %v295_v28 = vld [vmem:[%s4027_s16 + $0x7c] sm:$0xff]  }
  0x17   : > { %284 = vst [vmem:[#allocation2 + $0x64] sm:$0xf] %v283_v22  ;;  %v285_v23 = vld [vmem:[%s4027_s16 + $0x64] sm:$0xf]  ;;  %v287_v24 = vld [vmem:[%s4027_s16 + $0x74] sm:$0xf] }
  0x18   : > { %v289_v25 = vld [vmem:[%s4027_s16 + $0x68] sm:$0xf]  ;;  %286 = vst [vmem:[#allocation2 + $0x68] sm:$0xf] %v285_v23  ;;  %288 = vst [vmem:[#allocation2 + $0x6c] sm:$0xf] %v287_v24 }
  0x19   : > { %290 = vst [vmem:[#allocation2 + $0x70] sm:$0xf] %v289_v25  ;;  %v291_v26 = vld [vmem:[%s4027_s16 + $0x78] sm:$0xf]  ;;  %v293_v27 = vld [vmem:[%s4027_s16 + $0x6c] sm:$0xf] }
  0x1a   : > { %292 = vst [vmem:[#allocation2 + $0x74] sm:$0xf] %v291_v26  ;;  %294 = vst [vmem:[#allocation2 + $0x78] sm:$0xf] %v293_v27  ;;  %v299_v29 = vld [vmem:[%s4027_s16 + $0x90] sm:$0xf] }
  0x1b   : > { %296 = vst [vmem:[#allocation2 + $0x7c] sm:$0xff] %v295_v28   ;;  %v301_v30 = vld [vmem:[%s4027_s16 + $0x84] sm:$0xf]  ;;  %v303_v31 = vld [vmem:[%s4027_s16 + $0x94] sm:$0xf]  ;;  %v311_v35 = vld [vmem:[%s4027_s16 + $0x9c] sm:$0xff]  }
  0x1c   : > { %300 = vst [vmem:[#allocation2 + $0x84] sm:$0xf] %v299_v29  ;;  %302 = vst [vmem:[#allocation2 + $0x88] sm:$0xf] %v301_v30  ;;  %v305_v32 = vld [vmem:[%s4027_s16 + $0x88] sm:$0xf] }
  0x1d   : > { %304 = vst [vmem:[#allocation2 + $0x8c] sm:$0xf] %v303_v31  ;;  %v307_v33 = vld [vmem:[%s4027_s16 + $0x98] sm:$0xf]  ;;  %v309_v34 = vld [vmem:[%s4027_s16 + $0x8c] sm:$0xf] }
  0x1e   : > { %306 = vst [vmem:[#allocation2 + $0x90] sm:$0xf] %v305_v32  ;;  %308 = vst [vmem:[#allocation2 + $0x94] sm:$0xf] %v307_v33  ;;  %v315_v36 = vld [vmem:[%s4027_s16 + $0xb0] sm:$0xf] }
  0x1f   : > { %310 = vst [vmem:[#allocation2 + $0x98] sm:$0xf] %v309_v34  ;;  %v317_v37 = vld [vmem:[%s4027_s16 + $0xa4] sm:$0xf]  ;;  %312 = vst [vmem:[#allocation2 + $0x9c] sm:$0xff] %v311_v35   ;;  %v327_v42 = vld [vmem:[%s4027_s16 + $0xbc] sm:$0xff]  }
  0x20   : > { %316 = vst [vmem:[#allocation2 + $0xa4] sm:$0xf] %v315_v36  ;;  %318 = vst [vmem:[#allocation2 + $0xa8] sm:$0xf] %v317_v37  ;;  %v319_v38 = vld [vmem:[%s4027_s16 + $0xb4] sm:$0xf] }
  0x21   : > { %v321_v39 = vld [vmem:[%s4027_s16 + $0xa8] sm:$0xf]  ;;  %v323_v40 = vld [vmem:[%s4027_s16 + $0xb8] sm:$0xf]  ;;  %320 = vst [vmem:[#allocation2 + $0xac] sm:$0xf] %v319_v38 }
  0x22   : > { %322 = vst [vmem:[#allocation2 + $0xb0] sm:$0xf] %v321_v39  ;;  %324 = vst [vmem:[#allocation2 + $0xb4] sm:$0xf] %v323_v40  ;;  %v325_v41 = vld [vmem:[%s4027_s16 + $0xac] sm:$0xf] }
  0x23   : > { %v331_v43 = vld [vmem:[%s4027_s16 + $0xd0] sm:$0xf]  ;;  %326 = vst [vmem:[#allocation2 + $0xb8] sm:$0xf] %v325_v41  ;;  %328 = vst [vmem:[#allocation2 + $0xbc] sm:$0xff] %v327_v42   ;;  %v343_v49 = vld [vmem:[%s4027_s16 + $0xdc] sm:$0xff]  }
  0x24   : > { %332 = vst [vmem:[#allocation2 + $0xc4] sm:$0xf] %v331_v43  ;;  %v333_v44 = vld [vmem:[%s4027_s16 + $0xc4] sm:$0xf]  ;;  %v335_v45 = vld [vmem:[%s4027_s16 + $0xd4] sm:$0xf] }
  0x25   : > { %v337_v46 = vld [vmem:[%s4027_s16 + $0xc8] sm:$0xf]  ;;  %334 = vst [vmem:[#allocation2 + $0xc8] sm:$0xf] %v333_v44  ;;  %336 = vst [vmem:[#allocation2 + $0xcc] sm:$0xf] %v335_v45 }
  0x26   : > { %338 = vst [vmem:[#allocation2 + $0xd0] sm:$0xf] %v337_v46  ;;  %v339_v47 = vld [vmem:[%s4027_s16 + $0xd8] sm:$0xf]  ;;  %v341_v48 = vld [vmem:[%s4027_s16 + $0xcc] sm:$0xf] }
  0x27   : > { %340 = vst [vmem:[#allocation2 + $0xd4] sm:$0xf] %v339_v47  ;;  %342 = vst [vmem:[#allocation2 + $0xd8] sm:$0xf] %v341_v48  ;;  %v347_v50 = vld [vmem:[%s4027_s16 + $0xf0] sm:$0xf] }
  0x28   : > { %344 = vst [vmem:[#allocation2 + $0xdc] sm:$0xff] %v343_v49   ;;  %v349_v51 = vld [vmem:[%s4027_s16 + $0xe4] sm:$0xf]  ;;  %v351_v52 = vld [vmem:[%s4027_s16 + $0xf4] sm:$0xf] }
  0x29   : > { %348 = vst [vmem:[#allocation2 + $0xe4] sm:$0xf] %v347_v50  ;;  %350 = vst [vmem:[#allocation2 + $0xe8] sm:$0xf] %v349_v51  ;;  %v353_v53 = vld [vmem:[%s4027_s16 + $0xe8] sm:$0xf] }
  0x2a   : > { %352 = vst [vmem:[#allocation2 + $0xec] sm:$0xf] %v351_v52  ;;  %v355_v54 = vld [vmem:[%s4027_s16 + $0xf8] sm:$0xf]  ;;  %v357_v55 = vld [vmem:[%s4027_s16 + $0xec] sm:$0xf] }
  0x2b   : > { %354 = vst [vmem:[#allocation2 + $0xf0] sm:$0xf] %v353_v53  ;;  %356 = vst [vmem:[#allocation2 + $0xf4] sm:$0xf] %v355_v54  ;;  %v359_v56 = vld [vmem:[%s4027_s16 + $0xfc] sm:$0xf] }
  0x2c   : > { %358 = vst [vmem:[#allocation2 + $0xf8] sm:$0xf] %v357_v55  ;;  %360 = vst [vmem:[#allocation2 + $0xfc] sm:$0xf] %v359_v56 }
  0x2d   : > { %519 = vsyncadd [#allocation5], 4096 }
  0x2e   : > { %3970 = dma.done.wait [#allocation5], 4096 }
  0x2f   : > { %3971 = vsyncadd [#allocation5], 4294963200  ;;  %v3984_v57 = vmov 0.0   ;;  %v4097_v58 = vld [vmem:[#allocation2] sm:$0xff]  ;;  %v4099_v59 = vld [vmem:[#allocation2 + $0x8] sm:$0xff]  ;;  %p3245_p5 = scmp.ne.s32.totalorder %s3974_s9, 0 }
  0x30   : > { %524 = vst [vmem:[#allocation3] sm:$0xff] %v3984_v57  ;;  %525 = vst [vmem:[#allocation3 + $0x8] sm:$0xff] %v3984_v57  ;;  %v4101_v60 = vld [vmem:[#allocation2 + $0x10] sm:$0xff]  ;;  %v4103_v61 = vld [vmem:[#allocation2 + $0x18] sm:$0xff]  ;;  %581 = vmatprep.subr.bf16.mxu0 (!%p3245_p5), %v4099_v59  ;;  %v3985_v26 = vmov (!%p3245_p5), 0  }
  0x31   : > { %526 = vst [vmem:[#allocation4] sm:$0xff] %v3984_v57  ;;  %527 = vst [vmem:[#allocation4 + $0x8] sm:$0xff] %v3984_v57  ;;  %v4105_v62 = vld [vmem:[#allocation2 + $0x20] sm:$0xff]  ;;  %v4107_v63 = vld [vmem:[#allocation2 + $0x28] sm:$0xff]  ;;  %624 = vmatprep.subr.bf16.mxu1 (!%p3245_p5), %v4103_v61  ;;  %582 = vmatpush1.bf16.msra.mxu0 (!%p3245_p5), %v4097_v58 }
  0x32   : > { %v4109_v0 = vld [vmem:[#allocation2 + $0x30] sm:$0xff]  ;;  %v4111_v1 = vld [vmem:[#allocation2 + $0x38] sm:$0xff]  ;;  %v4113_v2 = vld [vmem:[#allocation2 + $0x40] sm:$0xff]  ;;  %625 = vmatpush1.bf16.msra.mxu1 (!%p3245_p5), %v4101_v60  ;;  %583 = vmatprep.subr.bf16.mxu0 (!%p3245_p5), %v4107_v63 }
  0x33   : > { %v4115_v3 = vld [vmem:[#allocation2 + $0x48] sm:$0xff]  ;;  %v4117_v4 = vld [vmem:[#allocation2 + $0x50] sm:$0xff]  ;;  %v4119_v5 = vld [vmem:[#allocation2 + $0x58] sm:$0xff]  ;;  %626 = vmatprep.subr.bf16.mxu1 (!%p3245_p5), %v4111_v1  ;;  %613 = vmatprep.mubr.bf16.mxu0 (!%p3245_p5), %v3985_v26 }
  0x34   : > { %v4121_v6 = vld [vmem:[#allocation2 + $0x60] sm:$0xff]  ;;  %v4123_v7 = vld [vmem:[#allocation2 + $0x68] sm:$0xff]  ;;  %v4125_v8 = vld [vmem:[#allocation2 + $0x70] sm:$0xff]  ;;  %563 = sbr.rel (%p3245_p5) target bundleno = 2184 (0x888), region = 69  ;;  %656 = vmatprep.mubr.bf16.mxu1 (!%p3245_p5), %v3985_v26 }
  0x35   : > { %v4127_v9 = vld [vmem:[#allocation2 + $0x78] sm:$0xff]  ;;  %v4129_v10 = vld [vmem:[#allocation2 + $0x80] sm:$0xff]  ;;  %v4131_v11 = vld [vmem:[#allocation2 + $0x88] sm:$0xff]  ;;  %584 = vmatpush1.bf16.msra.mxu0 (!%p3245_p5), %v4105_v62 }
  0x36   : > { %v4133_v12 = vld [vmem:[#allocation2 + $0x90] sm:$0xff]  ;;  %v4135_v13 = vld [vmem:[#allocation2 + $0x98] sm:$0xff]  ;;  %v4137_v14 = vld [vmem:[#allocation2 + $0xa0] sm:$0xff]  ;;  %627 = vmatpush1.bf16.msra.mxu1 (!%p3245_p5), %v4109_v0  ;;  %585 = vmatprep.subr.bf16.mxu0 (!%p3245_p5), %v4115_v3 }
  0x37   : > { %v4139_v15 = vld [vmem:[#allocation2 + $0xa8] sm:$0xff]  ;;  %v4141_v16 = vld [vmem:[#allocation2 + $0xb0] sm:$0xff]  ;;  %v4143_v17 = vld [vmem:[#allocation2 + $0xb8] sm:$0xff]  ;;  %628 = vmatprep.subr.bf16.mxu1 (!%p3245_p5), %v4119_v5 }
  0x38   : > { %v4145_v18 = vld [vmem:[#allocation2 + $0xc0] sm:$0xff]  ;;  %v4147_v19 = vld [vmem:[#allocation2 + $0xc8] sm:$0xff]  ;;  %v4149_v20 = vld [vmem:[#allocation2 + $0xd0] sm:$0xff] }
  0x39   : > { %v4151_v21 = vld [vmem:[#allocation2 + $0xd8] sm:$0xff]  ;;  %v4153_v22 = vld [vmem:[#allocation2 + $0xe0] sm:$0xff]  ;;  %v4155_v23 = vld [vmem:[#allocation2 + $0xe8] sm:$0xff]  ;;  %586 = vmatpush1.bf16.msra.mxu0 (!%p3245_p5), %v4113_v2 }
  0x3a   : > { %v4157_v24 = vld [vmem:[#allocation2 + $0xf0] sm:$0xff]  ;;  %v4159_v25 = vld [vmem:[#allocation2 + $0xf8] sm:$0xff]  ;;  %629 = vmatpush1.bf16.msra.mxu1 (!%p3245_p5), %v4117_v4  ;;  %587 = vmatprep.subr.bf16.mxu0 (!%p3245_p5), %v4123_v7  ;;  %v564_v27 = vld [vmem:[#allocation3] sm:$0xff] (!%p3245_p5) }
  0x3b   : > { %630 = vmatprep.subr.bf16.mxu1 %v4127_v9  ;;  %v565_v28 = vld [vmem:[#allocation3 + $0x8] sm:$0xff]  ;;  %v568_v30 = vld [vmem:[%s4041_s22] sm:$0xff]  ;;  %v570_v31 = vld [vmem:[%s4041_s22 + $0x10] sm:$0xff] }
  0x3c   : > { %v580_v29 = vpack.c.bf16 %v565_v28, %v564_v27  ;;  %v572_v32 = vunpack.c.l.bf16 %v568_v30  ;;  %v573_v33 = vunpack.c.h.bf16 %v568_v30  ;;  %v576_v34 = vunpack.c.l.bf16 %v570_v31  ;;  %v569_v37 = vld [vmem:[%s4041_s22 + $0x8] sm:$0xff]  ;;  %v571_v44 = vld [vmem:[%s4041_s22 + $0x18] sm:$0xff] }
  0x3d   : > { %588 = vmatpush1.bf16.msra.mxu0 %v4121_v6  ;;  %v577_v36 = vunpack.c.h.bf16 %v570_v31  ;;  %v575_v49 = vunpack.c.h.bf16 %v569_v37  ;;  %v579_v54 = vunpack.c.h.bf16 %v571_v44  ;;  %v574_v56 = vunpack.c.l.bf16 %v569_v37 }
  0x3e   : > { %631 = vmatpush1.bf16.msra.mxu1 %v4125_v8  ;;  %589 = vmatprep.subr.bf16.mxu0 %v4131_v11  ;;  %v578_v27 = vunpack.c.l.bf16 %v571_v44 }
  0x3f   : > { %632 = vmatprep.subr.bf16.mxu1 %v4135_v13 }
  0x41   : > { %590 = vmatpush1.bf16.msra.mxu0 %v4129_v10 }
  0x42   : > { %633 = vmatpush1.bf16.msra.mxu1 %v4133_v12  ;;  %591 = vmatprep.subr.bf16.mxu0 %v4139_v15 }
  0x43   : > { %634 = vmatprep.subr.bf16.mxu1 %v4143_v17 }
  0x45   : > { %592 = vmatpush1.bf16.msra.mxu0 %v4137_v14 }
  0x46   : > { %635 = vmatpush1.bf16.msra.mxu1 %v4141_v16  ;;  %593 = vmatprep.subr.bf16.mxu0 %v4147_v19 }
  0x47   : > { %636 = vmatprep.subr.bf16.mxu1 %v4151_v21 }
  0x49   : > { %594 = vmatpush1.bf16.msra.mxu0 %v4145_v18 }
  0x4a   : > { %637 = vmatpush1.bf16.msra.mxu1 %v4149_v20  ;;  %595 = vmatprep.subr.bf16.mxu0 %v4155_v23 }
  0x4b   : > { %638 = vmatprep.subr.bf16.mxu1 %v4159_v25 }
  0x4d   : > { %596 = vmatpush1.bf16.msra.mxu0 %v4153_v22 }
  0x4e   : > { %639 = vmatpush1.bf16.msra.mxu1 %v4157_v24  ;;  %738 = vmatprep.subr.bf16.mxu0 %v4099_v59 }
  0x4f   : > { %781 = vmatprep.subr.bf16.mxu1 %v4103_v61 }
  0x50   : > { %614 = vmatmul.mubr.bf16.vlgmr.msra.gmra.mrb[0].mxu0 %v580_v29 }
  0x51   : > { %657 = vmatmul.mubr.bf16.vlgmr.msra.gmra.mrb[0].mxu1 %v580_v29  ;;  %739 = vmatpush1.bf16.msra.mxu0 %v4097_v58 }
  0x52   : > { %782 = vmatpush1.bf16.msra.mxu1 %v4101_v60  ;;  %740 = vmatprep.subr.bf16.mxu0 %v4107_v63 }
  0x53   : > { %783 = vmatprep.subr.bf16.mxu1 %v4111_v1  ;;  %770 = vmatprep.mubr.bf16.mxu0 %v3985_v26 }
  0x54   : > { %813 = vmatprep.mubr.bf16.mxu1 %v3985_v26 }
  0x55   : > { %741 = vmatpush1.bf16.msra.mxu0 %v4105_v62 }
  0x56   : > { %784 = vmatpush1.bf16.msra.mxu1 %v4109_v0  ;;  %742 = vmatprep.subr.bf16.mxu0 %v4115_v3 }
  0x57   : > { %785 = vmatprep.subr.bf16.mxu1 %v4119_v5 }
  0x59   : > { %743 = vmatpush1.bf16.msra.mxu0 %v4113_v2 }
  0x5a   : > { %786 = vmatpush1.bf16.msra.mxu1 %v4117_v4  ;;  %744 = vmatprep.subr.bf16.mxu0 %v4123_v7 }
  0x5b   : > { %787 = vmatprep.subr.bf16.mxu1 %v4127_v9 }
  0x5d   : > { %745 = vmatpush1.bf16.msra.mxu0 %v4121_v6 }
  0x5e   : > { %788 = vmatpush1.bf16.msra.mxu1 %v4125_v8  ;;  %746 = vmatprep.subr.bf16.mxu0 %v4131_v11 }
  0x5f   : > { %789 = vmatprep.subr.bf16.mxu1 %v4135_v13 }
  0x61   : > { %747 = vmatpush1.bf16.msra.mxu0 %v4129_v10 }
  0x62   : > { %790 = vmatpush1.bf16.msra.mxu1 %v4133_v12  ;;  %748 = vmatprep.subr.bf16.mxu0 %v4139_v15 }
  0x63   : > { %791 = vmatprep.subr.bf16.mxu1 %v4143_v17 }
  0x65   : > { %749 = vmatpush1.bf16.msra.mxu0 %v4137_v14 }
  0x66   : > { %792 = vmatpush1.bf16.msra.mxu1 %v4141_v16  ;;  %750 = vmatprep.subr.bf16.mxu0 %v4147_v19 }
  0x67   : > { %793 = vmatprep.subr.bf16.mxu1 %v4151_v21 }
  0x69   : > { %751 = vmatpush1.bf16.msra.mxu0 %v4145_v18 }
  0x6a   : > { %794 = vmatpush1.bf16.msra.mxu1 %v4149_v20  ;;  %752 = vmatprep.subr.bf16.mxu0 %v4155_v23 }
  0x6b   : > { %795 = vmatprep.subr.bf16.mxu1 %v4159_v25 }
  0x6d   : > { %753 = vmatpush1.bf16.msra.mxu0 %v4153_v22 }
  0x6e   : > { %796 = vmatpush1.bf16.msra.mxu1 %v4157_v24  ;;  %896 = vmatprep.subr.bf16.mxu0 %v4099_v59 }
  0x6f   : > { %939 = vmatprep.subr.bf16.mxu1 %v4103_v61 }
 0x123   : > { %v615_v35 = vpop.f32.mrb[0].mxu0 }
 0x124   : > { %v658_v38 = vpop.f32.mrb[0].mxu1  ;;  %v667_v39 = vadd.f32 %v615_v35, %v572_v32  ;;  %v617_v40 = vpop.f32.mrb[1].mxu0 }
 0x125   : > { %v660_v41 = vpop.f32.mrb[1].mxu1  ;;  %v668_v42 = vadd.f32 %v617_v40, %v573_v33  ;;  %v619_v43 = vpop.f32.mrb[2].mxu0  ;;  %v669_v29 = vadd.f32 %v658_v38, %v574_v56 }
 0x126   : > { %v662_v45 = vpop.f32.mrb[2].mxu1  ;;  %v3246_v46 = vmul.f32 -1.442695, %v667_v39  ;;  %v671_v47 = vadd.f32 %v619_v43, %v576_v34  ;;  %v621_v48 = vpop.f32.mrb[3].mxu0  ;;  %v670_v57 = vadd.f32 %v660_v41, %v575_v49 }
 0x127   : > { %v664_v50 = vpop.f32.mrb[3].mxu1  ;;  %v3248_v51 = vmul.f32 -1.442695, %v668_v42  ;;  %v672_v52 = vadd.f32 %v621_v48, %v577_v36  ;;  %v673_v31 = vadd.f32 %v662_v45, %v578_v27  ;;  %v566_v45 = vld [vmem:[#allocation4] sm:$0xff]  ;;  %v567_v48 = vld [vmem:[#allocation4 + $0x8] sm:$0xff] }
 0x128   : > { %3446 = vpow2.f32 %v3246_v46  ;;  %v3247_v53 = vmul.f32 -1.442695, %v671_v47  ;;  %v674_v28 = vadd.f32 %v664_v50, %v579_v54  ;;  %v3250_v30 = vmul.f32 -1.442695, %v670_v57 }
 0x129   : > { %3448 = vpow2.f32 %v3248_v51  ;;  %v3249_v55 = vmul.f32 -1.442695, %v672_v52 }
 0x12a   : > { %3450 = vpow2.f32 %v3247_v53  ;;  %v3251_v32 = vmul.f32 -1.442695, %v674_v28 }
 0x12b   : > { %3452 = vpow2.f32 %v3249_v55 }
 0x12c   : > { %3454 = vtanh.f32 %v669_v29 }
 0x12d   : > { %3456 = vpow2.f32 %v3250_v30 }
 0x12e   : > { %3458 = vtanh.f32 %v673_v31 }
 0x12f   : > { %3460 = vpow2.f32 %v3251_v32 }
 0x132   : > { %v3447_v33 = vpop.eup %3446 }
 0x133   : > { %v3449_v34 = vpop.eup %3448  ;;  %v681_v35 = vadd.f32 1.0, %v3447_v33 }
 0x134   : > { %v3451_v36 = vpop.eup %3450  ;;  %v693_v39 = vadd.f32 1.0, %v3449_v34 }
 0x135   : > { %v3453_v40 = vpop.eup %3452  ;;  %3462 = vrcp.f32 %v681_v35  ;;  %v682_v37 = vadd.f32 1.0, %v3451_v36  ;;  %v3252_v35 = vld [vmem:[%s4041_s22 + $0x20] sm:$0xff]  ;;  %v3254_v36 = vld [vmem:[%s4041_s22 + $0x30] sm:$0xff] }
 0x136   : > { %3464 = vrcp.f32 %v693_v39  ;;  %v694_v41 = vadd.f32 1.0, %v3453_v40  ;;  %v3455_v38 = vpop.eup %3454  ;;  %v730_v39 = vunpack.c.l.bf16 %v3252_v35  ;;  %v731_v40 = vunpack.c.h.bf16 %v3252_v35 }
 0x137   : > { %3466 = vrcp.f32 %v682_v37  ;;  %v3457_v42 = vpop.eup %3456  ;;  %v734_v37 = vunpack.c.l.bf16 %v3254_v36 }
 0x138   : > { %3468 = vrcp.f32 %v694_v41  ;;  %v3459_v43 = vpop.eup %3458  ;;  %v707_v50 = vadd.f32 1.0, %v3457_v42  ;;  %v735_v42 = vunpack.c.h.bf16 %v3254_v36 }
 0x139   : > { %v3461_v44 = vpop.eup %3460 }
 0x13a   : > { %v708_v55 = vadd.f32 1.0, %v3461_v44  ;;  %3470 = vrcp.f32 %v707_v50  ;;  %v3253_v44 = vld [vmem:[%s4041_s22 + $0x28] sm:$0xff] }
 0x13f   : > { %v3463_v46 = vpop.eup %3462 }
 0x140   : > { %v3465_v47 = vpop.eup %3464  ;;  %v715_v49 = vmul.f32 %v3463_v46, %v3455_v38 }
 0x141   : > { %v3467_v51 = vpop.eup %3466  ;;  %v713_v52 = vmul.f32 %v3465_v47, %v566_v45 }
 0x142   : > { %v3469_v53 = vpop.eup %3468  ;;  %v716_v54 = vmul.f32 %v3467_v51, %v3459_v43 }
 0x143   : > { %v714_v56 = vmul.f32 %v3469_v53, %v567_v48  ;;  %v4236_v57 = vadd.f32 %v715_v49, %v713_v52 }
 0x144   : > { %v3471_v28 = vpop.eup %3470 }
 0x145   : > { %3472 = vtanh.f32 %v4236_v57  ;;  %v4239_v27 = vadd.f32 %v716_v54, %v714_v56 }
 0x146   : > { %3474 = vrcp.f32 %v708_v55  ;;  %v733_v55 = vunpack.c.h.bf16 %v3253_v44 }
 0x147   : > { %3476 = vtanh.f32 %v4239_v27 }
 0x14f   : > { %v3473_v29 = vpop.eup %3472 }
 0x150   : > { %v3475_v30 = vpop.eup %3474  ;;  %v721_v32 = vmul.f32 %v3473_v29, %v3471_v28  ;;  %v3255_v29 = vld [vmem:[%s4041_s22 + $0x38] sm:$0xff] }
 0x151   : > { %v3477_v31 = vpop.eup %3476 }
 0x152   : > { %v722_v33 = vmul.f32 %v3477_v31, %v3475_v30  ;;  %v732_v31 = vunpack.c.l.bf16 %v3253_v44 }
 0x154   : > { %v723_v34 = vpack.c.bf16 %v722_v33, %v721_v32  ;;  %v737_v33 = vunpack.c.h.bf16 %v3255_v29 }
 0x156   : > { %724 = vst [vmem:[%s4046_s25] sm:$0xff] %v723_v34  ;;  %771 = vmatmul.mubr.bf16.vlgmr.msra.gmra.mrb[4].mxu0 %v723_v34  ;;  %814 = vmatmul.mubr.bf16.vlgmr.msra.gmra.mrb[4].mxu1 %v723_v34  ;;  %v736_v34 = vunpack.c.l.bf16 %v3255_v29 }
 0x157   : > { %897 = vmatpush1.bf16.msra.mxu0 %v4097_v58  ;;  %940 = vmatpush1.bf16.msra.mxu1 %v4101_v60 }
 0x158   : > { %898 = vmatprep.subr.bf16.mxu0 %v4107_v63  ;;  %941 = vmatprep.subr.bf16.mxu1 %v4111_v1 }
 0x159   : > { %928 = vmatprep.mubr.bf16.mxu0 %v3985_v26  ;;  %971 = vmatprep.mubr.bf16.mxu1 %v3985_v26 }
 0x15b   : > { %899 = vmatpush1.bf16.msra.mxu0 %v4105_v62  ;;  %942 = vmatpush1.bf16.msra.mxu1 %v4109_v0 }
 0x15c   : > { %900 = vmatprep.subr.bf16.mxu0 %v4115_v3  ;;  %943 = vmatprep.subr.bf16.mxu1 %v4119_v5 }
 0x15f   : > { %901 = vmatpush1.bf16.msra.mxu0 %v4113_v2  ;;  %944 = vmatpush1.bf16.msra.mxu1 %v4117_v4 }
 0x160   : > { %902 = vmatprep.subr.bf16.mxu0 %v4123_v7  ;;  %945 = vmatprep.subr.bf16.mxu1 %v4127_v9 }
 0x163   : > { %903 = vmatpush1.bf16.msra.mxu0 %v4121_v6  ;;  %946 = vmatpush1.bf16.msra.mxu1 %v4125_v8 }
 0x164   : > { %904 = vmatprep.subr.bf16.mxu0 %v4131_v11  ;;  %947 = vmatprep.subr.bf16.mxu1 %v4135_v13 }
 0x167   : > { %905 = vmatpush1.bf16.msra.mxu0 %v4129_v10  ;;  %948 = vmatpush1.bf16.msra.mxu1 %v4133_v12 }
 0x168   : > { %906 = vmatprep.subr.bf16.mxu0 %v4139_v15  ;;  %949 = vmatprep.subr.bf16.mxu1 %v4143_v17 }
 0x16b   : > { %907 = vmatpush1.bf16.msra.mxu0 %v4137_v14  ;;  %950 = vmatpush1.bf16.msra.mxu1 %v4141_v16 }
 0x16c   : > { %908 = vmatprep.subr.bf16.mxu0 %v4147_v19  ;;  %951 = vmatprep.subr.bf16.mxu1 %v4151_v21 }
 0x16f   : > { %909 = vmatpush1.bf16.msra.mxu0 %v4145_v18  ;;  %952 = vmatpush1.bf16.msra.mxu1 %v4149_v20 }
 0x170   : > { %910 = vmatprep.subr.bf16.mxu0 %v4155_v23  ;;  %953 = vmatprep.subr.bf16.mxu1 %v4159_v25 }
 0x173   : > { %911 = vmatpush1.bf16.msra.mxu0 %v4153_v22  ;;  %954 = vmatpush1.bf16.msra.mxu1 %v4157_v24 }
 0x174   : > { %1054 = vmatprep.subr.bf16.mxu0 %v4099_v59  ;;  %1097 = vmatprep.subr.bf16.mxu1 %v4103_v61 }
 0x229   : > { %v772_v41 = vpop.f32.mrb[4].mxu0  ;;  %v815_v38 = vpop.f32.mrb[4].mxu1 }
 0x22a   : > { %v824_v43 = vadd.f32 %v772_v41, %v730_v39  ;;  %v774_v45 = vpop.f32.mrb[5].mxu0  ;;  %v817_v46 = vpop.f32.mrb[5].mxu1  ;;  %v826_v35 = vadd.f32 %v815_v38, %v732_v31 }
 0x22b   : > { %v825_v47 = vadd.f32 %v774_v45, %v731_v40  ;;  %v776_v48 = vpop.f32.mrb[6].mxu0  ;;  %v819_v49 = vpop.f32.mrb[6].mxu1  ;;  %v827_v32 = vadd.f32 %v817_v46, %v733_v55 }
 0x22c   : > { %v3256_v50 = vmul.f32 -1.442695, %v824_v43  ;;  %v828_v51 = vadd.f32 %v776_v48, %v734_v37  ;;  %v778_v52 = vpop.f32.mrb[7].mxu0  ;;  %v821_v53 = vpop.f32.mrb[7].mxu1  ;;  %v830_v40 = vadd.f32 %v819_v49, %v736_v34 }
 0x22d   : > { %v3258_v54 = vmul.f32 -1.442695, %v825_v47  ;;  %v829_v56 = vadd.f32 %v778_v52, %v735_v42  ;;  %v3260_v36 = vmul.f32 -1.442695, %v827_v32  ;;  %v831_v39 = vadd.f32 %v821_v53, %v737_v33 }
 0x22e   : > { %3478 = vpow2.f32 %v3256_v50  ;;  %v3257_v28 = vmul.f32 -1.442695, %v828_v51 }
 0x22f   : > { %3480 = vpow2.f32 %v3258_v54  ;;  %v3259_v30 = vmul.f32 -1.442695, %v829_v56  ;;  %v3261_v42 = vmul.f32 -1.442695, %v831_v39 }
 0x230   : > { %3482 = vpow2.f32 %v3257_v28 }
 0x231   : > { %3484 = vpow2.f32 %v3259_v30 }
 0x232   : > { %3486 = vtanh.f32 %v826_v35 }
 0x233   : > { %3488 = vpow2.f32 %v3260_v36 }
 0x234   : > { %3490 = vtanh.f32 %v830_v40 }
 0x238   : > { %v3479_v37 = vpop.eup %3478 }
 0x239   : > { %v3481_v41 = vpop.eup %3480  ;;  %v838_v43 = vadd.f32 1.0, %v3479_v37 }
 0x23a   : > { %v850_v45 = vadd.f32 1.0, %v3481_v41  ;;  %v3483_v47 = vpop.eup %3482 }
 0x23b   : > { %3492 = vrcp.f32 %v838_v43  ;;  %v839_v44 = vadd.f32 1.0, %v3483_v47  ;;  %v3485_v46 = vpop.eup %3484  ;;  %v3265_v43 = vld [vmem:[%s4041_s22 + $0x50] sm:$0xff] }
 0x23c   : > { %3494 = vrcp.f32 %v850_v45  ;;  %v851_v48 = vadd.f32 1.0, %v3485_v46  ;;  %v3487_v38 = vpop.eup %3486  ;;  %v892_v47 = vunpack.c.l.bf16 %v3265_v43 }
 0x23d   : > { %3496 = vpow2.f32 %v3261_v42  ;;  %v3489_v50 = vpop.eup %3488 }
 0x23e   : > { %3498 = vrcp.f32 %v839_v44  ;;  %v3491_v49 = vpop.eup %3490  ;;  %v864_v28 = vadd.f32 1.0, %v3489_v50  ;;  %v3264_v50 = vld [vmem:[%s4041_s22 + $0x48] sm:$0xff] }
 0x23f   : > { %3500 = vrcp.f32 %v851_v48  ;;  %v893_v48 = vunpack.c.h.bf16 %v3265_v43 }
 0x240   : > { %3502 = vrcp.f32 %v864_v28 }
 0x245   : > { %v3493_v51 = vpop.eup %3492 }
 0x246   : > { %v3495_v52 = vpop.eup %3494  ;;  %v872_v53 = vmul.f32 %v3493_v51, %v3487_v38 }
 0x247   : > { %v3497_v54 = vpop.eup %3496  ;;  %v870_v55 = vmul.f32 %v3495_v52, %v4236_v57 }
 0x248   : > { %v3499_v56 = vpop.eup %3498  ;;  %v865_v32 = vadd.f32 1.0, %v3497_v54 }
 0x249   : > { %v4282_v29 = vadd.f32 %v872_v53, %v870_v55  ;;  %v873_v30 = vmul.f32 %v3499_v56, %v3491_v49  ;;  %v3501_v31 = vpop.eup %3500 }
 0x24a   : > { %v871_v33 = vmul.f32 %v3501_v31, %v4239_v27  ;;  %v3503_v35 = vpop.eup %3502  ;;  %v3263_v27 = vld [vmem:[%s4041_s22 + $0x40] sm:$0xff] }
 0x24b   : > { %3504 = vtanh.f32 %v4282_v29  ;;  %v888_v42 = vunpack.c.l.bf16 %v3263_v27  ;;  %v889_v45 = vunpack.c.h.bf16 %v3263_v27 }
 0x24c   : > { %v4286_v34 = vadd.f32 %v873_v30, %v871_v33  ;;  %3506 = vrcp.f32 %v865_v32  ;;  %v891_v32 = vunpack.c.h.bf16 %v3264_v50 }
 0x24e   : > { %3508 = vtanh.f32 %v4286_v34 }
 0x255   : > { %v3505_v57 = vpop.eup %3504 }
 0x256   : > { %v3507_v36 = vpop.eup %3506  ;;  %v878_v40 = vmul.f32 %v3505_v57, %v3503_v35  ;;  %v3266_v57 = vld [vmem:[%s4041_s22 + $0x58] sm:$0xff] }
 0x258   : > { %v3509_v39 = vpop.eup %3508 }
 0x259   : > { %v879_v37 = vmul.f32 %v3509_v39, %v3507_v36  ;;  %v890_v39 = vunpack.c.l.bf16 %v3264_v50 }
 0x25b   : > { %v880_v41 = vpack.c.bf16 %v879_v37, %v878_v40  ;;  %v895_v37 = vunpack.c.h.bf16 %v3266_v57 }
 0x25d   : > { %3262 = vst [vmem:[%s4046_s25 + $0x8] sm:$0xff] %v880_v41  ;;  %929 = vmatmul.mubr.bf16.vlgmr.msra.gmra.mrb[8].mxu0 %v880_v41  ;;  %972 = vmatmul.mubr.bf16.vlgmr.msra.gmra.mrb[8].mxu1 %v880_v41  ;;  %v894_v41 = vunpack.c.l.bf16 %v3266_v57 }
 0x25e   : > { %1055 = vmatpush1.bf16.msra.mxu0 %v4097_v58  ;;  %1098 = vmatpush1.bf16.msra.mxu1 %v4101_v60 }
 0x25f   : > { %1056 = vmatprep.subr.bf16.mxu0 %v4107_v63  ;;  %1099 = vmatprep.subr.bf16.mxu1 %v4111_v1 }
 0x260   : > { %1086 = vmatprep.mubr.bf16.mxu0 %v3985_v26  ;;  %1129 = vmatprep.mubr.bf16.mxu1 %v3985_v26 }
 0x262   : > { %1057 = vmatpush1.bf16.msra.mxu0 %v4105_v62  ;;  %1100 = vmatpush1.bf16.msra.mxu1 %v4109_v0 }
 0x263   : > { %1058 = vmatprep.subr.bf16.mxu0 %v4115_v3  ;;  %1101 = vmatprep.subr.bf16.mxu1 %v4119_v5 }
 0x266   : > { %1059 = vmatpush1.bf16.msra.mxu0 %v4113_v2  ;;  %1102 = vmatpush1.bf16.msra.mxu1 %v4117_v4 }
 0x267   : > { %1060 = vmatprep.subr.bf16.mxu0 %v4123_v7  ;;  %1103 = vmatprep.subr.bf16.mxu1 %v4127_v9 }
 0x26a   : > { %1061 = vmatpush1.bf16.msra.mxu0 %v4121_v6  ;;  %1104 = vmatpush1.bf16.msra.mxu1 %v4125_v8 }
 0x26b   : > { %1062 = vmatprep.subr.bf16.mxu0 %v4131_v11  ;;  %1105 = vmatprep.subr.bf16.mxu1 %v4135_v13 }
 0x26e   : > { %1063 = vmatpush1.bf16.msra.mxu0 %v4129_v10  ;;  %1106 = vmatpush1.bf16.msra.mxu1 %v4133_v12 }
 0x26f   : > { %1064 = vmatprep.subr.bf16.mxu0 %v4139_v15  ;;  %1107 = vmatprep.subr.bf16.mxu1 %v4143_v17 }
 0x272   : > { %1065 = vmatpush1.bf16.msra.mxu0 %v4137_v14  ;;  %1108 = vmatpush1.bf16.msra.mxu1 %v4141_v16 }
 0x273   : > { %1066 = vmatprep.subr.bf16.mxu0 %v4147_v19  ;;  %1109 = vmatprep.subr.bf16.mxu1 %v4151_v21 }
 0x276   : > { %1067 = vmatpush1.bf16.msra.mxu0 %v4145_v18  ;;  %1110 = vmatpush1.bf16.msra.mxu1 %v4149_v20 }
 0x277   : > { %1068 = vmatprep.subr.bf16.mxu0 %v4155_v23  ;;  %1111 = vmatprep.subr.bf16.mxu1 %v4159_v25 }
 0x27a   : > { %1069 = vmatpush1.bf16.msra.mxu0 %v4153_v22  ;;  %1112 = vmatpush1.bf16.msra.mxu1 %v4157_v24 }
 0x27b   : > { %1212 = vmatprep.subr.bf16.mxu0 %v4099_v59  ;;  %1255 = vmatprep.subr.bf16.mxu1 %v4103_v61 }
 0x330   : > { %v930_v44 = vpop.f32.mrb[8].mxu0  ;;  %v973_v46 = vpop.f32.mrb[8].mxu1 }
 0x331   : > { %v982_v38 = vadd.f32 %v930_v44, %v888_v42  ;;  %v932_v49 = vpop.f32.mrb[9].mxu0  ;;  %v975_v51 = vpop.f32.mrb[9].mxu1  ;;  %v984_v27 = vadd.f32 %v973_v46, %v890_v39 }
 0x332   : > { %v983_v52 = vadd.f32 %v932_v49, %v889_v45  ;;  %v934_v53 = vpop.f32.mrb[10].mxu0  ;;  %v977_v54 = vpop.f32.mrb[10].mxu1  ;;  %v985_v40 = vadd.f32 %v975_v51, %v891_v32 }
 0x333   : > { %v3267_v55 = vmul.f32 -1.442695, %v982_v38  ;;  %v986_v56 = vadd.f32 %v934_v53, %v892_v47  ;;  %v936_v28 = vpop.f32.mrb[11].mxu0  ;;  %v979_v30 = vpop.f32.mrb[11].mxu1  ;;  %v988_v45 = vadd.f32 %v977_v54, %v894_v41 }
 0x334   : > { %v3269_v31 = vmul.f32 -1.442695, %v983_v52  ;;  %v987_v33 = vadd.f32 %v936_v28, %v893_v48  ;;  %v3271_v43 = vmul.f32 -1.442695, %v985_v40  ;;  %v989_v42 = vadd.f32 %v979_v30, %v895_v37 }
 0x335   : > { %3510 = vpow2.f32 %v3267_v55  ;;  %v3268_v35 = vmul.f32 -1.442695, %v986_v56 }
 0x336   : > { %3512 = vpow2.f32 %v3269_v31  ;;  %v3270_v36 = vmul.f32 -1.442695, %v987_v33  ;;  %v3272_v48 = vmul.f32 -1.442695, %v989_v42 }
 0x337   : > { %3514 = vpow2.f32 %v3268_v35 }
 0x338   : > { %3516 = vpow2.f32 %v3270_v36 }
 0x339   : > { %3518 = vtanh.f32 %v984_v27 }
 0x33a   : > { %3520 = vpow2.f32 %v3271_v43 }
 0x33b   : > { %3522 = vtanh.f32 %v988_v45 }
 0x33f   : > { %v3511_v47 = vpop.eup %3510 }
 0x340   : > { %v3513_v44 = vpop.eup %3512  ;;  %v996_v38 = vadd.f32 1.0, %v3511_v47 }
 0x341   : > { %v1008_v49 = vadd.f32 1.0, %v3513_v44  ;;  %v3515_v52 = vpop.eup %3514 }
 0x342   : > { %3524 = vrcp.f32 %v996_v38  ;;  %v997_v50 = vadd.f32 1.0, %v3515_v52  ;;  %v3517_v51 = vpop.eup %3516  ;;  %v3276_v38 = vld [vmem:[%s4041_s22 + $0x70] sm:$0xff] }
 0x343   : > { %3526 = vrcp.f32 %v1008_v49  ;;  %v1009_v53 = vadd.f32 1.0, %v3517_v51  ;;  %v3519_v46 = vpop.eup %3518  ;;  %v1050_v52 = vunpack.c.l.bf16 %v3276_v38 }
 0x344   : > { %3528 = vpow2.f32 %v3272_v48  ;;  %v3521_v55 = vpop.eup %3520 }
 0x345   : > { %3530 = vrcp.f32 %v997_v50  ;;  %v3523_v54 = vpop.eup %3522  ;;  %v1022_v35 = vadd.f32 1.0, %v3521_v55  ;;  %v3275_v55 = vld [vmem:[%s4041_s22 + $0x68] sm:$0xff] }
 0x346   : > { %3532 = vrcp.f32 %v1009_v53  ;;  %v1051_v53 = vunpack.c.h.bf16 %v3276_v38 }
 0x347   : > { %3534 = vrcp.f32 %v1022_v35 }
 0x34c   : > { %v3525_v56 = vpop.eup %3524 }
 0x34d   : > { %v3527_v28 = vpop.eup %3526  ;;  %v1030_v30 = vmul.f32 %v3525_v56, %v3519_v46 }
 0x34e   : > { %v3529_v31 = vpop.eup %3528  ;;  %v1028_v32 = vmul.f32 %v3527_v28, %v4282_v29 }
 0x34f   : > { %v3531_v33 = vpop.eup %3530  ;;  %v1023_v40 = vadd.f32 1.0, %v3529_v31 }
 0x350   : > { %v4329_v57 = vadd.f32 %v1030_v30, %v1028_v32  ;;  %v1031_v36 = vmul.f32 %v3531_v33, %v3523_v54  ;;  %v3533_v39 = vpop.eup %3532 }
 0x351   : > { %v1029_v37 = vmul.f32 %v3533_v39, %v4286_v34  ;;  %v3535_v27 = vpop.eup %3534  ;;  %v3274_v34 = vld [vmem:[%s4041_s22 + $0x60] sm:$0xff] }
 0x352   : > { %3536 = vtanh.f32 %v4329_v57  ;;  %v1046_v48 = vunpack.c.l.bf16 %v3274_v34  ;;  %v1047_v49 = vunpack.c.h.bf16 %v3274_v34 }
 0x353   : > { %v4333_v41 = vadd.f32 %v1031_v36, %v1029_v37  ;;  %3538 = vrcp.f32 %v1023_v40  ;;  %v1049_v40 = vunpack.c.h.bf16 %v3275_v55 }
 0x355   : > { %3540 = vtanh.f32 %v4333_v41 }
 0x35c   : > { %v3537_v29 = vpop.eup %3536 }
 0x35d   : > { %v3539_v43 = vpop.eup %3538  ;;  %v1036_v45 = vmul.f32 %v3537_v29, %v3535_v27  ;;  %v3277_v29 = vld [vmem:[%s4041_s22 + $0x78] sm:$0xff] }
 0x35f   : > { %v3541_v42 = vpop.eup %3540 }
 0x360   : > { %v1037_v47 = vmul.f32 %v3541_v42, %v3539_v43  ;;  %v1048_v42 = vunpack.c.l.bf16 %v3275_v55 }
 0x362   : > { %v1038_v44 = vpack.c.bf16 %v1037_v47, %v1036_v45  ;;  %v1053_v47 = vunpack.c.h.bf16 %v3277_v29 }
 0x364   : > { %3273 = vst [vmem:[%s4046_s25 + $0x10] sm:$0xff] %v1038_v44  ;;  %1087 = vmatmul.mubr.bf16.vlgmr.msra.gmra.mrb[12].mxu0 %v1038_v44  ;;  %1130 = vmatmul.mubr.bf16.vlgmr.msra.gmra.mrb[12].mxu1 %v1038_v44  ;;  %v1052_v44 = vunpack.c.l.bf16 %v3277_v29 }
 0x365   : > { %1213 = vmatpush1.bf16.msra.mxu0 %v4097_v58  ;;  %1256 = vmatpush1.bf16.msra.mxu1 %v4101_v60 }
 0x366   : > { %1214 = vmatprep.subr.bf16.mxu0 %v4107_v63  ;;  %1257 = vmatprep.subr.bf16.mxu1 %v4111_v1 }
 0x367   : > { %1244 = vmatprep.mubr.bf16.mxu0 %v3985_v26  ;;  %1287 = vmatprep.mubr.bf16.mxu1 %v3985_v26 }
 0x369   : > { %1215 = vmatpush1.bf16.msra.mxu0 %v4105_v62  ;;  %1258 = vmatpush1.bf16.msra.mxu1 %v4109_v0 }
 0x36a   : > { %1216 = vmatprep.subr.bf16.mxu0 %v4115_v3  ;;  %1259 = vmatprep.subr.bf16.mxu1 %v4119_v5 }
 0x36d   : > { %1217 = vmatpush1.bf16.msra.mxu0 %v4113_v2  ;;  %1260 = vmatpush1.bf16.msra.mxu1 %v4117_v4 }
 0x36e   : > { %1218 = vmatprep.subr.bf16.mxu0 %v4123_v7  ;;  %1261 = vmatprep.subr.bf16.mxu1 %v4127_v9 }
 0x371   : > { %1219 = vmatpush1.bf16.msra.mxu0 %v4121_v6  ;;  %1262 = vmatpush1.bf16.msra.mxu1 %v4125_v8 }
 0x372   : > { %1220 = vmatprep.subr.bf16.mxu0 %v4131_v11  ;;  %1263 = vmatprep.subr.bf16.mxu1 %v4135_v13 }
 0x375   : > { %1221 = vmatpush1.bf16.msra.mxu0 %v4129_v10  ;;  %1264 = vmatpush1.bf16.msra.mxu1 %v4133_v12 }
 0x376   : > { %1222 = vmatprep.subr.bf16.mxu0 %v4139_v15  ;;  %1265 = vmatprep.subr.bf16.mxu1 %v4143_v17 }
 0x379   : > { %1223 = vmatpush1.bf16.msra.mxu0 %v4137_v14  ;;  %1266 = vmatpush1.bf16.msra.mxu1 %v4141_v16 }
 0x37a   : > { %1224 = vmatprep.subr.bf16.mxu0 %v4147_v19  ;;  %1267 = vmatprep.subr.bf16.mxu1 %v4151_v21 }
 0x37d   : > { %1225 = vmatpush1.bf16.msra.mxu0 %v4145_v18  ;;  %1268 = vmatpush1.bf16.msra.mxu1 %v4149_v20 }
 0x37e   : > { %1226 = vmatprep.subr.bf16.mxu0 %v4155_v23  ;;  %1269 = vmatprep.subr.bf16.mxu1 %v4159_v25 }
 0x381   : > { %1227 = vmatpush1.bf16.msra.mxu0 %v4153_v22  ;;  %1270 = vmatpush1.bf16.msra.mxu1 %v4157_v24 }
 0x382   : > { %1370 = vmatprep.subr.bf16.mxu0 %v4099_v59  ;;  %1413 = vmatprep.subr.bf16.mxu1 %v4103_v61 }
 0x437   : > { %v1088_v50 = vpop.f32.mrb[12].mxu0  ;;  %v1131_v51 = vpop.f32.mrb[12].mxu1 }
 0x438   : > { %v1140_v46 = vadd.f32 %v1088_v50, %v1046_v48  ;;  %v1090_v54 = vpop.f32.mrb[13].mxu0  ;;  %v1133_v56 = vpop.f32.mrb[13].mxu1  ;;  %v1142_v34 = vadd.f32 %v1131_v51, %v1048_v42 }
 0x439   : > { %v1141_v28 = vadd.f32 %v1090_v54, %v1047_v49  ;;  %v1092_v30 = vpop.f32.mrb[14].mxu0  ;;  %v1135_v31 = vpop.f32.mrb[14].mxu1  ;;  %v1143_v45 = vadd.f32 %v1133_v56, %v1049_v40 }
 0x43a   : > { %v3278_v32 = vmul.f32 -1.442695, %v1140_v46  ;;  %v1144_v33 = vadd.f32 %v1092_v30, %v1050_v52  ;;  %v1094_v35 = vpop.f32.mrb[15].mxu0  ;;  %v1137_v36 = vpop.f32.mrb[15].mxu1  ;;  %v1146_v49 = vadd.f32 %v1135_v31, %v1052_v44 }
 0x43b   : > { %v3280_v39 = vmul.f32 -1.442695, %v1141_v28  ;;  %v1145_v37 = vadd.f32 %v1094_v35, %v1051_v53  ;;  %v3282_v38 = vmul.f32 -1.442695, %v1143_v45  ;;  %v1147_v48 = vadd.f32 %v1137_v36, %v1053_v47 }
 0x43c   : > { %3542 = vpow2.f32 %v3278_v32  ;;  %v3279_v27 = vmul.f32 -1.442695, %v1144_v33 }
 0x43d   : > { %3544 = vpow2.f32 %v3280_v39  ;;  %v3281_v43 = vmul.f32 -1.442695, %v1145_v37  ;;  %v3283_v53 = vmul.f32 -1.442695, %v1147_v48 }
 0x43e   : > { %3546 = vpow2.f32 %v3279_v27 }
 0x43f   : > { %3548 = vpow2.f32 %v3281_v43 }
 0x440   : > { %3550 = vtanh.f32 %v1142_v34 }
 0x441   : > { %3552 = vpow2.f32 %v3282_v38 }
 0x442   : > { %3554 = vtanh.f32 %v1146_v49 }
 0x446   : > { %v3543_v52 = vpop.eup %3542 }
 0x447   : > { %v3545_v50 = vpop.eup %3544  ;;  %v1154_v46 = vadd.f32 1.0, %v3543_v52 }
 0x448   : > { %v1166_v54 = vadd.f32 1.0, %v3545_v50  ;;  %v3547_v28 = vpop.eup %3546 }
 0x449   : > { %3556 = vrcp.f32 %v1154_v46  ;;  %v1155_v55 = vadd.f32 1.0, %v3547_v28  ;;  %v3549_v56 = vpop.eup %3548  ;;  %v3287_v46 = vld [vmem:[%s4041_s22 + $0x90] sm:$0xff] }
 0x44a   : > { %3558 = vrcp.f32 %v1166_v54  ;;  %v1167_v30 = vadd.f32 1.0, %v3549_v56  ;;  %v3551_v51 = vpop.eup %3550  ;;  %v1208_v28 = vunpack.c.l.bf16 %v3287_v46 }
 0x44b   : > { %3560 = vpow2.f32 %v3283_v53  ;;  %v3553_v32 = vpop.eup %3552 }
 0x44c   : > { %3562 = vrcp.f32 %v1155_v55  ;;  %v3555_v31 = vpop.eup %3554  ;;  %v1180_v27 = vadd.f32 1.0, %v3553_v32  ;;  %v3286_v32 = vld [vmem:[%s4041_s22 + $0x88] sm:$0xff] }
 0x44d   : > { %3564 = vrcp.f32 %v1167_v30  ;;  %v1209_v30 = vunpack.c.h.bf16 %v3287_v46 }
 0x44e   : > { %3566 = vrcp.f32 %v1180_v27 }
 0x453   : > { %v3557_v33 = vpop.eup %3556 }
 0x454   : > { %v3559_v35 = vpop.eup %3558  ;;  %v1188_v36 = vmul.f32 %v3557_v33, %v3551_v51 }
 0x455   : > { %v3561_v39 = vpop.eup %3560  ;;  %v1186_v40 = vmul.f32 %v3559_v35, %v4329_v57 }
 0x456   : > { %v3563_v37 = vpop.eup %3562  ;;  %v1181_v45 = vadd.f32 1.0, %v3561_v39 }
 0x457   : > { %v4376_v29 = vadd.f32 %v1188_v36, %v1186_v40  ;;  %v1189_v43 = vmul.f32 %v3563_v37, %v3555_v31  ;;  %v3565_v42 = vpop.eup %3564 }
 0x458   : > { %v1187_v47 = vmul.f32 %v3565_v42, %v4333_v41  ;;  %v3567_v34 = vpop.eup %3566  ;;  %v3285_v41 = vld [vmem:[%s4041_s22 + $0x80] sm:$0xff] }
 0x459   : > { %3568 = vtanh.f32 %v4376_v29  ;;  %v1204_v53 = vunpack.c.l.bf16 %v3285_v41  ;;  %v1205_v54 = vunpack.c.h.bf16 %v3285_v41 }
 0x45a   : > { %v4380_v44 = vadd.f32 %v1189_v43, %v1187_v47  ;;  %3570 = vrcp.f32 %v1181_v45  ;;  %v1207_v45 = vunpack.c.h.bf16 %v3286_v32 }
 0x45c   : > { %3572 = vtanh.f32 %v4380_v44 }
 0x463   : > { %v3569_v57 = vpop.eup %3568 }
 0x464   : > { %v3571_v38 = vpop.eup %3570  ;;  %v1194_v49 = vmul.f32 %v3569_v57, %v3567_v34  ;;  %v3288_v57 = vld [vmem:[%s4041_s22 + $0x98] sm:$0xff] }
 0x466   : > { %v3573_v48 = vpop.eup %3572 }
 0x467   : > { %v1195_v52 = vmul.f32 %v3573_v48, %v3571_v38  ;;  %v1206_v48 = vunpack.c.l.bf16 %v3286_v32 }
 0x469   : > { %v1196_v50 = vpack.c.bf16 %v1195_v52, %v1194_v49  ;;  %v1211_v52 = vunpack.c.h.bf16 %v3288_v57 }
 0x46b   : > { %3284 = vst [vmem:[%s4046_s25 + $0x18] sm:$0xff] %v1196_v50  ;;  %1245 = vmatmul.mubr.bf16.vlgmr.msra.gmra.mrb[16].mxu0 %v1196_v50  ;;  %1288 = vmatmul.mubr.bf16.vlgmr.msra.gmra.mrb[16].mxu1 %v1196_v50  ;;  %v1210_v50 = vunpack.c.l.bf16 %v3288_v57 }
 0x46c   : > { %1371 = vmatpush1.bf16.msra.mxu0 %v4097_v58  ;;  %1414 = vmatpush1.bf16.msra.mxu1 %v4101_v60 }
 0x46d   : > { %1372 = vmatprep.subr.bf16.mxu0 %v4107_v63  ;;  %1415 = vmatprep.subr.bf16.mxu1 %v4111_v1 }
 0x46e   : > { %1402 = vmatprep.mubr.bf16.mxu0 %v3985_v26  ;;  %1445 = vmatprep.mubr.bf16.mxu1 %v3985_v26 }
 0x470   : > { %1373 = vmatpush1.bf16.msra.mxu0 %v4105_v62  ;;  %1416 = vmatpush1.bf16.msra.mxu1 %v4109_v0 }
 0x471   : > { %1374 = vmatprep.subr.bf16.mxu0 %v4115_v3  ;;  %1417 = vmatprep.subr.bf16.mxu1 %v4119_v5 }
 0x474   : > { %1375 = vmatpush1.bf16.msra.mxu0 %v4113_v2  ;;  %1418 = vmatpush1.bf16.msra.mxu1 %v4117_v4 }
 0x475   : > { %1376 = vmatprep.subr.bf16.mxu0 %v4123_v7  ;;  %1419 = vmatprep.subr.bf16.mxu1 %v4127_v9 }
 0x478   : > { %1377 = vmatpush1.bf16.msra.mxu0 %v4121_v6  ;;  %1420 = vmatpush1.bf16.msra.mxu1 %v4125_v8 }
 0x479   : > { %1378 = vmatprep.subr.bf16.mxu0 %v4131_v11  ;;  %1421 = vmatprep.subr.bf16.mxu1 %v4135_v13 }
 0x47c   : > { %1379 = vmatpush1.bf16.msra.mxu0 %v4129_v10  ;;  %1422 = vmatpush1.bf16.msra.mxu1 %v4133_v12 }
 0x47d   : > { %1380 = vmatprep.subr.bf16.mxu0 %v4139_v15  ;;  %1423 = vmatprep.subr.bf16.mxu1 %v4143_v17 }
 0x480   : > { %1381 = vmatpush1.bf16.msra.mxu0 %v4137_v14  ;;  %1424 = vmatpush1.bf16.msra.mxu1 %v4141_v16 }
 0x481   : > { %1382 = vmatprep.subr.bf16.mxu0 %v4147_v19  ;;  %1425 = vmatprep.subr.bf16.mxu1 %v4151_v21 }
 0x484   : > { %1383 = vmatpush1.bf16.msra.mxu0 %v4145_v18  ;;  %1426 = vmatpush1.bf16.msra.mxu1 %v4149_v20 }
 0x485   : > { %1384 = vmatprep.subr.bf16.mxu0 %v4155_v23  ;;  %1427 = vmatprep.subr.bf16.mxu1 %v4159_v25 }
 0x488   : > { %1385 = vmatpush1.bf16.msra.mxu0 %v4153_v22  ;;  %1428 = vmatpush1.bf16.msra.mxu1 %v4157_v24 }
 0x489   : > { %1528 = vmatprep.subr.bf16.mxu0 %v4099_v59  ;;  %1571 = vmatprep.subr.bf16.mxu1 %v4103_v61 }
 0x53e   : > { %v1246_v55 = vpop.f32.mrb[16].mxu0  ;;  %v1289_v56 = vpop.f32.mrb[16].mxu1 }
 0x53f   : > { %v1298_v51 = vadd.f32 %v1246_v55, %v1204_v53  ;;  %v1248_v31 = vpop.f32.mrb[17].mxu0  ;;  %v1291_v33 = vpop.f32.mrb[17].mxu1  ;;  %v1300_v41 = vadd.f32 %v1289_v56, %v1206_v48 }
 0x540   : > { %v1299_v35 = vadd.f32 %v1248_v31, %v1205_v54  ;;  %v1250_v36 = vpop.f32.mrb[18].mxu0  ;;  %v1293_v39 = vpop.f32.mrb[18].mxu1  ;;  %v1301_v49 = vadd.f32 %v1291_v33, %v1207_v45 }
 0x541   : > { %v3289_v40 = vmul.f32 -1.442695, %v1298_v51  ;;  %v1302_v37 = vadd.f32 %v1250_v36, %v1208_v28  ;;  %v1252_v27 = vpop.f32.mrb[19].mxu0  ;;  %v1295_v43 = vpop.f32.mrb[19].mxu1  ;;  %v1304_v54 = vadd.f32 %v1293_v39, %v1210_v50 }
 0x542   : > { %v3291_v42 = vmul.f32 -1.442695, %v1299_v35  ;;  %v1303_v47 = vadd.f32 %v1252_v27, %v1209_v30  ;;  %v3293_v46 = vmul.f32 -1.442695, %v1301_v49  ;;  %v1305_v53 = vadd.f32 %v1295_v43, %v1211_v52 }
 0x543   : > { %3574 = vpow2.f32 %v3289_v40  ;;  %v3290_v34 = vmul.f32 -1.442695, %v1302_v37 }
 0x544   : > { %3576 = vpow2.f32 %v3291_v42  ;;  %v3292_v38 = vmul.f32 -1.442695, %v1303_v47  ;;  %v3294_v30 = vmul.f32 -1.442695, %v1305_v53 }
 0x545   : > { %3578 = vpow2.f32 %v3290_v34 }
 0x546   : > { %3580 = vpow2.f32 %v3292_v38 }
 0x547   : > { %3582 = vtanh.f32 %v1300_v41 }
 0x548   : > { %3584 = vpow2.f32 %v3293_v46 }
 0x549   : > { %3586 = vtanh.f32 %v1304_v54 }
 0x54d   : > { %v3575_v28 = vpop.eup %3574 }
 0x54e   : > { %v3577_v55 = vpop.eup %3576  ;;  %v1312_v51 = vadd.f32 1.0, %v3575_v28 }
 0x54f   : > { %v1324_v31 = vadd.f32 1.0, %v3577_v55  ;;  %v3579_v35 = vpop.eup %3578 }
 0x550   : > { %3588 = vrcp.f32 %v1312_v51  ;;  %v1313_v32 = vadd.f32 1.0, %v3579_v35  ;;  %v3581_v33 = vpop.eup %3580  ;;  %v3298_v51 = vld [vmem:[%s4041_s22 + $0xb0] sm:$0xff] }
 0x551   : > { %3590 = vrcp.f32 %v1324_v31  ;;  %v1325_v36 = vadd.f32 1.0, %v3581_v33  ;;  %v3583_v56 = vpop.eup %3582  ;;  %v1366_v35 = vunpack.c.l.bf16 %v3298_v51 }
 0x552   : > { %3592 = vpow2.f32 %v3294_v30  ;;  %v3585_v40 = vpop.eup %3584 }
 0x553   : > { %3594 = vrcp.f32 %v1313_v32  ;;  %v3587_v39 = vpop.eup %3586  ;;  %v1338_v34 = vadd.f32 1.0, %v3585_v40  ;;  %v3297_v40 = vld [vmem:[%s4041_s22 + $0xa8] sm:$0xff] }
 0x554   : > { %3596 = vrcp.f32 %v1325_v36  ;;  %v1367_v36 = vunpack.c.h.bf16 %v3298_v51 }
 0x555   : > { %3598 = vrcp.f32 %v1338_v34 }
 0x55a   : > { %v3589_v37 = vpop.eup %3588 }
 0x55b   : > { %v3591_v27 = vpop.eup %3590  ;;  %v1346_v43 = vmul.f32 %v3589_v37, %v3583_v56 }
 0x55c   : > { %v3593_v42 = vpop.eup %3592  ;;  %v1344_v45 = vmul.f32 %v3591_v27, %v4376_v29 }
 0x55d   : > { %v3595_v47 = vpop.eup %3594  ;;  %v1339_v49 = vadd.f32 1.0, %v3593_v42 }
 0x55e   : > { %v4423_v57 = vadd.f32 %v1346_v43, %v1344_v45  ;;  %v1347_v38 = vmul.f32 %v3595_v47, %v3587_v39  ;;  %v3597_v48 = vpop.eup %3596 }
 0x55f   : > { %v1345_v52 = vmul.f32 %v3597_v48, %v4380_v44  ;;  %v3599_v41 = vpop.eup %3598  ;;  %v3296_v44 = vld [vmem:[%s4041_s22 + $0xa0] sm:$0xff] }
 0x560   : > { %3600 = vtanh.f32 %v4423_v57  ;;  %v1362_v30 = vunpack.c.l.bf16 %v3296_v44  ;;  %v1363_v31 = vunpack.c.h.bf16 %v3296_v44 }
 0x561   : > { %v4427_v50 = vadd.f32 %v1347_v38, %v1345_v52  ;;  %3602 = vrcp.f32 %v1339_v49  ;;  %v1365_v49 = vunpack.c.h.bf16 %v3297_v40 }
 0x563   : > { %3604 = vtanh.f32 %v4427_v50 }
 0x56a   : > { %v3601_v29 = vpop.eup %3600 }
 0x56b   : > { %v3603_v46 = vpop.eup %3602  ;;  %v1352_v54 = vmul.f32 %v3601_v29, %v3599_v41  ;;  %v3299_v29 = vld [vmem:[%s4041_s22 + $0xb8] sm:$0xff] }
 0x56d   : > { %v3605_v53 = vpop.eup %3604 }
 0x56e   : > { %v1353_v28 = vmul.f32 %v3605_v53, %v3603_v46  ;;  %v1364_v53 = vunpack.c.l.bf16 %v3297_v40 }
 0x570   : > { %v1354_v55 = vpack.c.bf16 %v1353_v28, %v1352_v54  ;;  %v1369_v28 = vunpack.c.h.bf16 %v3299_v29 }
 0x572   : > { %3295 = vst [vmem:[%s4046_s25 + $0x20] sm:$0xff] %v1354_v55  ;;  %1403 = vmatmul.mubr.bf16.vlgmr.msra.gmra.mrb[20].mxu0 %v1354_v55  ;;  %1446 = vmatmul.mubr.bf16.vlgmr.msra.gmra.mrb[20].mxu1 %v1354_v55  ;;  %v1368_v55 = vunpack.c.l.bf16 %v3299_v29 }
 0x573   : > { %1529 = vmatpush1.bf16.msra.mxu0 %v4097_v58  ;;  %1572 = vmatpush1.bf16.msra.mxu1 %v4101_v60 }
 0x574   : > { %1530 = vmatprep.subr.bf16.mxu0 %v4107_v63  ;;  %1573 = vmatprep.subr.bf16.mxu1 %v4111_v1 }
 0x575   : > { %1560 = vmatprep.mubr.bf16.mxu0 %v3985_v26  ;;  %1603 = vmatprep.mubr.bf16.mxu1 %v3985_v26 }
 0x577   : > { %1531 = vmatpush1.bf16.msra.mxu0 %v4105_v62  ;;  %1574 = vmatpush1.bf16.msra.mxu1 %v4109_v0 }
 0x578   : > { %1532 = vmatprep.subr.bf16.mxu0 %v4115_v3  ;;  %1575 = vmatprep.subr.bf16.mxu1 %v4119_v5 }
 0x57b   : > { %1533 = vmatpush1.bf16.msra.mxu0 %v4113_v2  ;;  %1576 = vmatpush1.bf16.msra.mxu1 %v4117_v4 }
 0x57c   : > { %1534 = vmatprep.subr.bf16.mxu0 %v4123_v7  ;;  %1577 = vmatprep.subr.bf16.mxu1 %v4127_v9 }
 0x57f   : > { %1535 = vmatpush1.bf16.msra.mxu0 %v4121_v6  ;;  %1578 = vmatpush1.bf16.msra.mxu1 %v4125_v8 }
 0x580   : > { %1536 = vmatprep.subr.bf16.mxu0 %v4131_v11  ;;  %1579 = vmatprep.subr.bf16.mxu1 %v4135_v13 }
 0x583   : > { %1537 = vmatpush1.bf16.msra.mxu0 %v4129_v10  ;;  %1580 = vmatpush1.bf16.msra.mxu1 %v4133_v12 }
 0x584   : > { %1538 = vmatprep.subr.bf16.mxu0 %v4139_v15  ;;  %1581 = vmatprep.subr.bf16.mxu1 %v4143_v17 }
 0x587   : > { %1539 = vmatpush1.bf16.msra.mxu0 %v4137_v14  ;;  %1582 = vmatpush1.bf16.msra.mxu1 %v4141_v16 }
 0x588   : > { %1540 = vmatprep.subr.bf16.mxu0 %v4147_v19  ;;  %1583 = vmatprep.subr.bf16.mxu1 %v4151_v21 }
 0x58b   : > { %1541 = vmatpush1.bf16.msra.mxu0 %v4145_v18  ;;  %1584 = vmatpush1.bf16.msra.mxu1 %v4149_v20 }
 0x58c   : > { %1542 = vmatprep.subr.bf16.mxu0 %v4155_v23  ;;  %1585 = vmatprep.subr.bf16.mxu1 %v4159_v25 }
 0x58f   : > { %1543 = vmatpush1.bf16.msra.mxu0 %v4153_v22  ;;  %1586 = vmatpush1.bf16.msra.mxu1 %v4157_v24 }
 0x590   : > { %1686 = vmatprep.subr.bf16.mxu0 %v4099_v59  ;;  %1729 = vmatprep.subr.bf16.mxu1 %v4103_v61 }
 0x645   : > { %v1404_v32 = vpop.f32.mrb[20].mxu0  ;;  %v1447_v33 = vpop.f32.mrb[20].mxu1 }
 0x646   : > { %v1456_v56 = vadd.f32 %v1404_v32, %v1362_v30  ;;  %v1406_v39 = vpop.f32.mrb[21].mxu0  ;;  %v1449_v37 = vpop.f32.mrb[21].mxu1  ;;  %v1458_v44 = vadd.f32 %v1447_v33, %v1364_v53 }
 0x647   : > { %v1457_v27 = vadd.f32 %v1406_v39, %v1363_v31  ;;  %v1408_v43 = vpop.f32.mrb[22].mxu0  ;;  %v1451_v42 = vpop.f32.mrb[22].mxu1  ;;  %v1459_v54 = vadd.f32 %v1449_v37, %v1365_v49 }
 0x648   : > { %v3300_v45 = vmul.f32 -1.442695, %v1456_v56  ;;  %v1460_v47 = vadd.f32 %v1408_v43, %v1366_v35  ;;  %v1410_v34 = vpop.f32.mrb[23].mxu0  ;;  %v1453_v38 = vpop.f32.mrb[23].mxu1  ;;  %v1462_v31 = vadd.f32 %v1451_v42, %v1368_v55 }
 0x649   : > { %v3302_v48 = vmul.f32 -1.442695, %v1457_v27  ;;  %v1461_v52 = vadd.f32 %v1410_v34, %v1367_v36  ;;  %v3304_v51 = vmul.f32 -1.442695, %v1459_v54  ;;  %v1463_v30 = vadd.f32 %v1453_v38, %v1369_v28 }
 0x64a   : > { %3606 = vpow2.f32 %v3300_v45  ;;  %v3301_v41 = vmul.f32 -1.442695, %v1460_v47 }
 0x64b   : > { %3608 = vpow2.f32 %v3302_v48  ;;  %v3303_v46 = vmul.f32 -1.442695, %v1461_v52  ;;  %v3305_v36 = vmul.f32 -1.442695, %v1463_v30 }
 0x64c   : > { %3610 = vpow2.f32 %v3301_v41 }
 0x64d   : > { %3612 = vpow2.f32 %v3303_v46 }
 0x64e   : > { %3614 = vtanh.f32 %v1458_v44 }
 0x64f   : > { %3616 = vpow2.f32 %v3304_v51 }
 0x650   : > { %3618 = vtanh.f32 %v1462_v31 }
 0x654   : > { %v3607_v35 = vpop.eup %3606 }
 0x655   : > { %v3609_v32 = vpop.eup %3608  ;;  %v1470_v56 = vadd.f32 1.0, %v3607_v35 }
 0x656   : > { %v1482_v39 = vadd.f32 1.0, %v3609_v32  ;;  %v3611_v27 = vpop.eup %3610 }
 0x657   : > { %3620 = vrcp.f32 %v1470_v56  ;;  %v1471_v40 = vadd.f32 1.0, %v3611_v27  ;;  %v3613_v37 = vpop.eup %3612 }
 0x658   : > { %3622 = vrcp.f32 %v1482_v39  ;;  %v1483_v43 = vadd.f32 1.0, %v3613_v37  ;;  %v3615_v33 = vpop.eup %3614 }
 0x659   : > { %3624 = vpow2.f32 %v3305_v36  ;;  %v3617_v45 = vpop.eup %3616 }
 0x65a   : > { %3626 = vrcp.f32 %v1471_v40  ;;  %v3619_v42 = vpop.eup %3618  ;;  %v1496_v41 = vadd.f32 1.0, %v3617_v45 }
 0x65b   : > { %3628 = vrcp.f32 %v1483_v43 }
 0x65c   : > { %3630 = vrcp.f32 %v1496_v41 }
 0x661   : > { %v3621_v47 = vpop.eup %3620 }
 0x662   : > { %v3623_v34 = vpop.eup %3622  ;;  %v1504_v38 = vmul.f32 %v3621_v47, %v3615_v33  ;;  %v3308_v33 = vld [vmem:[%s4041_s22 + $0xc8] sm:$0xff] }
 0x663   : > { %v3625_v48 = vpop.eup %3624  ;;  %v1502_v49 = vmul.f32 %v3623_v34, %v4423_v57 }
 0x664   : > { %v3627_v52 = vpop.eup %3626  ;;  %v1497_v54 = vadd.f32 1.0, %v3625_v48 }
 0x665   : > { %v4470_v29 = vadd.f32 %v1504_v38, %v1502_v49  ;;  %v1505_v46 = vmul.f32 %v3627_v52, %v3619_v42  ;;  %v3629_v53 = vpop.eup %3628 }
 0x666   : > { %v1503_v28 = vmul.f32 %v3629_v53, %v4427_v50  ;;  %v3631_v44 = vpop.eup %3630  ;;  %v3309_v50 = vld [vmem:[%s4041_s22 + $0xd0] sm:$0xff]  ;;  %v1523_v53 = vunpack.c.h.bf16 %v3308_v33 }
 0x667   : > { %3632 = vtanh.f32 %v4470_v29  ;;  %v1524_v39 = vunpack.c.l.bf16 %v3309_v50  ;;  %v1525_v37 = vunpack.c.h.bf16 %v3309_v50 }
 0x668   : > { %v4474_v55 = vadd.f32 %v1505_v46, %v1503_v28  ;;  %3634 = vrcp.f32 %v1497_v54 }
 0x66a   : > { %3636 = vtanh.f32 %v4474_v55 }
 0x671   : > { %v3633_v57 = vpop.eup %3632 }
 0x672   : > { %v3635_v51 = vpop.eup %3634  ;;  %v1510_v31 = vmul.f32 %v3633_v57, %v3631_v44  ;;  %v3310_v44 = vld [vmem:[%s4041_s22 + $0xd8] sm:$0xff] }
 0x674   : > { %v3637_v30 = vpop.eup %3636 }
 0x675   : > { %v1511_v35 = vmul.f32 %v3637_v30, %v3635_v51  ;;  %v1522_v51 = vunpack.c.l.bf16 %v3308_v33 }
 0x677   : > { %v1512_v32 = vpack.c.bf16 %v1511_v35, %v1510_v31  ;;  %v1527_v31 = vunpack.c.h.bf16 %v3310_v44  ;;  %v1526_v35 = vunpack.c.l.bf16 %v3310_v44 }
 0x679   : > { %3306 = vst [vmem:[%s4046_s25 + $0x28] sm:$0xff] %v1512_v32  ;;  %1561 = vmatmul.mubr.bf16.vlgmr.msra.gmra.mrb[24].mxu0 %v1512_v32  ;;  %1604 = vmatmul.mubr.bf16.vlgmr.msra.gmra.mrb[24].mxu1 %v1512_v32 }
 0x67a   : > { %1687 = vmatpush1.bf16.msra.mxu0 %v4097_v58  ;;  %1730 = vmatpush1.bf16.msra.mxu1 %v4101_v60 }
 0x67b   : > { %1688 = vmatprep.subr.bf16.mxu0 %v4107_v63  ;;  %1731 = vmatprep.subr.bf16.mxu1 %v4111_v1 }
 0x67c   : > { %1718 = vmatprep.mubr.bf16.mxu0 %v3985_v26  ;;  %1761 = vmatprep.mubr.bf16.mxu1 %v3985_v26  ;;  %v3307_v26 = vld [vmem:[%s4041_s22 + $0xc0] sm:$0xff] }
 0x67d   : > { %v1520_v56 = vunpack.c.l.bf16 %v3307_v26  ;;  %v1521_v36 = vunpack.c.h.bf16 %v3307_v26 }
 0x67e   : > { %1689 = vmatpush1.bf16.msra.mxu0 %v4105_v62  ;;  %1732 = vmatpush1.bf16.msra.mxu1 %v4109_v0 }
 0x67f   : > { %1690 = vmatprep.subr.bf16.mxu0 %v4115_v3  ;;  %1733 = vmatprep.subr.bf16.mxu1 %v4119_v5 }
 0x682   : > { %1691 = vmatpush1.bf16.msra.mxu0 %v4113_v2  ;;  %1734 = vmatpush1.bf16.msra.mxu1 %v4117_v4 }
 0x683   : > { %1692 = vmatprep.subr.bf16.mxu0 %v4123_v7  ;;  %1735 = vmatprep.subr.bf16.mxu1 %v4127_v9 }
 0x686   : > { %1693 = vmatpush1.bf16.msra.mxu0 %v4121_v6  ;;  %1736 = vmatpush1.bf16.msra.mxu1 %v4125_v8 }
 0x687   : > { %1694 = vmatprep.subr.bf16.mxu0 %v4131_v11  ;;  %1737 = vmatprep.subr.bf16.mxu1 %v4135_v13 }
 0x68a   : > { %1695 = vmatpush1.bf16.msra.mxu0 %v4129_v10  ;;  %1738 = vmatpush1.bf16.msra.mxu1 %v4133_v12 }
 0x68b   : > { %1696 = vmatprep.subr.bf16.mxu0 %v4139_v15  ;;  %1739 = vmatprep.subr.bf16.mxu1 %v4143_v17 }
 0x68e   : > { %1697 = vmatpush1.bf16.msra.mxu0 %v4137_v14  ;;  %1740 = vmatpush1.bf16.msra.mxu1 %v4141_v16 }
 0x68f   : > { %1698 = vmatprep.subr.bf16.mxu0 %v4147_v19  ;;  %1741 = vmatprep.subr.bf16.mxu1 %v4151_v21 }
 0x692   : > { %1699 = vmatpush1.bf16.msra.mxu0 %v4145_v18  ;;  %1742 = vmatpush1.bf16.msra.mxu1 %v4149_v20 }
 0x693   : > { %1700 = vmatprep.subr.bf16.mxu0 %v4155_v23  ;;  %1743 = vmatprep.subr.bf16.mxu1 %v4159_v25 }
 0x696   : > { %1701 = vmatpush1.bf16.msra.mxu0 %v4153_v22  ;;  %1744 = vmatpush1.bf16.msra.mxu1 %v4157_v24 }
 0x74c   : > { %v1562_v27 = vpop.f32.mrb[24].mxu0  ;;  %v1605_v40 = vpop.f32.mrb[24].mxu1 }
 0x74d   : > { %v1614_v43 = vadd.f32 %v1562_v27, %v1520_v56  ;;  %v1564_v45 = vpop.f32.mrb[25].mxu0  ;;  %v1607_v42 = vpop.f32.mrb[25].mxu1  ;;  %v1616_v32 = vadd.f32 %v1605_v40, %v1522_v51 }
 0x74e   : > { %v1615_v47 = vadd.f32 %v1564_v45, %v1521_v36  ;;  %v1566_v34 = vpop.f32.mrb[26].mxu0  ;;  %v1609_v38 = vpop.f32.mrb[26].mxu1  ;;  %v1617_v30 = vadd.f32 %v1607_v42, %v1523_v53 }
 0x74f   : > { %v3311_v48 = vmul.f32 -1.442695, %v1614_v43  ;;  %v1618_v49 = vadd.f32 %v1566_v34, %v1524_v39  ;;  %v1568_v52 = vpop.f32.mrb[27].mxu0  ;;  %v1611_v41 = vpop.f32.mrb[27].mxu1  ;;  %v1620_v56 = vadd.f32 %v1609_v38, %v1526_v35 }
 0x750   : > { %v3313_v46 = vmul.f32 -1.442695, %v1615_v47  ;;  %v1619_v54 = vadd.f32 %v1568_v52, %v1525_v37  ;;  %v3315_v26 = vmul.f32 -1.442695, %v1617_v30  ;;  %v1621_v50 = vadd.f32 %v1611_v41, %v1527_v31 }
 0x751   : > { %3638 = vpow2.f32 %v3311_v48  ;;  %v3312_v28 = vmul.f32 -1.442695, %v1618_v49 }
 0x752   : > { %3640 = vpow2.f32 %v3313_v46  ;;  %v3314_v57 = vmul.f32 -1.442695, %v1619_v54  ;;  %v3316_v37 = vmul.f32 -1.442695, %v1621_v50 }
 0x753   : > { %3642 = vpow2.f32 %v3312_v28 }
 0x754   : > { %3644 = vpow2.f32 %v3314_v57 }
 0x755   : > { %3646 = vtanh.f32 %v1616_v32 }
 0x756   : > { %3648 = vpow2.f32 %v3315_v26 }
 0x757   : > { %3650 = vtanh.f32 %v1620_v56 }
 0x75b   : > { %v3639_v36 = vpop.eup %3638 }
 0x75c   : > { %v3641_v39 = vpop.eup %3640  ;;  %v1628_v27 = vadd.f32 1.0, %v3639_v36 }
 0x75d   : > { %v1640_v43 = vadd.f32 1.0, %v3641_v39  ;;  %v3643_v45 = vpop.eup %3642  ;;  %v3320_v39 = vld [vmem:[%s4041_s22 + $0xf0] sm:$0xff] }
 0x75e   : > { %3652 = vrcp.f32 %v1628_v27  ;;  %v1629_v33 = vadd.f32 1.0, %v3643_v45  ;;  %v3645_v42 = vpop.eup %3644 }
 0x75f   : > { %3654 = vrcp.f32 %v1640_v43  ;;  %v1641_v47 = vadd.f32 1.0, %v3645_v42  ;;  %v3647_v40 = vpop.eup %3646  ;;  %v1682_v43 = vunpack.c.l.bf16 %v3320_v39  ;;  %v1683_v42 = vunpack.c.h.bf16 %v3320_v39 }
 0x760   : > { %3656 = vpow2.f32 %v3316_v37  ;;  %v3649_v34 = vpop.eup %3648 }
 0x761   : > { %3658 = vrcp.f32 %v1629_v33  ;;  %v3651_v38 = vpop.eup %3650  ;;  %v1654_v54 = vadd.f32 1.0, %v3649_v34 }
 0x762   : > { %3660 = vrcp.f32 %v1641_v47 }
 0x763   : > { %3662 = vrcp.f32 %v1654_v54 }
 0x768   : > { %v3653_v48 = vpop.eup %3652 }
 0x769   : > { %v3655_v49 = vpop.eup %3654  ;;  %v1662_v52 = vmul.f32 %v3653_v48, %v3647_v40  ;;  %v3319_v40 = vld [vmem:[%s4041_s22 + $0xe8] sm:$0xff] }
 0x76a   : > { %v3657_v41 = vpop.eup %3656  ;;  %v1660_v46 = vmul.f32 %v3655_v49, %v4470_v29 }
 0x76b   : > { %v3659_v53 = vpop.eup %3658  ;;  %v1655_v51 = vadd.f32 1.0, %v3657_v41 }
 0x76c   : > { %v4515_v28 = vadd.f32 %v1662_v52, %v1660_v46  ;;  %v1663_v44 = vmul.f32 %v3659_v53, %v3651_v38  ;;  %v3661_v57 = vpop.eup %3660 }
 0x76d   : > { %v1661_v30 = vmul.f32 %v3661_v57, %v4474_v55  ;;  %v3663_v29 = vpop.eup %3662  ;;  %v3318_v55 = vld [vmem:[%s4041_s22 + $0xe0] sm:$0xff]  ;;  %v1681_v57 = vunpack.c.h.bf16 %v3319_v40 }
 0x76e   : > { %3664 = vtanh.f32 %v4515_v28  ;;  %v1678_v27 = vunpack.c.l.bf16 %v3318_v55  ;;  %v1679_v37 = vunpack.c.h.bf16 %v3318_v55 }
 0x76f   : > { %v4519_v31 = vadd.f32 %v1663_v44, %v1661_v30  ;;  %3666 = vrcp.f32 %v1655_v51 }
 0x771   : > { %3668 = vtanh.f32 %v4519_v31 }
 0x778   : > { %v3665_v35 = vpop.eup %3664 }
 0x779   : > { %v3667_v32 = vpop.eup %3666  ;;  %v1668_v50 = vmul.f32 %v3665_v35, %v3663_v29  ;;  %v3321_v29 = vld [vmem:[%s4041_s22 + $0xf8] sm:$0xff] }
 0x77b   : > { %v3669_v26 = vpop.eup %3668 }
 0x77c   : > { %v1669_v56 = vmul.f32 %v3669_v26, %v3667_v32  ;;  %v1680_v32 = vunpack.c.l.bf16 %v3319_v40 }
 0x77e   : > { %v1670_v36 = vpack.c.bf16 %v1669_v56, %v1668_v50  ;;  %v1685_v50 = vunpack.c.h.bf16 %v3321_v29  ;;  %v1684_v56 = vunpack.c.l.bf16 %v3321_v29 }
 0x780   : > { %3317 = vst [vmem:[%s4046_s25 + $0x30] sm:$0xff] %v1670_v36  ;;  %1719 = vmatmul.mubr.bf16.vlgmr.msra.gmra.mrb[28].mxu0 %v1670_v36  ;;  %1762 = vmatmul.mubr.bf16.vlgmr.msra.gmra.mrb[28].mxu1 %v1670_v36 }
 0x853   : > { %v1720_v45 = vpop.f32.mrb[28].mxu0  ;;  %v1763_v33 = vpop.f32.mrb[28].mxu1 }
 0x854   : > { %v1772_v47 = vadd.f32 %v1720_v45, %v1678_v27  ;;  %v1722_v34 = vpop.f32.mrb[29].mxu0  ;;  %v1765_v38 = vpop.f32.mrb[29].mxu1  ;;  %v1774_v36 = vadd.f32 %v1763_v33, %v1680_v32 }
 0x855   : > { %v1773_v48 = vadd.f32 %v1722_v34, %v1679_v37  ;;  %v1724_v49 = vpop.f32.mrb[30].mxu0  ;;  %v1767_v52 = vpop.f32.mrb[30].mxu1  ;;  %v1775_v26 = vadd.f32 %v1765_v38, %v1681_v57 }
 0x856   : > { %v3322_v41 = vmul.f32 -1.442695, %v1772_v47  ;;  %v1776_v46 = vadd.f32 %v1724_v49, %v1682_v43  ;;  %v1726_v53 = vpop.f32.mrb[31].mxu0  ;;  %v1769_v54 = vpop.f32.mrb[31].mxu1  ;;  %v1778_v27 = vadd.f32 %v1767_v52, %v1684_v56 }
 0x857   : > { %v3324_v44 = vmul.f32 -1.442695, %v1773_v48  ;;  %v1777_v51 = vadd.f32 %v1726_v53, %v1683_v42  ;;  %v3326_v55 = vmul.f32 -1.442695, %v1775_v26  ;;  %v1779_v39 = vadd.f32 %v1769_v54, %v1685_v50 }
 0x858   : > { %3670 = vpow2.f32 %v3322_v41  ;;  %v3323_v30 = vmul.f32 -1.442695, %v1776_v46 }
 0x859   : > { %3672 = vpow2.f32 %v3324_v44  ;;  %v3325_v35 = vmul.f32 -1.442695, %v1777_v51  ;;  %v3327_v42 = vmul.f32 -1.442695, %v1779_v39 }
 0x85a   : > { %3674 = vpow2.f32 %v3323_v30 }
 0x85b   : > { %3676 = vpow2.f32 %v3325_v35 }
 0x85c   : > { %3678 = vtanh.f32 %v1774_v36 }
 0x85d   : > { %3680 = vpow2.f32 %v3326_v55 }
 0x85e   : > { %3682 = vtanh.f32 %v1778_v27 }
 0x862   : > { %v3671_v37 = vpop.eup %3670 }
 0x863   : > { %v3673_v43 = vpop.eup %3672  ;;  %v1786_v45 = vadd.f32 1.0, %v3671_v37 }
 0x864   : > { %v1798_v47 = vadd.f32 1.0, %v3673_v43  ;;  %v3675_v34 = vpop.eup %3674 }
 0x865   : > { %3684 = vrcp.f32 %v1786_v45  ;;  %v1787_v40 = vadd.f32 1.0, %v3675_v34  ;;  %v3677_v38 = vpop.eup %3676 }
 0x866   : > { %3686 = vrcp.f32 %v1798_v47  ;;  %v1799_v48 = vadd.f32 1.0, %v3677_v38  ;;  %v3679_v33 = vpop.eup %3678 }
 0x867   : > { %3688 = vpow2.f32 %v3327_v42  ;;  %v3681_v49 = vpop.eup %3680 }
 0x868   : > { %3690 = vrcp.f32 %v1787_v40  ;;  %v3683_v52 = vpop.eup %3682  ;;  %v1812_v54 = vadd.f32 1.0, %v3681_v49 }
 0x869   : > { %3692 = vrcp.f32 %v1799_v48 }
 0x86a   : > { %3694 = vrcp.f32 %v1812_v54 }
 0x86f   : > { %v3685_v41 = vpop.eup %3684 }
 0x870   : > { %v3687_v46 = vpop.eup %3686  ;;  %v1820_v53 = vmul.f32 %v3685_v41, %v3679_v33 }
 0x871   : > { %v3689_v44 = vpop.eup %3688  ;;  %v1818_v57 = vmul.f32 %v3687_v46, %v4515_v28 }
 0x872   : > { %v3691_v51 = vpop.eup %3690  ;;  %v1813_v32 = vadd.f32 1.0, %v3689_v44 }
 0x873   : > { %v1822_v30 = vadd.f32 %v1820_v53, %v1818_v57  ;;  %v1821_v29 = vmul.f32 %v3691_v51, %v3683_v52  ;;  %v3693_v35 = vpop.eup %3692 }
 0x874   : > { %v1819_v26 = vmul.f32 %v3693_v35, %v4519_v31  ;;  %v3695_v56 = vpop.eup %3694 }
 0x875   : > { %3696 = vtanh.f32 %v1822_v30  ;;  %1833 = vst [vmem:[#allocation4] sm:$0xff] %v1822_v30 }
 0x876   : > { %v1823_v50 = vadd.f32 %v1821_v29, %v1819_v26  ;;  %3698 = vrcp.f32 %v1813_v32 }
 0x878   : > { %3700 = vtanh.f32 %v1823_v50  ;;  %1834 = vst [vmem:[#allocation4 + $0x8] sm:$0xff] %v1823_v50 }
 0x87f   : > { %v3697_v36 = vpop.eup %3696 }
 0x880   : > { %v1826_v55 = vmul.f32 %v3697_v36, %v3695_v56  ;;  %v3699_v39 = vpop.eup %3698 }
 0x882   : > { %1831 = vst [vmem:[#allocation3] sm:$0xff] %v1826_v55  ;;  %v3701_v28 = vpop.eup %3700 }
 0x883   : > { %v1827_v27 = vmul.f32 %v3701_v28, %v3699_v39 }
 0x885   : > { %v1828_v37 = vpack.c.bf16 %v1827_v27, %v1826_v55  ;;  %1832 = vst [vmem:[#allocation3 + $0x8] sm:$0xff] %v1827_v27 }
 0x887   : > { %3328 = vst [vmem:[%s4046_s25 + $0x38] sm:$0xff] %v1828_v37 }
 0x888 PF: > { %p3329_p6 = scmp.ne.s32.totalorder %s3974_s9, 1 }
 0x889   : > { %1857 = vmatprep.subr.bf16.mxu0 (!%p3329_p6), %v4099_v59  ;;  %1900 = vmatprep.subr.bf16.mxu1 (!%p3329_p6), %v4103_v61  ;;  %v3986_v31 = vmov (!%p3329_p6), 0   ;;  %v1839_v43 = vld [vmem:[#allocation3] sm:$0xff] (!%p3329_p6)  ;;  %v3332_v34 = vld [vmem:[%s4041_s22 + $0xf0] sm:$0xff] (!%p3329_p6)  ;;  %v3331_v52 = vld [vmem:[%s4041_s22 + $0xe8] sm:$0xff] (!%p3329_p6) }
 0x88a   : > { %1838 = sbr.rel (%p3329_p6) target bundleno = 4321 (0x10e1), region = 73  ;;  %1858 = vmatpush1.bf16.msra.mxu0 (!%p3329_p6), %v4097_v58  ;;  %1901 = vmatpush1.bf16.msra.mxu1 (!%p3329_p6), %v4101_v60  ;;  %v3330_v47 = vld [vmem:[%s4041_s22 + $0xe0] sm:$0xff] (!%p3329_p6)  ;;  %v1852_v48 = vunpack.c.l.bf16 (!%p3329_p6), %v3332_v34  ;;  %v1853_v49 = vunpack.c.h.bf16 (!%p3329_p6), %v3332_v34  ;;  %v3333_v51 = vld [vmem:[%s4041_s22 + $0xf8] sm:$0xff] (!%p3329_p6)  ;;  %v1851_v26 = vunpack.c.h.bf16 (!%p3329_p6), %v3331_v52  ;;  %v1850_v27 = vunpack.c.l.bf16 (!%p3329_p6), %v3331_v52 }
 0x88b   : > { %1859 = vmatprep.subr.bf16.mxu0 (!%p3329_p6), %v4107_v63  ;;  %1902 = vmatprep.subr.bf16.mxu1 (!%p3329_p6), %v4111_v1  ;;  %v1848_v40 = vunpack.c.l.bf16 (!%p3329_p6), %v3330_v47  ;;  %v1849_v38 = vunpack.c.h.bf16 (!%p3329_p6), %v3330_v47  ;;  %v1855_v39 = vunpack.c.h.bf16 (!%p3329_p6), %v3333_v51 }
 0x88c   : > { %1889 = vmatprep.mubr.bf16.mxu0 (!%p3329_p6), %v3986_v31  ;;  %1932 = vmatprep.mubr.bf16.mxu1 (!%p3329_p6), %v3986_v31  ;;  %v1840_v45 = vld [vmem:[#allocation3 + $0x8] sm:$0xff] (!%p3329_p6) }
 0x88d   : > { %v1856_v42 = vpack.c.bf16 (!%p3329_p6), %v1840_v45, %v1839_v43  ;;  %v1854_v43 = vunpack.c.l.bf16 (!%p3329_p6), %v3333_v51 }
 0x88e   : > { %1860 = vmatpush1.bf16.msra.mxu0 (!%p3329_p6), %v4105_v62  ;;  %1903 = vmatpush1.bf16.msra.mxu1 (!%p3329_p6), %v4109_v0 }
 0x88f   : > { %1861 = vmatprep.subr.bf16.mxu0 (!%p3329_p6), %v4115_v3  ;;  %1904 = vmatprep.subr.bf16.mxu1 (!%p3329_p6), %v4119_v5 }
 0x892   : > { %1862 = vmatpush1.bf16.msra.mxu0 %v4113_v2  ;;  %1905 = vmatpush1.bf16.msra.mxu1 %v4117_v4 }
 0x893   : > { %1863 = vmatprep.subr.bf16.mxu0 %v4123_v7  ;;  %1906 = vmatprep.subr.bf16.mxu1 %v4127_v9 }
 0x896   : > { %1864 = vmatpush1.bf16.msra.mxu0 %v4121_v6  ;;  %1907 = vmatpush1.bf16.msra.mxu1 %v4125_v8 }
 0x897   : > { %1865 = vmatprep.subr.bf16.mxu0 %v4131_v11  ;;  %1908 = vmatprep.subr.bf16.mxu1 %v4135_v13 }
 0x89a   : > { %1866 = vmatpush1.bf16.msra.mxu0 %v4129_v10  ;;  %1909 = vmatpush1.bf16.msra.mxu1 %v4133_v12 }
 0x89b   : > { %1867 = vmatprep.subr.bf16.mxu0 %v4139_v15  ;;  %1910 = vmatprep.subr.bf16.mxu1 %v4143_v17 }
 0x89e   : > { %1868 = vmatpush1.bf16.msra.mxu0 %v4137_v14  ;;  %1911 = vmatpush1.bf16.msra.mxu1 %v4141_v16 }
 0x89f   : > { %1869 = vmatprep.subr.bf16.mxu0 %v4147_v19  ;;  %1912 = vmatprep.subr.bf16.mxu1 %v4151_v21 }
 0x8a2   : > { %1870 = vmatpush1.bf16.msra.mxu0 %v4145_v18  ;;  %1913 = vmatpush1.bf16.msra.mxu1 %v4149_v20 }
 0x8a3   : > { %1871 = vmatprep.subr.bf16.mxu0 %v4155_v23  ;;  %1914 = vmatprep.subr.bf16.mxu1 %v4159_v25 }
 0x8a6   : > { %1872 = vmatpush1.bf16.msra.mxu0 %v4153_v22  ;;  %1915 = vmatpush1.bf16.msra.mxu1 %v4157_v24 }
 0x8a7   : > { %2015 = vmatprep.subr.bf16.mxu0 %v4099_v59  ;;  %2058 = vmatprep.subr.bf16.mxu1 %v4103_v61 }
 0x8a9   : > { %1890 = vmatmul.mubr.bf16.vlgmr.msra.gmra.mrb[0].mxu0 %v1856_v42  ;;  %1933 = vmatmul.mubr.bf16.vlgmr.msra.gmra.mrb[0].mxu1 %v1856_v42 }
 0x8aa   : > { %2016 = vmatpush1.bf16.msra.mxu0 %v4097_v58  ;;  %2059 = vmatpush1.bf16.msra.mxu1 %v4101_v60 }
 0x8ab   : > { %2017 = vmatprep.subr.bf16.mxu0 %v4107_v63  ;;  %2060 = vmatprep.subr.bf16.mxu1 %v4111_v1 }
 0x8ac   : > { %2047 = vmatprep.mubr.bf16.mxu0 %v3986_v31  ;;  %2090 = vmatprep.mubr.bf16.mxu1 %v3986_v31 }
 0x8ae   : > { %2018 = vmatpush1.bf16.msra.mxu0 %v4105_v62  ;;  %2061 = vmatpush1.bf16.msra.mxu1 %v4109_v0 }
 0x8af   : > { %2019 = vmatprep.subr.bf16.mxu0 %v4115_v3  ;;  %2062 = vmatprep.subr.bf16.mxu1 %v4119_v5 }
 0x8b2   : > { %2020 = vmatpush1.bf16.msra.mxu0 %v4113_v2  ;;  %2063 = vmatpush1.bf16.msra.mxu1 %v4117_v4 }
 0x8b3   : > { %2021 = vmatprep.subr.bf16.mxu0 %v4123_v7  ;;  %2064 = vmatprep.subr.bf16.mxu1 %v4127_v9 }
 0x8b6   : > { %2022 = vmatpush1.bf16.msra.mxu0 %v4121_v6  ;;  %2065 = vmatpush1.bf16.msra.mxu1 %v4125_v8 }
 0x8b7   : > { %2023 = vmatprep.subr.bf16.mxu0 %v4131_v11  ;;  %2066 = vmatprep.subr.bf16.mxu1 %v4135_v13 }
 0x8ba   : > { %2024 = vmatpush1.bf16.msra.mxu0 %v4129_v10  ;;  %2067 = vmatpush1.bf16.msra.mxu1 %v4133_v12 }
 0x8bb   : > { %2025 = vmatprep.subr.bf16.mxu0 %v4139_v15  ;;  %2068 = vmatprep.subr.bf16.mxu1 %v4143_v17 }
 0x8be   : > { %2026 = vmatpush1.bf16.msra.mxu0 %v4137_v14  ;;  %2069 = vmatpush1.bf16.msra.mxu1 %v4141_v16 }
 0x8bf   : > { %2027 = vmatprep.subr.bf16.mxu0 %v4147_v19  ;;  %2070 = vmatprep.subr.bf16.mxu1 %v4151_v21 }
 0x8c2   : > { %2028 = vmatpush1.bf16.msra.mxu0 %v4145_v18  ;;  %2071 = vmatpush1.bf16.msra.mxu1 %v4149_v20 }
 0x8c3   : > { %2029 = vmatprep.subr.bf16.mxu0 %v4155_v23  ;;  %2072 = vmatprep.subr.bf16.mxu1 %v4159_v25 }
 0x8c6   : > { %2030 = vmatpush1.bf16.msra.mxu0 %v4153_v22  ;;  %2073 = vmatpush1.bf16.msra.mxu1 %v4157_v24 }
 0x8c7   : > { %2173 = vmatprep.subr.bf16.mxu0 %v4099_v59  ;;  %2216 = vmatprep.subr.bf16.mxu1 %v4103_v61 }
 0x97c   : > { %v1891_v33 = vpop.f32.mrb[0].mxu0  ;;  %v1934_v41 = vpop.f32.mrb[0].mxu1 }
 0x97d   : > { %v1943_v46 = vadd.f32 %v1891_v33, %v1848_v40  ;;  %v1893_v53 = vpop.f32.mrb[1].mxu0  ;;  %v1936_v54 = vpop.f32.mrb[1].mxu1  ;;  %v1945_v42 = vadd.f32 %v1934_v41, %v1850_v27 }
 0x97e   : > { %v1944_v44 = vadd.f32 %v1893_v53, %v1849_v38  ;;  %v1895_v57 = vpop.f32.mrb[2].mxu0  ;;  %v1938_v30 = vpop.f32.mrb[2].mxu1  ;;  %v1946_v37 = vadd.f32 %v1936_v54, %v1851_v26 }
 0x97f   : > { %v3334_v29 = vmul.f32 -1.442695, %v1943_v46  ;;  %v1947_v35 = vadd.f32 %v1895_v57, %v1852_v48  ;;  %v1897_v32 = vpop.f32.mrb[3].mxu0  ;;  %v1940_v50 = vpop.f32.mrb[3].mxu1  ;;  %v1949_v34 = vadd.f32 %v1938_v30, %v1854_v43  ;;  %v1841_v30 = vld [vmem:[#allocation4] sm:$0xff] }
 0x980   : > { %v3336_v56 = vmul.f32 -1.442695, %v1944_v44  ;;  %v1948_v36 = vadd.f32 %v1897_v32, %v1853_v49  ;;  %v1950_v45 = vadd.f32 %v1940_v50, %v1855_v39  ;;  %v3338_v47 = vmul.f32 -1.442695, %v1946_v37  ;;  %v1842_v32 = vld [vmem:[#allocation4 + $0x8] sm:$0xff] }
 0x981   : > { %3702 = vpow2.f32 %v3334_v29  ;;  %v3335_v55 = vmul.f32 -1.442695, %v1947_v35 }
 0x982   : > { %3704 = vpow2.f32 %v3336_v56  ;;  %v3337_v28 = vmul.f32 -1.442695, %v1948_v36  ;;  %v3339_v40 = vmul.f32 -1.442695, %v1950_v45 }
 0x983   : > { %3706 = vpow2.f32 %v3335_v55 }
 0x984   : > { %3708 = vpow2.f32 %v3337_v28 }
 0x985   : > { %3710 = vtanh.f32 %v1945_v42 }
 0x986   : > { %3712 = vpow2.f32 %v3338_v47 }
 0x987   : > { %3714 = vtanh.f32 %v1949_v34 }
 0x988   : > { %3716 = vpow2.f32 %v3339_v40 }
 0x98b   : > { %v3703_v38 = vpop.eup %3702 }
 0x98c   : > { %v3705_v48 = vpop.eup %3704  ;;  %v1957_v33 = vadd.f32 1.0, %v3703_v38 }
 0x98d   : > { %v3707_v49 = vpop.eup %3706  ;;  %v1969_v46 = vadd.f32 1.0, %v3705_v48 }
 0x98e   : > { %v3709_v53 = vpop.eup %3708  ;;  %3718 = vrcp.f32 %v1957_v33  ;;  %v1958_v52 = vadd.f32 1.0, %v3707_v49  ;;  %v3341_v33 = vld [vmem:[%s4041_s22 + $0xc0] sm:$0xff]  ;;  %v3343_v49 = vld [vmem:[%s4041_s22 + $0xd0] sm:$0xff] }
 0x98f   : > { %3720 = vrcp.f32 %v1969_v46  ;;  %v1970_v54 = vadd.f32 1.0, %v3709_v53  ;;  %v3711_v41 = vpop.eup %3710  ;;  %v2007_v46 = vunpack.c.l.bf16 %v3341_v33  ;;  %v2008_v53 = vunpack.c.h.bf16 %v3341_v33 }
 0x990   : > { %3722 = vrcp.f32 %v1958_v52  ;;  %v3713_v44 = vpop.eup %3712  ;;  %v2011_v52 = vunpack.c.l.bf16 %v3343_v49 }
 0x991   : > { %3724 = vrcp.f32 %v1970_v54  ;;  %v3715_v57 = vpop.eup %3714  ;;  %v1983_v50 = vadd.f32 1.0, %v3713_v44  ;;  %v2012_v44 = vunpack.c.h.bf16 %v3343_v49 }
 0x992   : > { %v3717_v51 = vpop.eup %3716 }
 0x993   : > { %v1984_v28 = vadd.f32 1.0, %v3717_v51  ;;  %3726 = vrcp.f32 %v1983_v50  ;;  %v3342_v51 = vld [vmem:[%s4041_s22 + $0xc8] sm:$0xff] }
 0x998   : > { %v3719_v29 = vpop.eup %3718 }
 0x999   : > { %v3721_v35 = vpop.eup %3720  ;;  %v1991_v26 = vmul.f32 %v3719_v29, %v3711_v41 }
 0x99a   : > { %v3723_v56 = vpop.eup %3722  ;;  %v1989_v36 = vmul.f32 %v3721_v35, %v1841_v30 }
 0x99b   : > { %v3725_v55 = vpop.eup %3724  ;;  %v1992_v39 = vmul.f32 %v3723_v56, %v3715_v57 }
 0x99c   : > { %v1990_v27 = vmul.f32 %v3725_v55, %v1842_v32  ;;  %v4605_v37 = vadd.f32 %v1991_v26, %v1989_v36 }
 0x99d   : > { %v3727_v45 = vpop.eup %3726 }
 0x99e   : > { %3728 = vtanh.f32 %v4605_v37  ;;  %v4608_v43 = vadd.f32 %v1992_v39, %v1990_v27 }
 0x99f   : > { %3730 = vrcp.f32 %v1984_v28  ;;  %v2010_v28 = vunpack.c.h.bf16 %v3342_v51 }
 0x9a0   : > { %3732 = vtanh.f32 %v4608_v43 }
 0x9a8   : > { %v3729_v42 = vpop.eup %3728 }
 0x9a9   : > { %v3731_v47 = vpop.eup %3730  ;;  %v1997_v40 = vmul.f32 %v3729_v42, %v3727_v45  ;;  %v3344_v42 = vld [vmem:[%s4041_s22 + $0xd8] sm:$0xff] }
 0x9aa   : > { %v3733_v34 = vpop.eup %3732 }
 0x9ab   : > { %v1998_v38 = vmul.f32 %v3733_v34, %v3731_v47  ;;  %v2009_v34 = vunpack.c.l.bf16 %v3342_v51 }
 0x9ad   : > { %v1999_v48 = vpack.c.bf16 %v1998_v38, %v1997_v40  ;;  %v2014_v38 = vunpack.c.h.bf16 %v3344_v42 }
 0x9af   : > { %3340 = vst [vmem:[%s4046_s25 + $0x38] sm:$0xff] %v1999_v48  ;;  %2048 = vmatmul.mubr.bf16.vlgmr.msra.gmra.mrb[4].mxu0 %v1999_v48  ;;  %2091 = vmatmul.mubr.bf16.vlgmr.msra.gmra.mrb[4].mxu1 %v1999_v48  ;;  %v2013_v48 = vunpack.c.l.bf16 %v3344_v42 }
 0x9b0   : > { %2174 = vmatpush1.bf16.msra.mxu0 %v4097_v58  ;;  %2217 = vmatpush1.bf16.msra.mxu1 %v4101_v60 }
 0x9b1   : > { %2175 = vmatprep.subr.bf16.mxu0 %v4107_v63  ;;  %2218 = vmatprep.subr.bf16.mxu1 %v4111_v1 }
 0x9b2   : > { %2205 = vmatprep.mubr.bf16.mxu0 %v3986_v31  ;;  %2248 = vmatprep.mubr.bf16.mxu1 %v3986_v31 }
 0x9b4   : > { %2176 = vmatpush1.bf16.msra.mxu0 %v4105_v62  ;;  %2219 = vmatpush1.bf16.msra.mxu1 %v4109_v0 }
 0x9b5   : > { %2177 = vmatprep.subr.bf16.mxu0 %v4115_v3  ;;  %2220 = vmatprep.subr.bf16.mxu1 %v4119_v5 }
 0x9b8   : > { %2178 = vmatpush1.bf16.msra.mxu0 %v4113_v2  ;;  %2221 = vmatpush1.bf16.msra.mxu1 %v4117_v4 }
 0x9b9   : > { %2179 = vmatprep.subr.bf16.mxu0 %v4123_v7  ;;  %2222 = vmatprep.subr.bf16.mxu1 %v4127_v9 }
 0x9bc   : > { %2180 = vmatpush1.bf16.msra.mxu0 %v4121_v6  ;;  %2223 = vmatpush1.bf16.msra.mxu1 %v4125_v8 }
 0x9bd   : > { %2181 = vmatprep.subr.bf16.mxu0 %v4131_v11  ;;  %2224 = vmatprep.subr.bf16.mxu1 %v4135_v13 }
 0x9c0   : > { %2182 = vmatpush1.bf16.msra.mxu0 %v4129_v10  ;;  %2225 = vmatpush1.bf16.msra.mxu1 %v4133_v12 }
 0x9c1   : > { %2183 = vmatprep.subr.bf16.mxu0 %v4139_v15  ;;  %2226 = vmatprep.subr.bf16.mxu1 %v4143_v17 }
 0x9c4   : > { %2184 = vmatpush1.bf16.msra.mxu0 %v4137_v14  ;;  %2227 = vmatpush1.bf16.msra.mxu1 %v4141_v16 }
 0x9c5   : > { %2185 = vmatprep.subr.bf16.mxu0 %v4147_v19  ;;  %2228 = vmatprep.subr.bf16.mxu1 %v4151_v21 }
 0x9c8   : > { %2186 = vmatpush1.bf16.msra.mxu0 %v4145_v18  ;;  %2229 = vmatpush1.bf16.msra.mxu1 %v4149_v20 }
 0x9c9   : > { %2187 = vmatprep.subr.bf16.mxu0 %v4155_v23  ;;  %2230 = vmatprep.subr.bf16.mxu1 %v4159_v25 }
 0x9cc   : > { %2188 = vmatpush1.bf16.msra.mxu0 %v4153_v22  ;;  %2231 = vmatpush1.bf16.msra.mxu1 %v4157_v24 }
 0x9cd   : > { %2331 = vmatprep.subr.bf16.mxu0 %v4099_v59  ;;  %2374 = vmatprep.subr.bf16.mxu1 %v4103_v61 }
 0xa82   : > { %v2049_v54 = vpop.f32.mrb[4].mxu0  ;;  %v2092_v41 = vpop.f32.mrb[4].mxu1 }
 0xa83   : > { %v2101_v57 = vadd.f32 %v2049_v54, %v2007_v46  ;;  %v2051_v30 = vpop.f32.mrb[5].mxu0  ;;  %v2094_v29 = vpop.f32.mrb[5].mxu1  ;;  %v2103_v33 = vadd.f32 %v2092_v41, %v2009_v34 }
 0xa84   : > { %v2102_v35 = vadd.f32 %v2051_v30, %v2008_v53  ;;  %v2053_v32 = vpop.f32.mrb[6].mxu0  ;;  %v2096_v26 = vpop.f32.mrb[6].mxu1  ;;  %v2104_v40 = vadd.f32 %v2094_v29, %v2010_v28 }
 0xa85   : > { %v3345_v50 = vmul.f32 -1.442695, %v2101_v57  ;;  %v2105_v56 = vadd.f32 %v2053_v32, %v2011_v52  ;;  %v2055_v36 = vpop.f32.mrb[7].mxu0  ;;  %v2098_v55 = vpop.f32.mrb[7].mxu1  ;;  %v2107_v53 = vadd.f32 %v2096_v26, %v2013_v48 }
 0xa86   : > { %v3347_v39 = vmul.f32 -1.442695, %v2102_v35  ;;  %v2106_v27 = vadd.f32 %v2055_v36, %v2012_v44  ;;  %v3349_v49 = vmul.f32 -1.442695, %v2104_v40  ;;  %v2108_v46 = vadd.f32 %v2098_v55, %v2014_v38 }
 0xa87   : > { %3734 = vpow2.f32 %v3345_v50  ;;  %v3346_v45 = vmul.f32 -1.442695, %v2105_v56 }
 0xa88   : > { %3736 = vpow2.f32 %v3347_v39  ;;  %v3348_v47 = vmul.f32 -1.442695, %v2106_v27  ;;  %v3350_v44 = vmul.f32 -1.442695, %v2108_v46 }
 0xa89   : > { %3738 = vpow2.f32 %v3346_v45 }
 0xa8a   : > { %3740 = vpow2.f32 %v3348_v47 }
 0xa8b   : > { %3742 = vtanh.f32 %v2103_v33 }
 0xa8c   : > { %3744 = vpow2.f32 %v3349_v49 }
 0xa8d   : > { %3746 = vtanh.f32 %v2107_v53 }
 0xa91   : > { %v3735_v52 = vpop.eup %3734 }
 0xa92   : > { %v3737_v54 = vpop.eup %3736  ;;  %v2115_v57 = vadd.f32 1.0, %v3735_v52 }
 0xa93   : > { %v2127_v30 = vadd.f32 1.0, %v3737_v54  ;;  %v3739_v35 = vpop.eup %3738 }
 0xa94   : > { %3748 = vrcp.f32 %v2115_v57  ;;  %v2116_v51 = vadd.f32 1.0, %v3739_v35  ;;  %v3741_v29 = vpop.eup %3740  ;;  %v3354_v57 = vld [vmem:[%s4041_s22 + $0xb0] sm:$0xff] }
 0xa95   : > { %3750 = vrcp.f32 %v2127_v30  ;;  %v2128_v32 = vadd.f32 1.0, %v3741_v29  ;;  %v3743_v41 = vpop.eup %3742  ;;  %v2169_v35 = vunpack.c.l.bf16 %v3354_v57 }
 0xa96   : > { %3752 = vpow2.f32 %v3350_v44  ;;  %v3745_v50 = vpop.eup %3744 }
 0xa97   : > { %3754 = vrcp.f32 %v2116_v51  ;;  %v3747_v26 = vpop.eup %3746  ;;  %v2141_v45 = vadd.f32 1.0, %v3745_v50  ;;  %v3353_v50 = vld [vmem:[%s4041_s22 + $0xa8] sm:$0xff] }
 0xa98   : > { %3756 = vrcp.f32 %v2128_v32  ;;  %v2170_v32 = vunpack.c.h.bf16 %v3354_v57 }
 0xa99   : > { %3758 = vrcp.f32 %v2141_v45 }
 0xa9e   : > { %v3749_v56 = vpop.eup %3748 }
 0xa9f   : > { %v3751_v36 = vpop.eup %3750  ;;  %v2149_v55 = vmul.f32 %v3749_v56, %v3743_v41 }
 0xaa0   : > { %v3753_v39 = vpop.eup %3752  ;;  %v2147_v28 = vmul.f32 %v3751_v36, %v4605_v37 }
 0xaa1   : > { %v3755_v27 = vpop.eup %3754  ;;  %v2142_v40 = vadd.f32 1.0, %v3753_v39 }
 0xaa2   : > { %v4651_v42 = vadd.f32 %v2149_v55, %v2147_v28  ;;  %v2150_v47 = vmul.f32 %v3755_v27, %v3747_v26  ;;  %v3757_v34 = vpop.eup %3756 }
 0xaa3   : > { %v2148_v38 = vmul.f32 %v3757_v34, %v4608_v43  ;;  %v3759_v33 = vpop.eup %3758  ;;  %v3352_v43 = vld [vmem:[%s4041_s22 + $0xa0] sm:$0xff] }
 0xaa4   : > { %3760 = vtanh.f32 %v4651_v42  ;;  %v2165_v44 = vunpack.c.l.bf16 %v3352_v43  ;;  %v2166_v30 = vunpack.c.h.bf16 %v3352_v43 }
 0xaa5   : > { %v4655_v48 = vadd.f32 %v2150_v47, %v2148_v38  ;;  %3762 = vrcp.f32 %v2142_v40  ;;  %v2168_v40 = vunpack.c.h.bf16 %v3353_v50 }
 0xaa7   : > { %3764 = vtanh.f32 %v4655_v48 }
 0xaae   : > { %v3761_v37 = vpop.eup %3760 }
 0xaaf   : > { %v3763_v49 = vpop.eup %3762  ;;  %v2155_v53 = vmul.f32 %v3761_v37, %v3759_v33  ;;  %v3355_v37 = vld [vmem:[%s4041_s22 + $0xb8] sm:$0xff] }
 0xab1   : > { %v3765_v46 = vpop.eup %3764 }
 0xab2   : > { %v2156_v52 = vmul.f32 %v3765_v46, %v3763_v49  ;;  %v2167_v46 = vunpack.c.l.bf16 %v3353_v50 }
 0xab4   : > { %v2157_v54 = vpack.c.bf16 %v2156_v52, %v2155_v53  ;;  %v2172_v52 = vunpack.c.h.bf16 %v3355_v37 }
 0xab6   : > { %3351 = vst [vmem:[%s4046_s25 + $0x30] sm:$0xff] %v2157_v54  ;;  %2206 = vmatmul.mubr.bf16.vlgmr.msra.gmra.mrb[8].mxu0 %v2157_v54  ;;  %2249 = vmatmul.mubr.bf16.vlgmr.msra.gmra.mrb[8].mxu1 %v2157_v54  ;;  %v2171_v54 = vunpack.c.l.bf16 %v3355_v37 }
 0xab7   : > { %2332 = vmatpush1.bf16.msra.mxu0 %v4097_v58  ;;  %2375 = vmatpush1.bf16.msra.mxu1 %v4101_v60 }
 0xab8   : > { %2333 = vmatprep.subr.bf16.mxu0 %v4107_v63  ;;  %2376 = vmatprep.subr.bf16.mxu1 %v4111_v1 }
 0xab9   : > { %2363 = vmatprep.mubr.bf16.mxu0 %v3986_v31  ;;  %2406 = vmatprep.mubr.bf16.mxu1 %v3986_v31 }
 0xabb   : > { %2334 = vmatpush1.bf16.msra.mxu0 %v4105_v62  ;;  %2377 = vmatpush1.bf16.msra.mxu1 %v4109_v0 }
 0xabc   : > { %2335 = vmatprep.subr.bf16.mxu0 %v4115_v3  ;;  %2378 = vmatprep.subr.bf16.mxu1 %v4119_v5 }
 0xabf   : > { %2336 = vmatpush1.bf16.msra.mxu0 %v4113_v2  ;;  %2379 = vmatpush1.bf16.msra.mxu1 %v4117_v4 }
 0xac0   : > { %2337 = vmatprep.subr.bf16.mxu0 %v4123_v7  ;;  %2380 = vmatprep.subr.bf16.mxu1 %v4127_v9 }
 0xac3   : > { %2338 = vmatpush1.bf16.msra.mxu0 %v4121_v6  ;;  %2381 = vmatpush1.bf16.msra.mxu1 %v4125_v8 }
 0xac4   : > { %2339 = vmatprep.subr.bf16.mxu0 %v4131_v11  ;;  %2382 = vmatprep.subr.bf16.mxu1 %v4135_v13 }
 0xac7   : > { %2340 = vmatpush1.bf16.msra.mxu0 %v4129_v10  ;;  %2383 = vmatpush1.bf16.msra.mxu1 %v4133_v12 }
 0xac8   : > { %2341 = vmatprep.subr.bf16.mxu0 %v4139_v15  ;;  %2384 = vmatprep.subr.bf16.mxu1 %v4143_v17 }
 0xacb   : > { %2342 = vmatpush1.bf16.msra.mxu0 %v4137_v14  ;;  %2385 = vmatpush1.bf16.msra.mxu1 %v4141_v16 }
 0xacc   : > { %2343 = vmatprep.subr.bf16.mxu0 %v4147_v19  ;;  %2386 = vmatprep.subr.bf16.mxu1 %v4151_v21 }
 0xacf   : > { %2344 = vmatpush1.bf16.msra.mxu0 %v4145_v18  ;;  %2387 = vmatpush1.bf16.msra.mxu1 %v4149_v20 }
 0xad0   : > { %2345 = vmatprep.subr.bf16.mxu0 %v4155_v23  ;;  %2388 = vmatprep.subr.bf16.mxu1 %v4159_v25 }
 0xad3   : > { %2346 = vmatpush1.bf16.msra.mxu0 %v4153_v22  ;;  %2389 = vmatpush1.bf16.msra.mxu1 %v4157_v24 }
 0xad4   : > { %2489 = vmatprep.subr.bf16.mxu0 %v4099_v59  ;;  %2532 = vmatprep.subr.bf16.mxu1 %v4103_v61 }
 0xb89   : > { %v2207_v51 = vpop.f32.mrb[8].mxu0  ;;  %v2250_v29 = vpop.f32.mrb[8].mxu1 }
 0xb8a   : > { %v2259_v41 = vadd.f32 %v2207_v51, %v2165_v44  ;;  %v2209_v26 = vpop.f32.mrb[9].mxu0  ;;  %v2252_v56 = vpop.f32.mrb[9].mxu1  ;;  %v2261_v43 = vadd.f32 %v2250_v29, %v2167_v46 }
 0xb8b   : > { %v2260_v36 = vadd.f32 %v2209_v26, %v2166_v30  ;;  %v2211_v55 = vpop.f32.mrb[10].mxu0  ;;  %v2254_v39 = vpop.f32.mrb[10].mxu1  ;;  %v2262_v53 = vadd.f32 %v2252_v56, %v2168_v40 }
 0xb8c   : > { %v3356_v28 = vmul.f32 -1.442695, %v2259_v41  ;;  %v2263_v27 = vadd.f32 %v2211_v55, %v2169_v35  ;;  %v2213_v45 = vpop.f32.mrb[11].mxu0  ;;  %v2256_v47 = vpop.f32.mrb[11].mxu1  ;;  %v2265_v30 = vadd.f32 %v2254_v39, %v2171_v54 }
 0xb8d   : > { %v3358_v34 = vmul.f32 -1.442695, %v2260_v36  ;;  %v2264_v38 = vadd.f32 %v2213_v45, %v2170_v32  ;;  %v3360_v57 = vmul.f32 -1.442695, %v2262_v53  ;;  %v2266_v44 = vadd.f32 %v2256_v47, %v2172_v52 }
 0xb8e   : > { %3766 = vpow2.f32 %v3356_v28  ;;  %v3357_v33 = vmul.f32 -1.442695, %v2263_v27 }
 0xb8f   : > { %3768 = vpow2.f32 %v3358_v34  ;;  %v3359_v49 = vmul.f32 -1.442695, %v2264_v38  ;;  %v3361_v32 = vmul.f32 -1.442695, %v2266_v44 }
 0xb90   : > { %3770 = vpow2.f32 %v3357_v33 }
 0xb91   : > { %3772 = vpow2.f32 %v3359_v49 }
 0xb92   : > { %3774 = vtanh.f32 %v2261_v43 }
 0xb93   : > { %3776 = vpow2.f32 %v3360_v57 }
 0xb94   : > { %3778 = vtanh.f32 %v2265_v30 }
 0xb98   : > { %v3767_v35 = vpop.eup %3766 }
 0xb99   : > { %v3769_v51 = vpop.eup %3768  ;;  %v2273_v41 = vadd.f32 1.0, %v3767_v35 }
 0xb9a   : > { %v2285_v26 = vadd.f32 1.0, %v3769_v51  ;;  %v3771_v36 = vpop.eup %3770 }
 0xb9b   : > { %3780 = vrcp.f32 %v2273_v41  ;;  %v2274_v50 = vadd.f32 1.0, %v3771_v36  ;;  %v3773_v56 = vpop.eup %3772  ;;  %v3365_v41 = vld [vmem:[%s4041_s22 + $0x90] sm:$0xff] }
 0xb9c   : > { %3782 = vrcp.f32 %v2285_v26  ;;  %v2286_v55 = vadd.f32 1.0, %v3773_v56  ;;  %v3775_v29 = vpop.eup %3774  ;;  %v2327_v36 = vunpack.c.l.bf16 %v3365_v41 }
 0xb9d   : > { %3784 = vpow2.f32 %v3361_v32  ;;  %v3777_v28 = vpop.eup %3776 }
 0xb9e   : > { %3786 = vrcp.f32 %v2274_v50  ;;  %v3779_v39 = vpop.eup %3778  ;;  %v2299_v33 = vadd.f32 1.0, %v3777_v28  ;;  %v3364_v28 = vld [vmem:[%s4041_s22 + $0x88] sm:$0xff] }
 0xb9f   : > { %3788 = vrcp.f32 %v2286_v55  ;;  %v2328_v55 = vunpack.c.h.bf16 %v3365_v41 }
 0xba0   : > { %3790 = vrcp.f32 %v2299_v33 }
 0xba5   : > { %v3781_v27 = vpop.eup %3780 }
 0xba6   : > { %v3783_v45 = vpop.eup %3782  ;;  %v2307_v47 = vmul.f32 %v3781_v27, %v3775_v29 }
 0xba7   : > { %v3785_v34 = vpop.eup %3784  ;;  %v2305_v40 = vmul.f32 %v3783_v45, %v4651_v42 }
 0xba8   : > { %v3787_v38 = vpop.eup %3786  ;;  %v2300_v53 = vadd.f32 1.0, %v3785_v34 }
 0xba9   : > { %v4698_v37 = vadd.f32 %v2307_v47, %v2305_v40  ;;  %v2308_v49 = vmul.f32 %v3787_v38, %v3779_v39  ;;  %v3789_v46 = vpop.eup %3788 }
 0xbaa   : > { %v2306_v52 = vmul.f32 %v3789_v46, %v4655_v48  ;;  %v3791_v43 = vpop.eup %3790  ;;  %v3363_v48 = vld [vmem:[%s4041_s22 + $0x80] sm:$0xff] }
 0xbab   : > { %3792 = vtanh.f32 %v4698_v37  ;;  %v2323_v32 = vunpack.c.l.bf16 %v3363_v48  ;;  %v2324_v26 = vunpack.c.h.bf16 %v3363_v48 }
 0xbac   : > { %v4702_v54 = vadd.f32 %v2308_v49, %v2306_v52  ;;  %3794 = vrcp.f32 %v2300_v53  ;;  %v2326_v53 = vunpack.c.h.bf16 %v3364_v28 }
 0xbae   : > { %3796 = vtanh.f32 %v4702_v54 }
 0xbb5   : > { %v3793_v42 = vpop.eup %3792 }
 0xbb6   : > { %v3795_v57 = vpop.eup %3794  ;;  %v2313_v30 = vmul.f32 %v3793_v42, %v3791_v43  ;;  %v3366_v42 = vld [vmem:[%s4041_s22 + $0x98] sm:$0xff] }
 0xbb8   : > { %v3797_v44 = vpop.eup %3796 }
 0xbb9   : > { %v2314_v35 = vmul.f32 %v3797_v44, %v3795_v57  ;;  %v2325_v44 = vunpack.c.l.bf16 %v3364_v28 }
 0xbbb   : > { %v2315_v51 = vpack.c.bf16 %v2314_v35, %v2313_v30  ;;  %v2330_v35 = vunpack.c.h.bf16 %v3366_v42 }
 0xbbd   : > { %3362 = vst [vmem:[%s4046_s25 + $0x28] sm:$0xff] %v2315_v51  ;;  %2364 = vmatmul.mubr.bf16.vlgmr.msra.gmra.mrb[12].mxu0 %v2315_v51  ;;  %2407 = vmatmul.mubr.bf16.vlgmr.msra.gmra.mrb[12].mxu1 %v2315_v51  ;;  %v2329_v51 = vunpack.c.l.bf16 %v3366_v42 }
 0xbbe   : > { %2490 = vmatpush1.bf16.msra.mxu0 %v4097_v58  ;;  %2533 = vmatpush1.bf16.msra.mxu1 %v4101_v60 }
 0xbbf   : > { %2491 = vmatprep.subr.bf16.mxu0 %v4107_v63  ;;  %2534 = vmatprep.subr.bf16.mxu1 %v4111_v1 }
 0xbc0   : > { %2521 = vmatprep.mubr.bf16.mxu0 %v3986_v31  ;;  %2564 = vmatprep.mubr.bf16.mxu1 %v3986_v31 }
 0xbc2   : > { %2492 = vmatpush1.bf16.msra.mxu0 %v4105_v62  ;;  %2535 = vmatpush1.bf16.msra.mxu1 %v4109_v0 }
 0xbc3   : > { %2493 = vmatprep.subr.bf16.mxu0 %v4115_v3  ;;  %2536 = vmatprep.subr.bf16.mxu1 %v4119_v5 }
 0xbc6   : > { %2494 = vmatpush1.bf16.msra.mxu0 %v4113_v2  ;;  %2537 = vmatpush1.bf16.msra.mxu1 %v4117_v4 }
 0xbc7   : > { %2495 = vmatprep.subr.bf16.mxu0 %v4123_v7  ;;  %2538 = vmatprep.subr.bf16.mxu1 %v4127_v9 }
 0xbca   : > { %2496 = vmatpush1.bf16.msra.mxu0 %v4121_v6  ;;  %2539 = vmatpush1.bf16.msra.mxu1 %v4125_v8 }
 0xbcb   : > { %2497 = vmatprep.subr.bf16.mxu0 %v4131_v11  ;;  %2540 = vmatprep.subr.bf16.mxu1 %v4135_v13 }
 0xbce   : > { %2498 = vmatpush1.bf16.msra.mxu0 %v4129_v10  ;;  %2541 = vmatpush1.bf16.msra.mxu1 %v4133_v12 }
 0xbcf   : > { %2499 = vmatprep.subr.bf16.mxu0 %v4139_v15  ;;  %2542 = vmatprep.subr.bf16.mxu1 %v4143_v17 }
 0xbd2   : > { %2500 = vmatpush1.bf16.msra.mxu0 %v4137_v14  ;;  %2543 = vmatpush1.bf16.msra.mxu1 %v4141_v16 }
 0xbd3   : > { %2501 = vmatprep.subr.bf16.mxu0 %v4147_v19  ;;  %2544 = vmatprep.subr.bf16.mxu1 %v4151_v21 }
 0xbd6   : > { %2502 = vmatpush1.bf16.msra.mxu0 %v4145_v18  ;;  %2545 = vmatpush1.bf16.msra.mxu1 %v4149_v20 }
 0xbd7   : > { %2503 = vmatprep.subr.bf16.mxu0 %v4155_v23  ;;  %2546 = vmatprep.subr.bf16.mxu1 %v4159_v25 }
 0xbda   : > { %2504 = vmatpush1.bf16.msra.mxu0 %v4153_v22  ;;  %2547 = vmatpush1.bf16.msra.mxu1 %v4157_v24 }
 0xbdb   : > { %2647 = vmatprep.subr.bf16.mxu0 %v4099_v59  ;;  %2690 = vmatprep.subr.bf16.mxu1 %v4103_v61 }
 0xc90   : > { %v2365_v50 = vpop.f32.mrb[12].mxu0  ;;  %v2408_v56 = vpop.f32.mrb[12].mxu1 }
 0xc91   : > { %v2417_v29 = vadd.f32 %v2365_v50, %v2323_v32  ;;  %v2367_v39 = vpop.f32.mrb[13].mxu0  ;;  %v2410_v27 = vpop.f32.mrb[13].mxu1  ;;  %v2419_v48 = vadd.f32 %v2408_v56, %v2325_v44 }
 0xc92   : > { %v2418_v45 = vadd.f32 %v2367_v39, %v2324_v26  ;;  %v2369_v47 = vpop.f32.mrb[14].mxu0  ;;  %v2412_v34 = vpop.f32.mrb[14].mxu1  ;;  %v2420_v30 = vadd.f32 %v2410_v27, %v2326_v53 }
 0xc93   : > { %v3367_v40 = vmul.f32 -1.442695, %v2417_v29  ;;  %v2421_v38 = vadd.f32 %v2369_v47, %v2327_v36  ;;  %v2371_v33 = vpop.f32.mrb[15].mxu0  ;;  %v2414_v49 = vpop.f32.mrb[15].mxu1  ;;  %v2423_v26 = vadd.f32 %v2412_v34, %v2329_v51 }
 0xc94   : > { %v3369_v46 = vmul.f32 -1.442695, %v2418_v45  ;;  %v2422_v52 = vadd.f32 %v2371_v33, %v2328_v55  ;;  %v3371_v41 = vmul.f32 -1.442695, %v2420_v30  ;;  %v2424_v32 = vadd.f32 %v2414_v49, %v2330_v35 }
 0xc95   : > { %3798 = vpow2.f32 %v3367_v40  ;;  %v3368_v43 = vmul.f32 -1.442695, %v2421_v38 }
 0xc96   : > { %3800 = vpow2.f32 %v3369_v46  ;;  %v3370_v57 = vmul.f32 -1.442695, %v2422_v52  ;;  %v3372_v55 = vmul.f32 -1.442695, %v2424_v32 }
 0xc97   : > { %3802 = vpow2.f32 %v3368_v43 }
 0xc98   : > { %3804 = vpow2.f32 %v3370_v57 }
 0xc99   : > { %3806 = vtanh.f32 %v2419_v48 }
 0xc9a   : > { %3808 = vpow2.f32 %v3371_v41 }
 0xc9b   : > { %3810 = vtanh.f32 %v2423_v26 }
 0xc9f   : > { %v3799_v36 = vpop.eup %3798 }
 0xca0   : > { %v3801_v50 = vpop.eup %3800  ;;  %v2431_v29 = vadd.f32 1.0, %v3799_v36 }
 0xca1   : > { %v2443_v39 = vadd.f32 1.0, %v3801_v50  ;;  %v3803_v45 = vpop.eup %3802 }
 0xca2   : > { %3812 = vrcp.f32 %v2431_v29  ;;  %v2432_v28 = vadd.f32 1.0, %v3803_v45  ;;  %v3805_v27 = vpop.eup %3804  ;;  %v3376_v29 = vld [vmem:[%s4041_s22 + $0x70] sm:$0xff] }
 0xca3   : > { %3814 = vrcp.f32 %v2443_v39  ;;  %v2444_v47 = vadd.f32 1.0, %v3805_v27  ;;  %v3807_v56 = vpop.eup %3806  ;;  %v2485_v45 = vunpack.c.l.bf16 %v3376_v29 }
 0xca4   : > { %3816 = vpow2.f32 %v3372_v55  ;;  %v3809_v40 = vpop.eup %3808 }
 0xca5   : > { %3818 = vrcp.f32 %v2432_v28  ;;  %v3811_v34 = vpop.eup %3810  ;;  %v2457_v43 = vadd.f32 1.0, %v3809_v40  ;;  %v3375_v40 = vld [vmem:[%s4041_s22 + $0x68] sm:$0xff] }
 0xca6   : > { %3820 = vrcp.f32 %v2444_v47  ;;  %v2486_v47 = vunpack.c.h.bf16 %v3376_v29 }
 0xca7   : > { %3822 = vrcp.f32 %v2457_v43 }
 0xcac   : > { %v3813_v38 = vpop.eup %3812 }
 0xcad   : > { %v3815_v33 = vpop.eup %3814  ;;  %v2465_v49 = vmul.f32 %v3813_v38, %v3807_v56 }
 0xcae   : > { %v3817_v46 = vpop.eup %3816  ;;  %v2463_v53 = vmul.f32 %v3815_v33, %v4698_v37 }
 0xcaf   : > { %v3819_v52 = vpop.eup %3818  ;;  %v2458_v30 = vadd.f32 1.0, %v3817_v46 }
 0xcb0   : > { %v4745_v42 = vadd.f32 %v2465_v49, %v2463_v53  ;;  %v2466_v57 = vmul.f32 %v3819_v52, %v3811_v34  ;;  %v3821_v44 = vpop.eup %3820 }
 0xcb1   : > { %v2464_v35 = vmul.f32 %v3821_v44, %v4702_v54  ;;  %v3823_v48 = vpop.eup %3822  ;;  %v3374_v54 = vld [vmem:[%s4041_s22 + $0x60] sm:$0xff] }
 0xcb2   : > { %3824 = vtanh.f32 %v4745_v42  ;;  %v2481_v55 = vunpack.c.l.bf16 %v3374_v54  ;;  %v2482_v39 = vunpack.c.h.bf16 %v3374_v54 }
 0xcb3   : > { %v4749_v51 = vadd.f32 %v2466_v57, %v2464_v35  ;;  %3826 = vrcp.f32 %v2458_v30  ;;  %v2484_v30 = vunpack.c.h.bf16 %v3375_v40 }
 0xcb5   : > { %3828 = vtanh.f32 %v4749_v51 }
 0xcbc   : > { %v3825_v37 = vpop.eup %3824 }
 0xcbd   : > { %v3827_v41 = vpop.eup %3826  ;;  %v2471_v26 = vmul.f32 %v3825_v37, %v3823_v48  ;;  %v3377_v37 = vld [vmem:[%s4041_s22 + $0x78] sm:$0xff] }
 0xcbf   : > { %v3829_v32 = vpop.eup %3828 }
 0xcc0   : > { %v2472_v36 = vmul.f32 %v3829_v32, %v3827_v41  ;;  %v2483_v32 = vunpack.c.l.bf16 %v3375_v40 }
 0xcc2   : > { %v2473_v50 = vpack.c.bf16 %v2472_v36, %v2471_v26  ;;  %v2488_v36 = vunpack.c.h.bf16 %v3377_v37 }
 0xcc4   : > { %3373 = vst [vmem:[%s4046_s25 + $0x20] sm:$0xff] %v2473_v50  ;;  %2522 = vmatmul.mubr.bf16.vlgmr.msra.gmra.mrb[16].mxu0 %v2473_v50  ;;  %2565 = vmatmul.mubr.bf16.vlgmr.msra.gmra.mrb[16].mxu1 %v2473_v50  ;;  %v2487_v50 = vunpack.c.l.bf16 %v3377_v37 }
 0xcc5   : > { %2648 = vmatpush1.bf16.msra.mxu0 %v4097_v58  ;;  %2691 = vmatpush1.bf16.msra.mxu1 %v4101_v60 }
 0xcc6   : > { %2649 = vmatprep.subr.bf16.mxu0 %v4107_v63  ;;  %2692 = vmatprep.subr.bf16.mxu1 %v4111_v1 }
 0xcc7   : > { %2679 = vmatprep.mubr.bf16.mxu0 %v3986_v31  ;;  %2722 = vmatprep.mubr.bf16.mxu1 %v3986_v31 }
 0xcc9   : > { %2650 = vmatpush1.bf16.msra.mxu0 %v4105_v62  ;;  %2693 = vmatpush1.bf16.msra.mxu1 %v4109_v0 }
 0xcca   : > { %2651 = vmatprep.subr.bf16.mxu0 %v4115_v3  ;;  %2694 = vmatprep.subr.bf16.mxu1 %v4119_v5 }
 0xccd   : > { %2652 = vmatpush1.bf16.msra.mxu0 %v4113_v2  ;;  %2695 = vmatpush1.bf16.msra.mxu1 %v4117_v4 }
 0xcce   : > { %2653 = vmatprep.subr.bf16.mxu0 %v4123_v7  ;;  %2696 = vmatprep.subr.bf16.mxu1 %v4127_v9 }
 0xcd1   : > { %2654 = vmatpush1.bf16.msra.mxu0 %v4121_v6  ;;  %2697 = vmatpush1.bf16.msra.mxu1 %v4125_v8 }
 0xcd2   : > { %2655 = vmatprep.subr.bf16.mxu0 %v4131_v11  ;;  %2698 = vmatprep.subr.bf16.mxu1 %v4135_v13 }
 0xcd5   : > { %2656 = vmatpush1.bf16.msra.mxu0 %v4129_v10  ;;  %2699 = vmatpush1.bf16.msra.mxu1 %v4133_v12 }
 0xcd6   : > { %2657 = vmatprep.subr.bf16.mxu0 %v4139_v15  ;;  %2700 = vmatprep.subr.bf16.mxu1 %v4143_v17 }
 0xcd9   : > { %2658 = vmatpush1.bf16.msra.mxu0 %v4137_v14  ;;  %2701 = vmatpush1.bf16.msra.mxu1 %v4141_v16 }
 0xcda   : > { %2659 = vmatprep.subr.bf16.mxu0 %v4147_v19  ;;  %2702 = vmatprep.subr.bf16.mxu1 %v4151_v21 }
 0xcdd   : > { %2660 = vmatpush1.bf16.msra.mxu0 %v4145_v18  ;;  %2703 = vmatpush1.bf16.msra.mxu1 %v4149_v20 }
 0xcde   : > { %2661 = vmatprep.subr.bf16.mxu0 %v4155_v23  ;;  %2704 = vmatprep.subr.bf16.mxu1 %v4159_v25 }
 0xce1   : > { %2662 = vmatpush1.bf16.msra.mxu0 %v4153_v22  ;;  %2705 = vmatpush1.bf16.msra.mxu1 %v4157_v24 }
 0xce2   : > { %2805 = vmatprep.subr.bf16.mxu0 %v4099_v59  ;;  %2848 = vmatprep.subr.bf16.mxu1 %v4103_v61 }
 0xd97   : > { %v2523_v28 = vpop.f32.mrb[16].mxu0  ;;  %v2566_v27 = vpop.f32.mrb[16].mxu1 }
 0xd98   : > { %v2575_v56 = vadd.f32 %v2523_v28, %v2481_v55  ;;  %v2525_v34 = vpop.f32.mrb[17].mxu0  ;;  %v2568_v38 = vpop.f32.mrb[17].mxu1  ;;  %v2577_v54 = vadd.f32 %v2566_v27, %v2483_v32 }
 0xd99   : > { %v2576_v33 = vadd.f32 %v2525_v34, %v2482_v39  ;;  %v2527_v49 = vpop.f32.mrb[18].mxu0  ;;  %v2570_v46 = vpop.f32.mrb[18].mxu1  ;;  %v2578_v26 = vadd.f32 %v2568_v38, %v2484_v30 }
 0xd9a   : > { %v3378_v53 = vmul.f32 -1.442695, %v2575_v56  ;;  %v2579_v52 = vadd.f32 %v2527_v49, %v2485_v45  ;;  %v2529_v43 = vpop.f32.mrb[19].mxu0  ;;  %v2572_v57 = vpop.f32.mrb[19].mxu1  ;;  %v2581_v39 = vadd.f32 %v2570_v46, %v2487_v50 }
 0xd9b   : > { %v3380_v44 = vmul.f32 -1.442695, %v2576_v33  ;;  %v2580_v35 = vadd.f32 %v2529_v43, %v2486_v47  ;;  %v3382_v29 = vmul.f32 -1.442695, %v2578_v26  ;;  %v2582_v55 = vadd.f32 %v2572_v57, %v2488_v36 }
 0xd9c   : > { %3830 = vpow2.f32 %v3378_v53  ;;  %v3379_v48 = vmul.f32 -1.442695, %v2579_v52 }
 0xd9d   : > { %3832 = vpow2.f32 %v3380_v44  ;;  %v3381_v41 = vmul.f32 -1.442695, %v2580_v35  ;;  %v3383_v47 = vmul.f32 -1.442695, %v2582_v55 }
 0xd9e   : > { %3834 = vpow2.f32 %v3379_v48 }
 0xd9f   : > { %3836 = vpow2.f32 %v3381_v41 }
 0xda0   : > { %3838 = vtanh.f32 %v2577_v54 }
 0xda1   : > { %3840 = vpow2.f32 %v3382_v29 }
 0xda2   : > { %3842 = vtanh.f32 %v2581_v39 }
 0xda6   : > { %v3831_v45 = vpop.eup %3830 }
 0xda7   : > { %v3833_v28 = vpop.eup %3832  ;;  %v2589_v56 = vadd.f32 1.0, %v3831_v45 }
 0xda8   : > { %v2601_v34 = vadd.f32 1.0, %v3833_v28  ;;  %v3835_v33 = vpop.eup %3834 }
 0xda9   : > { %3844 = vrcp.f32 %v2589_v56  ;;  %v2590_v40 = vadd.f32 1.0, %v3835_v33  ;;  %v3837_v38 = vpop.eup %3836  ;;  %v3387_v56 = vld [vmem:[%s4041_s22 + $0x50] sm:$0xff] }
 0xdaa   : > { %3846 = vrcp.f32 %v2601_v34  ;;  %v2602_v49 = vadd.f32 1.0, %v3837_v38  ;;  %v3839_v27 = vpop.eup %3838  ;;  %v2643_v33 = vunpack.c.l.bf16 %v3387_v56 }
 0xdab   : > { %3848 = vpow2.f32 %v3383_v47  ;;  %v3841_v53 = vpop.eup %3840 }
 0xdac   : > { %3850 = vrcp.f32 %v2590_v40  ;;  %v3843_v46 = vpop.eup %3842  ;;  %v2615_v48 = vadd.f32 1.0, %v3841_v53  ;;  %v3386_v53 = vld [vmem:[%s4041_s22 + $0x48] sm:$0xff] }
 0xdad   : > { %3852 = vrcp.f32 %v2602_v49  ;;  %v2644_v49 = vunpack.c.h.bf16 %v3387_v56 }
 0xdae   : > { %3854 = vrcp.f32 %v2615_v48 }
 0xdb3   : > { %v3845_v52 = vpop.eup %3844 }
 0xdb4   : > { %v3847_v43 = vpop.eup %3846  ;;  %v2623_v57 = vmul.f32 %v3845_v52, %v3839_v27 }
 0xdb5   : > { %v3849_v44 = vpop.eup %3848  ;;  %v2621_v30 = vmul.f32 %v3847_v43, %v4745_v42 }
 0xdb6   : > { %v3851_v35 = vpop.eup %3850  ;;  %v2616_v26 = vadd.f32 1.0, %v3849_v44 }
 0xdb7   : > { %v4792_v37 = vadd.f32 %v2623_v57, %v2621_v30  ;;  %v2624_v41 = vmul.f32 %v3851_v35, %v3843_v46  ;;  %v3853_v32 = vpop.eup %3852 }
 0xdb8   : > { %v2622_v36 = vmul.f32 %v3853_v32, %v4749_v51  ;;  %v3855_v54 = vpop.eup %3854  ;;  %v3385_v51 = vld [vmem:[%s4041_s22 + $0x40] sm:$0xff] }
 0xdb9   : > { %3856 = vtanh.f32 %v4792_v37  ;;  %v2639_v47 = vunpack.c.l.bf16 %v3385_v51  ;;  %v2640_v34 = vunpack.c.h.bf16 %v3385_v51 }
 0xdba   : > { %v4796_v50 = vadd.f32 %v2624_v41, %v2622_v36  ;;  %3858 = vrcp.f32 %v2616_v26  ;;  %v2642_v41 = vunpack.c.h.bf16 %v3386_v53  ;;  %v3388_v36 = vld [vmem:[%s4041_s22 + $0x58] sm:$0xff] }
 0xdbc   : > { %3860 = vtanh.f32 %v4796_v50 }
 0xdc3   : > { %v3857_v42 = vpop.eup %3856 }
 0xdc4   : > { %v3859_v29 = vpop.eup %3858  ;;  %v2629_v39 = vmul.f32 %v3857_v42, %v3855_v54  ;;  %v2641_v42 = vunpack.c.l.bf16 %v3386_v53 }
 0xdc6   : > { %v3861_v55 = vpop.eup %3860 }
 0xdc7   : > { %v2630_v45 = vmul.f32 %v3861_v55, %v3859_v29  ;;  %v2646_v55 = vunpack.c.h.bf16 %v3388_v36 }
 0xdc9   : > { %v2631_v28 = vpack.c.bf16 %v2630_v45, %v2629_v39  ;;  %v2645_v39 = vunpack.c.l.bf16 %v3388_v36 }
 0xdcb   : > { %3384 = vst [vmem:[%s4046_s25 + $0x18] sm:$0xff] %v2631_v28  ;;  %2680 = vmatmul.mubr.bf16.vlgmr.msra.gmra.mrb[20].mxu0 %v2631_v28  ;;  %2723 = vmatmul.mubr.bf16.vlgmr.msra.gmra.mrb[20].mxu1 %v2631_v28 }
 0xdcc   : > { %2806 = vmatpush1.bf16.msra.mxu0 %v4097_v58  ;;  %2849 = vmatpush1.bf16.msra.mxu1 %v4101_v60 }
 0xdcd   : > { %2807 = vmatprep.subr.bf16.mxu0 %v4107_v63  ;;  %2850 = vmatprep.subr.bf16.mxu1 %v4111_v1 }
 0xdce   : > { %2837 = vmatprep.mubr.bf16.mxu0 %v3986_v31  ;;  %2880 = vmatprep.mubr.bf16.mxu1 %v3986_v31 }
 0xdd0   : > { %2808 = vmatpush1.bf16.msra.mxu0 %v4105_v62  ;;  %2851 = vmatpush1.bf16.msra.mxu1 %v4109_v0 }
 0xdd1   : > { %2809 = vmatprep.subr.bf16.mxu0 %v4115_v3  ;;  %2852 = vmatprep.subr.bf16.mxu1 %v4119_v5 }
 0xdd4   : > { %2810 = vmatpush1.bf16.msra.mxu0 %v4113_v2  ;;  %2853 = vmatpush1.bf16.msra.mxu1 %v4117_v4 }
 0xdd5   : > { %2811 = vmatprep.subr.bf16.mxu0 %v4123_v7  ;;  %2854 = vmatprep.subr.bf16.mxu1 %v4127_v9 }
 0xdd8   : > { %2812 = vmatpush1.bf16.msra.mxu0 %v4121_v6  ;;  %2855 = vmatpush1.bf16.msra.mxu1 %v4125_v8 }
 0xdd9   : > { %2813 = vmatprep.subr.bf16.mxu0 %v4131_v11  ;;  %2856 = vmatprep.subr.bf16.mxu1 %v4135_v13 }
 0xddc   : > { %2814 = vmatpush1.bf16.msra.mxu0 %v4129_v10  ;;  %2857 = vmatpush1.bf16.msra.mxu1 %v4133_v12 }
 0xddd   : > { %2815 = vmatprep.subr.bf16.mxu0 %v4139_v15  ;;  %2858 = vmatprep.subr.bf16.mxu1 %v4143_v17 }
 0xde0   : > { %2816 = vmatpush1.bf16.msra.mxu0 %v4137_v14  ;;  %2859 = vmatpush1.bf16.msra.mxu1 %v4141_v16 }
 0xde1   : > { %2817 = vmatprep.subr.bf16.mxu0 %v4147_v19  ;;  %2860 = vmatprep.subr.bf16.mxu1 %v4151_v21 }
 0xde4   : > { %2818 = vmatpush1.bf16.msra.mxu0 %v4145_v18  ;;  %2861 = vmatpush1.bf16.msra.mxu1 %v4149_v20 }
 0xde5   : > { %2819 = vmatprep.subr.bf16.mxu0 %v4155_v23  ;;  %2862 = vmatprep.subr.bf16.mxu1 %v4159_v25 }
 0xde8   : > { %2820 = vmatpush1.bf16.msra.mxu0 %v4153_v22  ;;  %2863 = vmatpush1.bf16.msra.mxu1 %v4157_v24 }
 0xde9   : > { %2962 = vmatprep.subr.bf16.mxu0 %v4099_v59  ;;  %3005 = vmatprep.subr.bf16.mxu1 %v4103_v61 }
 0xe9e   : > { %v2681_v40 = vpop.f32.mrb[20].mxu0  ;;  %v2724_v38 = vpop.f32.mrb[20].mxu1 }
 0xe9f   : > { %v2733_v27 = vadd.f32 %v2681_v40, %v2639_v47  ;;  %v2683_v46 = vpop.f32.mrb[21].mxu0  ;;  %v2726_v52 = vpop.f32.mrb[21].mxu1  ;;  %v2735_v45 = vadd.f32 %v2724_v38, %v2641_v42 }
 0xea0   : > { %v2734_v43 = vadd.f32 %v2683_v46, %v2640_v34  ;;  %v2685_v57 = vpop.f32.mrb[22].mxu0  ;;  %v2728_v44 = vpop.f32.mrb[22].mxu1  ;;  %v2736_v29 = vadd.f32 %v2726_v52, %v2642_v41 }
 0xea1   : > { %v3389_v30 = vmul.f32 -1.442695, %v2733_v27  ;;  %v2737_v59 = vadd.f32 %v2685_v57, %v2643_v33  ;;  %v2687_v35 = vpop.f32.mrb[23].mxu0  ;;  %v2730_v61 = vpop.f32.mrb[23].mxu1  ;;  %v2739_v56 = vadd.f32 %v2728_v44, %v2645_v39 }
 0xea2   : > { %v3391_v48 = vmul.f32 -1.442695, %v2734_v43  ;;  %v2738_v32 = vadd.f32 %v2687_v35, %v2644_v49  ;;  %v3393_v28 = vmul.f32 -1.442695, %v2736_v29  ;;  %v2740_v51 = vadd.f32 %v2730_v61, %v2646_v55 }
 0xea3   : > { %3862 = vpow2.f32 %v3389_v30  ;;  %v3390_v26 = vmul.f32 -1.442695, %v2737_v59 }
 0xea4   : > { %3864 = vpow2.f32 %v3391_v48  ;;  %v3392_v54 = vmul.f32 -1.442695, %v2738_v32  ;;  %v3394_v40 = vmul.f32 -1.442695, %v2740_v51 }
 0xea5   : > { %3866 = vpow2.f32 %v3390_v26 }
 0xea6   : > { %3868 = vpow2.f32 %v3392_v54 }
 0xea7   : > { %3870 = vtanh.f32 %v2735_v45 }
 0xea8   : > { %3872 = vpow2.f32 %v3393_v28 }
 0xea9   : > { %3874 = vtanh.f32 %v2739_v56 }
 0xead   : > { %v3863_v47 = vpop.eup %3862 }
 0xeae   : > { %v3865_v34 = vpop.eup %3864  ;;  %v2747_v33 = vadd.f32 1.0, %v3863_v47 }
 0xeaf   : > { %v2759_v49 = vadd.f32 1.0, %v3865_v34  ;;  %v3867_v27 = vpop.eup %3866 }
 0xeb0   : > { %3876 = vrcp.f32 %v2747_v33  ;;  %v2748_v53 = vadd.f32 1.0, %v3867_v27  ;;  %v3869_v46 = vpop.eup %3868 }
 0xeb1   : > { %3878 = vrcp.f32 %v2759_v49  ;;  %v2760_v52 = vadd.f32 1.0, %v3869_v46  ;;  %v3871_v38 = vpop.eup %3870 }
 0xeb2   : > { %3880 = vpow2.f32 %v3394_v40  ;;  %v3873_v43 = vpop.eup %3872 }
 0xeb3   : > { %3882 = vrcp.f32 %v2748_v53  ;;  %v3875_v57 = vpop.eup %3874  ;;  %v2773_v41 = vadd.f32 1.0, %v3873_v43 }
 0xeb4   : > { %3884 = vrcp.f32 %v2760_v52 }
 0xeb5   : > { %3886 = vrcp.f32 %v2773_v41 }
 0xeba   : > { %v3877_v44 = vpop.eup %3876 }
 0xebb   : > { %v3879_v30 = vpop.eup %3878  ;;  %v2781_v59 = vmul.f32 %v3877_v44, %v3871_v38 }
 0xebc   : > { %v3881_v35 = vpop.eup %3880  ;;  %v2779_v61 = vmul.f32 %v3879_v30, %v4792_v37 }
 0xebd   : > { %v3883_v48 = vpop.eup %3882  ;;  %v2774_v54 = vadd.f32 1.0, %v3881_v35 }
 0xebe   : > { %v4839_v32 = vadd.f32 %v2781_v59, %v2779_v61  ;;  %v2782_v26 = vmul.f32 %v3883_v48, %v3875_v57  ;;  %v3885_v36 = vpop.eup %3884 }
 0xebf   : > { %v2780_v42 = vmul.f32 %v3885_v36, %v4796_v50  ;;  %v3887_v55 = vpop.eup %3886 }
 0xec0   : > { %3888 = vtanh.f32 %v4839_v32 }
 0xec1   : > { %v4843_v29 = vadd.f32 %v2782_v26, %v2780_v42  ;;  %3890 = vrcp.f32 %v2774_v54 }
 0xec3   : > { %3892 = vtanh.f32 %v4843_v29 }
 0xeca   : > { %v3889_v37 = vpop.eup %3888 }
 0xecb   : > { %v3891_v39 = vpop.eup %3890  ;;  %v2787_v28 = vmul.f32 %v3889_v37, %v3887_v55 }
 0xecd   : > { %v3893_v45 = vpop.eup %3892 }
 0xece   : > { %v2788_v51 = vmul.f32 %v3893_v45, %v3891_v39 }
 0xed0   : > { %v2789_v56 = vpack.c.bf16 %v2788_v51, %v2787_v28 }
 0xed2   : > { %3395 = vst [vmem:[%s4046_s25 + $0x10] sm:$0xff] %v2789_v56  ;;  %2838 = vmatmul.mubr.bf16.vlgmr.msra.gmra.mrb[24].mxu0 %v2789_v56  ;;  %2881 = vmatmul.mubr.bf16.vlgmr.msra.gmra.mrb[24].mxu1 %v2789_v56 }
 0xed3   : > { %2963 = vmatpush1.bf16.msra.mxu0 %v4097_v58  ;;  %3006 = vmatpush1.bf16.msra.mxu1 %v4101_v60  ;;  %v3396_v58 = vld [vmem:[%s4041_s22 + $0x20] sm:$0xff]  ;;  %v3398_v60 = vld [vmem:[%s4041_s22 + $0x30] sm:$0xff] }
 0xed4   : > { %2964 = vmatprep.subr.bf16.mxu0 %v4107_v63  ;;  %3007 = vmatprep.subr.bf16.mxu1 %v4111_v1  ;;  %v2798_v63 = vunpack.c.h.bf16 %v3396_v58 }
 0xed5   : > { %2994 = vmatprep.mubr.bf16.mxu0 %v3986_v31  ;;  %3037 = vmatprep.mubr.bf16.mxu1 %v3986_v31 }
 0xed7   : > { %2965 = vmatpush1.bf16.msra.mxu0 %v4105_v62  ;;  %3008 = vmatpush1.bf16.msra.mxu1 %v4109_v0  ;;  %v2797_v62 = vunpack.c.l.bf16 %v3396_v58  ;;  %v2801_v0 = vunpack.c.l.bf16 %v3398_v60 }
 0xed8   : > { %2966 = vmatprep.subr.bf16.mxu0 %v4115_v3  ;;  %3009 = vmatprep.subr.bf16.mxu1 %v4119_v5  ;;  %v2802_v3 = vunpack.c.h.bf16 %v3398_v60  ;;  %v3397_v5 = vld [vmem:[%s4041_s22 + $0x28] sm:$0xff] }
 0xedb   : > { %2967 = vmatpush1.bf16.msra.mxu0 %v4113_v2  ;;  %3010 = vmatpush1.bf16.msra.mxu1 %v4117_v4 }
 0xedc   : > { %2968 = vmatprep.subr.bf16.mxu0 %v4123_v7  ;;  %3011 = vmatprep.subr.bf16.mxu1 %v4127_v9 }
 0xedf   : > { %2969 = vmatpush1.bf16.msra.mxu0 %v4121_v6  ;;  %3012 = vmatpush1.bf16.msra.mxu1 %v4125_v8 }
 0xee0   : > { %2970 = vmatprep.subr.bf16.mxu0 %v4131_v11  ;;  %3013 = vmatprep.subr.bf16.mxu1 %v4135_v13 }
 0xee3   : > { %2971 = vmatpush1.bf16.msra.mxu0 %v4129_v10  ;;  %3014 = vmatpush1.bf16.msra.mxu1 %v4133_v12 }
 0xee4   : > { %2972 = vmatprep.subr.bf16.mxu0 %v4139_v15  ;;  %3015 = vmatprep.subr.bf16.mxu1 %v4143_v17 }
 0xee7   : > { %2973 = vmatpush1.bf16.msra.mxu0 %v4137_v14  ;;  %3016 = vmatpush1.bf16.msra.mxu1 %v4141_v16  ;;  %v2800_v16 = vunpack.c.h.bf16 %v3397_v5 }
 0xee8   : > { %2974 = vmatprep.subr.bf16.mxu0 %v4147_v19  ;;  %3017 = vmatprep.subr.bf16.mxu1 %v4151_v21  ;;  %v3399_v19 = vld [vmem:[%s4041_s22 + $0x38] sm:$0xff]  ;;  %v2799_v21 = vunpack.c.l.bf16 %v3397_v5 }
 0xeeb   : > { %2975 = vmatpush1.bf16.msra.mxu0 %v4145_v18  ;;  %3018 = vmatpush1.bf16.msra.mxu1 %v4149_v20 }
 0xeec   : > { %2976 = vmatprep.subr.bf16.mxu0 %v4155_v23  ;;  %3019 = vmatprep.subr.bf16.mxu1 %v4159_v25  ;;  %v2804_v23 = vunpack.c.h.bf16 %v3399_v19 }
 0xeef   : > { %2977 = vmatpush1.bf16.msra.mxu0 %v4153_v22  ;;  %3020 = vmatpush1.bf16.msra.mxu1 %v4157_v24  ;;  %v2803_v24 = vunpack.c.l.bf16 %v3399_v19 }
 0xfa5   : > { %v2839_v1 = vpop.f32.mrb[24].mxu0  ;;  %v2882_v2 = vpop.f32.mrb[24].mxu1 }
 0xfa6   : > { %v2891_v4 = vadd.f32 %v2839_v1, %v2797_v62  ;;  %v2841_v6 = vpop.f32.mrb[25].mxu0  ;;  %v2884_v7 = vpop.f32.mrb[25].mxu1  ;;  %v2893_v25 = vadd.f32 %v2882_v2, %v2799_v21  ;;  %v2952_v62 = vld [vmem:[%s4041_s22 + $0x10] sm:$0xff] }
 0xfa7   : > { %v2892_v8 = vadd.f32 %v2841_v6, %v2798_v63  ;;  %v2843_v9 = vpop.f32.mrb[26].mxu0  ;;  %v2886_v10 = vpop.f32.mrb[26].mxu1  ;;  %v2894_v22 = vadd.f32 %v2884_v7, %v2800_v16  ;;  %v2958_v1 = vunpack.c.l.bf16 %v2952_v62  ;;  %v2951_v6 = vld [vmem:[%s4041_s22 + $0x8] sm:$0xff] }
 0xfa8   : > { %v3400_v11 = vmul.f32 -1.442695, %v2891_v4  ;;  %v2895_v12 = vadd.f32 %v2843_v9, %v2801_v0  ;;  %v2845_v13 = vpop.f32.mrb[27].mxu0  ;;  %v2888_v14 = vpop.f32.mrb[27].mxu1  ;;  %v2897_v47 = vadd.f32 %v2886_v10, %v2803_v24  ;;  %v2959_v4 = vunpack.c.h.bf16 %v2952_v62 }
 0xfa9   : > { %v3402_v15 = vmul.f32 -1.442695, %v2892_v8  ;;  %v2896_v17 = vadd.f32 %v2845_v13, %v2802_v3  ;;  %v3404_v31 = vmul.f32 -1.442695, %v2894_v22  ;;  %v2898_v50 = vadd.f32 %v2888_v14, %v2804_v23 }
 0xfaa   : > { %3894 = vpow2.f32 %v3400_v11  ;;  %v3401_v18 = vmul.f32 -1.442695, %v2895_v12  ;;  %v2956_v22 = vunpack.c.l.bf16 %v2951_v6 }
 0xfab   : > { %3896 = vpow2.f32 %v3402_v15  ;;  %v3403_v20 = vmul.f32 -1.442695, %v2896_v17  ;;  %v3405_v49 = vmul.f32 -1.442695, %v2898_v50  ;;  %v2957_v17 = vunpack.c.h.bf16 %v2951_v6 }
 0xfac   : > { %3898 = vpow2.f32 %v3401_v18 }
 0xfad   : > { %3900 = vpow2.f32 %v3403_v20  ;;  %v2953_v20 = vld [vmem:[%s4041_s22 + $0x18] sm:$0xff] }
 0xfae   : > { %3902 = vtanh.f32 %v2893_v25  ;;  %v2961_v24 = vunpack.c.h.bf16 %v2953_v20  ;;  %v2960_v25 = vunpack.c.l.bf16 %v2953_v20 }
 0xfaf   : > { %3904 = vpow2.f32 %v3404_v31 }
 0xfb0   : > { %3906 = vtanh.f32 %v2897_v47 }
 0xfb4   : > { %v3895_v34 = vpop.eup %3894 }
 0xfb5   : > { %v3897_v33 = vpop.eup %3896  ;;  %v2905_v40 = vadd.f32 1.0, %v3895_v34 }
 0xfb6   : > { %v2917_v27 = vadd.f32 1.0, %v3897_v33  ;;  %v3899_v53 = vpop.eup %3898 }
 0xfb7   : > { %3908 = vrcp.f32 %v2905_v40  ;;  %v2906_v46 = vadd.f32 1.0, %v3899_v53  ;;  %v3901_v52 = vpop.eup %3900 }
 0xfb8   : > { %3910 = vrcp.f32 %v2917_v27  ;;  %v2918_v38 = vadd.f32 1.0, %v3901_v52  ;;  %v3903_v43 = vpop.eup %3902 }
 0xfb9   : > { %3912 = vpow2.f32 %v3405_v49  ;;  %v3905_v57 = vpop.eup %3904 }
 0xfba   : > { %3914 = vrcp.f32 %v2906_v46  ;;  %v3907_v44 = vpop.eup %3906  ;;  %v2931_v26 = vadd.f32 1.0, %v3905_v57 }
 0xfbb   : > { %3916 = vrcp.f32 %v2918_v38 }
 0xfbc   : > { %3918 = vrcp.f32 %v2931_v26 }
 0xfc1   : > { %v3909_v30 = vpop.eup %3908 }
 0xfc2   : > { %v3911_v59 = vpop.eup %3910  ;;  %v2939_v35 = vmul.f32 %v3909_v30, %v3903_v43 }
 0xfc3   : > { %v3913_v61 = vpop.eup %3912  ;;  %v2937_v48 = vmul.f32 %v3911_v59, %v4839_v32 }
 0xfc4   : > { %v3915_v41 = vpop.eup %3914  ;;  %v2932_v55 = vadd.f32 1.0, %v3913_v61 }
 0xfc5   : > { %v4884_v36 = vadd.f32 %v2939_v35, %v2937_v48  ;;  %v2940_v54 = vmul.f32 %v3915_v41, %v3907_v44  ;;  %v3917_v42 = vpop.eup %3916 }
 0xfc6   : > { %v2938_v37 = vmul.f32 %v3917_v42, %v4843_v29  ;;  %v3919_v32 = vpop.eup %3918  ;;  %v2950_v29 = vld [vmem:[%s4041_s22] sm:$0xff] }
 0xfc7   : > { %3920 = vtanh.f32 %v4884_v36  ;;  %v2954_v63 = vunpack.c.l.bf16 %v2950_v29  ;;  %v2955_v0 = vunpack.c.h.bf16 %v2950_v29 }
 0xfc8   : > { %v4888_v39 = vadd.f32 %v2940_v54, %v2938_v37  ;;  %3922 = vrcp.f32 %v2932_v55 }
 0xfca   : > { %3924 = vtanh.f32 %v4888_v39 }
 0xfd1   : > { %v3921_v45 = vpop.eup %3920 }
 0xfd2   : > { %v3923_v28 = vpop.eup %3922  ;;  %v2945_v56 = vmul.f32 %v3921_v45, %v3919_v32 }
 0xfd4   : > { %v3925_v51 = vpop.eup %3924 }
 0xfd5   : > { %v2946_v58 = vmul.f32 %v3925_v51, %v3923_v28 }
 0xfd7   : > { %v2947_v60 = vpack.c.bf16 %v2946_v58, %v2945_v56 }
 0xfd9   : > { %3406 = vst [vmem:[%s4046_s25 + $0x8] sm:$0xff] %v2947_v60  ;;  %2995 = vmatmul.mubr.bf16.vlgmr.msra.gmra.mrb[28].mxu0 %v2947_v60  ;;  %3038 = vmatmul.mubr.bf16.vlgmr.msra.gmra.mrb[28].mxu1 %v2947_v60 }
0x10ac   : > { %v2996_v2 = vpop.f32.mrb[28].mxu0  ;;  %v3039_v3 = vpop.f32.mrb[28].mxu1 }
0x10ad   : > { %v3048_v5 = vadd.f32 %v2996_v2, %v2954_v63  ;;  %v2998_v7 = vpop.f32.mrb[29].mxu0  ;;  %v3041_v8 = vpop.f32.mrb[29].mxu1  ;;  %v3050_v31 = vadd.f32 %v3039_v3, %v2956_v22 }
0x10ae   : > { %v3049_v9 = vadd.f32 %v2998_v7, %v2955_v0  ;;  %v3000_v10 = vpop.f32.mrb[30].mxu0  ;;  %v3043_v11 = vpop.f32.mrb[30].mxu1  ;;  %v3051_v23 = vadd.f32 %v3041_v8, %v2957_v17 }
0x10af   : > { %v3407_v12 = vmul.f32 -1.442695, %v3048_v5  ;;  %v3052_v13 = vadd.f32 %v3000_v10, %v2958_v1  ;;  %v3002_v14 = vpop.f32.mrb[31].mxu0  ;;  %v3045_v15 = vpop.f32.mrb[31].mxu1  ;;  %v3054_v34 = vadd.f32 %v3043_v11, %v2960_v25 }
0x10b0   : > { %v3409_v16 = vmul.f32 -1.442695, %v3049_v9  ;;  %v3053_v18 = vadd.f32 %v3002_v14, %v2959_v4  ;;  %v3411_v50 = vmul.f32 -1.442695, %v3051_v23  ;;  %v3055_v47 = vadd.f32 %v3045_v15, %v2961_v24 }
0x10b1   : > { %3926 = vpow2.f32 %v3407_v12  ;;  %v3408_v19 = vmul.f32 -1.442695, %v3052_v13 }
0x10b2   : > { %3928 = vpow2.f32 %v3409_v16  ;;  %v3410_v21 = vmul.f32 -1.442695, %v3053_v18  ;;  %v3412_v27 = vmul.f32 -1.442695, %v3055_v47 }
0x10b3   : > { %3930 = vpow2.f32 %v3408_v19 }
0x10b4   : > { %3932 = vpow2.f32 %v3410_v21 }
0x10b5   : > { %3934 = vtanh.f32 %v3050_v31 }
0x10b6   : > { %3936 = vpow2.f32 %v3411_v50 }
0x10b7   : > { %3938 = vtanh.f32 %v3054_v34 }
0x10bb   : > { %v3927_v33 = vpop.eup %3926 }
0x10bc   : > { %v3929_v40 = vpop.eup %3928  ;;  %v3062_v49 = vadd.f32 1.0, %v3927_v33 }
0x10bd   : > { %v3074_v53 = vadd.f32 1.0, %v3929_v40  ;;  %v3931_v46 = vpop.eup %3930 }
0x10be   : > { %3940 = vrcp.f32 %v3062_v49  ;;  %v3063_v52 = vadd.f32 1.0, %v3931_v46  ;;  %v3933_v38 = vpop.eup %3932 }
0x10bf   : > { %3942 = vrcp.f32 %v3074_v53  ;;  %v3075_v43 = vadd.f32 1.0, %v3933_v38  ;;  %v3935_v57 = vpop.eup %3934 }
0x10c0   : > { %3944 = vpow2.f32 %v3412_v27  ;;  %v3937_v44 = vpop.eup %3936 }
0x10c1   : > { %3946 = vrcp.f32 %v3063_v52  ;;  %v3939_v30 = vpop.eup %3938  ;;  %v3088_v48 = vadd.f32 1.0, %v3937_v44 }
0x10c2   : > { %3948 = vrcp.f32 %v3075_v43 }
0x10c3   : > { %3950 = vrcp.f32 %v3088_v48 }
0x10c8   : > { %v3941_v59 = vpop.eup %3940 }
0x10c9   : > { %v3943_v35 = vpop.eup %3942  ;;  %v3096_v61 = vmul.f32 %v3941_v59, %v3935_v57 }
0x10ca   : > { %v3945_v41 = vpop.eup %3944  ;;  %v3094_v26 = vmul.f32 %v3943_v35, %v4884_v36 }
0x10cb   : > { %v3947_v54 = vpop.eup %3946  ;;  %v3089_v32 = vadd.f32 1.0, %v3945_v41 }
0x10cc   : > { %v3098_v42 = vadd.f32 %v3096_v61, %v3094_v26  ;;  %v3097_v55 = vmul.f32 %v3947_v54, %v3939_v30  ;;  %v3949_v37 = vpop.eup %3948 }
0x10cd   : > { %v3095_v45 = vmul.f32 %v3949_v37, %v4888_v39  ;;  %v3951_v51 = vpop.eup %3950 }
0x10ce   : > { %3952 = vtanh.f32 %v3098_v42  ;;  %3108 = vst [vmem:[#allocation4] sm:$0xff] %v3098_v42 }
0x10cf   : > { %v3099_v28 = vadd.f32 %v3097_v55, %v3095_v45  ;;  %3954 = vrcp.f32 %v3089_v32 }
0x10d1   : > { %3956 = vtanh.f32 %v3099_v28  ;;  %3109 = vst [vmem:[#allocation4 + $0x8] sm:$0xff] %v3099_v28 }
0x10d8   : > { %v3953_v56 = vpop.eup %3952 }
0x10d9   : > { %v3102_v58 = vmul.f32 %v3953_v56, %v3951_v51  ;;  %v3955_v60 = vpop.eup %3954 }
0x10db   : > { %3106 = vst [vmem:[#allocation3] sm:$0xff] %v3102_v58  ;;  %v3957_v36 = vpop.eup %3956 }
0x10dc   : > { %v3103_v29 = vmul.f32 %v3957_v36, %v3955_v60 }
0x10de   : > { %v3104_v62 = vpack.c.bf16 %v3103_v29, %v3102_v58  ;;  %3107 = vst [vmem:[#allocation3 + $0x8] sm:$0xff] %v3103_v29 }
0x10e0   : > { %3105 = vst [vmem:[%s4046_s25] sm:$0xff] %v3104_v62 }
0x10e1 PF: > { %s12_s11 = sadd.s32 1, %s3982_s11   ;;  %s4911_s9 = smov %s3978_s10 }
0x10e2   : > { %p9_p7 = scmp.ge.s32.totalorder %s12_s11, 4   ;;  %s4912_s10 = smov %s4914_s12 }
0x10e4   :  { %11 = sbr.rel (!%p9_p7) target bundleno = 2 (0x2), region = 146 }
0x10eb   :  { %3152 = vsyncmov [#allocation5] }
0x10ee   :  { %s3153_s26 = vpop.sfrf %3152 }
0x10ef   :  { %p3415_p8 = scmp.ne.s32.totalorder %s3153_s26, 0 }
0x10f1   :  { %3157 = shalt.err (%p3415_p8)  }

</bundles_post_ra>
